<compile_context>
chip_gen: v7x
topology: tpu7x:2x2x1
jax: 0.10.0
libtpu: 0.0.40
codegen_flags: <defaults>
</compile_context>

<pallas_src>
import functools
import math

import jax
import jax.numpy as jnp
from jax.experimental import pallas as pl
from jax.experimental.pallas import tpu as pltpu

# ----------------------------- model hyperparams (small, forward-consistent)
B = 2            # batch
L = 8            # sequence length (shared by both text inputs)
N_DENSE = 4      # len(args.dense_features)
TEXT_DIM = 8     # args.text_dim
VOCAB_DIM = 4    # args.vocab_dim_v1
N_TEXT_FEAT = 2  # len(args.text_features)
VOCAB = 16       # synthetic embedding table size

HID1, LAYERS1, HEADS1, INTER1 = 32, 2, 4, 64     # first RoBERTa (text_layer)
TEXT_DIM_1 = 8                                    # args.text_dim_1
HID2, LAYERS2, HEADS2, INTER2 = 64, 2, 4, 128    # second RoBERTa (text_layer_1)

OUT_SIZE = N_DENSE + 2 * HID1 + 2 * HID2          # classifier input width (196)
LINEAR_LAYER_SIZE = (64, 32)
NUM_LABEL = 20                                    # prob.view(-1, 10, 2) requires 20
OUT_LANES = 128                                   # lane-dense merged output width

LN_EPS = 1e-12
BN_EPS = 1e-5

_WIDTHS = (8, 16, 32, 64, 128)


# ------------------------------------------------------------- weight slabs
class _SlabBuilder:
    """Packs many small weight tensors into a few width-grouped f32 slabs so
    the kernel needs one DMA per slab instead of one per leaf."""

    def __init__(self):
        self._parts = {w: [] for w in _WIDTHS}
        self._rows = {w: 0 for w in _WIDTHS}
        self.index = {}            # name -> (width, row_off, n_rows, n_cols)

    def add(self, name, arr):
        arr = jnp.asarray(arr, jnp.float32)
        if arr.ndim == 1:
            arr = arr[None, :]
        r, c = arr.shape
        w = next(x for x in _WIDTHS if c <= x)
        rp = -(-r // 8) * 8        # keep every entry 8-row (sublane) aligned
        self.index[name] = (w, self._rows[w], r, c)
        self._parts[w].append(jnp.pad(arr, ((0, rp - r), (0, w - c))))
        self._rows[w] += rp

    def finalize(self):
        widths = tuple(w for w in _WIDTHS if self._parts[w])
        slabs = {w: jnp.concatenate(self._parts[w], axis=0) for w in widths}
        return slabs, widths, dict(self.index)


# ------------------------------------------------------- in-kernel math bits
def _ln(x, g, b):
    mu = jnp.mean(x, axis=-1, keepdims=True)
    xc = x - mu
    var = jnp.mean(xc * xc, axis=-1, keepdims=True)
    return xc * jax.lax.rsqrt(var + LN_EPS) * g + b


def _gelu(x):
    # TODO(synk): HF RoBERTa defaults to exact erf-GELU; the tanh approximation
    # is kept for guaranteed Mosaic lowering (tiny numeric drift only).
    c = 0.7978845608028654  # sqrt(2/pi)
    return 0.5 * x * (1.0 + jnp.tanh(c * (x + 0.044715 * x * x * x)))


def _softmax_rows(s):
    s = s - jnp.max(s, axis=-1, keepdims=True)
    e = jnp.exp(s)
    return e * pl.reciprocal(jnp.sum(e, axis=-1, keepdims=True), approx=True)


def _tower(h, abias, get, pfx, n_layers, n_heads):
    """One RoBERTa encoder on batch-stacked tokens h: (B*L, D).
    abias: (B*L, B*L) block-diagonal additive key-mask bias."""
    D = h.shape[-1]
    dh = D // n_heads
    scale = 1.0 / math.sqrt(dh)

    # embeddings: inputs_embeds + position + token_type (pre-tiled), LayerNorm
    h = _ln(h + get(pfx + ".emb_add"), get(pfx + ".eg"), get(pfx + ".eb"))

    for li in range(n_layers):
        p = f"{pfx}.l{li}."
        # residual + (V-bias-folded) attention-output bias; heads accumulate in
        acc = h + get(p + "ao_b")
        for hh in range(n_heads):
            qh = jnp.dot(h, get(f"{p}wq{hh}"),
                         preferred_element_type=jnp.float32) + get(f"{p}bq{hh}")
            kh = jnp.dot(h, get(f"{p}wk{hh}"),
                         preferred_element_type=jnp.float32)
            vh = jnp.dot(h, get(f"{p}wv{hh}"),
                         preferred_element_type=jnp.float32)
            # q @ k^T without materialising kh.T (contract dim 1 of both)
            s = jax.lax.dot_general(qh, kh, (((1,), (1,)), ((), ())),
                                    preferred_element_type=jnp.float32)
            pz = _softmax_rows(s * scale + abias)
            ctx = jnp.dot(pz, vh, preferred_element_type=jnp.float32)
            acc = acc + jnp.dot(ctx, get(f"{p}wo{hh}"),
                                preferred_element_type=jnp.float32)
        h = _ln(acc, get(p + "l1g"), get(p + "l1b"))

        inter = _gelu(jnp.dot(h, get(p + "i_w"),
                              preferred_element_type=jnp.float32) + get(p + "i_b"))
        out = jnp.dot(inter, get(p + "o_w"),
                      preferred_element_type=jnp.float32) + get(p + "o_b")
        h = _ln(out + h, get(p + "l2g"), get(p + "l2b"))
    return h


def _per_sample_max(hm, bsz, seq):
    parts = [jnp.max(hm[b * seq:(b + 1) * seq], axis=0, keepdims=True)
             for b in range(bsz)]
    return jnp.concatenate(parts, axis=0)


# --------------------------------------------------------- the fused kernel
def _fused_kernel(tf_ref, tf1_ref, ids_ref, abias_ref, maxbias_ref, meanmat_ref,
                  dense_ref, *slab_out_refs, widths, index, bsz, seq):
    n_sl = len(widths)
    slab_refs = dict(zip(widths, slab_out_refs[:n_sl]))
    out_ref = slab_out_refs[n_sl]
    bl = bsz * seq

    def get(name):
        w, off, r, c = index[name]
        return slab_refs[w][off:off + r, :c]

    # --- text_linear + relu.  The frozen embedding gather is done as one-hot
    #     matmuls against (emb_table @ W) slices pre-folded at prep time.
    iota_v = jax.lax.broadcasted_iota(jnp.int32, (bl, VOCAB), 1)
    oh0 = (ids_ref[0] == iota_v).astype(jnp.float32)          # (BL, VOCAB)
    oh1 = (ids_ref[1] == iota_v).astype(jnp.float32)
    h = (jnp.dot(tf_ref[...], get("tl.wt"), preferred_element_type=jnp.float32)
         + jnp.dot(oh0, get("tl.we0"), preferred_element_type=jnp.float32)
         + jnp.dot(oh1, get("tl.we1"), preferred_element_type=jnp.float32)
         + get("tl.b"))
    h = jnp.maximum(h, 0.0)                                    # (BL, HID1)

    # --- first RoBERTa tower + masked pooling
    h = _tower(h, abias_ref[0], get, "r1", LAYERS1, HEADS1)
    mean1 = jnp.dot(meanmat_ref[0], h, preferred_element_type=jnp.float32)
    max1 = _per_sample_max(h + maxbias_ref[0], bsz, seq)       # (B, HID1)

    # --- BatchNorm `norm` folded into text_linear_1; concat -> weight row split
    h2 = (jnp.dot(tf1_ref[...], get("tl1.wa"), preferred_element_type=jnp.float32)
          + jnp.dot(h, get("tl1.wb"), preferred_element_type=jnp.float32)
          + get("tl1.b"))
    h2 = jnp.maximum(h2, 0.0)                                  # (BL, HID2)

    # --- second RoBERTa tower + masked pooling
    h2 = _tower(h2, abias_ref[1], get, "r2", LAYERS2, HEADS2)
    mean2 = jnp.dot(meanmat_ref[1], h2, preferred_element_type=jnp.float32)
    max2 = _per_sample_max(h2 + maxbias_ref[1], bsz, seq)      # (B, HID2)

    # --- classification head (eval BatchNorms pre-folded into the Linears);
    #     the feature concat is replaced by a row-split of the dense weight.
    z = (jnp.dot(dense_ref[...], get("cls.wd"), preferred_element_type=jnp.float32)
         + jnp.dot(mean1, get("cls.wm1"), preferred_element_type=jnp.float32)
         + jnp.dot(max1, get("cls.wx1"), preferred_element_type=jnp.float32)
         + jnp.dot(mean2, get("cls.wm2"), preferred_element_type=jnp.float32)
         + jnp.dot(max2, get("cls.wx2"), preferred_element_type=jnp.float32)
         + get("cls.bd"))
    z = jnp.maximum(z, 0.0)
    z = jnp.maximum(jnp.dot(z, get("cls.w1"),
                            preferred_element_type=jnp.float32) + get("cls.b1"), 0.0)
    logits = jnp.dot(z, get("cls.wo"),
                     preferred_element_type=jnp.float32) + get("cls.bo")   # (B, 20)

    # --- softmax + age/gender marginalisation fused into one lane-dense matmul
    e = jnp.exp(logits - jnp.max(logits, axis=-1, keepdims=True))
    prob = e / jnp.sum(e, axis=-1, keepdims=True)
    out_ref[...] = jnp.dot(prob, get("out_m"), preferred_element_type=jnp.float32)


# -------------------------------------------------- parameter prep (BN fold)
def _bn_scale_shift(bn):
    s = bn["g"] / jnp.sqrt(bn["var"] + BN_EPS)     # (1, D)
    return s, bn["b"] - bn["mean"] * s             # scale, shift


def _add_tower_weights(sb, pfx, rp, n_heads, bsz):
    D = rp["pos"].shape[1]
    dh = D // n_heads
    sb.add(pfx + ".emb_add", jnp.tile(rp["pos"] + rp["type"], (bsz, 1)))  # (B*L, D)
    sb.add(pfx + ".eg", rp["eg"])
    sb.add(pfx + ".eb", rp["eb"])
    for li, lp in enumerate(rp["layers"]):
        p = f"{pfx}.l{li}."
        qkv_w, qkv_b = lp["qkv_w"], lp["qkv_b"]
        wq, wk, wv = qkv_w[:, :D], qkv_w[:, D:2 * D], qkv_w[:, 2 * D:]
        bq, bv = qkv_b[:, :D], qkv_b[:, 2 * D:]
        # K bias only adds a per-query constant to the scores (softmax removes
        # it exactly) -> dropped.  V bias folds into the output bias below.
        for hh in range(n_heads):
            lo = hh * dh
            sb.add(f"{p}wq{hh}", wq[:, lo:lo + dh])       # (D, dh)
            sb.add(f"{p}wk{hh}", wk[:, lo:lo + dh])
            sb.add(f"{p}wv{hh}", wv[:, lo:lo + dh])
            sb.add(f"{p}bq{hh}", bq[:, lo:lo + dh])       # (1, dh)
            sb.add(f"{p}wo{hh}", lp["ao_w"][lo:lo + dh, :])   # (dh, D)
        sb.add(p + "ao_b", lp["ao_b"] + bv @ lp["ao_w"])
        sb.add(p + "l1g", lp["l1g"]); sb.add(p + "l1b", lp["l1b"])
        sb.add(p + "i_w", lp["i_w"]); sb.add(p + "i_b", lp["i_b"])
        sb.add(p + "o_w", lp["o_w"]); sb.add(p + "o_b", lp["o_b"])
        sb.add(p + "l2g", lp["l2g"]); sb.add(p + "l2b", lp["l2b"])


def prepare_weights(params, bsz=B):
    """One-time packing of all (BN-folded) weights into a few f32 slabs."""
    sb = _SlabBuilder()

    # text_linear with the frozen embedding table folded in (one-hot matmul form)
    tlw, tlb = params["text_linear"]["w"], params["text_linear"]["b"]
    emb = params["text_embeddings"]
    sb.add("tl.wt", tlw[:TEXT_DIM])
    sb.add("tl.we0", emb @ tlw[TEXT_DIM:TEXT_DIM + VOCAB_DIM])
    sb.add("tl.we1", emb @ tlw[TEXT_DIM + VOCAB_DIM:])
    sb.add("tl.b", tlb)

    _add_tower_weights(sb, "r1", params["text_layer"], HEADS1, bsz)

    # BatchNorm `norm` folded into text_linear_1 (BN directly precedes the Linear)
    s, sh = _bn_scale_shift(params["norm"])
    w1 = params["text_linear_1"]["w"] * s.T
    b1 = params["text_linear_1"]["b"] + sh @ params["text_linear_1"]["w"]
    sb.add("tl1.wa", w1[:TEXT_DIM_1])
    sb.add("tl1.wb", w1[TEXT_DIM_1:])
    sb.add("tl1.b", b1)

    _add_tower_weights(sb, "r2", params["text_layer_1"], HEADS2, bsz)

    # classifier: norm -> dense -> norm_1 -> relu -> dense_1 -> norm_2 -> relu -> out
    # (every BN is adjacent to a Linear, so the folds are exact in eval mode)
    cls = params["classifier"]
    s0, sh0 = _bn_scale_shift(cls["norm"])
    s1, sh1 = _bn_scale_shift(cls["norm_1"])
    s2, sh2 = _bn_scale_shift(cls["norm_2"])
    Wd, bd = cls["dense"]["w"], cls["dense"]["b"]
    Wd2 = Wd * s0.T * s1
    bd2 = (bd + sh0 @ Wd) * s1 + sh1
    W1f = cls["dense_1"]["w"] * s2
    b1f = cls["dense_1"]["b"] * s2 + sh2
    o = (0, N_DENSE, N_DENSE + HID1, N_DENSE + 2 * HID1,
         N_DENSE + 2 * HID1 + HID2, OUT_SIZE)
    for nm, (lo, hi) in zip(("wd", "wm1", "wx1", "wm2", "wx2"),
                            zip(o[:-1], o[1:])):
        sb.add("cls." + nm, Wd2[lo:hi])
    sb.add("cls.bd", bd2)
    sb.add("cls.w1", W1f); sb.add("cls.b1", b1f)
    sb.add("cls.wo", cls["out_proj"]["w"]); sb.add("cls.bo", cls["out_proj"]["b"])

    # marginalisation matrix: cols 0:10 = age pair-sums, 10:12 = gender sums
    r = jnp.arange(NUM_LABEL)
    out_m = jnp.zeros((NUM_LABEL, OUT_LANES), jnp.float32)
    out_m = out_m.at[:, :10].set(
        (r[:, None] // 2 == jnp.arange(10)[None, :]).astype(jnp.float32))
    out_m = out_m.at[:, 10:12].set(
        (r[:, None] % 2 == jnp.arange(2)[None, :]).astype(jnp.float32))
    sb.add("out_m", out_m)

    slabs, widths, index = sb.finalize()
    return slabs, (widths, index)


# --------------------------------------------------------------- forward
def _model_forward(slabs, dense_features, text_features, text_ids, text_masks,
                   text_features_1, text_masks_1, *, meta):
    widths, index = meta
    bsz, seq, _ = text_features.shape
    bl = bsz * seq

    tf = text_features.astype(jnp.float32).reshape(bl, TEXT_DIM)
    tf1 = text_features_1.astype(jnp.float32).reshape(bl, TEXT_DIM_1)
    ids = jnp.transpose(
        text_ids.reshape(bl, N_TEXT_FEAT).astype(jnp.int32))[:, :, None]  # (2,BL,1)
    m0 = text_masks.astype(jnp.float32)
    m1 = text_masks_1.astype(jnp.float32)

    eye_b = jnp.eye(bsz, dtype=jnp.float32)
    same = jnp.kron(eye_b, jnp.ones((seq, seq), jnp.float32))            # (BL, BL)

    def attn_bias(m):       # block-diagonal additive key-mask bias
        return (1.0 - same * m.reshape(1, bl)) * (-1e9)

    def mean_mat(m):        # pre-normalised block-diagonal mean-pool matrix
        mm = m / jnp.sum(m, axis=1, keepdims=True)
        return (eye_b[:, :, None] * mm[None, :, :]).reshape(bsz, bl)

    def max_bias(m):
        return ((1.0 - m) * (-1e10)).reshape(bl, 1)

    abias = jnp.stack([attn_bias(m0), attn_bias(m1)])                    # (2,BL,BL)
    maxb = jnp.stack([max_bias(m0), max_bias(m1)])                       # (2,BL,1)
    meanm = jnp.stack([mean_mat(m0), mean_mat(m1)])                      # (2,B,BL)
    dense = dense_features.astype(jnp.float32)

    vmem = pl.BlockSpec(memory_space=pltpu.MemorySpace.VMEM)
    inputs = [tf, tf1, ids, abias, maxb, meanm, dense] + [slabs[w] for w in widths]

    out = pl.pallas_call(
        functools.partial(_fused_kernel, widths=widths, index=index,
                          bsz=bsz, seq=seq),
        out_shape=jax.ShapeDtypeStruct((bsz, OUT_LANES), jnp.float32),
        in_specs=[vmem] * len(inputs),
        out_specs=vmem,
    )(*inputs)

    return out[:, :10], out[:, 10:12]


# ------------------------------------------------------------ param init
def _normal(key, shape, std=0.02):
    return std * jax.random.normal(key, shape, jnp.float32)


def init_linear_params(key, din, dout):
    return {"w": _normal(key, (din, dout)),
            "b": jnp.zeros((1, dout), jnp.float32)}


def init_bn_params(D):
    return {"g": jnp.ones((1, D), jnp.float32),
            "b": jnp.zeros((1, D), jnp.float32),
            "mean": jnp.zeros((1, D), jnp.float32),
            "var": jnp.ones((1, D), jnp.float32)}


def init_roberta_params(key, D, n_layers, inter, max_len):
    keys = jax.random.split(key, 2 + 4 * n_layers)
    p = {"pos": _normal(keys[0], (max_len, D)),
         "type": _normal(keys[1], (1, D)),
         "eg": jnp.ones((1, D), jnp.float32),
         "eb": jnp.zeros((1, D), jnp.float32),
         "layers": []}
    idx = 2
    for _ in range(n_layers):
        lp = {"qkv_w": _normal(keys[idx + 0], (D, 3 * D)),
              "qkv_b": jnp.zeros((1, 3 * D), jnp.float32),
              "ao_w": _normal(keys[idx + 1], (D, D)),
              "ao_b": jnp.zeros((1, D), jnp.float32),
              "i_w": _normal(keys[idx + 2], (D, inter)),
              "i_b": jnp.zeros((1, inter), jnp.float32),
              "o_w": _normal(keys[idx + 3], (inter, D)),
              "o_b": jnp.zeros((1, D), jnp.float32),
              "l1g": jnp.ones((1, D), jnp.float32),
              "l1b": jnp.zeros((1, D), jnp.float32),
              "l2g": jnp.ones((1, D), jnp.float32),
              "l2b": jnp.zeros((1, D), jnp.float32)}
        p["layers"].append(lp)
        idx += 4
    return p


def init_model_params(key):
    ks = jax.random.split(key, 8)
    return {
        "text_embeddings": _normal(ks[0], (VOCAB, VOCAB_DIM)),
        "text_linear": init_linear_params(
            ks[1], TEXT_DIM + VOCAB_DIM * N_TEXT_FEAT, HID1),
        "text_layer": init_roberta_params(ks[2], HID1, LAYERS1, INTER1, L),
        "norm": init_bn_params(TEXT_DIM_1 + HID1),
        "text_linear_1": init_linear_params(ks[3], TEXT_DIM_1 + HID1, HID2),
        "text_layer_1": init_roberta_params(ks[4], HID2, LAYERS2, INTER2, L),
        "classifier": {
            "norm": init_bn_params(OUT_SIZE),
            "dense": init_linear_params(ks[5], OUT_SIZE, LINEAR_LAYER_SIZE[0]),
            "norm_1": init_bn_params(LINEAR_LAYER_SIZE[0]),
            "dense_1": init_linear_params(
                ks[6], LINEAR_LAYER_SIZE[0], LINEAR_LAYER_SIZE[1]),
            "norm_2": init_bn_params(LINEAR_LAYER_SIZE[1]),
            "out_proj": init_linear_params(ks[7], LINEAR_LAYER_SIZE[1], NUM_LABEL),
        },
    }


# ------------------------------------------------------------------ main
if __name__ == "__main__":
    root = jax.random.PRNGKey(0)
    kp, k1, k2, k3, k4 = jax.random.split(root, 5)

    params = init_model_params(kp)
    slabs, meta = prepare_weights(params)      # one-time weight packing / BN fold
    model_forward = jax.jit(functools.partial(_model_forward, meta=meta))

    dense_features = jax.random.normal(k1, (B, N_DENSE), jnp.float32)
    text_features = jax.random.normal(k2, (B, L, TEXT_DIM), jnp.float32)
    text_ids = jax.random.randint(k3, (B, L, N_TEXT_FEAT), 0, VOCAB, jnp.int32)
    text_features_1 = jax.random.normal(k4, (B, L, TEXT_DIM_1), jnp.float32)
    # valid-token masks (at least one valid position per row)
    text_masks = jnp.stack([jnp.ones((L,), jnp.float32),
                            jnp.concatenate([jnp.ones((L - 3,)), jnp.zeros((3,))])])
    text_masks_1 = jnp.stack([jnp.concatenate([jnp.ones((L - 2,)), jnp.zeros((2,))]),
                              jnp.ones((L,), jnp.float32)])

    age_probs, gender_probs = model_forward(
        slabs, dense_features, text_features, text_ids, text_masks,
        text_features_1, text_masks_1)
    jax.block_until_ready((age_probs, gender_probs))

    assert age_probs.shape == (B, 10)
    assert gender_probs.shape == (B, 2)
    assert bool(jnp.all(jnp.isfinite(age_probs)))
    assert bool(jnp.all(jnp.isfinite(gender_probs)))
    print("KERNEL_OK")
</pallas_src>

<mosaic_0001>
module attributes {stable_mosaic.version = 11 : i64} {
  func.func @_fused_kernel(%arg0: memref<16x8xf32, #tpu.memory_space<vmem>>, %arg1: memref<16x8xf32, #tpu.memory_space<vmem>>, %arg2: memref<2x16x1xi32, #tpu.memory_space<vmem>>, %arg3: memref<2x16x16xf32, #tpu.memory_space<vmem>>, %arg4: memref<2x16x1xf32, #tpu.memory_space<vmem>>, %arg5: memref<2x2x16xf32, #tpu.memory_space<vmem>>, %arg6: memref<2x4xf32, #tpu.memory_space<vmem>>, %arg7: memref<832x8xf32, #tpu.memory_space<vmem>>, %arg8: memref<1600x16xf32, #tpu.memory_space<vmem>>, %arg9: memref<480x32xf32, #tpu.memory_space<vmem>>, %arg10: memref<848x64xf32, #tpu.memory_space<vmem>>, %arg11: memref<168x128xf32, #tpu.memory_space<vmem>>, %arg12: memref<2x128xf32, #tpu.memory_space<vmem>>) attributes {dimension_semantics = [], scalar_prefetch = 0 : i64, scratch_operands = 0 : i64, tpu.core_type = #tpu.core_type<tc>} {
    %0 = tpu.iota {dimensions = array<i32: 1>} : vector<16x16xi32>
    %c0 = arith.constant 0 : index
    %c0_0 = arith.constant 0 : index
    %c0_1 = arith.constant 0 : index
    %1 = vector.load %arg2[%c0, %c0_0, %c0_1] : memref<2x16x1xi32, #tpu.memory_space<vmem>>, vector<1x16x1xi32>
    %2 = vector.shape_cast %1 : vector<1x16x1xi32> to vector<16x1xi32>
    %3 = vector.broadcast %2 : vector<16x1xi32> to vector<16x16xi32>
    %4 = arith.cmpi eq, %3, %0 : vector<16x16xi32>
    %5 = arith.extui %4 : vector<16x16xi1> to vector<16x16xi32>
    %6 = arith.sitofp %5 : vector<16x16xi32> to vector<16x16xf32>
    %c1 = arith.constant 1 : index
    %c0_2 = arith.constant 0 : index
    %c0_3 = arith.constant 0 : index
    %7 = vector.load %arg2[%c1, %c0_2, %c0_3] : memref<2x16x1xi32, #tpu.memory_space<vmem>>, vector<1x16x1xi32>
    %8 = vector.shape_cast %7 : vector<1x16x1xi32> to vector<16x1xi32>
    %9 = vector.broadcast %8 : vector<16x1xi32> to vector<16x16xi32>
    %10 = arith.cmpi eq, %9, %0 : vector<16x16xi32>
    %11 = arith.extui %10 : vector<16x16xi1> to vector<16x16xi32>
    %12 = arith.sitofp %11 : vector<16x16xi32> to vector<16x16xf32>
    %c0_4 = arith.constant 0 : index
    %c0_5 = arith.constant 0 : index
    %13 = vector.load %arg0[%c0_4, %c0_5] : memref<16x8xf32, #tpu.memory_space<vmem>>, vector<16x8xf32>
    %c0_6 = arith.constant 0 : index
    %c0_7 = arith.constant 0 : index
    %14 = vector.load %arg9[%c0_6, %c0_7] : memref<480x32xf32, #tpu.memory_space<vmem>>, vector<8x32xf32>
    %cst = arith.constant dense<0.000000e+00> : vector<16x32xf32>
    %15 = tpu.matmul %13, %14, %cst {dimension_numbers = #tpu.dot_dimension_numbers<[1], [0], [0], [1], [0, 0, 1, 1], [], []>} : vector<16x8xf32>, vector<8x32xf32>, vector<16x32xf32> -> vector<16x32xf32>
    %c8 = arith.constant 8 : index
    %c0_8 = arith.constant 0 : index
    %16 = vector.load %arg9[%c8, %c0_8] : memref<480x32xf32, #tpu.memory_space<vmem>>, vector<16x32xf32>
    %cst_9 = arith.constant dense<0.000000e+00> : vector<16x32xf32>
    %17 = tpu.matmul %6, %16, %cst_9 {dimension_numbers = #tpu.dot_dimension_numbers<[1], [0], [0], [1], [0, 0, 1, 1], [], []>} : vector<16x16xf32>, vector<16x32xf32>, vector<16x32xf32> -> vector<16x32xf32>
    %18 = arith.addf %15, %17 : vector<16x32xf32>
    %c24 = arith.constant 24 : index
    %c0_10 = arith.constant 0 : index
    %19 = vector.load %arg9[%c24, %c0_10] : memref<480x32xf32, #tpu.memory_space<vmem>>, vector<16x32xf32>
    %cst_11 = arith.constant dense<0.000000e+00> : vector<16x32xf32>
    %20 = tpu.matmul %12, %19, %cst_11 {dimension_numbers = #tpu.dot_dimension_numbers<[1], [0], [0], [1], [0, 0, 1, 1], [], []>} : vector<16x16xf32>, vector<16x32xf32>, vector<16x32xf32> -> vector<16x32xf32>
    %21 = arith.addf %18, %20 : vector<16x32xf32>
    %c40 = arith.constant 40 : index
    %c0_12 = arith.constant 0 : index
    %22 = vector.load %arg9[%c40, %c0_12] : memref<480x32xf32, #tpu.memory_space<vmem>>, vector<1x32xf32>
    %23 = vector.broadcast %22 : vector<1x32xf32> to vector<16x32xf32>
    %24 = arith.addf %21, %23 : vector<16x32xf32>
    %cst_13 = arith.constant 0.000000e+00 : f32
    %25 = vector.broadcast %cst_13 : f32 to vector<16x32xf32>
    %26 = arith.maximumf %24, %25 : vector<16x32xf32>
    %c0_14 = arith.constant 0 : index
    %c0_15 = arith.constant 0 : index
    %c0_16 = arith.constant 0 : index
    %27 = vector.load %arg3[%c0_14, %c0_15, %c0_16] : memref<2x16x16xf32, #tpu.memory_space<vmem>>, vector<1x16x16xf32>
    %28 = vector.shape_cast %27 : vector<1x16x16xf32> to vector<16x16xf32>
    %c48 = arith.constant 48 : index
    %c0_17 = arith.constant 0 : index
    %29 = vector.load %arg9[%c48, %c0_17] : memref<480x32xf32, #tpu.memory_space<vmem>>, vector<16x32xf32>
    %30 = arith.addf %26, %29 : vector<16x32xf32>
    %c64 = arith.constant 64 : index
    %c0_18 = arith.constant 0 : index
    %31 = vector.load %arg9[%c64, %c0_18] : memref<480x32xf32, #tpu.memory_space<vmem>>, vector<1x32xf32>
    %c72 = arith.constant 72 : index
    %c0_19 = arith.constant 0 : index
    %32 = vector.load %arg9[%c72, %c0_19] : memref<480x32xf32, #tpu.memory_space<vmem>>, vector<1x32xf32>
    %cst_20 = arith.constant dense<0.000000e+00> : vector<16xf32>
    %33 = vector.multi_reduction <add>, %30, %cst_20 [1] : vector<16x32xf32> to vector<16xf32>
    %34 = vector.shape_cast %33 : vector<16xf32> to vector<16x1xf32>
    %cst_21 = arith.constant 3.200000e+01 : f32
    %35 = vector.broadcast %cst_21 : f32 to vector<16x1xf32>
    %36 = arith.divf %34, %35 : vector<16x1xf32>
    %37 = vector.broadcast %36 : vector<16x1xf32> to vector<16x32xf32>
    %38 = arith.subf %30, %37 : vector<16x32xf32>
    %39 = arith.mulf %38, %38 : vector<16x32xf32>
    %cst_22 = arith.constant dense<0.000000e+00> : vector<16xf32>
    %40 = vector.multi_reduction <add>, %39, %cst_22 [1] : vector<16x32xf32> to vector<16xf32>
    %41 = vector.shape_cast %40 : vector<16xf32> to vector<16x1xf32>
    %cst_23 = arith.constant 3.200000e+01 : f32
    %42 = vector.broadcast %cst_23 : f32 to vector<16x1xf32>
    %43 = arith.divf %41, %42 : vector<16x1xf32>
    %cst_24 = arith.constant 9.99999996E-13 : f32
    %44 = vector.broadcast %cst_24 : f32 to vector<16x1xf32>
    %45 = arith.addf %43, %44 : vector<16x1xf32>
    %46 = math.rsqrt %45 : vector<16x1xf32>
    %47 = vector.broadcast %46 : vector<16x1xf32> to vector<16x32xf32>
    %48 = arith.mulf %38, %47 : vector<16x32xf32>
    %49 = vector.broadcast %31 : vector<1x32xf32> to vector<16x32xf32>
    %50 = arith.mulf %48, %49 : vector<16x32xf32>
    %51 = vector.broadcast %32 : vector<1x32xf32> to vector<16x32xf32>
    %52 = arith.addf %50, %51 : vector<16x32xf32>
    %c112 = arith.constant 112 : index
    %c0_25 = arith.constant 0 : index
    %53 = vector.load %arg9[%c112, %c0_25] : memref<480x32xf32, #tpu.memory_space<vmem>>, vector<1x32xf32>
    %54 = vector.broadcast %53 : vector<1x32xf32> to vector<16x32xf32>
    %55 = arith.addf %52, %54 : vector<16x32xf32>
    %c0_26 = arith.constant 0 : index
    %c0_27 = arith.constant 0 : index
    %56 = vector.load %arg7[%c0_26, %c0_27] : memref<832x8xf32, #tpu.memory_space<vmem>>, vector<32x8xf32>
    %cst_28 = arith.constant dense<0.000000e+00> : vector<16x8xf32>
    %57 = tpu.matmul %52, %56, %cst_28 {dimension_numbers = #tpu.dot_dimension_numbers<[1], [0], [0], [1], [0, 0, 1, 1], [], []>} : vector<16x32xf32>, vector<32x8xf32>, vector<16x8xf32> -> vector<16x8xf32>
    %c96 = arith.constant 96 : index
    %c0_29 = arith.constant 0 : index
    %58 = vector.load %arg7[%c96, %c0_29] : memref<832x8xf32, #tpu.memory_space<vmem>>, vector<1x8xf32>
    %59 = vector.broadcast %58 : vector<1x8xf32> to vector<16x8xf32>
    %60 = arith.addf %57, %59 : vector<16x8xf32>
    %c32 = arith.constant 32 : index
    %c0_30 = arith.constant 0 : index
    %61 = vector.load %arg7[%c32, %c0_30] : memref<832x8xf32, #tpu.memory_space<vmem>>, vector<32x8xf32>
    %cst_31 = arith.constant dense<0.000000e+00> : vector<16x8xf32>
    %62 = tpu.matmul %52, %61, %cst_31 {dimension_numbers = #tpu.dot_dimension_numbers<[1], [0], [0], [1], [0, 0, 1, 1], [], []>} : vector<16x32xf32>, vector<32x8xf32>, vector<16x8xf32> -> vector<16x8xf32>
    %c64_32 = arith.constant 64 : index
    %c0_33 = arith.constant 0 : index
    %63 = vector.load %arg7[%c64_32, %c0_33] : memref<832x8xf32, #tpu.memory_space<vmem>>, vector<32x8xf32>
    %cst_34 = arith.constant dense<0.000000e+00> : vector<16x8xf32>
    %64 = tpu.matmul %52, %63, %cst_34 {dimension_numbers = #tpu.dot_dimension_numbers<[1], [0], [0], [1], [0, 0, 1, 1], [], []>} : vector<16x32xf32>, vector<32x8xf32>, vector<16x8xf32> -> vector<16x8xf32>
    %cst_35 = arith.constant dense<0.000000e+00> : vector<16x16xf32>
    %65 = tpu.matmul %60, %62, %cst_35 {dimension_numbers = #tpu.dot_dimension_numbers<[1], [1], [0], [0], [0, 0, 1, 0], [], []>} : vector<16x8xf32>, vector<16x8xf32>, vector<16x16xf32> -> vector<16x16xf32>
    %cst_36 = arith.constant 0.353553385 : f32
    %66 = vector.broadcast %cst_36 : f32 to vector<16x16xf32>
    %67 = arith.mulf %65, %66 : vector<16x16xf32>
    %68 = arith.addf %67, %28 : vector<16x16xf32>
    %cst_37 = arith.constant dense<0xFF800000> : vector<16xf32>
    %69 = vector.multi_reduction <maximumf>, %68, %cst_37 [1] : vector<16x16xf32> to vector<16xf32>
    %70 = vector.shape_cast %69 : vector<16xf32> to vector<16x1xf32>
    %71 = vector.broadcast %70 : vector<16x1xf32> to vector<16x16xf32>
    %72 = arith.subf %68, %71 : vector<16x16xf32>
    %73 = math.exp %72 : vector<16x16xf32>
    %cst_38 = arith.constant dense<0.000000e+00> : vector<16xf32>
    %74 = vector.multi_reduction <add>, %73, %cst_38 [1] : vector<16x16xf32> to vector<16xf32>
    %75 = vector.shape_cast %74 : vector<16xf32> to vector<16x1xf32>
    %76 = tpu.reciprocal %75 {approx = true} : vector<16x1xf32> -> vector<16x1xf32>
    %77 = vector.broadcast %76 : vector<16x1xf32> to vector<16x16xf32>
    %78 = arith.mulf %73, %77 : vector<16x16xf32>
    %cst_39 = arith.constant dense<0.000000e+00> : vector<16x8xf32>
    %79 = tpu.matmul %78, %64, %cst_39 {dimension_numbers = #tpu.dot_dimension_numbers<[1], [0], [0], [1], [0, 0, 1, 1], [], []>} : vector<16x16xf32>, vector<16x8xf32>, vector<16x8xf32> -> vector<16x8xf32>
    %c80 = arith.constant 80 : index
    %c0_40 = arith.constant 0 : index
    %80 = vector.load %arg9[%c80, %c0_40] : memref<480x32xf32, #tpu.memory_space<vmem>>, vector<8x32xf32>
    %cst_41 = arith.constant dense<0.000000e+00> : vector<16x32xf32>
    %81 = tpu.matmul %79, %80, %cst_41 {dimension_numbers = #tpu.dot_dimension_numbers<[1], [0], [0], [1], [0, 0, 1, 1], [], []>} : vector<16x8xf32>, vector<8x32xf32>, vector<16x32xf32> -> vector<16x32xf32>
    %82 = arith.addf %55, %81 : vector<16x32xf32>
    %c104 = arith.constant 104 : index
    %c0_42 = arith.constant 0 : index
    %83 = vector.load %arg7[%c104, %c0_42] : memref<832x8xf32, #tpu.memory_space<vmem>>, vector<32x8xf32>
    %cst_43 = arith.constant dense<0.000000e+00> : vector<16x8xf32>
    %84 = tpu.matmul %52, %83, %cst_43 {dimension_numbers = #tpu.dot_dimension_numbers<[1], [0], [0], [1], [0, 0, 1, 1], [], []>} : vector<16x32xf32>, vector<32x8xf32>, vector<16x8xf32> -> vector<16x8xf32>
    %c200 = arith.constant 200 : index
    %c0_44 = arith.constant 0 : index
    %85 = vector.load %arg7[%c200, %c0_44] : memref<832x8xf32, #tpu.memory_space<vmem>>, vector<1x8xf32>
    %86 = vector.broadcast %85 : vector<1x8xf32> to vector<16x8xf32>
    %87 = arith.addf %84, %86 : vector<16x8xf32>
    %c136 = arith.constant 136 : index
    %c0_45 = arith.constant 0 : index
    %88 = vector.load %arg7[%c136, %c0_45] : memref<832x8xf32, #tpu.memory_space<vmem>>, vector<32x8xf32>
    %cst_46 = arith.constant dense<0.000000e+00> : vector<16x8xf32>
    %89 = tpu.matmul %52, %88, %cst_46 {dimension_numbers = #tpu.dot_dimension_numbers<[1], [0], [0], [1], [0, 0, 1, 1], [], []>} : vector<16x32xf32>, vector<32x8xf32>, vector<16x8xf32> -> vector<16x8xf32>
    %c168 = arith.constant 168 : index
    %c0_47 = arith.constant 0 : index
    %90 = vector.load %arg7[%c168, %c0_47] : memref<832x8xf32, #tpu.memory_space<vmem>>, vector<32x8xf32>
    %cst_48 = arith.constant dense<0.000000e+00> : vector<16x8xf32>
    %91 = tpu.matmul %52, %90, %cst_48 {dimension_numbers = #tpu.dot_dimension_numbers<[1], [0], [0], [1], [0, 0, 1, 1], [], []>} : vector<16x32xf32>, vector<32x8xf32>, vector<16x8xf32> -> vector<16x8xf32>
    %cst_49 = arith.constant dense<0.000000e+00> : vector<16x16xf32>
    %92 = tpu.matmul %87, %89, %cst_49 {dimension_numbers = #tpu.dot_dimension_numbers<[1], [1], [0], [0], [0, 0, 1, 0], [], []>} : vector<16x8xf32>, vector<16x8xf32>, vector<16x16xf32> -> vector<16x16xf32>
    %cst_50 = arith.constant 0.353553385 : f32
    %93 = vector.broadcast %cst_50 : f32 to vector<16x16xf32>
    %94 = arith.mulf %92, %93 : vector<16x16xf32>
    %95 = arith.addf %94, %28 : vector<16x16xf32>
    %cst_51 = arith.constant dense<0xFF800000> : vector<16xf32>
    %96 = vector.multi_reduction <maximumf>, %95, %cst_51 [1] : vector<16x16xf32> to vector<16xf32>
    %97 = vector.shape_cast %96 : vector<16xf32> to vector<16x1xf32>
    %98 = vector.broadcast %97 : vector<16x1xf32> to vector<16x16xf32>
    %99 = arith.subf %95, %98 : vector<16x16xf32>
    %100 = math.exp %99 : vector<16x16xf32>
    %cst_52 = arith.constant dense<0.000000e+00> : vector<16xf32>
    %101 = vector.multi_reduction <add>, %100, %cst_52 [1] : vector<16x16xf32> to vector<16xf32>
    %102 = vector.shape_cast %101 : vector<16xf32> to vector<16x1xf32>
    %103 = tpu.reciprocal %102 {approx = true} : vector<16x1xf32> -> vector<16x1xf32>
    %104 = vector.broadcast %103 : vector<16x1xf32> to vector<16x16xf32>
    %105 = arith.mulf %100, %104 : vector<16x16xf32>
    %cst_53 = arith.constant dense<0.000000e+00> : vector<16x8xf32>
    %106 = tpu.matmul %105, %91, %cst_53 {dimension_numbers = #tpu.dot_dimension_numbers<[1], [0], [0], [1], [0, 0, 1, 1], [], []>} : vector<16x16xf32>, vector<16x8xf32>, vector<16x8xf32> -> vector<16x8xf32>
    %c88 = arith.constant 88 : index
    %c0_54 = arith.constant 0 : index
    %107 = vector.load %arg9[%c88, %c0_54] : memref<480x32xf32, #tpu.memory_space<vmem>>, vector<8x32xf32>
    %cst_55 = arith.constant dense<0.000000e+00> : vector<16x32xf32>
    %108 = tpu.matmul %106, %107, %cst_55 {dimension_numbers = #tpu.dot_dimension_numbers<[1], [0], [0], [1], [0, 0, 1, 1], [], []>} : vector<16x8xf32>, vector<8x32xf32>, vector<16x32xf32> -> vector<16x32xf32>
    %109 = arith.addf %82, %108 : vector<16x32xf32>
    %c208 = arith.constant 208 : index
    %c0_56 = arith.constant 0 : index
    %110 = vector.load %arg7[%c208, %c0_56] : memref<832x8xf32, #tpu.memory_space<vmem>>, vector<32x8xf32>
    %cst_57 = arith.constant dense<0.000000e+00> : vector<16x8xf32>
    %111 = tpu.matmul %52, %110, %cst_57 {dimension_numbers = #tpu.dot_dimension_numbers<[1], [0], [0], [1], [0, 0, 1, 1], [], []>} : vector<16x32xf32>, vector<32x8xf32>, vector<16x8xf32> -> vector<16x8xf32>
    %c304 = arith.constant 304 : index
    %c0_58 = arith.constant 0 : index
    %112 = vector.load %arg7[%c304, %c0_58] : memref<832x8xf32, #tpu.memory_space<vmem>>, vector<1x8xf32>
    %113 = vector.broadcast %112 : vector<1x8xf32> to vector<16x8xf32>
    %114 = arith.addf %111, %113 : vector<16x8xf32>
    %c240 = arith.constant 240 : index
    %c0_59 = arith.constant 0 : index
    %115 = vector.load %arg7[%c240, %c0_59] : memref<832x8xf32, #tpu.memory_space<vmem>>, vector<32x8xf32>
    %cst_60 = arith.constant dense<0.000000e+00> : vector<16x8xf32>
    %116 = tpu.matmul %52, %115, %cst_60 {dimension_numbers = #tpu.dot_dimension_numbers<[1], [0], [0], [1], [0, 0, 1, 1], [], []>} : vector<16x32xf32>, vector<32x8xf32>, vector<16x8xf32> -> vector<16x8xf32>
    %c272 = arith.constant 272 : index
    %c0_61 = arith.constant 0 : index
    %117 = vector.load %arg7[%c272, %c0_61] : memref<832x8xf32, #tpu.memory_space<vmem>>, vector<32x8xf32>
    %cst_62 = arith.constant dense<0.000000e+00> : vector<16x8xf32>
    %118 = tpu.matmul %52, %117, %cst_62 {dimension_numbers = #tpu.dot_dimension_numbers<[1], [0], [0], [1], [0, 0, 1, 1], [], []>} : vector<16x32xf32>, vector<32x8xf32>, vector<16x8xf32> -> vector<16x8xf32>
    %cst_63 = arith.constant dense<0.000000e+00> : vector<16x16xf32>
    %119 = tpu.matmul %114, %116, %cst_63 {dimension_numbers = #tpu.dot_dimension_numbers<[1], [1], [0], [0], [0, 0, 1, 0], [], []>} : vector<16x8xf32>, vector<16x8xf32>, vector<16x16xf32> -> vector<16x16xf32>
    %cst_64 = arith.constant 0.353553385 : f32
    %120 = vector.broadcast %cst_64 : f32 to vector<16x16xf32>
    %121 = arith.mulf %119, %120 : vector<16x16xf32>
    %122 = arith.addf %121, %28 : vector<16x16xf32>
    %cst_65 = arith.constant dense<0xFF800000> : vector<16xf32>
    %123 = vector.multi_reduction <maximumf>, %122, %cst_65 [1] : vector<16x16xf32> to vector<16xf32>
    %124 = vector.shape_cast %123 : vector<16xf32> to vector<16x1xf32>
    %125 = vector.broadcast %124 : vector<16x1xf32> to vector<16x16xf32>
    %126 = arith.subf %122, %125 : vector<16x16xf32>
    %127 = math.exp %126 : vector<16x16xf32>
    %cst_66 = arith.constant dense<0.000000e+00> : vector<16xf32>
    %128 = vector.multi_reduction <add>, %127, %cst_66 [1] : vector<16x16xf32> to vector<16xf32>
    %129 = vector.shape_cast %128 : vector<16xf32> to vector<16x1xf32>
    %130 = tpu.reciprocal %129 {approx = true} : vector<16x1xf32> -> vector<16x1xf32>
    %131 = vector.broadcast %130 : vector<16x1xf32> to vector<16x16xf32>
    %132 = arith.mulf %127, %131 : vector<16x16xf32>
    %cst_67 = arith.constant dense<0.000000e+00> : vector<16x8xf32>
    %133 = tpu.matmul %132, %118, %cst_67 {dimension_numbers = #tpu.dot_dimension_numbers<[1], [0], [0], [1], [0, 0, 1, 1], [], []>} : vector<16x16xf32>, vector<16x8xf32>, vector<16x8xf32> -> vector<16x8xf32>
    %c96_68 = arith.constant 96 : index
    %c0_69 = arith.constant 0 : index
    %134 = vector.load %arg9[%c96_68, %c0_69] : memref<480x32xf32, #tpu.memory_space<vmem>>, vector<8x32xf32>
    %cst_70 = arith.constant dense<0.000000e+00> : vector<16x32xf32>
    %135 = tpu.matmul %133, %134, %cst_70 {dimension_numbers = #tpu.dot_dimension_numbers<[1], [0], [0], [1], [0, 0, 1, 1], [], []>} : vector<16x8xf32>, vector<8x32xf32>, vector<16x32xf32> -> vector<16x32xf32>
    %136 = arith.addf %109, %135 : vector<16x32xf32>
    %c312 = arith.constant 312 : index
    %c0_71 = arith.constant 0 : index
    %137 = vector.load %arg7[%c312, %c0_71] : memref<832x8xf32, #tpu.memory_space<vmem>>, vector<32x8xf32>
    %cst_72 = arith.constant dense<0.000000e+00> : vector<16x8xf32>
    %138 = tpu.matmul %52, %137, %cst_72 {dimension_numbers = #tpu.dot_dimension_numbers<[1], [0], [0], [1], [0, 0, 1, 1], [], []>} : vector<16x32xf32>, vector<32x8xf32>, vector<16x8xf32> -> vector<16x8xf32>
    %c408 = arith.constant 408 : index
    %c0_73 = arith.constant 0 : index
    %139 = vector.load %arg7[%c408, %c0_73] : memref<832x8xf32, #tpu.memory_space<vmem>>, vector<1x8xf32>
    %140 = vector.broadcast %139 : vector<1x8xf32> to vector<16x8xf32>
    %141 = arith.addf %138, %140 : vector<16x8xf32>
    %c344 = arith.constant 344 : index
    %c0_74 = arith.constant 0 : index
    %142 = vector.load %arg7[%c344, %c0_74] : memref<832x8xf32, #tpu.memory_space<vmem>>, vector<32x8xf32>
    %cst_75 = arith.constant dense<0.000000e+00> : vector<16x8xf32>
    %143 = tpu.matmul %52, %142, %cst_75 {dimension_numbers = #tpu.dot_dimension_numbers<[1], [0], [0], [1], [0, 0, 1, 1], [], []>} : vector<16x32xf32>, vector<32x8xf32>, vector<16x8xf32> -> vector<16x8xf32>
    %c376 = arith.constant 376 : index
    %c0_76 = arith.constant 0 : index
    %144 = vector.load %arg7[%c376, %c0_76] : memref<832x8xf32, #tpu.memory_space<vmem>>, vector<32x8xf32>
    %cst_77 = arith.constant dense<0.000000e+00> : vector<16x8xf32>
    %145 = tpu.matmul %52, %144, %cst_77 {dimension_numbers = #tpu.dot_dimension_numbers<[1], [0], [0], [1], [0, 0, 1, 1], [], []>} : vector<16x32xf32>, vector<32x8xf32>, vector<16x8xf32> -> vector<16x8xf32>
    %cst_78 = arith.constant dense<0.000000e+00> : vector<16x16xf32>
    %146 = tpu.matmul %141, %143, %cst_78 {dimension_numbers = #tpu.dot_dimension_numbers<[1], [1], [0], [0], [0, 0, 1, 0], [], []>} : vector<16x8xf32>, vector<16x8xf32>, vector<16x16xf32> -> vector<16x16xf32>
    %cst_79 = arith.constant 0.353553385 : f32
    %147 = vector.broadcast %cst_79 : f32 to vector<16x16xf32>
    %148 = arith.mulf %146, %147 : vector<16x16xf32>
    %149 = arith.addf %148, %28 : vector<16x16xf32>
    %cst_80 = arith.constant dense<0xFF800000> : vector<16xf32>
    %150 = vector.multi_reduction <maximumf>, %149, %cst_80 [1] : vector<16x16xf32> to vector<16xf32>
    %151 = vector.shape_cast %150 : vector<16xf32> to vector<16x1xf32>
    %152 = vector.broadcast %151 : vector<16x1xf32> to vector<16x16xf32>
    %153 = arith.subf %149, %152 : vector<16x16xf32>
    %154 = math.exp %153 : vector<16x16xf32>
    %cst_81 = arith.constant dense<0.000000e+00> : vector<16xf32>
    %155 = vector.multi_reduction <add>, %154, %cst_81 [1] : vector<16x16xf32> to vector<16xf32>
    %156 = vector.shape_cast %155 : vector<16xf32> to vector<16x1xf32>
    %157 = tpu.reciprocal %156 {approx = true} : vector<16x1xf32> -> vector<16x1xf32>
    %158 = vector.broadcast %157 : vector<16x1xf32> to vector<16x16xf32>
    %159 = arith.mulf %154, %158 : vector<16x16xf32>
    %cst_82 = arith.constant dense<0.000000e+00> : vector<16x8xf32>
    %160 = tpu.matmul %159, %145, %cst_82 {dimension_numbers = #tpu.dot_dimension_numbers<[1], [0], [0], [1], [0, 0, 1, 1], [], []>} : vector<16x16xf32>, vector<16x8xf32>, vector<16x8xf32> -> vector<16x8xf32>
    %c104_83 = arith.constant 104 : index
    %c0_84 = arith.constant 0 : index
    %161 = vector.load %arg9[%c104_83, %c0_84] : memref<480x32xf32, #tpu.memory_space<vmem>>, vector<8x32xf32>
    %cst_85 = arith.constant dense<0.000000e+00> : vector<16x32xf32>
    %162 = tpu.matmul %160, %161, %cst_85 {dimension_numbers = #tpu.dot_dimension_numbers<[1], [0], [0], [1], [0, 0, 1, 1], [], []>} : vector<16x8xf32>, vector<8x32xf32>, vector<16x32xf32> -> vector<16x32xf32>
    %163 = arith.addf %136, %162 : vector<16x32xf32>
    %c120 = arith.constant 120 : index
    %c0_86 = arith.constant 0 : index
    %164 = vector.load %arg9[%c120, %c0_86] : memref<480x32xf32, #tpu.memory_space<vmem>>, vector<1x32xf32>
    %c128 = arith.constant 128 : index
    %c0_87 = arith.constant 0 : index
    %165 = vector.load %arg9[%c128, %c0_87] : memref<480x32xf32, #tpu.memory_space<vmem>>, vector<1x32xf32>
    %cst_88 = arith.constant dense<0.000000e+00> : vector<16xf32>
    %166 = vector.multi_reduction <add>, %163, %cst_88 [1] : vector<16x32xf32> to vector<16xf32>
    %167 = vector.shape_cast %166 : vector<16xf32> to vector<16x1xf32>
    %cst_89 = arith.constant 3.200000e+01 : f32
    %168 = vector.broadcast %cst_89 : f32 to vector<16x1xf32>
    %169 = arith.divf %167, %168 : vector<16x1xf32>
    %170 = vector.broadcast %169 : vector<16x1xf32> to vector<16x32xf32>
    %171 = arith.subf %163, %170 : vector<16x32xf32>
    %172 = arith.mulf %171, %171 : vector<16x32xf32>
    %cst_90 = arith.constant dense<0.000000e+00> : vector<16xf32>
    %173 = vector.multi_reduction <add>, %172, %cst_90 [1] : vector<16x32xf32> to vector<16xf32>
    %174 = vector.shape_cast %173 : vector<16xf32> to vector<16x1xf32>
    %cst_91 = arith.constant 3.200000e+01 : f32
    %175 = vector.broadcast %cst_91 : f32 to vector<16x1xf32>
    %176 = arith.divf %174, %175 : vector<16x1xf32>
    %cst_92 = arith.constant 9.99999996E-13 : f32
    %177 = vector.broadcast %cst_92 : f32 to vector<16x1xf32>
    %178 = arith.addf %176, %177 : vector<16x1xf32>
    %179 = math.rsqrt %178 : vector<16x1xf32>
    %180 = vector.broadcast %179 : vector<16x1xf32> to vector<16x32xf32>
    %181 = arith.mulf %171, %180 : vector<16x32xf32>
    %182 = vector.broadcast %164 : vector<1x32xf32> to vector<16x32xf32>
    %183 = arith.mulf %181, %182 : vector<16x32xf32>
    %184 = vector.broadcast %165 : vector<1x32xf32> to vector<16x32xf32>
    %185 = arith.addf %183, %184 : vector<16x32xf32>
    %c0_93 = arith.constant 0 : index
    %c0_94 = arith.constant 0 : index
    %186 = vector.load %arg10[%c0_93, %c0_94] : memref<848x64xf32, #tpu.memory_space<vmem>>, vector<32x64xf32>
    %cst_95 = arith.constant dense<0.000000e+00> : vector<16x64xf32>
    %187 = tpu.matmul %185, %186, %cst_95 {dimension_numbers = #tpu.dot_dimension_numbers<[1], [0], [0], [1], [0, 0, 1, 1], [], []>} : vector<16x32xf32>, vector<32x64xf32>, vector<16x64xf32> -> vector<16x64xf32>
    %c32_96 = arith.constant 32 : index
    %c0_97 = arith.constant 0 : index
    %188 = vector.load %arg10[%c32_96, %c0_97] : memref<848x64xf32, #tpu.memory_space<vmem>>, vector<1x64xf32>
    %189 = vector.broadcast %188 : vector<1x64xf32> to vector<16x64xf32>
    %190 = arith.addf %187, %189 : vector<16x64xf32>
    %cst_98 = arith.constant 5.000000e-01 : f32
    %191 = vector.broadcast %cst_98 : f32 to vector<16x64xf32>
    %192 = arith.mulf %191, %190 : vector<16x64xf32>
    %cst_99 = arith.constant 4.471500e-02 : f32
    %193 = vector.broadcast %cst_99 : f32 to vector<16x64xf32>
    %194 = arith.mulf %193, %190 : vector<16x64xf32>
    %195 = arith.mulf %194, %190 : vector<16x64xf32>
    %196 = arith.mulf %195, %190 : vector<16x64xf32>
    %197 = arith.addf %190, %196 : vector<16x64xf32>
    %cst_100 = arith.constant 0.797884583 : f32
    %198 = vector.broadcast %cst_100 : f32 to vector<16x64xf32>
    %199 = arith.mulf %198, %197 : vector<16x64xf32>
    %200 = math.tanh %199 : vector<16x64xf32>
    %cst_101 = arith.constant 1.000000e+00 : f32
    %201 = vector.broadcast %cst_101 : f32 to vector<16x64xf32>
    %202 = arith.addf %201, %200 : vector<16x64xf32>
    %203 = arith.mulf %192, %202 : vector<16x64xf32>
    %c136_102 = arith.constant 136 : index
    %c0_103 = arith.constant 0 : index
    %204 = vector.load %arg9[%c136_102, %c0_103] : memref<480x32xf32, #tpu.memory_space<vmem>>, vector<64x32xf32>
    %cst_104 = arith.constant dense<0.000000e+00> : vector<16x32xf32>
    %205 = tpu.matmul %203, %204, %cst_104 {dimension_numbers = #tpu.dot_dimension_numbers<[1], [0], [0], [1], [0, 0, 1, 1], [], []>} : vector<16x64xf32>, vector<64x32xf32>, vector<16x32xf32> -> vector<16x32xf32>
    %c200_105 = arith.constant 200 : index
    %c0_106 = arith.constant 0 : index
    %206 = vector.load %arg9[%c200_105, %c0_106] : memref<480x32xf32, #tpu.memory_space<vmem>>, vector<1x32xf32>
    %207 = vector.broadcast %206 : vector<1x32xf32> to vector<16x32xf32>
    %208 = arith.addf %205, %207 : vector<16x32xf32>
    %209 = arith.addf %208, %185 : vector<16x32xf32>
    %c208_107 = arith.constant 208 : index
    %c0_108 = arith.constant 0 : index
    %210 = vector.load %arg9[%c208_107, %c0_108] : memref<480x32xf32, #tpu.memory_space<vmem>>, vector<1x32xf32>
    %c216 = arith.constant 216 : index
    %c0_109 = arith.constant 0 : index
    %211 = vector.load %arg9[%c216, %c0_109] : memref<480x32xf32, #tpu.memory_space<vmem>>, vector<1x32xf32>
    %cst_110 = arith.constant dense<0.000000e+00> : vector<16xf32>
    %212 = vector.multi_reduction <add>, %209, %cst_110 [1] : vector<16x32xf32> to vector<16xf32>
    %213 = vector.shape_cast %212 : vector<16xf32> to vector<16x1xf32>
    %cst_111 = arith.constant 3.200000e+01 : f32
    %214 = vector.broadcast %cst_111 : f32 to vector<16x1xf32>
    %215 = arith.divf %213, %214 : vector<16x1xf32>
    %216 = vector.broadcast %215 : vector<16x1xf32> to vector<16x32xf32>
    %217 = arith.subf %209, %216 : vector<16x32xf32>
    %218 = arith.mulf %217, %217 : vector<16x32xf32>
    %cst_112 = arith.constant dense<0.000000e+00> : vector<16xf32>
    %219 = vector.multi_reduction <add>, %218, %cst_112 [1] : vector<16x32xf32> to vector<16xf32>
    %220 = vector.shape_cast %219 : vector<16xf32> to vector<16x1xf32>
    %cst_113 = arith.constant 3.200000e+01 : f32
    %221 = vector.broadcast %cst_113 : f32 to vector<16x1xf32>
    %222 = arith.divf %220, %221 : vector<16x1xf32>
    %cst_114 = arith.constant 9.99999996E-13 : f32
    %223 = vector.broadcast %cst_114 : f32 to vector<16x1xf32>
    %224 = arith.addf %222, %223 : vector<16x1xf32>
    %225 = math.rsqrt %224 : vector<16x1xf32>
    %226 = vector.broadcast %225 : vector<16x1xf32> to vector<16x32xf32>
    %227 = arith.mulf %217, %226 : vector<16x32xf32>
    %228 = vector.broadcast %210 : vector<1x32xf32> to vector<16x32xf32>
    %229 = arith.mulf %227, %228 : vector<16x32xf32>
    %230 = vector.broadcast %211 : vector<1x32xf32> to vector<16x32xf32>
    %231 = arith.addf %229, %230 : vector<16x32xf32>
    %c256 = arith.constant 256 : index
    %c0_115 = arith.constant 0 : index
    %232 = vector.load %arg9[%c256, %c0_115] : memref<480x32xf32, #tpu.memory_space<vmem>>, vector<1x32xf32>
    %233 = vector.broadcast %232 : vector<1x32xf32> to vector<16x32xf32>
    %234 = arith.addf %231, %233 : vector<16x32xf32>
    %c416 = arith.constant 416 : index
    %c0_116 = arith.constant 0 : index
    %235 = vector.load %arg7[%c416, %c0_116] : memref<832x8xf32, #tpu.memory_space<vmem>>, vector<32x8xf32>
    %cst_117 = arith.constant dense<0.000000e+00> : vector<16x8xf32>
    %236 = tpu.matmul %231, %235, %cst_117 {dimension_numbers = #tpu.dot_dimension_numbers<[1], [0], [0], [1], [0, 0, 1, 1], [], []>} : vector<16x32xf32>, vector<32x8xf32>, vector<16x8xf32> -> vector<16x8xf32>
    %c512 = arith.constant 512 : index
    %c0_118 = arith.constant 0 : index
    %237 = vector.load %arg7[%c512, %c0_118] : memref<832x8xf32, #tpu.memory_space<vmem>>, vector<1x8xf32>
    %238 = vector.broadcast %237 : vector<1x8xf32> to vector<16x8xf32>
    %239 = arith.addf %236, %238 : vector<16x8xf32>
    %c448 = arith.constant 448 : index
    %c0_119 = arith.constant 0 : index
    %240 = vector.load %arg7[%c448, %c0_119] : memref<832x8xf32, #tpu.memory_space<vmem>>, vector<32x8xf32>
    %cst_120 = arith.constant dense<0.000000e+00> : vector<16x8xf32>
    %241 = tpu.matmul %231, %240, %cst_120 {dimension_numbers = #tpu.dot_dimension_numbers<[1], [0], [0], [1], [0, 0, 1, 1], [], []>} : vector<16x32xf32>, vector<32x8xf32>, vector<16x8xf32> -> vector<16x8xf32>
    %c480 = arith.constant 480 : index
    %c0_121 = arith.constant 0 : index
    %242 = vector.load %arg7[%c480, %c0_121] : memref<832x8xf32, #tpu.memory_space<vmem>>, vector<32x8xf32>
    %cst_122 = arith.constant dense<0.000000e+00> : vector<16x8xf32>
    %243 = tpu.matmul %231, %242, %cst_122 {dimension_numbers = #tpu.dot_dimension_numbers<[1], [0], [0], [1], [0, 0, 1, 1], [], []>} : vector<16x32xf32>, vector<32x8xf32>, vector<16x8xf32> -> vector<16x8xf32>
    %cst_123 = arith.constant dense<0.000000e+00> : vector<16x16xf32>
    %244 = tpu.matmul %239, %241, %cst_123 {dimension_numbers = #tpu.dot_dimension_numbers<[1], [1], [0], [0], [0, 0, 1, 0], [], []>} : vector<16x8xf32>, vector<16x8xf32>, vector<16x16xf32> -> vector<16x16xf32>
    %cst_124 = arith.constant 0.353553385 : f32
    %245 = vector.broadcast %cst_124 : f32 to vector<16x16xf32>
    %246 = arith.mulf %244, %245 : vector<16x16xf32>
    %247 = arith.addf %246, %28 : vector<16x16xf32>
    %cst_125 = arith.constant dense<0xFF800000> : vector<16xf32>
    %248 = vector.multi_reduction <maximumf>, %247, %cst_125 [1] : vector<16x16xf32> to vector<16xf32>
    %249 = vector.shape_cast %248 : vector<16xf32> to vector<16x1xf32>
    %250 = vector.broadcast %249 : vector<16x1xf32> to vector<16x16xf32>
    %251 = arith.subf %247, %250 : vector<16x16xf32>
    %252 = math.exp %251 : vector<16x16xf32>
    %cst_126 = arith.constant dense<0.000000e+00> : vector<16xf32>
    %253 = vector.multi_reduction <add>, %252, %cst_126 [1] : vector<16x16xf32> to vector<16xf32>
    %254 = vector.shape_cast %253 : vector<16xf32> to vector<16x1xf32>
    %255 = tpu.reciprocal %254 {approx = true} : vector<16x1xf32> -> vector<16x1xf32>
    %256 = vector.broadcast %255 : vector<16x1xf32> to vector<16x16xf32>
    %257 = arith.mulf %252, %256 : vector<16x16xf32>
    %cst_127 = arith.constant dense<0.000000e+00> : vector<16x8xf32>
    %258 = tpu.matmul %257, %243, %cst_127 {dimension_numbers = #tpu.dot_dimension_numbers<[1], [0], [0], [1], [0, 0, 1, 1], [], []>} : vector<16x16xf32>, vector<16x8xf32>, vector<16x8xf32> -> vector<16x8xf32>
    %c224 = arith.constant 224 : index
    %c0_128 = arith.constant 0 : index
    %259 = vector.load %arg9[%c224, %c0_128] : memref<480x32xf32, #tpu.memory_space<vmem>>, vector<8x32xf32>
    %cst_129 = arith.constant dense<0.000000e+00> : vector<16x32xf32>
    %260 = tpu.matmul %258, %259, %cst_129 {dimension_numbers = #tpu.dot_dimension_numbers<[1], [0], [0], [1], [0, 0, 1, 1], [], []>} : vector<16x8xf32>, vector<8x32xf32>, vector<16x32xf32> -> vector<16x32xf32>
    %261 = arith.addf %234, %260 : vector<16x32xf32>
    %c520 = arith.constant 520 : index
    %c0_130 = arith.constant 0 : index
    %262 = vector.load %arg7[%c520, %c0_130] : memref<832x8xf32, #tpu.memory_space<vmem>>, vector<32x8xf32>
    %cst_131 = arith.constant dense<0.000000e+00> : vector<16x8xf32>
    %263 = tpu.matmul %231, %262, %cst_131 {dimension_numbers = #tpu.dot_dimension_numbers<[1], [0], [0], [1], [0, 0, 1, 1], [], []>} : vector<16x32xf32>, vector<32x8xf32>, vector<16x8xf32> -> vector<16x8xf32>
    %c616 = arith.constant 616 : index
    %c0_132 = arith.constant 0 : index
    %264 = vector.load %arg7[%c616, %c0_132] : memref<832x8xf32, #tpu.memory_space<vmem>>, vector<1x8xf32>
    %265 = vector.broadcast %264 : vector<1x8xf32> to vector<16x8xf32>
    %266 = arith.addf %263, %265 : vector<16x8xf32>
    %c552 = arith.constant 552 : index
    %c0_133 = arith.constant 0 : index
    %267 = vector.load %arg7[%c552, %c0_133] : memref<832x8xf32, #tpu.memory_space<vmem>>, vector<32x8xf32>
    %cst_134 = arith.constant dense<0.000000e+00> : vector<16x8xf32>
    %268 = tpu.matmul %231, %267, %cst_134 {dimension_numbers = #tpu.dot_dimension_numbers<[1], [0], [0], [1], [0, 0, 1, 1], [], []>} : vector<16x32xf32>, vector<32x8xf32>, vector<16x8xf32> -> vector<16x8xf32>
    %c584 = arith.constant 584 : index
    %c0_135 = arith.constant 0 : index
    %269 = vector.load %arg7[%c584, %c0_135] : memref<832x8xf32, #tpu.memory_space<vmem>>, vector<32x8xf32>
    %cst_136 = arith.constant dense<0.000000e+00> : vector<16x8xf32>
    %270 = tpu.matmul %231, %269, %cst_136 {dimension_numbers = #tpu.dot_dimension_numbers<[1], [0], [0], [1], [0, 0, 1, 1], [], []>} : vector<16x32xf32>, vector<32x8xf32>, vector<16x8xf32> -> vector<16x8xf32>
    %cst_137 = arith.constant dense<0.000000e+00> : vector<16x16xf32>
    %271 = tpu.matmul %266, %268, %cst_137 {dimension_numbers = #tpu.dot_dimension_numbers<[1], [1], [0], [0], [0, 0, 1, 0], [], []>} : vector<16x8xf32>, vector<16x8xf32>, vector<16x16xf32> -> vector<16x16xf32>
    %cst_138 = arith.constant 0.353553385 : f32
    %272 = vector.broadcast %cst_138 : f32 to vector<16x16xf32>
    %273 = arith.mulf %271, %272 : vector<16x16xf32>
    %274 = arith.addf %273, %28 : vector<16x16xf32>
    %cst_139 = arith.constant dense<0xFF800000> : vector<16xf32>
    %275 = vector.multi_reduction <maximumf>, %274, %cst_139 [1] : vector<16x16xf32> to vector<16xf32>
    %276 = vector.shape_cast %275 : vector<16xf32> to vector<16x1xf32>
    %277 = vector.broadcast %276 : vector<16x1xf32> to vector<16x16xf32>
    %278 = arith.subf %274, %277 : vector<16x16xf32>
    %279 = math.exp %278 : vector<16x16xf32>
    %cst_140 = arith.constant dense<0.000000e+00> : vector<16xf32>
    %280 = vector.multi_reduction <add>, %279, %cst_140 [1] : vector<16x16xf32> to vector<16xf32>
    %281 = vector.shape_cast %280 : vector<16xf32> to vector<16x1xf32>
    %282 = tpu.reciprocal %281 {approx = true} : vector<16x1xf32> -> vector<16x1xf32>
    %283 = vector.broadcast %282 : vector<16x1xf32> to vector<16x16xf32>
    %284 = arith.mulf %279, %283 : vector<16x16xf32>
    %cst_141 = arith.constant dense<0.000000e+00> : vector<16x8xf32>
    %285 = tpu.matmul %284, %270, %cst_141 {dimension_numbers = #tpu.dot_dimension_numbers<[1], [0], [0], [1], [0, 0, 1, 1], [], []>} : vector<16x16xf32>, vector<16x8xf32>, vector<16x8xf32> -> vector<16x8xf32>
    %c232 = arith.constant 232 : index
    %c0_142 = arith.constant 0 : index
    %286 = vector.load %arg9[%c232, %c0_142] : memref<480x32xf32, #tpu.memory_space<vmem>>, vector<8x32xf32>
    %cst_143 = arith.constant dense<0.000000e+00> : vector<16x32xf32>
    %287 = tpu.matmul %285, %286, %cst_143 {dimension_numbers = #tpu.dot_dimension_numbers<[1], [0], [0], [1], [0, 0, 1, 1], [], []>} : vector<16x8xf32>, vector<8x32xf32>, vector<16x32xf32> -> vector<16x32xf32>
    %288 = arith.addf %261, %287 : vector<16x32xf32>
    %c624 = arith.constant 624 : index
    %c0_144 = arith.constant 0 : index
    %289 = vector.load %arg7[%c624, %c0_144] : memref<832x8xf32, #tpu.memory_space<vmem>>, vector<32x8xf32>
    %cst_145 = arith.constant dense<0.000000e+00> : vector<16x8xf32>
    %290 = tpu.matmul %231, %289, %cst_145 {dimension_numbers = #tpu.dot_dimension_numbers<[1], [0], [0], [1], [0, 0, 1, 1], [], []>} : vector<16x32xf32>, vector<32x8xf32>, vector<16x8xf32> -> vector<16x8xf32>
    %c720 = arith.constant 720 : index
    %c0_146 = arith.constant 0 : index
    %291 = vector.load %arg7[%c720, %c0_146] : memref<832x8xf32, #tpu.memory_space<vmem>>, vector<1x8xf32>
    %292 = vector.broadcast %291 : vector<1x8xf32> to vector<16x8xf32>
    %293 = arith.addf %290, %292 : vector<16x8xf32>
    %c656 = arith.constant 656 : index
    %c0_147 = arith.constant 0 : index
    %294 = vector.load %arg7[%c656, %c0_147] : memref<832x8xf32, #tpu.memory_space<vmem>>, vector<32x8xf32>
    %cst_148 = arith.constant dense<0.000000e+00> : vector<16x8xf32>
    %295 = tpu.matmul %231, %294, %cst_148 {dimension_numbers = #tpu.dot_dimension_numbers<[1], [0], [0], [1], [0, 0, 1, 1], [], []>} : vector<16x32xf32>, vector<32x8xf32>, vector<16x8xf32> -> vector<16x8xf32>
    %c688 = arith.constant 688 : index
    %c0_149 = arith.constant 0 : index
    %296 = vector.load %arg7[%c688, %c0_149] : memref<832x8xf32, #tpu.memory_space<vmem>>, vector<32x8xf32>
    %cst_150 = arith.constant dense<0.000000e+00> : vector<16x8xf32>
    %297 = tpu.matmul %231, %296, %cst_150 {dimension_numbers = #tpu.dot_dimension_numbers<[1], [0], [0], [1], [0, 0, 1, 1], [], []>} : vector<16x32xf32>, vector<32x8xf32>, vector<16x8xf32> -> vector<16x8xf32>
    %cst_151 = arith.constant dense<0.000000e+00> : vector<16x16xf32>
    %298 = tpu.matmul %293, %295, %cst_151 {dimension_numbers = #tpu.dot_dimension_numbers<[1], [1], [0], [0], [0, 0, 1, 0], [], []>} : vector<16x8xf32>, vector<16x8xf32>, vector<16x16xf32> -> vector<16x16xf32>
    %cst_152 = arith.constant 0.353553385 : f32
    %299 = vector.broadcast %cst_152 : f32 to vector<16x16xf32>
    %300 = arith.mulf %298, %299 : vector<16x16xf32>
    %301 = arith.addf %300, %28 : vector<16x16xf32>
    %cst_153 = arith.constant dense<0xFF800000> : vector<16xf32>
    %302 = vector.multi_reduction <maximumf>, %301, %cst_153 [1] : vector<16x16xf32> to vector<16xf32>
    %303 = vector.shape_cast %302 : vector<16xf32> to vector<16x1xf32>
    %304 = vector.broadcast %303 : vector<16x1xf32> to vector<16x16xf32>
    %305 = arith.subf %301, %304 : vector<16x16xf32>
    %306 = math.exp %305 : vector<16x16xf32>
    %cst_154 = arith.constant dense<0.000000e+00> : vector<16xf32>
    %307 = vector.multi_reduction <add>, %306, %cst_154 [1] : vector<16x16xf32> to vector<16xf32>
    %308 = vector.shape_cast %307 : vector<16xf32> to vector<16x1xf32>
    %309 = tpu.reciprocal %308 {approx = true} : vector<16x1xf32> -> vector<16x1xf32>
    %310 = vector.broadcast %309 : vector<16x1xf32> to vector<16x16xf32>
    %311 = arith.mulf %306, %310 : vector<16x16xf32>
    %cst_155 = arith.constant dense<0.000000e+00> : vector<16x8xf32>
    %312 = tpu.matmul %311, %297, %cst_155 {dimension_numbers = #tpu.dot_dimension_numbers<[1], [0], [0], [1], [0, 0, 1, 1], [], []>} : vector<16x16xf32>, vector<16x8xf32>, vector<16x8xf32> -> vector<16x8xf32>
    %c240_156 = arith.constant 240 : index
    %c0_157 = arith.constant 0 : index
    %313 = vector.load %arg9[%c240_156, %c0_157] : memref<480x32xf32, #tpu.memory_space<vmem>>, vector<8x32xf32>
    %cst_158 = arith.constant dense<0.000000e+00> : vector<16x32xf32>
    %314 = tpu.matmul %312, %313, %cst_158 {dimension_numbers = #tpu.dot_dimension_numbers<[1], [0], [0], [1], [0, 0, 1, 1], [], []>} : vector<16x8xf32>, vector<8x32xf32>, vector<16x32xf32> -> vector<16x32xf32>
    %315 = arith.addf %288, %314 : vector<16x32xf32>
    %c728 = arith.constant 728 : index
    %c0_159 = arith.constant 0 : index
    %316 = vector.load %arg7[%c728, %c0_159] : memref<832x8xf32, #tpu.memory_space<vmem>>, vector<32x8xf32>
    %cst_160 = arith.constant dense<0.000000e+00> : vector<16x8xf32>
    %317 = tpu.matmul %231, %316, %cst_160 {dimension_numbers = #tpu.dot_dimension_numbers<[1], [0], [0], [1], [0, 0, 1, 1], [], []>} : vector<16x32xf32>, vector<32x8xf32>, vector<16x8xf32> -> vector<16x8xf32>
    %c824 = arith.constant 824 : index
    %c0_161 = arith.constant 0 : index
    %318 = vector.load %arg7[%c824, %c0_161] : memref<832x8xf32, #tpu.memory_space<vmem>>, vector<1x8xf32>
    %319 = vector.broadcast %318 : vector<1x8xf32> to vector<16x8xf32>
    %320 = arith.addf %317, %319 : vector<16x8xf32>
    %c760 = arith.constant 760 : index
    %c0_162 = arith.constant 0 : index
    %321 = vector.load %arg7[%c760, %c0_162] : memref<832x8xf32, #tpu.memory_space<vmem>>, vector<32x8xf32>
    %cst_163 = arith.constant dense<0.000000e+00> : vector<16x8xf32>
    %322 = tpu.matmul %231, %321, %cst_163 {dimension_numbers = #tpu.dot_dimension_numbers<[1], [0], [0], [1], [0, 0, 1, 1], [], []>} : vector<16x32xf32>, vector<32x8xf32>, vector<16x8xf32> -> vector<16x8xf32>
    %c792 = arith.constant 792 : index
    %c0_164 = arith.constant 0 : index
    %323 = vector.load %arg7[%c792, %c0_164] : memref<832x8xf32, #tpu.memory_space<vmem>>, vector<32x8xf32>
    %cst_165 = arith.constant dense<0.000000e+00> : vector<16x8xf32>
    %324 = tpu.matmul %231, %323, %cst_165 {dimension_numbers = #tpu.dot_dimension_numbers<[1], [0], [0], [1], [0, 0, 1, 1], [], []>} : vector<16x32xf32>, vector<32x8xf32>, vector<16x8xf32> -> vector<16x8xf32>
    %cst_166 = arith.constant dense<0.000000e+00> : vector<16x16xf32>
    %325 = tpu.matmul %320, %322, %cst_166 {dimension_numbers = #tpu.dot_dimension_numbers<[1], [1], [0], [0], [0, 0, 1, 0], [], []>} : vector<16x8xf32>, vector<16x8xf32>, vector<16x16xf32> -> vector<16x16xf32>
    %cst_167 = arith.constant 0.353553385 : f32
    %326 = vector.broadcast %cst_167 : f32 to vector<16x16xf32>
    %327 = arith.mulf %325, %326 : vector<16x16xf32>
    %328 = arith.addf %327, %28 : vector<16x16xf32>
    %cst_168 = arith.constant dense<0xFF800000> : vector<16xf32>
    %329 = vector.multi_reduction <maximumf>, %328, %cst_168 [1] : vector<16x16xf32> to vector<16xf32>
    %330 = vector.shape_cast %329 : vector<16xf32> to vector<16x1xf32>
    %331 = vector.broadcast %330 : vector<16x1xf32> to vector<16x16xf32>
    %332 = arith.subf %328, %331 : vector<16x16xf32>
    %333 = math.exp %332 : vector<16x16xf32>
    %cst_169 = arith.constant dense<0.000000e+00> : vector<16xf32>
    %334 = vector.multi_reduction <add>, %333, %cst_169 [1] : vector<16x16xf32> to vector<16xf32>
    %335 = vector.shape_cast %334 : vector<16xf32> to vector<16x1xf32>
    %336 = tpu.reciprocal %335 {approx = true} : vector<16x1xf32> -> vector<16x1xf32>
    %337 = vector.broadcast %336 : vector<16x1xf32> to vector<16x16xf32>
    %338 = arith.mulf %333, %337 : vector<16x16xf32>
    %cst_170 = arith.constant dense<0.000000e+00> : vector<16x8xf32>
    %339 = tpu.matmul %338, %324, %cst_170 {dimension_numbers = #tpu.dot_dimension_numbers<[1], [0], [0], [1], [0, 0, 1, 1], [], []>} : vector<16x16xf32>, vector<16x8xf32>, vector<16x8xf32> -> vector<16x8xf32>
    %c248 = arith.constant 248 : index
    %c0_171 = arith.constant 0 : index
    %340 = vector.load %arg9[%c248, %c0_171] : memref<480x32xf32, #tpu.memory_space<vmem>>, vector<8x32xf32>
    %cst_172 = arith.constant dense<0.000000e+00> : vector<16x32xf32>
    %341 = tpu.matmul %339, %340, %cst_172 {dimension_numbers = #tpu.dot_dimension_numbers<[1], [0], [0], [1], [0, 0, 1, 1], [], []>} : vector<16x8xf32>, vector<8x32xf32>, vector<16x32xf32> -> vector<16x32xf32>
    %342 = arith.addf %315, %341 : vector<16x32xf32>
    %c264 = arith.constant 264 : index
    %c0_173 = arith.constant 0 : index
    %343 = vector.load %arg9[%c264, %c0_173] : memref<480x32xf32, #tpu.memory_space<vmem>>, vector<1x32xf32>
    %c272_174 = arith.constant 272 : index
    %c0_175 = arith.constant 0 : index
    %344 = vector.load %arg9[%c272_174, %c0_175] : memref<480x32xf32, #tpu.memory_space<vmem>>, vector<1x32xf32>
    %cst_176 = arith.constant dense<0.000000e+00> : vector<16xf32>
    %345 = vector.multi_reduction <add>, %342, %cst_176 [1] : vector<16x32xf32> to vector<16xf32>
    %346 = vector.shape_cast %345 : vector<16xf32> to vector<16x1xf32>
    %cst_177 = arith.constant 3.200000e+01 : f32
    %347 = vector.broadcast %cst_177 : f32 to vector<16x1xf32>
    %348 = arith.divf %346, %347 : vector<16x1xf32>
    %349 = vector.broadcast %348 : vector<16x1xf32> to vector<16x32xf32>
    %350 = arith.subf %342, %349 : vector<16x32xf32>
    %351 = arith.mulf %350, %350 : vector<16x32xf32>
    %cst_178 = arith.constant dense<0.000000e+00> : vector<16xf32>
    %352 = vector.multi_reduction <add>, %351, %cst_178 [1] : vector<16x32xf32> to vector<16xf32>
    %353 = vector.shape_cast %352 : vector<16xf32> to vector<16x1xf32>
    %cst_179 = arith.constant 3.200000e+01 : f32
    %354 = vector.broadcast %cst_179 : f32 to vector<16x1xf32>
    %355 = arith.divf %353, %354 : vector<16x1xf32>
    %cst_180 = arith.constant 9.99999996E-13 : f32
    %356 = vector.broadcast %cst_180 : f32 to vector<16x1xf32>
    %357 = arith.addf %355, %356 : vector<16x1xf32>
    %358 = math.rsqrt %357 : vector<16x1xf32>
    %359 = vector.broadcast %358 : vector<16x1xf32> to vector<16x32xf32>
    %360 = arith.mulf %350, %359 : vector<16x32xf32>
    %361 = vector.broadcast %343 : vector<1x32xf32> to vector<16x32xf32>
    %362 = arith.mulf %360, %361 : vector<16x32xf32>
    %363 = vector.broadcast %344 : vector<1x32xf32> to vector<16x32xf32>
    %364 = arith.addf %362, %363 : vector<16x32xf32>
    %c40_181 = arith.constant 40 : index
    %c0_182 = arith.constant 0 : index
    %365 = vector.load %arg10[%c40_181, %c0_182] : memref<848x64xf32, #tpu.memory_space<vmem>>, vector<32x64xf32>
    %cst_183 = arith.constant dense<0.000000e+00> : vector<16x64xf32>
    %366 = tpu.matmul %364, %365, %cst_183 {dimension_numbers = #tpu.dot_dimension_numbers<[1], [0], [0], [1], [0, 0, 1, 1], [], []>} : vector<16x32xf32>, vector<32x64xf32>, vector<16x64xf32> -> vector<16x64xf32>
    %c72_184 = arith.constant 72 : index
    %c0_185 = arith.constant 0 : index
    %367 = vector.load %arg10[%c72_184, %c0_185] : memref<848x64xf32, #tpu.memory_space<vmem>>, vector<1x64xf32>
    %368 = vector.broadcast %367 : vector<1x64xf32> to vector<16x64xf32>
    %369 = arith.addf %366, %368 : vector<16x64xf32>
    %cst_186 = arith.constant 5.000000e-01 : f32
    %370 = vector.broadcast %cst_186 : f32 to vector<16x64xf32>
    %371 = arith.mulf %370, %369 : vector<16x64xf32>
    %cst_187 = arith.constant 4.471500e-02 : f32
    %372 = vector.broadcast %cst_187 : f32 to vector<16x64xf32>
    %373 = arith.mulf %372, %369 : vector<16x64xf32>
    %374 = arith.mulf %373, %369 : vector<16x64xf32>
    %375 = arith.mulf %374, %369 : vector<16x64xf32>
    %376 = arith.addf %369, %375 : vector<16x64xf32>
    %cst_188 = arith.constant 0.797884583 : f32
    %377 = vector.broadcast %cst_188 : f32 to vector<16x64xf32>
    %378 = arith.mulf %377, %376 : vector<16x64xf32>
    %379 = math.tanh %378 : vector<16x64xf32>
    %cst_189 = arith.constant 1.000000e+00 : f32
    %380 = vector.broadcast %cst_189 : f32 to vector<16x64xf32>
    %381 = arith.addf %380, %379 : vector<16x64xf32>
    %382 = arith.mulf %371, %381 : vector<16x64xf32>
    %c280 = arith.constant 280 : index
    %c0_190 = arith.constant 0 : index
    %383 = vector.load %arg9[%c280, %c0_190] : memref<480x32xf32, #tpu.memory_space<vmem>>, vector<64x32xf32>
    %cst_191 = arith.constant dense<0.000000e+00> : vector<16x32xf32>
    %384 = tpu.matmul %382, %383, %cst_191 {dimension_numbers = #tpu.dot_dimension_numbers<[1], [0], [0], [1], [0, 0, 1, 1], [], []>} : vector<16x64xf32>, vector<64x32xf32>, vector<16x32xf32> -> vector<16x32xf32>
    %c344_192 = arith.constant 344 : index
    %c0_193 = arith.constant 0 : index
    %385 = vector.load %arg9[%c344_192, %c0_193] : memref<480x32xf32, #tpu.memory_space<vmem>>, vector<1x32xf32>
    %386 = vector.broadcast %385 : vector<1x32xf32> to vector<16x32xf32>
    %387 = arith.addf %384, %386 : vector<16x32xf32>
    %388 = arith.addf %387, %364 : vector<16x32xf32>
    %c352 = arith.constant 352 : index
    %c0_194 = arith.constant 0 : index
    %389 = vector.load %arg9[%c352, %c0_194] : memref<480x32xf32, #tpu.memory_space<vmem>>, vector<1x32xf32>
    %c360 = arith.constant 360 : index
    %c0_195 = arith.constant 0 : index
    %390 = vector.load %arg9[%c360, %c0_195] : memref<480x32xf32, #tpu.memory_space<vmem>>, vector<1x32xf32>
    %cst_196 = arith.constant dense<0.000000e+00> : vector<16xf32>
    %391 = vector.multi_reduction <add>, %388, %cst_196 [1] : vector<16x32xf32> to vector<16xf32>
    %392 = vector.shape_cast %391 : vector<16xf32> to vector<16x1xf32>
    %cst_197 = arith.constant 3.200000e+01 : f32
    %393 = vector.broadcast %cst_197 : f32 to vector<16x1xf32>
    %394 = arith.divf %392, %393 : vector<16x1xf32>
    %395 = vector.broadcast %394 : vector<16x1xf32> to vector<16x32xf32>
    %396 = arith.subf %388, %395 : vector<16x32xf32>
    %397 = arith.mulf %396, %396 : vector<16x32xf32>
    %cst_198 = arith.constant dense<0.000000e+00> : vector<16xf32>
    %398 = vector.multi_reduction <add>, %397, %cst_198 [1] : vector<16x32xf32> to vector<16xf32>
    %399 = vector.shape_cast %398 : vector<16xf32> to vector<16x1xf32>
    %cst_199 = arith.constant 3.200000e+01 : f32
    %400 = vector.broadcast %cst_199 : f32 to vector<16x1xf32>
    %401 = arith.divf %399, %400 : vector<16x1xf32>
    %cst_200 = arith.constant 9.99999996E-13 : f32
    %402 = vector.broadcast %cst_200 : f32 to vector<16x1xf32>
    %403 = arith.addf %401, %402 : vector<16x1xf32>
    %404 = math.rsqrt %403 : vector<16x1xf32>
    %405 = vector.broadcast %404 : vector<16x1xf32> to vector<16x32xf32>
    %406 = arith.mulf %396, %405 : vector<16x32xf32>
    %407 = vector.broadcast %389 : vector<1x32xf32> to vector<16x32xf32>
    %408 = arith.mulf %406, %407 : vector<16x32xf32>
    %409 = vector.broadcast %390 : vector<1x32xf32> to vector<16x32xf32>
    %410 = arith.addf %408, %409 : vector<16x32xf32>
    %c0_201 = arith.constant 0 : index
    %c0_202 = arith.constant 0 : index
    %c0_203 = arith.constant 0 : index
    %411 = vector.load %arg5[%c0_201, %c0_202, %c0_203] : memref<2x2x16xf32, #tpu.memory_space<vmem>>, vector<1x2x16xf32>
    %412 = vector.shape_cast %411 : vector<1x2x16xf32> to vector<2x16xf32>
    %cst_204 = arith.constant dense<0.000000e+00> : vector<2x32xf32>
    %413 = tpu.matmul %412, %410, %cst_204 {dimension_numbers = #tpu.dot_dimension_numbers<[1], [0], [0], [1], [0, 0, 1, 1], [], []>} : vector<2x16xf32>, vector<16x32xf32>, vector<2x32xf32> -> vector<2x32xf32>
    %c0_205 = arith.constant 0 : index
    %c0_206 = arith.constant 0 : index
    %c0_207 = arith.constant 0 : index
    %414 = vector.load %arg4[%c0_205, %c0_206, %c0_207] : memref<2x16x1xf32, #tpu.memory_space<vmem>>, vector<1x16x1xf32>
    %415 = vector.shape_cast %414 : vector<1x16x1xf32> to vector<16x1xf32>
    %416 = vector.broadcast %415 : vector<16x1xf32> to vector<16x32xf32>
    %417 = arith.addf %410, %416 : vector<16x32xf32>
    %418 = vector.extract_strided_slice %417 {offsets = [0, 0], sizes = [8, 32], strides = [1, 1]} : vector<16x32xf32> to vector<8x32xf32>
    %cst_208 = arith.constant dense<0xFF800000> : vector<32xf32>
    %419 = vector.multi_reduction <maximumf>, %418, %cst_208 [0] : vector<8x32xf32> to vector<32xf32>
    %420 = vector.shape_cast %419 : vector<32xf32> to vector<1x32xf32>
    %421 = vector.extract_strided_slice %417 {offsets = [8, 0], sizes = [8, 32], strides = [1, 1]} : vector<16x32xf32> to vector<8x32xf32>
    %cst_209 = arith.constant dense<0xFF800000> : vector<32xf32>
    %422 = vector.multi_reduction <maximumf>, %421, %cst_209 [0] : vector<8x32xf32> to vector<32xf32>
    %423 = vector.shape_cast %422 : vector<32xf32> to vector<1x32xf32>
    %424 = tpu.concatenate %420, %423 in 0 : vector<1x32xf32>, vector<1x32xf32> -> vector<2x32xf32>
    %c0_210 = arith.constant 0 : index
    %c0_211 = arith.constant 0 : index
    %425 = vector.load %arg1[%c0_210, %c0_211] : memref<16x8xf32, #tpu.memory_space<vmem>>, vector<16x8xf32>
    %c80_212 = arith.constant 80 : index
    %c0_213 = arith.constant 0 : index
    %426 = vector.load %arg10[%c80_212, %c0_213] : memref<848x64xf32, #tpu.memory_space<vmem>>, vector<8x64xf32>
    %cst_214 = arith.constant dense<0.000000e+00> : vector<16x64xf32>
    %427 = tpu.matmul %425, %426, %cst_214 {dimension_numbers = #tpu.dot_dimension_numbers<[1], [0], [0], [1], [0, 0, 1, 1], [], []>} : vector<16x8xf32>, vector<8x64xf32>, vector<16x64xf32> -> vector<16x64xf32>
    %c88_215 = arith.constant 88 : index
    %c0_216 = arith.constant 0 : index
    %428 = vector.load %arg10[%c88_215, %c0_216] : memref<848x64xf32, #tpu.memory_space<vmem>>, vector<32x64xf32>
    %cst_217 = arith.constant dense<0.000000e+00> : vector<16x64xf32>
    %429 = tpu.matmul %410, %428, %cst_217 {dimension_numbers = #tpu.dot_dimension_numbers<[1], [0], [0], [1], [0, 0, 1, 1], [], []>} : vector<16x32xf32>, vector<32x64xf32>, vector<16x64xf32> -> vector<16x64xf32>
    %430 = arith.addf %427, %429 : vector<16x64xf32>
    %c120_218 = arith.constant 120 : index
    %c0_219 = arith.constant 0 : index
    %431 = vector.load %arg10[%c120_218, %c0_219] : memref<848x64xf32, #tpu.memory_space<vmem>>, vector<1x64xf32>
    %432 = vector.broadcast %431 : vector<1x64xf32> to vector<16x64xf32>
    %433 = arith.addf %430, %432 : vector<16x64xf32>
    %cst_220 = arith.constant 0.000000e+00 : f32
    %434 = vector.broadcast %cst_220 : f32 to vector<16x64xf32>
    %435 = arith.maximumf %433, %434 : vector<16x64xf32>
    %c1_221 = arith.constant 1 : index
    %c0_222 = arith.constant 0 : index
    %c0_223 = arith.constant 0 : index
    %436 = vector.load %arg3[%c1_221, %c0_222, %c0_223] : memref<2x16x16xf32, #tpu.memory_space<vmem>>, vector<1x16x16xf32>
    %437 = vector.shape_cast %436 : vector<1x16x16xf32> to vector<16x16xf32>
    %c128_224 = arith.constant 128 : index
    %c0_225 = arith.constant 0 : index
    %438 = vector.load %arg10[%c128_224, %c0_225] : memref<848x64xf32, #tpu.memory_space<vmem>>, vector<16x64xf32>
    %439 = arith.addf %435, %438 : vector<16x64xf32>
    %c144 = arith.constant 144 : index
    %c0_226 = arith.constant 0 : index
    %440 = vector.load %arg10[%c144, %c0_226] : memref<848x64xf32, #tpu.memory_space<vmem>>, vector<1x64xf32>
    %c152 = arith.constant 152 : index
    %c0_227 = arith.constant 0 : index
    %441 = vector.load %arg10[%c152, %c0_227] : memref<848x64xf32, #tpu.memory_space<vmem>>, vector<1x64xf32>
    %cst_228 = arith.constant dense<0.000000e+00> : vector<16xf32>
    %442 = vector.multi_reduction <add>, %439, %cst_228 [1] : vector<16x64xf32> to vector<16xf32>
    %443 = vector.shape_cast %442 : vector<16xf32> to vector<16x1xf32>
    %cst_229 = arith.constant 6.400000e+01 : f32
    %444 = vector.broadcast %cst_229 : f32 to vector<16x1xf32>
    %445 = arith.divf %443, %444 : vector<16x1xf32>
    %446 = vector.broadcast %445 : vector<16x1xf32> to vector<16x64xf32>
    %447 = arith.subf %439, %446 : vector<16x64xf32>
    %448 = arith.mulf %447, %447 : vector<16x64xf32>
    %cst_230 = arith.constant dense<0.000000e+00> : vector<16xf32>
    %449 = vector.multi_reduction <add>, %448, %cst_230 [1] : vector<16x64xf32> to vector<16xf32>
    %450 = vector.shape_cast %449 : vector<16xf32> to vector<16x1xf32>
    %cst_231 = arith.constant 6.400000e+01 : f32
    %451 = vector.broadcast %cst_231 : f32 to vector<16x1xf32>
    %452 = arith.divf %450, %451 : vector<16x1xf32>
    %cst_232 = arith.constant 9.99999996E-13 : f32
    %453 = vector.broadcast %cst_232 : f32 to vector<16x1xf32>
    %454 = arith.addf %452, %453 : vector<16x1xf32>
    %455 = math.rsqrt %454 : vector<16x1xf32>
    %456 = vector.broadcast %455 : vector<16x1xf32> to vector<16x64xf32>
    %457 = arith.mulf %447, %456 : vector<16x64xf32>
    %458 = vector.broadcast %440 : vector<1x64xf32> to vector<16x64xf32>
    %459 = arith.mulf %457, %458 : vector<16x64xf32>
    %460 = vector.broadcast %441 : vector<1x64xf32> to vector<16x64xf32>
    %461 = arith.addf %459, %460 : vector<16x64xf32>
    %c224_233 = arith.constant 224 : index
    %c0_234 = arith.constant 0 : index
    %462 = vector.load %arg10[%c224_233, %c0_234] : memref<848x64xf32, #tpu.memory_space<vmem>>, vector<1x64xf32>
    %463 = vector.broadcast %462 : vector<1x64xf32> to vector<16x64xf32>
    %464 = arith.addf %461, %463 : vector<16x64xf32>
    %c0_235 = arith.constant 0 : index
    %c0_236 = arith.constant 0 : index
    %465 = vector.load %arg8[%c0_235, %c0_236] : memref<1600x16xf32, #tpu.memory_space<vmem>>, vector<64x16xf32>
    %cst_237 = arith.constant dense<0.000000e+00> : vector<16x16xf32>
    %466 = tpu.matmul %461, %465, %cst_237 {dimension_numbers = #tpu.dot_dimension_numbers<[1], [0], [0], [1], [0, 0, 1, 1], [], []>} : vector<16x64xf32>, vector<64x16xf32>, vector<16x16xf32> -> vector<16x16xf32>
    %c192 = arith.constant 192 : index
    %c0_238 = arith.constant 0 : index
    %467 = vector.load %arg8[%c192, %c0_238] : memref<1600x16xf32, #tpu.memory_space<vmem>>, vector<1x16xf32>
    %468 = vector.broadcast %467 : vector<1x16xf32> to vector<16x16xf32>
    %469 = arith.addf %466, %468 : vector<16x16xf32>
    %c64_239 = arith.constant 64 : index
    %c0_240 = arith.constant 0 : index
    %470 = vector.load %arg8[%c64_239, %c0_240] : memref<1600x16xf32, #tpu.memory_space<vmem>>, vector<64x16xf32>
    %cst_241 = arith.constant dense<0.000000e+00> : vector<16x16xf32>
    %471 = tpu.matmul %461, %470, %cst_241 {dimension_numbers = #tpu.dot_dimension_numbers<[1], [0], [0], [1], [0, 0, 1, 1], [], []>} : vector<16x64xf32>, vector<64x16xf32>, vector<16x16xf32> -> vector<16x16xf32>
    %c128_242 = arith.constant 128 : index
    %c0_243 = arith.constant 0 : index
    %472 = vector.load %arg8[%c128_242, %c0_243] : memref<1600x16xf32, #tpu.memory_space<vmem>>, vector<64x16xf32>
    %cst_244 = arith.constant dense<0.000000e+00> : vector<16x16xf32>
    %473 = tpu.matmul %461, %472, %cst_244 {dimension_numbers = #tpu.dot_dimension_numbers<[1], [0], [0], [1], [0, 0, 1, 1], [], []>} : vector<16x64xf32>, vector<64x16xf32>, vector<16x16xf32> -> vector<16x16xf32>
    %cst_245 = arith.constant dense<0.000000e+00> : vector<16x16xf32>
    %474 = tpu.matmul %469, %471, %cst_245 {dimension_numbers = #tpu.dot_dimension_numbers<[1], [1], [0], [0], [0, 0, 1, 0], [], []>} : vector<16x16xf32>, vector<16x16xf32>, vector<16x16xf32> -> vector<16x16xf32>
    %cst_246 = arith.constant 2.500000e-01 : f32
    %475 = vector.broadcast %cst_246 : f32 to vector<16x16xf32>
    %476 = arith.mulf %474, %475 : vector<16x16xf32>
    %477 = arith.addf %476, %437 : vector<16x16xf32>
    %cst_247 = arith.constant dense<0xFF800000> : vector<16xf32>
    %478 = vector.multi_reduction <maximumf>, %477, %cst_247 [1] : vector<16x16xf32> to vector<16xf32>
    %479 = vector.shape_cast %478 : vector<16xf32> to vector<16x1xf32>
    %480 = vector.broadcast %479 : vector<16x1xf32> to vector<16x16xf32>
    %481 = arith.subf %477, %480 : vector<16x16xf32>
    %482 = math.exp %481 : vector<16x16xf32>
    %cst_248 = arith.constant dense<0.000000e+00> : vector<16xf32>
    %483 = vector.multi_reduction <add>, %482, %cst_248 [1] : vector<16x16xf32> to vector<16xf32>
    %484 = vector.shape_cast %483 : vector<16xf32> to vector<16x1xf32>
    %485 = tpu.reciprocal %484 {approx = true} : vector<16x1xf32> -> vector<16x1xf32>
    %486 = vector.broadcast %485 : vector<16x1xf32> to vector<16x16xf32>
    %487 = arith.mulf %482, %486 : vector<16x16xf32>
    %cst_249 = arith.constant dense<0.000000e+00> : vector<16x16xf32>
    %488 = tpu.matmul %487, %473, %cst_249 {dimension_numbers = #tpu.dot_dimension_numbers<[1], [0], [0], [1], [0, 0, 1, 1], [], []>} : vector<16x16xf32>, vector<16x16xf32>, vector<16x16xf32> -> vector<16x16xf32>
    %c160 = arith.constant 160 : index
    %c0_250 = arith.constant 0 : index
    %489 = vector.load %arg10[%c160, %c0_250] : memref<848x64xf32, #tpu.memory_space<vmem>>, vector<16x64xf32>
    %cst_251 = arith.constant dense<0.000000e+00> : vector<16x64xf32>
    %490 = tpu.matmul %488, %489, %cst_251 {dimension_numbers = #tpu.dot_dimension_numbers<[1], [0], [0], [1], [0, 0, 1, 1], [], []>} : vector<16x16xf32>, vector<16x64xf32>, vector<16x64xf32> -> vector<16x64xf32>
    %491 = arith.addf %464, %490 : vector<16x64xf32>
    %c200_252 = arith.constant 200 : index
    %c0_253 = arith.constant 0 : index
    %492 = vector.load %arg8[%c200_252, %c0_253] : memref<1600x16xf32, #tpu.memory_space<vmem>>, vector<64x16xf32>
    %cst_254 = arith.constant dense<0.000000e+00> : vector<16x16xf32>
    %493 = tpu.matmul %461, %492, %cst_254 {dimension_numbers = #tpu.dot_dimension_numbers<[1], [0], [0], [1], [0, 0, 1, 1], [], []>} : vector<16x64xf32>, vector<64x16xf32>, vector<16x16xf32> -> vector<16x16xf32>
    %c392 = arith.constant 392 : index
    %c0_255 = arith.constant 0 : index
    %494 = vector.load %arg8[%c392, %c0_255] : memref<1600x16xf32, #tpu.memory_space<vmem>>, vector<1x16xf32>
    %495 = vector.broadcast %494 : vector<1x16xf32> to vector<16x16xf32>
    %496 = arith.addf %493, %495 : vector<16x16xf32>
    %c264_256 = arith.constant 264 : index
    %c0_257 = arith.constant 0 : index
    %497 = vector.load %arg8[%c264_256, %c0_257] : memref<1600x16xf32, #tpu.memory_space<vmem>>, vector<64x16xf32>
    %cst_258 = arith.constant dense<0.000000e+00> : vector<16x16xf32>
    %498 = tpu.matmul %461, %497, %cst_258 {dimension_numbers = #tpu.dot_dimension_numbers<[1], [0], [0], [1], [0, 0, 1, 1], [], []>} : vector<16x64xf32>, vector<64x16xf32>, vector<16x16xf32> -> vector<16x16xf32>
    %c328 = arith.constant 328 : index
    %c0_259 = arith.constant 0 : index
    %499 = vector.load %arg8[%c328, %c0_259] : memref<1600x16xf32, #tpu.memory_space<vmem>>, vector<64x16xf32>
    %cst_260 = arith.constant dense<0.000000e+00> : vector<16x16xf32>
    %500 = tpu.matmul %461, %499, %cst_260 {dimension_numbers = #tpu.dot_dimension_numbers<[1], [0], [0], [1], [0, 0, 1, 1], [], []>} : vector<16x64xf32>, vector<64x16xf32>, vector<16x16xf32> -> vector<16x16xf32>
    %cst_261 = arith.constant dense<0.000000e+00> : vector<16x16xf32>
    %501 = tpu.matmul %496, %498, %cst_261 {dimension_numbers = #tpu.dot_dimension_numbers<[1], [1], [0], [0], [0, 0, 1, 0], [], []>} : vector<16x16xf32>, vector<16x16xf32>, vector<16x16xf32> -> vector<16x16xf32>
    %cst_262 = arith.constant 2.500000e-01 : f32
    %502 = vector.broadcast %cst_262 : f32 to vector<16x16xf32>
    %503 = arith.mulf %501, %502 : vector<16x16xf32>
    %504 = arith.addf %503, %437 : vector<16x16xf32>
    %cst_263 = arith.constant dense<0xFF800000> : vector<16xf32>
    %505 = vector.multi_reduction <maximumf>, %504, %cst_263 [1] : vector<16x16xf32> to vector<16xf32>
    %506 = vector.shape_cast %505 : vector<16xf32> to vector<16x1xf32>
    %507 = vector.broadcast %506 : vector<16x1xf32> to vector<16x16xf32>
    %508 = arith.subf %504, %507 : vector<16x16xf32>
    %509 = math.exp %508 : vector<16x16xf32>
    %cst_264 = arith.constant dense<0.000000e+00> : vector<16xf32>
    %510 = vector.multi_reduction <add>, %509, %cst_264 [1] : vector<16x16xf32> to vector<16xf32>
    %511 = vector.shape_cast %510 : vector<16xf32> to vector<16x1xf32>
    %512 = tpu.reciprocal %511 {approx = true} : vector<16x1xf32> -> vector<16x1xf32>
    %513 = vector.broadcast %512 : vector<16x1xf32> to vector<16x16xf32>
    %514 = arith.mulf %509, %513 : vector<16x16xf32>
    %cst_265 = arith.constant dense<0.000000e+00> : vector<16x16xf32>
    %515 = tpu.matmul %514, %500, %cst_265 {dimension_numbers = #tpu.dot_dimension_numbers<[1], [0], [0], [1], [0, 0, 1, 1], [], []>} : vector<16x16xf32>, vector<16x16xf32>, vector<16x16xf32> -> vector<16x16xf32>
    %c176 = arith.constant 176 : index
    %c0_266 = arith.constant 0 : index
    %516 = vector.load %arg10[%c176, %c0_266] : memref<848x64xf32, #tpu.memory_space<vmem>>, vector<16x64xf32>
    %cst_267 = arith.constant dense<0.000000e+00> : vector<16x64xf32>
    %517 = tpu.matmul %515, %516, %cst_267 {dimension_numbers = #tpu.dot_dimension_numbers<[1], [0], [0], [1], [0, 0, 1, 1], [], []>} : vector<16x16xf32>, vector<16x64xf32>, vector<16x64xf32> -> vector<16x64xf32>
    %518 = arith.addf %491, %517 : vector<16x64xf32>
    %c400 = arith.constant 400 : index
    %c0_268 = arith.constant 0 : index
    %519 = vector.load %arg8[%c400, %c0_268] : memref<1600x16xf32, #tpu.memory_space<vmem>>, vector<64x16xf32>
    %cst_269 = arith.constant dense<0.000000e+00> : vector<16x16xf32>
    %520 = tpu.matmul %461, %519, %cst_269 {dimension_numbers = #tpu.dot_dimension_numbers<[1], [0], [0], [1], [0, 0, 1, 1], [], []>} : vector<16x64xf32>, vector<64x16xf32>, vector<16x16xf32> -> vector<16x16xf32>
    %c592 = arith.constant 592 : index
    %c0_270 = arith.constant 0 : index
    %521 = vector.load %arg8[%c592, %c0_270] : memref<1600x16xf32, #tpu.memory_space<vmem>>, vector<1x16xf32>
    %522 = vector.broadcast %521 : vector<1x16xf32> to vector<16x16xf32>
    %523 = arith.addf %520, %522 : vector<16x16xf32>
    %c464 = arith.constant 464 : index
    %c0_271 = arith.constant 0 : index
    %524 = vector.load %arg8[%c464, %c0_271] : memref<1600x16xf32, #tpu.memory_space<vmem>>, vector<64x16xf32>
    %cst_272 = arith.constant dense<0.000000e+00> : vector<16x16xf32>
    %525 = tpu.matmul %461, %524, %cst_272 {dimension_numbers = #tpu.dot_dimension_numbers<[1], [0], [0], [1], [0, 0, 1, 1], [], []>} : vector<16x64xf32>, vector<64x16xf32>, vector<16x16xf32> -> vector<16x16xf32>
    %c528 = arith.constant 528 : index
    %c0_273 = arith.constant 0 : index
    %526 = vector.load %arg8[%c528, %c0_273] : memref<1600x16xf32, #tpu.memory_space<vmem>>, vector<64x16xf32>
    %cst_274 = arith.constant dense<0.000000e+00> : vector<16x16xf32>
    %527 = tpu.matmul %461, %526, %cst_274 {dimension_numbers = #tpu.dot_dimension_numbers<[1], [0], [0], [1], [0, 0, 1, 1], [], []>} : vector<16x64xf32>, vector<64x16xf32>, vector<16x16xf32> -> vector<16x16xf32>
    %cst_275 = arith.constant dense<0.000000e+00> : vector<16x16xf32>
    %528 = tpu.matmul %523, %525, %cst_275 {dimension_numbers = #tpu.dot_dimension_numbers<[1], [1], [0], [0], [0, 0, 1, 0], [], []>} : vector<16x16xf32>, vector<16x16xf32>, vector<16x16xf32> -> vector<16x16xf32>
    %cst_276 = arith.constant 2.500000e-01 : f32
    %529 = vector.broadcast %cst_276 : f32 to vector<16x16xf32>
    %530 = arith.mulf %528, %529 : vector<16x16xf32>
    %531 = arith.addf %530, %437 : vector<16x16xf32>
    %cst_277 = arith.constant dense<0xFF800000> : vector<16xf32>
    %532 = vector.multi_reduction <maximumf>, %531, %cst_277 [1] : vector<16x16xf32> to vector<16xf32>
    %533 = vector.shape_cast %532 : vector<16xf32> to vector<16x1xf32>
    %534 = vector.broadcast %533 : vector<16x1xf32> to vector<16x16xf32>
    %535 = arith.subf %531, %534 : vector<16x16xf32>
    %536 = math.exp %535 : vector<16x16xf32>
    %cst_278 = arith.constant dense<0.000000e+00> : vector<16xf32>
    %537 = vector.multi_reduction <add>, %536, %cst_278 [1] : vector<16x16xf32> to vector<16xf32>
    %538 = vector.shape_cast %537 : vector<16xf32> to vector<16x1xf32>
    %539 = tpu.reciprocal %538 {approx = true} : vector<16x1xf32> -> vector<16x1xf32>
    %540 = vector.broadcast %539 : vector<16x1xf32> to vector<16x16xf32>
    %541 = arith.mulf %536, %540 : vector<16x16xf32>
    %cst_279 = arith.constant dense<0.000000e+00> : vector<16x16xf32>
    %542 = tpu.matmul %541, %527, %cst_279 {dimension_numbers = #tpu.dot_dimension_numbers<[1], [0], [0], [1], [0, 0, 1, 1], [], []>} : vector<16x16xf32>, vector<16x16xf32>, vector<16x16xf32> -> vector<16x16xf32>
    %c192_280 = arith.constant 192 : index
    %c0_281 = arith.constant 0 : index
    %543 = vector.load %arg10[%c192_280, %c0_281] : memref<848x64xf32, #tpu.memory_space<vmem>>, vector<16x64xf32>
    %cst_282 = arith.constant dense<0.000000e+00> : vector<16x64xf32>
    %544 = tpu.matmul %542, %543, %cst_282 {dimension_numbers = #tpu.dot_dimension_numbers<[1], [0], [0], [1], [0, 0, 1, 1], [], []>} : vector<16x16xf32>, vector<16x64xf32>, vector<16x64xf32> -> vector<16x64xf32>
    %545 = arith.addf %518, %544 : vector<16x64xf32>
    %c600 = arith.constant 600 : index
    %c0_283 = arith.constant 0 : index
    %546 = vector.load %arg8[%c600, %c0_283] : memref<1600x16xf32, #tpu.memory_space<vmem>>, vector<64x16xf32>
    %cst_284 = arith.constant dense<0.000000e+00> : vector<16x16xf32>
    %547 = tpu.matmul %461, %546, %cst_284 {dimension_numbers = #tpu.dot_dimension_numbers<[1], [0], [0], [1], [0, 0, 1, 1], [], []>} : vector<16x64xf32>, vector<64x16xf32>, vector<16x16xf32> -> vector<16x16xf32>
    %c792_285 = arith.constant 792 : index
    %c0_286 = arith.constant 0 : index
    %548 = vector.load %arg8[%c792_285, %c0_286] : memref<1600x16xf32, #tpu.memory_space<vmem>>, vector<1x16xf32>
    %549 = vector.broadcast %548 : vector<1x16xf32> to vector<16x16xf32>
    %550 = arith.addf %547, %549 : vector<16x16xf32>
    %c664 = arith.constant 664 : index
    %c0_287 = arith.constant 0 : index
    %551 = vector.load %arg8[%c664, %c0_287] : memref<1600x16xf32, #tpu.memory_space<vmem>>, vector<64x16xf32>
    %cst_288 = arith.constant dense<0.000000e+00> : vector<16x16xf32>
    %552 = tpu.matmul %461, %551, %cst_288 {dimension_numbers = #tpu.dot_dimension_numbers<[1], [0], [0], [1], [0, 0, 1, 1], [], []>} : vector<16x64xf32>, vector<64x16xf32>, vector<16x16xf32> -> vector<16x16xf32>
    %c728_289 = arith.constant 728 : index
    %c0_290 = arith.constant 0 : index
    %553 = vector.load %arg8[%c728_289, %c0_290] : memref<1600x16xf32, #tpu.memory_space<vmem>>, vector<64x16xf32>
    %cst_291 = arith.constant dense<0.000000e+00> : vector<16x16xf32>
    %554 = tpu.matmul %461, %553, %cst_291 {dimension_numbers = #tpu.dot_dimension_numbers<[1], [0], [0], [1], [0, 0, 1, 1], [], []>} : vector<16x64xf32>, vector<64x16xf32>, vector<16x16xf32> -> vector<16x16xf32>
    %cst_292 = arith.constant dense<0.000000e+00> : vector<16x16xf32>
    %555 = tpu.matmul %550, %552, %cst_292 {dimension_numbers = #tpu.dot_dimension_numbers<[1], [1], [0], [0], [0, 0, 1, 0], [], []>} : vector<16x16xf32>, vector<16x16xf32>, vector<16x16xf32> -> vector<16x16xf32>
    %cst_293 = arith.constant 2.500000e-01 : f32
    %556 = vector.broadcast %cst_293 : f32 to vector<16x16xf32>
    %557 = arith.mulf %555, %556 : vector<16x16xf32>
    %558 = arith.addf %557, %437 : vector<16x16xf32>
    %cst_294 = arith.constant dense<0xFF800000> : vector<16xf32>
    %559 = vector.multi_reduction <maximumf>, %558, %cst_294 [1] : vector<16x16xf32> to vector<16xf32>
    %560 = vector.shape_cast %559 : vector<16xf32> to vector<16x1xf32>
    %561 = vector.broadcast %560 : vector<16x1xf32> to vector<16x16xf32>
    %562 = arith.subf %558, %561 : vector<16x16xf32>
    %563 = math.exp %562 : vector<16x16xf32>
    %cst_295 = arith.constant dense<0.000000e+00> : vector<16xf32>
    %564 = vector.multi_reduction <add>, %563, %cst_295 [1] : vector<16x16xf32> to vector<16xf32>
    %565 = vector.shape_cast %564 : vector<16xf32> to vector<16x1xf32>
    %566 = tpu.reciprocal %565 {approx = true} : vector<16x1xf32> -> vector<16x1xf32>
    %567 = vector.broadcast %566 : vector<16x1xf32> to vector<16x16xf32>
    %568 = arith.mulf %563, %567 : vector<16x16xf32>
    %cst_296 = arith.constant dense<0.000000e+00> : vector<16x16xf32>
    %569 = tpu.matmul %568, %554, %cst_296 {dimension_numbers = #tpu.dot_dimension_numbers<[1], [0], [0], [1], [0, 0, 1, 1], [], []>} : vector<16x16xf32>, vector<16x16xf32>, vector<16x16xf32> -> vector<16x16xf32>
    %c208_297 = arith.constant 208 : index
    %c0_298 = arith.constant 0 : index
    %570 = vector.load %arg10[%c208_297, %c0_298] : memref<848x64xf32, #tpu.memory_space<vmem>>, vector<16x64xf32>
    %cst_299 = arith.constant dense<0.000000e+00> : vector<16x64xf32>
    %571 = tpu.matmul %569, %570, %cst_299 {dimension_numbers = #tpu.dot_dimension_numbers<[1], [0], [0], [1], [0, 0, 1, 1], [], []>} : vector<16x16xf32>, vector<16x64xf32>, vector<16x64xf32> -> vector<16x64xf32>
    %572 = arith.addf %545, %571 : vector<16x64xf32>
    %c232_300 = arith.constant 232 : index
    %c0_301 = arith.constant 0 : index
    %573 = vector.load %arg10[%c232_300, %c0_301] : memref<848x64xf32, #tpu.memory_space<vmem>>, vector<1x64xf32>
    %c240_302 = arith.constant 240 : index
    %c0_303 = arith.constant 0 : index
    %574 = vector.load %arg10[%c240_302, %c0_303] : memref<848x64xf32, #tpu.memory_space<vmem>>, vector<1x64xf32>
    %cst_304 = arith.constant dense<0.000000e+00> : vector<16xf32>
    %575 = vector.multi_reduction <add>, %572, %cst_304 [1] : vector<16x64xf32> to vector<16xf32>
    %576 = vector.shape_cast %575 : vector<16xf32> to vector<16x1xf32>
    %cst_305 = arith.constant 6.400000e+01 : f32
    %577 = vector.broadcast %cst_305 : f32 to vector<16x1xf32>
    %578 = arith.divf %576, %577 : vector<16x1xf32>
    %579 = vector.broadcast %578 : vector<16x1xf32> to vector<16x64xf32>
    %580 = arith.subf %572, %579 : vector<16x64xf32>
    %581 = arith.mulf %580, %580 : vector<16x64xf32>
    %cst_306 = arith.constant dense<0.000000e+00> : vector<16xf32>
    %582 = vector.multi_reduction <add>, %581, %cst_306 [1] : vector<16x64xf32> to vector<16xf32>
    %583 = vector.shape_cast %582 : vector<16xf32> to vector<16x1xf32>
    %cst_307 = arith.constant 6.400000e+01 : f32
    %584 = vector.broadcast %cst_307 : f32 to vector<16x1xf32>
    %585 = arith.divf %583, %584 : vector<16x1xf32>
    %cst_308 = arith.constant 9.99999996E-13 : f32
    %586 = vector.broadcast %cst_308 : f32 to vector<16x1xf32>
    %587 = arith.addf %585, %586 : vector<16x1xf32>
    %588 = math.rsqrt %587 : vector<16x1xf32>
    %589 = vector.broadcast %588 : vector<16x1xf32> to vector<16x64xf32>
    %590 = arith.mulf %580, %589 : vector<16x64xf32>
    %591 = vector.broadcast %573 : vector<1x64xf32> to vector<16x64xf32>
    %592 = arith.mulf %590, %591 : vector<16x64xf32>
    %593 = vector.broadcast %574 : vector<1x64xf32> to vector<16x64xf32>
    %594 = arith.addf %592, %593 : vector<16x64xf32>
    %c0_309 = arith.constant 0 : index
    %c0_310 = arith.constant 0 : index
    %595 = vector.load %arg11[%c0_309, %c0_310] : memref<168x128xf32, #tpu.memory_space<vmem>>, vector<64x128xf32>
    %cst_311 = arith.constant dense<0.000000e+00> : vector<16x128xf32>
    %596 = tpu.matmul %594, %595, %cst_311 {dimension_numbers = #tpu.dot_dimension_numbers<[1], [0], [0], [1], [0, 0, 1, 1], [], []>} : vector<16x64xf32>, vector<64x128xf32>, vector<16x128xf32> -> vector<16x128xf32>
    %c64_312 = arith.constant 64 : index
    %c0_313 = arith.constant 0 : index
    %597 = vector.load %arg11[%c64_312, %c0_313] : memref<168x128xf32, #tpu.memory_space<vmem>>, vector<1x128xf32>
    %598 = vector.broadcast %597 : vector<1x128xf32> to vector<16x128xf32>
    %599 = arith.addf %596, %598 : vector<16x128xf32>
    %cst_314 = arith.constant 5.000000e-01 : f32
    %600 = vector.broadcast %cst_314 : f32 to vector<16x128xf32>
    %601 = arith.mulf %600, %599 : vector<16x128xf32>
    %cst_315 = arith.constant 4.471500e-02 : f32
    %602 = vector.broadcast %cst_315 : f32 to vector<16x128xf32>
    %603 = arith.mulf %602, %599 : vector<16x128xf32>
    %604 = arith.mulf %603, %599 : vector<16x128xf32>
    %605 = arith.mulf %604, %599 : vector<16x128xf32>
    %606 = arith.addf %599, %605 : vector<16x128xf32>
    %cst_316 = arith.constant 0.797884583 : f32
    %607 = vector.broadcast %cst_316 : f32 to vector<16x128xf32>
    %608 = arith.mulf %607, %606 : vector<16x128xf32>
    %609 = math.tanh %608 : vector<16x128xf32>
    %cst_317 = arith.constant 1.000000e+00 : f32
    %610 = vector.broadcast %cst_317 : f32 to vector<16x128xf32>
    %611 = arith.addf %610, %609 : vector<16x128xf32>
    %612 = arith.mulf %601, %611 : vector<16x128xf32>
    %c248_318 = arith.constant 248 : index
    %c0_319 = arith.constant 0 : index
    %613 = vector.load %arg10[%c248_318, %c0_319] : memref<848x64xf32, #tpu.memory_space<vmem>>, vector<128x64xf32>
    %cst_320 = arith.constant dense<0.000000e+00> : vector<16x64xf32>
    %614 = tpu.matmul %612, %613, %cst_320 {dimension_numbers = #tpu.dot_dimension_numbers<[1], [0], [0], [1], [0, 0, 1, 1], [], []>} : vector<16x128xf32>, vector<128x64xf32>, vector<16x64xf32> -> vector<16x64xf32>
    %c376_321 = arith.constant 376 : index
    %c0_322 = arith.constant 0 : index
    %615 = vector.load %arg10[%c376_321, %c0_322] : memref<848x64xf32, #tpu.memory_space<vmem>>, vector<1x64xf32>
    %616 = vector.broadcast %615 : vector<1x64xf32> to vector<16x64xf32>
    %617 = arith.addf %614, %616 : vector<16x64xf32>
    %618 = arith.addf %617, %594 : vector<16x64xf32>
    %c384 = arith.constant 384 : index
    %c0_323 = arith.constant 0 : index
    %619 = vector.load %arg10[%c384, %c0_323] : memref<848x64xf32, #tpu.memory_space<vmem>>, vector<1x64xf32>
    %c392_324 = arith.constant 392 : index
    %c0_325 = arith.constant 0 : index
    %620 = vector.load %arg10[%c392_324, %c0_325] : memref<848x64xf32, #tpu.memory_space<vmem>>, vector<1x64xf32>
    %cst_326 = arith.constant dense<0.000000e+00> : vector<16xf32>
    %621 = vector.multi_reduction <add>, %618, %cst_326 [1] : vector<16x64xf32> to vector<16xf32>
    %622 = vector.shape_cast %621 : vector<16xf32> to vector<16x1xf32>
    %cst_327 = arith.constant 6.400000e+01 : f32
    %623 = vector.broadcast %cst_327 : f32 to vector<16x1xf32>
    %624 = arith.divf %622, %623 : vector<16x1xf32>
    %625 = vector.broadcast %624 : vector<16x1xf32> to vector<16x64xf32>
    %626 = arith.subf %618, %625 : vector<16x64xf32>
    %627 = arith.mulf %626, %626 : vector<16x64xf32>
    %cst_328 = arith.constant dense<0.000000e+00> : vector<16xf32>
    %628 = vector.multi_reduction <add>, %627, %cst_328 [1] : vector<16x64xf32> to vector<16xf32>
    %629 = vector.shape_cast %628 : vector<16xf32> to vector<16x1xf32>
    %cst_329 = arith.constant 6.400000e+01 : f32
    %630 = vector.broadcast %cst_329 : f32 to vector<16x1xf32>
    %631 = arith.divf %629, %630 : vector<16x1xf32>
    %cst_330 = arith.constant 9.99999996E-13 : f32
    %632 = vector.broadcast %cst_330 : f32 to vector<16x1xf32>
    %633 = arith.addf %631, %632 : vector<16x1xf32>
    %634 = math.rsqrt %633 : vector<16x1xf32>
    %635 = vector.broadcast %634 : vector<16x1xf32> to vector<16x64xf32>
    %636 = arith.mulf %626, %635 : vector<16x64xf32>
    %637 = vector.broadcast %619 : vector<1x64xf32> to vector<16x64xf32>
    %638 = arith.mulf %636, %637 : vector<16x64xf32>
    %639 = vector.broadcast %620 : vector<1x64xf32> to vector<16x64xf32>
    %640 = arith.addf %638, %639 : vector<16x64xf32>
    %c464_331 = arith.constant 464 : index
    %c0_332 = arith.constant 0 : index
    %641 = vector.load %arg10[%c464_331, %c0_332] : memref<848x64xf32, #tpu.memory_space<vmem>>, vector<1x64xf32>
    %642 = vector.broadcast %641 : vector<1x64xf32> to vector<16x64xf32>
    %643 = arith.addf %640, %642 : vector<16x64xf32>
    %c800 = arith.constant 800 : index
    %c0_333 = arith.constant 0 : index
    %644 = vector.load %arg8[%c800, %c0_333] : memref<1600x16xf32, #tpu.memory_space<vmem>>, vector<64x16xf32>
    %cst_334 = arith.constant dense<0.000000e+00> : vector<16x16xf32>
    %645 = tpu.matmul %640, %644, %cst_334 {dimension_numbers = #tpu.dot_dimension_numbers<[1], [0], [0], [1], [0, 0, 1, 1], [], []>} : vector<16x64xf32>, vector<64x16xf32>, vector<16x16xf32> -> vector<16x16xf32>
    %c992 = arith.constant 992 : index
    %c0_335 = arith.constant 0 : index
    %646 = vector.load %arg8[%c992, %c0_335] : memref<1600x16xf32, #tpu.memory_space<vmem>>, vector<1x16xf32>
    %647 = vector.broadcast %646 : vector<1x16xf32> to vector<16x16xf32>
    %648 = arith.addf %645, %647 : vector<16x16xf32>
    %c864 = arith.constant 864 : index
    %c0_336 = arith.constant 0 : index
    %649 = vector.load %arg8[%c864, %c0_336] : memref<1600x16xf32, #tpu.memory_space<vmem>>, vector<64x16xf32>
    %cst_337 = arith.constant dense<0.000000e+00> : vector<16x16xf32>
    %650 = tpu.matmul %640, %649, %cst_337 {dimension_numbers = #tpu.dot_dimension_numbers<[1], [0], [0], [1], [0, 0, 1, 1], [], []>} : vector<16x64xf32>, vector<64x16xf32>, vector<16x16xf32> -> vector<16x16xf32>
    %c928 = arith.constant 928 : index
    %c0_338 = arith.constant 0 : index
    %651 = vector.load %arg8[%c928, %c0_338] : memref<1600x16xf32, #tpu.memory_space<vmem>>, vector<64x16xf32>
    %cst_339 = arith.constant dense<0.000000e+00> : vector<16x16xf32>
    %652 = tpu.matmul %640, %651, %cst_339 {dimension_numbers = #tpu.dot_dimension_numbers<[1], [0], [0], [1], [0, 0, 1, 1], [], []>} : vector<16x64xf32>, vector<64x16xf32>, vector<16x16xf32> -> vector<16x16xf32>
    %cst_340 = arith.constant dense<0.000000e+00> : vector<16x16xf32>
    %653 = tpu.matmul %648, %650, %cst_340 {dimension_numbers = #tpu.dot_dimension_numbers<[1], [1], [0], [0], [0, 0, 1, 0], [], []>} : vector<16x16xf32>, vector<16x16xf32>, vector<16x16xf32> -> vector<16x16xf32>
    %cst_341 = arith.constant 2.500000e-01 : f32
    %654 = vector.broadcast %cst_341 : f32 to vector<16x16xf32>
    %655 = arith.mulf %653, %654 : vector<16x16xf32>
    %656 = arith.addf %655, %437 : vector<16x16xf32>
    %cst_342 = arith.constant dense<0xFF800000> : vector<16xf32>
    %657 = vector.multi_reduction <maximumf>, %656, %cst_342 [1] : vector<16x16xf32> to vector<16xf32>
    %658 = vector.shape_cast %657 : vector<16xf32> to vector<16x1xf32>
    %659 = vector.broadcast %658 : vector<16x1xf32> to vector<16x16xf32>
    %660 = arith.subf %656, %659 : vector<16x16xf32>
    %661 = math.exp %660 : vector<16x16xf32>
    %cst_343 = arith.constant dense<0.000000e+00> : vector<16xf32>
    %662 = vector.multi_reduction <add>, %661, %cst_343 [1] : vector<16x16xf32> to vector<16xf32>
    %663 = vector.shape_cast %662 : vector<16xf32> to vector<16x1xf32>
    %664 = tpu.reciprocal %663 {approx = true} : vector<16x1xf32> -> vector<16x1xf32>
    %665 = vector.broadcast %664 : vector<16x1xf32> to vector<16x16xf32>
    %666 = arith.mulf %661, %665 : vector<16x16xf32>
    %cst_344 = arith.constant dense<0.000000e+00> : vector<16x16xf32>
    %667 = tpu.matmul %666, %652, %cst_344 {dimension_numbers = #tpu.dot_dimension_numbers<[1], [0], [0], [1], [0, 0, 1, 1], [], []>} : vector<16x16xf32>, vector<16x16xf32>, vector<16x16xf32> -> vector<16x16xf32>
    %c400_345 = arith.constant 400 : index
    %c0_346 = arith.constant 0 : index
    %668 = vector.load %arg10[%c400_345, %c0_346] : memref<848x64xf32, #tpu.memory_space<vmem>>, vector<16x64xf32>
    %cst_347 = arith.constant dense<0.000000e+00> : vector<16x64xf32>
    %669 = tpu.matmul %667, %668, %cst_347 {dimension_numbers = #tpu.dot_dimension_numbers<[1], [0], [0], [1], [0, 0, 1, 1], [], []>} : vector<16x16xf32>, vector<16x64xf32>, vector<16x64xf32> -> vector<16x64xf32>
    %670 = arith.addf %643, %669 : vector<16x64xf32>
    %c1000 = arith.constant 1000 : index
    %c0_348 = arith.constant 0 : index
    %671 = vector.load %arg8[%c1000, %c0_348] : memref<1600x16xf32, #tpu.memory_space<vmem>>, vector<64x16xf32>
    %cst_349 = arith.constant dense<0.000000e+00> : vector<16x16xf32>
    %672 = tpu.matmul %640, %671, %cst_349 {dimension_numbers = #tpu.dot_dimension_numbers<[1], [0], [0], [1], [0, 0, 1, 1], [], []>} : vector<16x64xf32>, vector<64x16xf32>, vector<16x16xf32> -> vector<16x16xf32>
    %c1192 = arith.constant 1192 : index
    %c0_350 = arith.constant 0 : index
    %673 = vector.load %arg8[%c1192, %c0_350] : memref<1600x16xf32, #tpu.memory_space<vmem>>, vector<1x16xf32>
    %674 = vector.broadcast %673 : vector<1x16xf32> to vector<16x16xf32>
    %675 = arith.addf %672, %674 : vector<16x16xf32>
    %c1064 = arith.constant 1064 : index
    %c0_351 = arith.constant 0 : index
    %676 = vector.load %arg8[%c1064, %c0_351] : memref<1600x16xf32, #tpu.memory_space<vmem>>, vector<64x16xf32>
    %cst_352 = arith.constant dense<0.000000e+00> : vector<16x16xf32>
    %677 = tpu.matmul %640, %676, %cst_352 {dimension_numbers = #tpu.dot_dimension_numbers<[1], [0], [0], [1], [0, 0, 1, 1], [], []>} : vector<16x64xf32>, vector<64x16xf32>, vector<16x16xf32> -> vector<16x16xf32>
    %c1128 = arith.constant 1128 : index
    %c0_353 = arith.constant 0 : index
    %678 = vector.load %arg8[%c1128, %c0_353] : memref<1600x16xf32, #tpu.memory_space<vmem>>, vector<64x16xf32>
    %cst_354 = arith.constant dense<0.000000e+00> : vector<16x16xf32>
    %679 = tpu.matmul %640, %678, %cst_354 {dimension_numbers = #tpu.dot_dimension_numbers<[1], [0], [0], [1], [0, 0, 1, 1], [], []>} : vector<16x64xf32>, vector<64x16xf32>, vector<16x16xf32> -> vector<16x16xf32>
    %cst_355 = arith.constant dense<0.000000e+00> : vector<16x16xf32>
    %680 = tpu.matmul %675, %677, %cst_355 {dimension_numbers = #tpu.dot_dimension_numbers<[1], [1], [0], [0], [0, 0, 1, 0], [], []>} : vector<16x16xf32>, vector<16x16xf32>, vector<16x16xf32> -> vector<16x16xf32>
    %cst_356 = arith.constant 2.500000e-01 : f32
    %681 = vector.broadcast %cst_356 : f32 to vector<16x16xf32>
    %682 = arith.mulf %680, %681 : vector<16x16xf32>
    %683 = arith.addf %682, %437 : vector<16x16xf32>
    %cst_357 = arith.constant dense<0xFF800000> : vector<16xf32>
    %684 = vector.multi_reduction <maximumf>, %683, %cst_357 [1] : vector<16x16xf32> to vector<16xf32>
    %685 = vector.shape_cast %684 : vector<16xf32> to vector<16x1xf32>
    %686 = vector.broadcast %685 : vector<16x1xf32> to vector<16x16xf32>
    %687 = arith.subf %683, %686 : vector<16x16xf32>
    %688 = math.exp %687 : vector<16x16xf32>
    %cst_358 = arith.constant dense<0.000000e+00> : vector<16xf32>
    %689 = vector.multi_reduction <add>, %688, %cst_358 [1] : vector<16x16xf32> to vector<16xf32>
    %690 = vector.shape_cast %689 : vector<16xf32> to vector<16x1xf32>
    %691 = tpu.reciprocal %690 {approx = true} : vector<16x1xf32> -> vector<16x1xf32>
    %692 = vector.broadcast %691 : vector<16x1xf32> to vector<16x16xf32>
    %693 = arith.mulf %688, %692 : vector<16x16xf32>
    %cst_359 = arith.constant dense<0.000000e+00> : vector<16x16xf32>
    %694 = tpu.matmul %693, %679, %cst_359 {dimension_numbers = #tpu.dot_dimension_numbers<[1], [0], [0], [1], [0, 0, 1, 1], [], []>} : vector<16x16xf32>, vector<16x16xf32>, vector<16x16xf32> -> vector<16x16xf32>
    %c416_360 = arith.constant 416 : index
    %c0_361 = arith.constant 0 : index
    %695 = vector.load %arg10[%c416_360, %c0_361] : memref<848x64xf32, #tpu.memory_space<vmem>>, vector<16x64xf32>
    %cst_362 = arith.constant dense<0.000000e+00> : vector<16x64xf32>
    %696 = tpu.matmul %694, %695, %cst_362 {dimension_numbers = #tpu.dot_dimension_numbers<[1], [0], [0], [1], [0, 0, 1, 1], [], []>} : vector<16x16xf32>, vector<16x64xf32>, vector<16x64xf32> -> vector<16x64xf32>
    %697 = arith.addf %670, %696 : vector<16x64xf32>
    %c1200 = arith.constant 1200 : index
    %c0_363 = arith.constant 0 : index
    %698 = vector.load %arg8[%c1200, %c0_363] : memref<1600x16xf32, #tpu.memory_space<vmem>>, vector<64x16xf32>
    %cst_364 = arith.constant dense<0.000000e+00> : vector<16x16xf32>
    %699 = tpu.matmul %640, %698, %cst_364 {dimension_numbers = #tpu.dot_dimension_numbers<[1], [0], [0], [1], [0, 0, 1, 1], [], []>} : vector<16x64xf32>, vector<64x16xf32>, vector<16x16xf32> -> vector<16x16xf32>
    %c1392 = arith.constant 1392 : index
    %c0_365 = arith.constant 0 : index
    %700 = vector.load %arg8[%c1392, %c0_365] : memref<1600x16xf32, #tpu.memory_space<vmem>>, vector<1x16xf32>
    %701 = vector.broadcast %700 : vector<1x16xf32> to vector<16x16xf32>
    %702 = arith.addf %699, %701 : vector<16x16xf32>
    %c1264 = arith.constant 1264 : index
    %c0_366 = arith.constant 0 : index
    %703 = vector.load %arg8[%c1264, %c0_366] : memref<1600x16xf32, #tpu.memory_space<vmem>>, vector<64x16xf32>
    %cst_367 = arith.constant dense<0.000000e+00> : vector<16x16xf32>
    %704 = tpu.matmul %640, %703, %cst_367 {dimension_numbers = #tpu.dot_dimension_numbers<[1], [0], [0], [1], [0, 0, 1, 1], [], []>} : vector<16x64xf32>, vector<64x16xf32>, vector<16x16xf32> -> vector<16x16xf32>
    %c1328 = arith.constant 1328 : index
    %c0_368 = arith.constant 0 : index
    %705 = vector.load %arg8[%c1328, %c0_368] : memref<1600x16xf32, #tpu.memory_space<vmem>>, vector<64x16xf32>
    %cst_369 = arith.constant dense<0.000000e+00> : vector<16x16xf32>
    %706 = tpu.matmul %640, %705, %cst_369 {dimension_numbers = #tpu.dot_dimension_numbers<[1], [0], [0], [1], [0, 0, 1, 1], [], []>} : vector<16x64xf32>, vector<64x16xf32>, vector<16x16xf32> -> vector<16x16xf32>
    %cst_370 = arith.constant dense<0.000000e+00> : vector<16x16xf32>
    %707 = tpu.matmul %702, %704, %cst_370 {dimension_numbers = #tpu.dot_dimension_numbers<[1], [1], [0], [0], [0, 0, 1, 0], [], []>} : vector<16x16xf32>, vector<16x16xf32>, vector<16x16xf32> -> vector<16x16xf32>
    %cst_371 = arith.constant 2.500000e-01 : f32
    %708 = vector.broadcast %cst_371 : f32 to vector<16x16xf32>
    %709 = arith.mulf %707, %708 : vector<16x16xf32>
    %710 = arith.addf %709, %437 : vector<16x16xf32>
    %cst_372 = arith.constant dense<0xFF800000> : vector<16xf32>
    %711 = vector.multi_reduction <maximumf>, %710, %cst_372 [1] : vector<16x16xf32> to vector<16xf32>
    %712 = vector.shape_cast %711 : vector<16xf32> to vector<16x1xf32>
    %713 = vector.broadcast %712 : vector<16x1xf32> to vector<16x16xf32>
    %714 = arith.subf %710, %713 : vector<16x16xf32>
    %715 = math.exp %714 : vector<16x16xf32>
    %cst_373 = arith.constant dense<0.000000e+00> : vector<16xf32>
    %716 = vector.multi_reduction <add>, %715, %cst_373 [1] : vector<16x16xf32> to vector<16xf32>
    %717 = vector.shape_cast %716 : vector<16xf32> to vector<16x1xf32>
    %718 = tpu.reciprocal %717 {approx = true} : vector<16x1xf32> -> vector<16x1xf32>
    %719 = vector.broadcast %718 : vector<16x1xf32> to vector<16x16xf32>
    %720 = arith.mulf %715, %719 : vector<16x16xf32>
    %cst_374 = arith.constant dense<0.000000e+00> : vector<16x16xf32>
    %721 = tpu.matmul %720, %706, %cst_374 {dimension_numbers = #tpu.dot_dimension_numbers<[1], [0], [0], [1], [0, 0, 1, 1], [], []>} : vector<16x16xf32>, vector<16x16xf32>, vector<16x16xf32> -> vector<16x16xf32>
    %c432 = arith.constant 432 : index
    %c0_375 = arith.constant 0 : index
    %722 = vector.load %arg10[%c432, %c0_375] : memref<848x64xf32, #tpu.memory_space<vmem>>, vector<16x64xf32>
    %cst_376 = arith.constant dense<0.000000e+00> : vector<16x64xf32>
    %723 = tpu.matmul %721, %722, %cst_376 {dimension_numbers = #tpu.dot_dimension_numbers<[1], [0], [0], [1], [0, 0, 1, 1], [], []>} : vector<16x16xf32>, vector<16x64xf32>, vector<16x64xf32> -> vector<16x64xf32>
    %724 = arith.addf %697, %723 : vector<16x64xf32>
    %c1400 = arith.constant 1400 : index
    %c0_377 = arith.constant 0 : index
    %725 = vector.load %arg8[%c1400, %c0_377] : memref<1600x16xf32, #tpu.memory_space<vmem>>, vector<64x16xf32>
    %cst_378 = arith.constant dense<0.000000e+00> : vector<16x16xf32>
    %726 = tpu.matmul %640, %725, %cst_378 {dimension_numbers = #tpu.dot_dimension_numbers<[1], [0], [0], [1], [0, 0, 1, 1], [], []>} : vector<16x64xf32>, vector<64x16xf32>, vector<16x16xf32> -> vector<16x16xf32>
    %c1592 = arith.constant 1592 : index
    %c0_379 = arith.constant 0 : index
    %727 = vector.load %arg8[%c1592, %c0_379] : memref<1600x16xf32, #tpu.memory_space<vmem>>, vector<1x16xf32>
    %728 = vector.broadcast %727 : vector<1x16xf32> to vector<16x16xf32>
    %729 = arith.addf %726, %728 : vector<16x16xf32>
    %c1464 = arith.constant 1464 : index
    %c0_380 = arith.constant 0 : index
    %730 = vector.load %arg8[%c1464, %c0_380] : memref<1600x16xf32, #tpu.memory_space<vmem>>, vector<64x16xf32>
    %cst_381 = arith.constant dense<0.000000e+00> : vector<16x16xf32>
    %731 = tpu.matmul %640, %730, %cst_381 {dimension_numbers = #tpu.dot_dimension_numbers<[1], [0], [0], [1], [0, 0, 1, 1], [], []>} : vector<16x64xf32>, vector<64x16xf32>, vector<16x16xf32> -> vector<16x16xf32>
    %c1528 = arith.constant 1528 : index
    %c0_382 = arith.constant 0 : index
    %732 = vector.load %arg8[%c1528, %c0_382] : memref<1600x16xf32, #tpu.memory_space<vmem>>, vector<64x16xf32>
    %cst_383 = arith.constant dense<0.000000e+00> : vector<16x16xf32>
    %733 = tpu.matmul %640, %732, %cst_383 {dimension_numbers = #tpu.dot_dimension_numbers<[1], [0], [0], [1], [0, 0, 1, 1], [], []>} : vector<16x64xf32>, vector<64x16xf32>, vector<16x16xf32> -> vector<16x16xf32>
    %cst_384 = arith.constant dense<0.000000e+00> : vector<16x16xf32>
    %734 = tpu.matmul %729, %731, %cst_384 {dimension_numbers = #tpu.dot_dimension_numbers<[1], [1], [0], [0], [0, 0, 1, 0], [], []>} : vector<16x16xf32>, vector<16x16xf32>, vector<16x16xf32> -> vector<16x16xf32>
    %cst_385 = arith.constant 2.500000e-01 : f32
    %735 = vector.broadcast %cst_385 : f32 to vector<16x16xf32>
    %736 = arith.mulf %734, %735 : vector<16x16xf32>
    %737 = arith.addf %736, %437 : vector<16x16xf32>
    %cst_386 = arith.constant dense<0xFF800000> : vector<16xf32>
    %738 = vector.multi_reduction <maximumf>, %737, %cst_386 [1] : vector<16x16xf32> to vector<16xf32>
    %739 = vector.shape_cast %738 : vector<16xf32> to vector<16x1xf32>
    %740 = vector.broadcast %739 : vector<16x1xf32> to vector<16x16xf32>
    %741 = arith.subf %737, %740 : vector<16x16xf32>
    %742 = math.exp %741 : vector<16x16xf32>
    %cst_387 = arith.constant dense<0.000000e+00> : vector<16xf32>
    %743 = vector.multi_reduction <add>, %742, %cst_387 [1] : vector<16x16xf32> to vector<16xf32>
    %744 = vector.shape_cast %743 : vector<16xf32> to vector<16x1xf32>
    %745 = tpu.reciprocal %744 {approx = true} : vector<16x1xf32> -> vector<16x1xf32>
    %746 = vector.broadcast %745 : vector<16x1xf32> to vector<16x16xf32>
    %747 = arith.mulf %742, %746 : vector<16x16xf32>
    %cst_388 = arith.constant dense<0.000000e+00> : vector<16x16xf32>
    %748 = tpu.matmul %747, %733, %cst_388 {dimension_numbers = #tpu.dot_dimension_numbers<[1], [0], [0], [1], [0, 0, 1, 1], [], []>} : vector<16x16xf32>, vector<16x16xf32>, vector<16x16xf32> -> vector<16x16xf32>
    %c448_389 = arith.constant 448 : index
    %c0_390 = arith.constant 0 : index
    %749 = vector.load %arg10[%c448_389, %c0_390] : memref<848x64xf32, #tpu.memory_space<vmem>>, vector<16x64xf32>
    %cst_391 = arith.constant dense<0.000000e+00> : vector<16x64xf32>
    %750 = tpu.matmul %748, %749, %cst_391 {dimension_numbers = #tpu.dot_dimension_numbers<[1], [0], [0], [1], [0, 0, 1, 1], [], []>} : vector<16x16xf32>, vector<16x64xf32>, vector<16x64xf32> -> vector<16x64xf32>
    %751 = arith.addf %724, %750 : vector<16x64xf32>
    %c472 = arith.constant 472 : index
    %c0_392 = arith.constant 0 : index
    %752 = vector.load %arg10[%c472, %c0_392] : memref<848x64xf32, #tpu.memory_space<vmem>>, vector<1x64xf32>
    %c480_393 = arith.constant 480 : index
    %c0_394 = arith.constant 0 : index
    %753 = vector.load %arg10[%c480_393, %c0_394] : memref<848x64xf32, #tpu.memory_space<vmem>>, vector<1x64xf32>
    %cst_395 = arith.constant dense<0.000000e+00> : vector<16xf32>
    %754 = vector.multi_reduction <add>, %751, %cst_395 [1] : vector<16x64xf32> to vector<16xf32>
    %755 = vector.shape_cast %754 : vector<16xf32> to vector<16x1xf32>
    %cst_396 = arith.constant 6.400000e+01 : f32
    %756 = vector.broadcast %cst_396 : f32 to vector<16x1xf32>
    %757 = arith.divf %755, %756 : vector<16x1xf32>
    %758 = vector.broadcast %757 : vector<16x1xf32> to vector<16x64xf32>
    %759 = arith.subf %751, %758 : vector<16x64xf32>
    %760 = arith.mulf %759, %759 : vector<16x64xf32>
    %cst_397 = arith.constant dense<0.000000e+00> : vector<16xf32>
    %761 = vector.multi_reduction <add>, %760, %cst_397 [1] : vector<16x64xf32> to vector<16xf32>
    %762 = vector.shape_cast %761 : vector<16xf32> to vector<16x1xf32>
    %cst_398 = arith.constant 6.400000e+01 : f32
    %763 = vector.broadcast %cst_398 : f32 to vector<16x1xf32>
    %764 = arith.divf %762, %763 : vector<16x1xf32>
    %cst_399 = arith.constant 9.99999996E-13 : f32
    %765 = vector.broadcast %cst_399 : f32 to vector<16x1xf32>
    %766 = arith.addf %764, %765 : vector<16x1xf32>
    %767 = math.rsqrt %766 : vector<16x1xf32>
    %768 = vector.broadcast %767 : vector<16x1xf32> to vector<16x64xf32>
    %769 = arith.mulf %759, %768 : vector<16x64xf32>
    %770 = vector.broadcast %752 : vector<1x64xf32> to vector<16x64xf32>
    %771 = arith.mulf %769, %770 : vector<16x64xf32>
    %772 = vector.broadcast %753 : vector<1x64xf32> to vector<16x64xf32>
    %773 = arith.addf %771, %772 : vector<16x64xf32>
    %c72_400 = arith.constant 72 : index
    %c0_401 = arith.constant 0 : index
    %774 = vector.load %arg11[%c72_400, %c0_401] : memref<168x128xf32, #tpu.memory_space<vmem>>, vector<64x128xf32>
    %cst_402 = arith.constant dense<0.000000e+00> : vector<16x128xf32>
    %775 = tpu.matmul %773, %774, %cst_402 {dimension_numbers = #tpu.dot_dimension_numbers<[1], [0], [0], [1], [0, 0, 1, 1], [], []>} : vector<16x64xf32>, vector<64x128xf32>, vector<16x128xf32> -> vector<16x128xf32>
    %c136_403 = arith.constant 136 : index
    %c0_404 = arith.constant 0 : index
    %776 = vector.load %arg11[%c136_403, %c0_404] : memref<168x128xf32, #tpu.memory_space<vmem>>, vector<1x128xf32>
    %777 = vector.broadcast %776 : vector<1x128xf32> to vector<16x128xf32>
    %778 = arith.addf %775, %777 : vector<16x128xf32>
    %cst_405 = arith.constant 5.000000e-01 : f32
    %779 = vector.broadcast %cst_405 : f32 to vector<16x128xf32>
    %780 = arith.mulf %779, %778 : vector<16x128xf32>
    %cst_406 = arith.constant 4.471500e-02 : f32
    %781 = vector.broadcast %cst_406 : f32 to vector<16x128xf32>
    %782 = arith.mulf %781, %778 : vector<16x128xf32>
    %783 = arith.mulf %782, %778 : vector<16x128xf32>
    %784 = arith.mulf %783, %778 : vector<16x128xf32>
    %785 = arith.addf %778, %784 : vector<16x128xf32>
    %cst_407 = arith.constant 0.797884583 : f32
    %786 = vector.broadcast %cst_407 : f32 to vector<16x128xf32>
    %787 = arith.mulf %786, %785 : vector<16x128xf32>
    %788 = math.tanh %787 : vector<16x128xf32>
    %cst_408 = arith.constant 1.000000e+00 : f32
    %789 = vector.broadcast %cst_408 : f32 to vector<16x128xf32>
    %790 = arith.addf %789, %788 : vector<16x128xf32>
    %791 = arith.mulf %780, %790 : vector<16x128xf32>
    %c488 = arith.constant 488 : index
    %c0_409 = arith.constant 0 : index
    %792 = vector.load %arg10[%c488, %c0_409] : memref<848x64xf32, #tpu.memory_space<vmem>>, vector<128x64xf32>
    %cst_410 = arith.constant dense<0.000000e+00> : vector<16x64xf32>
    %793 = tpu.matmul %791, %792, %cst_410 {dimension_numbers = #tpu.dot_dimension_numbers<[1], [0], [0], [1], [0, 0, 1, 1], [], []>} : vector<16x128xf32>, vector<128x64xf32>, vector<16x64xf32> -> vector<16x64xf32>
    %c616_411 = arith.constant 616 : index
    %c0_412 = arith.constant 0 : index
    %794 = vector.load %arg10[%c616_411, %c0_412] : memref<848x64xf32, #tpu.memory_space<vmem>>, vector<1x64xf32>
    %795 = vector.broadcast %794 : vector<1x64xf32> to vector<16x64xf32>
    %796 = arith.addf %793, %795 : vector<16x64xf32>
    %797 = arith.addf %796, %773 : vector<16x64xf32>
    %c624_413 = arith.constant 624 : index
    %c0_414 = arith.constant 0 : index
    %798 = vector.load %arg10[%c624_413, %c0_414] : memref<848x64xf32, #tpu.memory_space<vmem>>, vector<1x64xf32>
    %c632 = arith.constant 632 : index
    %c0_415 = arith.constant 0 : index
    %799 = vector.load %arg10[%c632, %c0_415] : memref<848x64xf32, #tpu.memory_space<vmem>>, vector<1x64xf32>
    %cst_416 = arith.constant dense<0.000000e+00> : vector<16xf32>
    %800 = vector.multi_reduction <add>, %797, %cst_416 [1] : vector<16x64xf32> to vector<16xf32>
    %801 = vector.shape_cast %800 : vector<16xf32> to vector<16x1xf32>
    %cst_417 = arith.constant 6.400000e+01 : f32
    %802 = vector.broadcast %cst_417 : f32 to vector<16x1xf32>
    %803 = arith.divf %801, %802 : vector<16x1xf32>
    %804 = vector.broadcast %803 : vector<16x1xf32> to vector<16x64xf32>
    %805 = arith.subf %797, %804 : vector<16x64xf32>
    %806 = arith.mulf %805, %805 : vector<16x64xf32>
    %cst_418 = arith.constant dense<0.000000e+00> : vector<16xf32>
    %807 = vector.multi_reduction <add>, %806, %cst_418 [1] : vector<16x64xf32> to vector<16xf32>
    %808 = vector.shape_cast %807 : vector<16xf32> to vector<16x1xf32>
    %cst_419 = arith.constant 6.400000e+01 : f32
    %809 = vector.broadcast %cst_419 : f32 to vector<16x1xf32>
    %810 = arith.divf %808, %809 : vector<16x1xf32>
    %cst_420 = arith.constant 9.99999996E-13 : f32
    %811 = vector.broadcast %cst_420 : f32 to vector<16x1xf32>
    %812 = arith.addf %810, %811 : vector<16x1xf32>
    %813 = math.rsqrt %812 : vector<16x1xf32>
    %814 = vector.broadcast %813 : vector<16x1xf32> to vector<16x64xf32>
    %815 = arith.mulf %805, %814 : vector<16x64xf32>
    %816 = vector.broadcast %798 : vector<1x64xf32> to vector<16x64xf32>
    %817 = arith.mulf %815, %816 : vector<16x64xf32>
    %818 = vector.broadcast %799 : vector<1x64xf32> to vector<16x64xf32>
    %819 = arith.addf %817, %818 : vector<16x64xf32>
    %c1_421 = arith.constant 1 : index
    %c0_422 = arith.constant 0 : index
    %c0_423 = arith.constant 0 : index
    %820 = vector.load %arg5[%c1_421, %c0_422, %c0_423] : memref<2x2x16xf32, #tpu.memory_space<vmem>>, vector<1x2x16xf32>
    %821 = vector.shape_cast %820 : vector<1x2x16xf32> to vector<2x16xf32>
    %cst_424 = arith.constant dense<0.000000e+00> : vector<2x64xf32>
    %822 = tpu.matmul %821, %819, %cst_424 {dimension_numbers = #tpu.dot_dimension_numbers<[1], [0], [0], [1], [0, 0, 1, 1], [], []>} : vector<2x16xf32>, vector<16x64xf32>, vector<2x64xf32> -> vector<2x64xf32>
    %c1_425 = arith.constant 1 : index
    %c0_426 = arith.constant 0 : index
    %c0_427 = arith.constant 0 : index
    %823 = vector.load %arg4[%c1_425, %c0_426, %c0_427] : memref<2x16x1xf32, #tpu.memory_space<vmem>>, vector<1x16x1xf32>
    %824 = vector.shape_cast %823 : vector<1x16x1xf32> to vector<16x1xf32>
    %825 = vector.broadcast %824 : vector<16x1xf32> to vector<16x64xf32>
    %826 = arith.addf %819, %825 : vector<16x64xf32>
    %827 = vector.extract_strided_slice %826 {offsets = [0, 0], sizes = [8, 64], strides = [1, 1]} : vector<16x64xf32> to vector<8x64xf32>
    %cst_428 = arith.constant dense<0xFF800000> : vector<64xf32>
    %828 = vector.multi_reduction <maximumf>, %827, %cst_428 [0] : vector<8x64xf32> to vector<64xf32>
    %829 = vector.shape_cast %828 : vector<64xf32> to vector<1x64xf32>
    %830 = vector.extract_strided_slice %826 {offsets = [8, 0], sizes = [8, 64], strides = [1, 1]} : vector<16x64xf32> to vector<8x64xf32>
    %cst_429 = arith.constant dense<0xFF800000> : vector<64xf32>
    %831 = vector.multi_reduction <maximumf>, %830, %cst_429 [0] : vector<8x64xf32> to vector<64xf32>
    %832 = vector.shape_cast %831 : vector<64xf32> to vector<1x64xf32>
    %833 = tpu.concatenate %829, %832 in 0 : vector<1x64xf32>, vector<1x64xf32> -> vector<2x64xf32>
    %c0_430 = arith.constant 0 : index
    %c0_431 = arith.constant 0 : index
    %834 = vector.load %arg6[%c0_430, %c0_431] : memref<2x4xf32, #tpu.memory_space<vmem>>, vector<2x4xf32>
    %c640 = arith.constant 640 : index
    %c0_432 = arith.constant 0 : index
    %835 = vector.load %arg10[%c640, %c0_432] : memref<848x64xf32, #tpu.memory_space<vmem>>, vector<4x64xf32>
    %cst_433 = arith.constant dense<0.000000e+00> : vector<2x64xf32>
    %836 = tpu.matmul %834, %835, %cst_433 {dimension_numbers = #tpu.dot_dimension_numbers<[1], [0], [0], [1], [0, 0, 1, 1], [], []>} : vector<2x4xf32>, vector<4x64xf32>, vector<2x64xf32> -> vector<2x64xf32>
    %c648 = arith.constant 648 : index
    %c0_434 = arith.constant 0 : index
    %837 = vector.load %arg10[%c648, %c0_434] : memref<848x64xf32, #tpu.memory_space<vmem>>, vector<32x64xf32>
    %cst_435 = arith.constant dense<0.000000e+00> : vector<2x64xf32>
    %838 = tpu.matmul %413, %837, %cst_435 {dimension_numbers = #tpu.dot_dimension_numbers<[1], [0], [0], [1], [0, 0, 1, 1], [], []>} : vector<2x32xf32>, vector<32x64xf32>, vector<2x64xf32> -> vector<2x64xf32>
    %839 = arith.addf %836, %838 : vector<2x64xf32>
    %c680 = arith.constant 680 : index
    %c0_436 = arith.constant 0 : index
    %840 = vector.load %arg10[%c680, %c0_436] : memref<848x64xf32, #tpu.memory_space<vmem>>, vector<32x64xf32>
    %cst_437 = arith.constant dense<0.000000e+00> : vector<2x64xf32>
    %841 = tpu.matmul %424, %840, %cst_437 {dimension_numbers = #tpu.dot_dimension_numbers<[1], [0], [0], [1], [0, 0, 1, 1], [], []>} : vector<2x32xf32>, vector<32x64xf32>, vector<2x64xf32> -> vector<2x64xf32>
    %842 = arith.addf %839, %841 : vector<2x64xf32>
    %c712 = arith.constant 712 : index
    %c0_438 = arith.constant 0 : index
    %843 = vector.load %arg10[%c712, %c0_438] : memref<848x64xf32, #tpu.memory_space<vmem>>, vector<64x64xf32>
    %cst_439 = arith.constant dense<0.000000e+00> : vector<2x64xf32>
    %844 = tpu.matmul %822, %843, %cst_439 {dimension_numbers = #tpu.dot_dimension_numbers<[1], [0], [0], [1], [0, 0, 1, 1], [], []>} : vector<2x64xf32>, vector<64x64xf32>, vector<2x64xf32> -> vector<2x64xf32>
    %845 = arith.addf %842, %844 : vector<2x64xf32>
    %c776 = arith.constant 776 : index
    %c0_440 = arith.constant 0 : index
    %846 = vector.load %arg10[%c776, %c0_440] : memref<848x64xf32, #tpu.memory_space<vmem>>, vector<64x64xf32>
    %cst_441 = arith.constant dense<0.000000e+00> : vector<2x64xf32>
    %847 = tpu.matmul %833, %846, %cst_441 {dimension_numbers = #tpu.dot_dimension_numbers<[1], [0], [0], [1], [0, 0, 1, 1], [], []>} : vector<2x64xf32>, vector<64x64xf32>, vector<2x64xf32> -> vector<2x64xf32>
    %848 = arith.addf %845, %847 : vector<2x64xf32>
    %c840 = arith.constant 840 : index
    %c0_442 = arith.constant 0 : index
    %849 = vector.load %arg10[%c840, %c0_442] : memref<848x64xf32, #tpu.memory_space<vmem>>, vector<1x64xf32>
    %850 = vector.broadcast %849 : vector<1x64xf32> to vector<2x64xf32>
    %851 = arith.addf %848, %850 : vector<2x64xf32>
    %cst_443 = arith.constant 0.000000e+00 : f32
    %852 = vector.broadcast %cst_443 : f32 to vector<2x64xf32>
    %853 = arith.maximumf %851, %852 : vector<2x64xf32>
    %c368 = arith.constant 368 : index
    %c0_444 = arith.constant 0 : index
    %854 = vector.load %arg9[%c368, %c0_444] : memref<480x32xf32, #tpu.memory_space<vmem>>, vector<64x32xf32>
    %cst_445 = arith.constant dense<0.000000e+00> : vector<2x32xf32>
    %855 = tpu.matmul %853, %854, %cst_445 {dimension_numbers = #tpu.dot_dimension_numbers<[1], [0], [0], [1], [0, 0, 1, 1], [], []>} : vector<2x64xf32>, vector<64x32xf32>, vector<2x32xf32> -> vector<2x32xf32>
    %c432_446 = arith.constant 432 : index
    %c0_447 = arith.constant 0 : index
    %856 = vector.load %arg9[%c432_446, %c0_447] : memref<480x32xf32, #tpu.memory_space<vmem>>, vector<1x32xf32>
    %857 = vector.broadcast %856 : vector<1x32xf32> to vector<2x32xf32>
    %858 = arith.addf %855, %857 : vector<2x32xf32>
    %cst_448 = arith.constant 0.000000e+00 : f32
    %859 = vector.broadcast %cst_448 : f32 to vector<2x32xf32>
    %860 = arith.maximumf %858, %859 : vector<2x32xf32>
    %c440 = arith.constant 440 : index
    %c0_449 = arith.constant 0 : index
    %861 = vector.load %arg9[%c440, %c0_449] : memref<480x32xf32, #tpu.memory_space<vmem>>, vector<32x20xf32>
    %cst_450 = arith.constant dense<0.000000e+00> : vector<2x20xf32>
    %862 = tpu.matmul %860, %861, %cst_450 {dimension_numbers = #tpu.dot_dimension_numbers<[1], [0], [0], [1], [0, 0, 1, 1], [], []>} : vector<2x32xf32>, vector<32x20xf32>, vector<2x20xf32> -> vector<2x20xf32>
    %c472_451 = arith.constant 472 : index
    %c0_452 = arith.constant 0 : index
    %863 = vector.load %arg9[%c472_451, %c0_452] : memref<480x32xf32, #tpu.memory_space<vmem>>, vector<1x20xf32>
    %864 = vector.broadcast %863 : vector<1x20xf32> to vector<2x20xf32>
    %865 = arith.addf %862, %864 : vector<2x20xf32>
    %cst_453 = arith.constant dense<0xFF800000> : vector<2xf32>
    %866 = vector.multi_reduction <maximumf>, %865, %cst_453 [1] : vector<2x20xf32> to vector<2xf32>
    %867 = vector.shape_cast %866 : vector<2xf32> to vector<2x1xf32>
    %868 = vector.broadcast %867 : vector<2x1xf32> to vector<2x20xf32>
    %869 = arith.subf %865, %868 : vector<2x20xf32>
    %870 = math.exp %869 : vector<2x20xf32>
    %cst_454 = arith.constant dense<0.000000e+00> : vector<2xf32>
    %871 = vector.multi_reduction <add>, %870, %cst_454 [1] : vector<2x20xf32> to vector<2xf32>
    %872 = vector.shape_cast %871 : vector<2xf32> to vector<2x1xf32>
    %873 = vector.broadcast %872 : vector<2x1xf32> to vector<2x20xf32>
    %874 = arith.divf %870, %873 : vector<2x20xf32>
    %c144_455 = arith.constant 144 : index
    %c0_456 = arith.constant 0 : index
    %875 = vector.load %arg11[%c144_455, %c0_456] : memref<168x128xf32, #tpu.memory_space<vmem>>, vector<20x128xf32>
    %cst_457 = arith.constant dense<0.000000e+00> : vector<2x128xf32>
    %876 = tpu.matmul %874, %875, %cst_457 {dimension_numbers = #tpu.dot_dimension_numbers<[1], [0], [0], [1], [0, 0, 1, 1], [], []>} : vector<2x20xf32>, vector<20x128xf32>, vector<2x128xf32> -> vector<2x128xf32>
    %c0_458 = arith.constant 0 : index
    %c0_459 = arith.constant 0 : index
    %877 = vector.load %arg12[%c0_458, %c0_459] : memref<2x128xf32, #tpu.memory_space<vmem>>, vector<2x128xf32>
    tpu.vector_store %arg12[%c0_458, %c0_459], %876 {strides = array<i32>} : memref<2x128xf32, #tpu.memory_space<vmem>>, vector<2x128xf32>,
    return
  }
}

</mosaic_0001>

<bundles_post_ra>
// kernel: _model_forward.1
= control target key start
LH: loop header
LB: loop body
LE: loop exit
PB: predicated region body
PF: predicated region fallthrough
CT: control target
= control target key end

     0   :  { %v14755_v0 = vmov 0   ;;  %v41_v9 = vlaneseq  ;;  %vm77_vm0 = vcmask 130048   ;;  %v14756_v12 = vmov 0.0   ;;  %s17113_s2 = inlined_call_operand.vmem [shape: s32[2,16,1], index: 2, kind: input, shape index: {}]   ;;  %s17114_s9 = inlined_call_operand.vmem [shape: f32[480,32], index: 9, kind: input, shape index: {}]   ;;  %s17115_s0 = inlined_call_operand.vmem [shape: f32[16,8], index: 0, kind: input, shape index: {}]   ;;  %s17116_s7 = inlined_call_operand.vmem [shape: f32[832,8], index: 7, kind: input, shape index: {}]   ;;  %s17117_s3 = inlined_call_operand.vmem [shape: f32[2,16,16], index: 3, kind: input, shape index: {}]   ;;  %s17118_s10 = inlined_call_operand.vmem [shape: f32[848,64], index: 10, kind: input, shape index: {}]   ;;  %s17119_s5 = inlined_call_operand.vmem [shape: f32[2,2,16], index: 5, kind: input, shape index: {}]   ;;  %s17120_s1 = inlined_call_operand.vmem [shape: f32[16,8], index: 1, kind: input, shape index: {}]   ;;  %s17121_s8 = inlined_call_operand.vmem [shape: f32[1600,16], index: 8, kind: input, shape index: {}]   ;;  %s17122_s11 = inlined_call_operand.vmem [shape: f32[168,128], index: 11, kind: input, shape index: {}]   ;;  %s17123_s4 = inlined_call_operand.vmem [shape: f32[2,16,1], index: 4, kind: input, shape index: {}]   ;;  %s17124_s6 = inlined_call_operand.vmem [shape: f32[2,4], index: 6, kind: input, shape index: {}]   ;;  %s17125_s12 = inlined_call_operand.vmem [shape: f32[2,128], index: 12, kind: output, shape index: {}]  }
   0x1   :  { %14561 = vset.pattern.permute.xlu0 %v14755_v0  ;;  %v43_v1 = vld [vmem:[%s17113_s2] sm:$0xff]  ;;  %14562 = vset.pattern.permute.xlu1 %v14755_v0  ;;  %v11117_v2 = vld [vmem:[%s17113_s2 + $0x10] sm:$0xff]  ;;  %v75_v3 = vld [vmem:[%s17114_s9 + $0x8] sm:$0xff]  ;;  %vm159_vm3 = vcmask 64512   ;;  %vm343_vm6 = vcmask 261120   ;;  %vm2637_vm8 = vcmask 523264  }
   0x2   :  { %46 = vperm.xlu0 %14561, %v43_v1   ;;  %61 = vperm.xlu1 %14562, %v11117_v2   ;;  %v76_v4 = vld [vmem:[%s17114_s9 + $0x10] sm:$0xff]  ;;  %v44_v5 = vld [vmem:[%s17113_s2 + $0x8] sm:$0xff]  ;;  %v11118_v6 = vld [vmem:[%s17113_s2 + $0x18] sm:$0xff]  ;;  %v42_v10 = vand.u32 127, %v41_v9  ;;  %vm14758_vm9 = vmmov 0   ;;  %vm10526_vm11 = vcmask 1043456  }
   0x3   :  { %v13528_v7 = vpack.c.bf16 %v76_v4, %v75_v3  ;;  %v74_v8 = vld [vmem:[%s17114_s9] sm:$0xff]  ;;  %v241_v14 = vld [vmem:[%s17114_s9 + $0x18] sm:$0xff]  ;;  %v73_v21 = vld [vmem:[%s17115_s0 + $0x8] sm:$0xff]  ;;  %vm10522_vm12 = vcmask 31744   ;;  %vm5240_vm13 = vcmask 1040384   ;;  %vm11018_vm14 = vcmask 156672  }
   0x4   :  { %v242_v15 = vld [vmem:[%s17114_s9 + $0x20] sm:$0xff]  ;;  %v11127_v25 = vld [vmem:[%s17114_s9 + $0x28] ss:$0 sm:$0xff]  ;;  %v338_v30 = vld [vmem:[%s17114_s9 + $0x38] sm:$0xff]  ;;  %vm11033_vm15 = vcmask 162816  }
   0x5   :  { %13529 = vmatprep.subr.bf16.mxu0 %v13528_v7  ;;  %v72_v17 = vld [vmem:[%s17115_s0] sm:$0xff]  ;;  %v13532_v18 = vpack.c.bf16 %v242_v15, %v241_v14  ;;  %v337_v32 = vld [vmem:[%s17114_s9 + $0x30] sm:$0xff]  ;;  %v391_v49 = vld [vmem:[%s17116_s7 + $0x8] sm:$0xff] }
   0x6   :  { %49 = vperm.xlu0 %14561, %v44_v5   ;;  %64 = vperm.xlu1 %14562, %v11118_v6   ;;  %v390_v48 = vld [vmem:[%s17116_s7] sm:$0xff]  ;;  %v560_v52 = vld [vmem:[%s17116_s7 + $0x48] sm:$0xff]  ;;  %v392_v54 = vld [vmem:[%s17116_s7 + $0x10] sm:$0xff] }
   0x7   :  { %13531 = vmatpush3.bf16.msra.mxu0 %v13528_v7  ;;  %v13536_v50 = vpack.c.bf16 %v391_v49, %v390_v48  ;;  %v559_v51 = vld [vmem:[%s17116_s7 + $0x40] sm:$0xff]  ;;  %v393_v55 = vld [vmem:[%s17116_s7 + $0x18] sm:$0xff]  ;;  %v561_v57 = vld [vmem:[%s17116_s7 + $0x50] sm:$0xff] }
   0x8   :  { %12174 = vmatprep.subr.mxu0 %v74_v8  ;;  %v13552_v53 = vpack.c.bf16 %v560_v52, %v559_v51  ;;  %v13540_v56 = vpack.c.bf16 %v393_v55, %v392_v54  ;;  %v562_v58 = vld [vmem:[%s17116_s7 + $0x58] sm:$0xff]  ;;  %v480_v60 = vld [vmem:[%s17116_s7 + $0x20] sm:$0xff]  ;;  %v481_v61 = vld [vmem:[%s17116_s7 + $0x28] sm:$0xff] }
   0x9   :  { %13537 = vmatprep.subr.bf16.mxu1 %v13536_v50  ;;  %v13556_v59 = vpack.c.bf16 %v562_v58, %v561_v57  ;;  %v13544_v62 = vpack.c.bf16 %v481_v61, %v480_v60  ;;  %v11128_v6 = vld [vmem:[%s17114_s9 + $0x40] ss:$0 sm:$0xff]  ;;  %v482_v14 = vld [vmem:[%s17116_s7 + $0x30] sm:$0xff]  ;;  %v483_v15 = vld [vmem:[%s17116_s7 + $0x38] sm:$0xff] }
   0xa   :  { %13539 = vmatpush3.bf16.msra.mxu1 %v13536_v50  ;;  %vm14950_vm7 = vmpackc.low %vm159_vm3, %vm159_vm3 }
   0xb   :  { %13541 = vmatprep.subr.bf16.mxu1 %v13540_v56  ;;  %vm15786_vm10 = vmpackc.low %vm77_vm0, %vm77_vm0 }
   0xe   :  { %13543 = vmatpush3.bf16.msra.mxu1 %v13540_v56 }
   0xf   :  { %13545 = vmatprep.subr.bf16.mxu1 %v13544_v62 }
  0x81   :  { %v47_v11 = vpop.permute.xlu0 %46  ;;  %v62_v20 = vpop.permute.xlu1 %61 }
  0x82   :  { %vm51_vm1 = vcmp.eq.s32.totalorder %v47_v11, %v42_v10  ;;  %vm66_vm4 = vcmp.eq.s32.totalorder %v62_v20, %v42_v10 }
  0x83   :  { %v11115_v13 = vsel %vm51_vm1, 1.0, %v14756_v12  ;;  %v11119_v22 = vsel %vm66_vm4, 1.0, %v14756_v12 }
  0x84   :  { %12171 = vmatprep.mubr.msk.f32.mxu0 %vm77_vm0, %v11115_v13 }
  0x85   :  { %v50_v16 = vpop.permute.xlu0 %49  ;;  %v65_v23 = vpop.permute.xlu1 %64 }
  0x86   :  { %vm52_vm2 = vcmp.eq.s32.totalorder %v50_v16, %v42_v10  ;;  %vm67_vm5 = vcmp.eq.s32.totalorder %v65_v23, %v42_v10 }
  0x87   :  { %v11116_v19 = vsel %vm52_vm2, 1.0, %v14756_v12  ;;  %v11120_v24 = vsel %vm67_vm5, 1.0, %v14756_v12 }
  0x88   :  { %12172 = vmatmul.mubr.msk.f32.vlgmr.msra.gmra.mrb[0].mxu0 %vm77_vm0, %v11116_v19  ;;  %v11131_v19 = vld [vmem:[%s17116_s7 + $0x60] ss:$0 sm:$0xff] }
  0x89   :  { %12175 = vmatpush3.msra.mxu0 %v74_v8  ;;  %12176 = vmatprep.mubr.msk.f32.mxu0 %vm159_vm3, %v72_v17  ;;  %v11129_v8 = vld [vmem:[%s17114_s9 + $0x48] ss:$0 sm:$0xff] }
  0x8a   :  { %13533 = vmatprep.subr.bf16.mxu0 %v13532_v18 }
  0x90   :  { %12177 = vmatmul.mubr.msk.f32.vlgmr.msra.gmra.mrb[0].mxu0 %vm159_vm3, %v73_v21 }
  0x91   :  { %13535 = vmatpush3.bf16.msra.mxu0 %v13532_v18  ;;  %12183 = vmatprep.mubr.msk.f32.mxu0 %vm77_vm0, %v11119_v22  ;;  %v13548_v18 = vpack.c.bf16 %v483_v15, %v482_v14  ;;  %v1000_v15 = vld [vmem:[%s17116_s7 + $0x88] sm:$0xff] }
  0x92   :  { %13553 = vmatprep.subr.bf16.mxu0 %v13552_v53 }
  0x98   :  { %12184 = vmatmul.mubr.msk.f32.vlgmr.msra.gmra.mrb[0].mxu0 %vm77_vm0, %v11120_v24 }
  0x99   :  { %13555 = vmatpush3.bf16.msra.mxu0 %v13552_v53  ;;  %v11146_v53 = vld [vmem:[%s17116_s7 + $0xc8] ss:$0 sm:$0xff] }
  0x9a   :  { %13557 = vmatprep.subr.bf16.mxu0 %v13556_v59 }
  0x9d   :  { %13559 = vmatpush3.bf16.msra.mxu0 %v13556_v59 }
 0x16b   :  { %v12185_v26 = vpop.f32.mrb[0].mxu0 }
 0x16c   :  { %v332_v27 = vadd.f32 %v12185_v26, %v11127_v25  ;;  %v315_v28 = vpop.f32.mrb[1].mxu0  ;;  %v916_v26 = vld [vmem:[%s17116_s7 + $0x68] sm:$0xff] }
 0x16d   :  { %v331_v29 = vadd.f32 %v11127_v25, %v315_v28 }
 0x16e   :  { %v334_v31 = vmax.f32 %v332_v27, 0.0  ;;  %v917_v27 = vld [vmem:[%s17116_s7 + $0x70] sm:$0xff] }
 0x16f   :  { %v333_v33 = vmax.f32 %v331_v29, 0.0 }
 0x170   :  { %v340_v34 = vadd.f32 %v338_v30, %v334_v31 }
 0x171   :  { %v339_v35 = vadd.f32 %v337_v32, %v333_v33  ;;  %v13570_v32 = vpack.c.bf16 %v917_v27, %v916_v26  ;;  %v918_v33 = vld [vmem:[%s17116_s7 + $0x78] sm:$0xff] }
 0x172   :  { %v347_v36 = vsel %vm343_vm6, %v340_v34, 0.0 }
 0x173   :  { %348 = vadd.xlane.f32.xlu1 %v347_v36  ;;  %v344_v37 = vsel %vm343_vm6, %v339_v35, 0.0 }
 0x174   :  { %345 = vadd.xlane.f32.xlu0 %v344_v37  ;;  %v1079_v37 = vld [vmem:[%s17116_s7 + $0xa8] sm:$0xff] }
 0x200   :  { %v349_v38 = vpop.xlane.xlu1 %348 }
 0x201   :  { %v352_v39 = vmul.f32 0.03125, %v349_v38  ;;  %v346_v40 = vpop.xlane.xlu0 %345  ;;  %v1080_v38 = vld [vmem:[%s17116_s7 + $0xb0] sm:$0xff] }
 0x202   :  { %v351_v41 = vmul.f32 0.03125, %v346_v40  ;;  %v1081_v40 = vld [vmem:[%s17116_s7 + $0xb8] sm:$0xff] }
 0x203   :  { %v354_v42 = vsub.f32 %v340_v34, %v352_v39  ;;  %v919_v34 = vld [vmem:[%s17116_s7 + $0x80] sm:$0xff]  ;;  %v13586_v39 = vpack.c.bf16 %v1080_v38, %v1079_v37 }
 0x204   :  { %v353_v43 = vsub.f32 %v339_v35, %v351_v41  ;;  %v13574_v36 = vpack.c.bf16 %v919_v34, %v918_v33  ;;  %v1082_v41 = vld [vmem:[%s17116_s7 + $0xc0] sm:$0xff] }
 0x205   :  { %v356_v46 = vmul.f32 %v354_v42, %v354_v42 }
 0x206   :  { %v355_v44 = vmul.f32 %v353_v43, %v353_v43 }
 0x207   :  { %v360_v47 = vsel %vm343_vm6, %v356_v46, 0.0 }
 0x208   :  { %v357_v45 = vsel %vm343_vm6, %v355_v44, 0.0  ;;  %v14988_v44 = vld [vmem:[%s17117_s3 + $0x8] sm:$0xff] }
 0x209   :  { %358 = vadd.xlane.f32.xlu0 %v357_v45 }
 0x20d   :  { %361 = vadd.xlane.f32.xlu0 %v360_v47  ;;  %v14993_v47 = vld [vmem:[%s17117_s3] sm:$0xff] }
 0x296   :  { %v359_v63 = vpop.xlane.xlu0 %358 }
 0x297   :  { %v363_v0 = vmul.f32 0.03125, %v359_v63 }
 0x299   :  { %v365_v1 = vadd.f32 1e-12, %v363_v0 }
 0x29a   :  { %v362_v2 = vpop.xlane.xlu0 %361 }
 0x29b   :  { %14563 = vrsqrt.f32 %v365_v1  ;;  %v364_v3 = vmul.f32 0.03125, %v362_v2 }
 0x29d   :  { %v366_v4 = vadd.f32 1e-12, %v364_v3 }
 0x29f   :  { %14565 = vrsqrt.f32 %v366_v4 }
 0x2a5   :  { %v14564_v5 = vpop.eup %14563 }
 0x2a6   :  { %v369_v7 = vmul.f32 %v14564_v5, %v353_v43 }
 0x2a8   :  { %v375_v9 = vmul.f32 %v11128_v6, %v369_v7 }
 0x2a9   :  { %v14566_v10 = vpop.eup %14565 }
 0x2aa   :  { %v14916_v11 = vadd.f32 %v11129_v8, %v375_v9  ;;  %v370_v13 = vmul.f32 %v14566_v10, %v354_v42  ;;  %v13590_v42 = vpack.c.bf16 %v1082_v41, %v1081_v40 }
 0x2ac   :  { %v376_v16 = vmul.f32 %v11128_v6, %v370_v13  ;;  %12194 = vmatprep.mubr.msk.f32.mxu1 %vm343_vm6, %v14916_v11  ;;  %12216 = vmatprep.mubr.msk.f32.mxu0 %vm343_vm6, %v14916_v11  ;;  %v832_v6 = vld [vmem:[%s17114_s9 + $0x50] sm:$0xff] }
 0x2ae   :  { %v14928_v17 = vadd.f32 %v11129_v8, %v376_v16  ;;  %v1001_v16 = vld [vmem:[%s17116_s7 + $0x90] sm:$0xff] }
 0x2b0   :  { %12195 = vmatmul.mubr.msk.f32.vlgmr.msra.gmra.mrb[0].mxu1 %vm343_vm6, %v14928_v17  ;;  %12217 = vmatmul.mubr.msk.f32.vlgmr.msra.gmra.mrb[2].mxu0 %vm343_vm6, %v14928_v17 }
 0x2b1   :  { %13547 = vmatpush3.bf16.msra.mxu1 %v13544_v62  ;;  %12205 = vmatprep.mubr.msk.f32.mxu1 %vm343_vm6, %v14916_v11 }
 0x2b2   :  { %13549 = vmatprep.subr.bf16.mxu1 %v13548_v18 }
 0x2b5   :  { %13551 = vmatpush3.bf16.msra.mxu1 %v13548_v18  ;;  %v13578_v18 = vpack.c.bf16 %v1001_v16, %v1000_v15 }
 0x2b8   :  { %12206 = vmatmul.mubr.msk.f32.vlgmr.msra.gmra.mrb[2].mxu1 %vm343_vm6, %v14928_v17 }
 0x383   :  { %v12196_v20 = vpop.f32.mrb[0].mxu1  ;;  %v12218_v21 = vpop.f32.mrb[2].mxu0 }
 0x384   :  { %v471_v22 = vpop.f32.mrb[1].mxu1  ;;  %v629_v23 = vpop.f32.mrb[3].mxu0  ;;  %v477_v35 = vadd.f32 %v12196_v20, %v11131_v19  ;;  %v1003_v20 = vld [vmem:[%s17116_s7 + $0xa0] sm:$0xff] }
 0x385   :  { %v472_v24 = vadd.f32 %v11131_v19, %v471_v22  ;;  %v13566_v25 = vpack.c.bf16 %v12218_v21, %v629_v23  ;;  %v1002_v19 = vld [vmem:[%s17116_s7 + $0x98] sm:$0xff] }
 0x386   :  { %v13582_v23 = vpack.c.bf16 %v1003_v20, %v1002_v19 }
 0x387   :  { %12223 = vmatprep.mubr.msk.f32.mxu1 %vm159_vm3, %v472_v24  ;;  %13567 = vmatprep.subr.bf16.mxu0 %v13566_v25 }
 0x388   :  { %13569 = vmatpush3.bf16.msra.mxu0 %v13566_v25 }
 0x389   :  { %12233 = vmatprep.subr.mxu0 %v832_v6 }
 0x38b   :  { %v12207_v28 = vpop.f32.mrb[2].mxu1 }
 0x38c   :  { %v550_v29 = vpop.f32.mrb[3].mxu1 }
 0x38d   :  { %v13560_v31 = vpack.c.bf16 %v12207_v28, %v550_v29 }
 0x38f   :  { %13562 = vmatprep.subr.msk.bf16.mxu1 %vm14950_vm7, %v13560_v31 }
 0x390   :  { %13565 = vmatpush3.bf16.xpose.msk.msra.mxu1 %vm14950_vm7, %v13560_v31 }
 0x391   :  { %13571 = vmatprep.subr.bf16.mxu1 %v13570_v32 }
 0x397   :  { %12224 = vmatmul.mubr.msk.f32.vlgmr.msra.gmra.mrb[4].mxu1 %vm159_vm3, %v477_v35 }
 0x398   :  { %13573 = vmatpush3.bf16.msra.mxu1 %v13570_v32  ;;  %12246 = vmatprep.mubr.msk.f32.mxu1 %vm343_vm6, %v14916_v11 }
 0x399   :  { %13575 = vmatprep.subr.bf16.mxu1 %v13574_v36 }
 0x39c   :  { %13577 = vmatpush3.bf16.msra.mxu1 %v13574_v36 }
 0x39d   :  { %13587 = vmatprep.subr.bf16.mxu1 %v13586_v39 }
 0x39f   :  { %12247 = vmatmul.mubr.msk.f32.vlgmr.msra.gmra.mrb[6].mxu1 %vm343_vm6, %v14928_v17 }
 0x3a0   :  { %13589 = vmatpush3.bf16.msra.mxu1 %v13586_v39  ;;  %12268 = vmatprep.mubr.msk.f32.mxu1 %vm343_vm6, %v14916_v11 }
 0x3a1   :  { %13591 = vmatprep.subr.bf16.mxu1 %v13590_v42 }
 0x3a4   :  { %13593 = vmatpush3.bf16.msra.mxu1 %v13590_v42 }
 0x3a7   :  { %12269 = vmatmul.mubr.msk.f32.vlgmr.msra.gmra.mrb[8].mxu1 %vm343_vm6, %v14928_v17 }
 0x46a   :  { %v12225_v43 = vpop.f32.mrb[4].mxu1 }
 0x46b   :  { %v726_v45 = vmul.f32 0.35355338, %v12225_v43  ;;  %v716_v46 = vpop.f32.mrb[5].mxu1 }
 0x46c   :  { %v725_v48 = vmul.f32 0.35355338, %v716_v46 }
 0x46d   :  { %v728_v49 = vadd.f32 %v726_v45, %v14988_v44 }
 0x46e   :  { %v727_v50 = vadd.f32 %v725_v48, %v14993_v47 }
 0x46f   :  { %v732_v51 = vsel %vm77_vm0, %v728_v49, -inf }
 0x470   :  { %733 = vmax.xlane.f32.xlu0 %v732_v51  ;;  %v729_v52 = vsel %vm77_vm0, %v727_v50, -inf }
 0x471   :  { %730 = vmax.xlane.f32.xlu1 %v729_v52  ;;  %v1352_v52 = vld [vmem:[%s17114_s9 + $0x58] sm:$0xff] }
 0x472   :  { %v12248_v54 = vpop.f32.mrb[6].mxu1 }
 0x473   :  { %v997_v55 = vadd.f32 %v12248_v54, %v11146_v53  ;;  %v991_v56 = vpop.f32.mrb[7].mxu1 }
 0x474   :  { %v992_v24 = vadd.f32 %v11146_v53, %v991_v56  ;;  %v1438_v56 = vld [vmem:[%s17116_s7 + $0xe0] sm:$0xff] }
 0x47a   :  { %v12270_v57 = vpop.f32.mrb[8].mxu1 }
 0x47b   :  { %v1149_v58 = vpop.f32.mrb[9].mxu1 }
 0x47c   :  { %v13600_v59 = vpack.c.bf16 %v12270_v57, %v1149_v58  ;;  %v1439_v57 = vld [vmem:[%s17116_s7 + $0xe8] sm:$0xff] }
 0x47e   :  { %13601 = vmatprep.subr.bf16.mxu1 %v13600_v59 }
 0x47f   :  { %13603 = vmatpush3.bf16.msra.mxu1 %v13600_v59 }
 0x4fd   :  { %v734_v60 = vpop.xlane.xlu0 %733 }
 0x4fe   :  { %v736_v61 = vsub.f32 %v728_v49, %v734_v60  ;;  %v731_v62 = vpop.xlane.xlu1 %730  ;;  %v1436_v49 = vld [vmem:[%s17116_s7 + $0xd0] sm:$0xff] }
 0x4ff   :  { %v735_v63 = vsub.f32 %v727_v50, %v731_v62  ;;  %v1437_v50 = vld [vmem:[%s17116_s7 + $0xd8] sm:$0xff]  ;;  %v1599_v62 = vld [vmem:[%s17116_s7 + $0x110] sm:$0xff] }
 0x500   :  { %v739_v0 = vmul.f32 1.442695, %v736_v61  ;;  %v13604_v51 = vpack.c.bf16 %v1437_v50, %v1436_v49  ;;  %v13608_v61 = vpack.c.bf16 %v1439_v57, %v1438_v56  ;;  %v1872_v50 = vld [vmem:[%s17114_s9 + $0x60] sm:$0xff] }
 0x501   :  { %v737_v1 = vmul.f32 1.442695, %v735_v63  ;;  %v1600_v63 = vld [vmem:[%s17116_s7 + $0x118] sm:$0xff] }
 0x502   :  { %14567 = vpow2.f32 %v739_v0  ;;  %13605 = vmatprep.subr.bf16.mxu1 %v13604_v51  ;;  %v13620_v0 = vpack.c.bf16 %v1600_v63, %v1599_v62  ;;  %v2121_v63 = vld [vmem:[%s17116_s7 + $0x188] sm:$0xff] }
 0x503   :  { %14569 = vpow2.f32 %v737_v1  ;;  %v1601_v1 = vld [vmem:[%s17116_s7 + $0x120] sm:$0xff] }
 0x50c   :  { %v14568_v2 = vpop.eup %14567 }
 0x50d   :  { %v14570_v3 = vpop.eup %14569  ;;  %v744_v4 = vsel %vm77_vm0, %v14568_v2, 0.0 }
 0x50e   :  { %745 = vadd.xlane.f32.xlu0 %v744_v4  ;;  %v741_v5 = vsel %vm77_vm0, %v14570_v3, 0.0  ;;  %v1520_v4 = vld [vmem:[%s17116_s7 + $0xf0] sm:$0xff] }
 0x50f   :  { %742 = vadd.xlane.f32.xlu1 %v741_v5  ;;  %v1521_v5 = vld [vmem:[%s17116_s7 + $0xf8] sm:$0xff] }
 0x59b   :  { %v746_v7 = vpop.xlane.xlu0 %745 }
 0x59c   :  { %14571 = vrcp.f32 %v746_v7  ;;  %v743_v8 = vpop.xlane.xlu1 %742  ;;  %v1522_v7 = vld [vmem:[%s17116_s7 + $0x100] sm:$0xff] }
 0x59d   :  { %14573 = vrcp.f32 %v743_v8  ;;  %v1523_v8 = vld [vmem:[%s17116_s7 + $0x108] sm:$0xff] }
 0x5a6   :  { %v14572_v9 = vpop.eup %14571 }
 0x5a7   :  { %v14574_v10 = vpop.eup %14573  ;;  %v750_v14 = vmul.f32 %v14572_v9, %v14568_v2  ;;  %v1602_v2 = vld [vmem:[%s17116_s7 + $0x128] sm:$0xff] }
 0x5a8   :  { %v749_v13 = vmul.f32 %v14574_v10, %v14570_v3  ;;  %v13624_v3 = vpack.c.bf16 %v1602_v2, %v1601_v1  ;;  %v2040_v2 = vld [vmem:[%s17116_s7 + $0x158] sm:$0xff] }
 0x5aa   :  { %12230 = vmatprep.mubr.msk.f32.mxu0 %vm77_vm0, %v749_v13  ;;  %v13616_v13 = vpack.c.bf16 %v1523_v8, %v1522_v7 }
 0x5ab   :  { %12231 = vmatmul.mubr.msk.f32.vlgmr.msra.gmra.mrb[4].mxu0 %vm77_vm0, %v750_v14  ;;  %v11161_v14 = vld [vmem:[%s17116_s7 + $0x130] ss:$0 sm:$0xff] }
 0x5ac   :  { %12234 = vmatpush3.msra.mxu0 %v832_v6  ;;  %v13612_v6 = vpack.c.bf16 %v1521_v5, %v1520_v4  ;;  %v2042_v5 = vld [vmem:[%s17116_s7 + $0x168] sm:$0xff] }
 0x5ad   :  { %13579 = vmatprep.subr.bf16.mxu0 %v13578_v18 }
 0x67e   :  { %v12232_v21 = vpop.f32.mrb[4].mxu0 }
 0x67f   :  { %v823_v22 = vpop.f32.mrb[5].mxu0 }
 0x680   :  { %12235 = vmatprep.mubr.msk.f32.mxu0 %vm159_vm3, %v823_v22 }
 0x681   :  { %12236 = vmatmul.mubr.msk.f32.vlgmr.msra.gmra.mrb[6].mxu0 %vm159_vm3, %v12232_v21 }
 0x682   :  { %13581 = vmatpush3.bf16.msra.mxu0 %v13578_v18  ;;  %12257 = vmatprep.mubr.msk.f32.mxu0 %vm343_vm6, %v14916_v11 }
 0x683   :  { %13583 = vmatprep.subr.bf16.mxu0 %v13582_v23 }
 0x686   :  { %13585 = vmatpush3.bf16.msra.mxu0 %v13582_v23 }
 0x689   :  { %12258 = vmatmul.mubr.msk.f32.vlgmr.msra.gmra.mrb[8].mxu0 %vm343_vm6, %v14928_v17 }
 0x68a   :  { %12275 = vmatprep.mubr.msk.f32.mxu0 %vm159_vm3, %v992_v24 }
 0x75c   :  { %v12259_v25 = vpop.f32.mrb[8].mxu0 }
 0x75d   :  { %v1070_v26 = vpop.f32.mrb[9].mxu0 }
 0x75e   :  { %v13594_v27 = vpack.c.bf16 %v12259_v25, %v1070_v26 }
 0x760   :  { %13596 = vmatprep.subr.msk.bf16.mxu0 %vm14950_vm7, %v13594_v27 }
 0x761   :  { %13599 = vmatpush3.bf16.xpose.msk.msra.mxu0 %vm14950_vm7, %v13594_v27 }
 0x762   :  { %12285 = vmatprep.subr.mxu0 %v1352_v52 }
 0x768   :  { %12276 = vmatmul.mubr.msk.f32.vlgmr.msra.gmra.mrb[10].mxu0 %vm159_vm3, %v997_v55 }
 0x769   :  { %12286 = vmatpush3.msra.mxu0 %v1352_v52 }
 0x76a   :  { %13613 = vmatprep.subr.bf16.mxu0 %v13612_v6 }
 0x83b   :  { %v12277_v28 = vpop.f32.mrb[10].mxu0 }
 0x83c   :  { %v1246_v29 = vmul.f32 0.35355338, %v12277_v28  ;;  %v1236_v31 = vpop.f32.mrb[11].mxu0 }
 0x83d   :  { %v1245_v32 = vmul.f32 0.35355338, %v1236_v31 }
 0x83e   :  { %v1248_v33 = vadd.f32 %v1246_v29, %v14988_v44 }
 0x83f   :  { %v1247_v34 = vadd.f32 %v1245_v32, %v14993_v47 }
 0x840   :  { %v1252_v35 = vsel %vm77_vm0, %v1248_v33, -inf }
 0x841   :  { %1253 = vmax.xlane.f32.xlu0 %v1252_v35  ;;  %v1249_v36 = vsel %vm77_vm0, %v1247_v34, -inf }
 0x842   :  { %1250 = vmax.xlane.f32.xlu1 %v1249_v36 }
 0x8ce   :  { %v1254_v37 = vpop.xlane.xlu0 %1253 }
 0x8cf   :  { %v1256_v38 = vsub.f32 %v1248_v33, %v1254_v37  ;;  %v1251_v39 = vpop.xlane.xlu1 %1250 }
 0x8d0   :  { %v1255_v40 = vsub.f32 %v1247_v34, %v1251_v39 }
 0x8d1   :  { %v1259_v41 = vmul.f32 1.442695, %v1256_v38 }
 0x8d2   :  { %v1257_v42 = vmul.f32 1.442695, %v1255_v40 }
 0x8d3   :  { %14575 = vpow2.f32 %v1259_v41 }
 0x8d4   :  { %14577 = vpow2.f32 %v1257_v42 }
 0x8dd   :  { %v14576_v43 = vpop.eup %14575 }
 0x8de   :  { %v14578_v45 = vpop.eup %14577  ;;  %v1264_v46 = vsel %vm77_vm0, %v14576_v43, 0.0 }
 0x8df   :  { %1265 = vadd.xlane.f32.xlu0 %v1264_v46  ;;  %v1261_v48 = vsel %vm77_vm0, %v14578_v45, 0.0  ;;  %v1956_v46 = vld [vmem:[%s17116_s7 + $0x138] sm:$0xff] }
 0x8e0   :  { %1262 = vadd.xlane.f32.xlu1 %v1261_v48  ;;  %v1957_v48 = vld [vmem:[%s17116_s7 + $0x140] sm:$0xff] }
 0x8e1   :  { %v13638_v49 = vpack.c.bf16 %v1957_v48, %v1956_v46 }
 0x96c   :  { %v1266_v53 = vpop.xlane.xlu0 %1265 }
 0x96d   :  { %14579 = vrcp.f32 %v1266_v53  ;;  %v1263_v54 = vpop.xlane.xlu1 %1262 }
 0x96e   :  { %14581 = vrcp.f32 %v1263_v54  ;;  %v1958_v54 = vld [vmem:[%s17116_s7 + $0x148] sm:$0xff] }
 0x977   :  { %v14580_v55 = vpop.eup %14579 }
 0x978   :  { %v14582_v58 = vpop.eup %14581  ;;  %v1270_v60 = vmul.f32 %v14580_v55, %v14576_v43  ;;  %v1959_v55 = vld [vmem:[%s17116_s7 + $0x150] sm:$0xff] }
 0x979   :  { %v1269_v59 = vmul.f32 %v14582_v58, %v14578_v45 }
 0x97b   :  { %12282 = vmatprep.mubr.msk.f32.mxu1 %vm77_vm0, %v1269_v59  ;;  %v13642_v59 = vpack.c.bf16 %v1959_v55, %v1958_v54 }
 0x97c   :  { %12283 = vmatmul.mubr.msk.f32.vlgmr.msra.gmra.mrb[10].mxu1 %vm77_vm0, %v1270_v60  ;;  %v2119_v60 = vld [vmem:[%s17116_s7 + $0x178] sm:$0xff] }
 0x97d   :  { %13607 = vmatpush3.bf16.msra.mxu1 %v13604_v51  ;;  %12298 = vmatprep.mubr.msk.f32.mxu1 %vm343_vm6, %v14916_v11 }
 0x97e   :  { %13609 = vmatprep.subr.bf16.mxu1 %v13608_v61 }
 0x981   :  { %13611 = vmatpush3.bf16.msra.mxu1 %v13608_v61  ;;  %v2120_v61 = vld [vmem:[%s17116_s7 + $0x180] sm:$0xff] }
 0x982   :  { %13621 = vmatprep.subr.bf16.mxu1 %v13620_v0  ;;  %v13654_v62 = vpack.c.bf16 %v2120_v61, %v2119_v60 }
 0x984   :  { %12299 = vmatmul.mubr.msk.f32.vlgmr.msra.gmra.mrb[12].mxu1 %vm343_vm6, %v14928_v17 }
 0x985   :  { %13623 = vmatpush3.bf16.msra.mxu1 %v13620_v0  ;;  %12320 = vmatprep.mubr.msk.f32.mxu1 %vm343_vm6, %v14916_v11  ;;  %v2122_v0 = vld [vmem:[%s17116_s7 + $0x190] sm:$0xff] }
 0x986   :  { %13625 = vmatprep.subr.bf16.mxu1 %v13624_v3  ;;  %v13658_v1 = vpack.c.bf16 %v2122_v0, %v2121_v63 }
 0x989   :  { %13627 = vmatpush3.bf16.msra.mxu1 %v13624_v3  ;;  %v2041_v3 = vld [vmem:[%s17116_s7 + $0x160] sm:$0xff] }
 0x98a   :  { %v13646_v4 = vpack.c.bf16 %v2041_v3, %v2040_v2 }
 0x98c   :  { %12321 = vmatmul.mubr.msk.f32.vlgmr.msra.gmra.mrb[14].mxu1 %vm343_vm6, %v14928_v17 }
 0xa4f   :  { %v12284_v9 = vpop.f32.mrb[10].mxu1 }
 0xa50   :  { %v1343_v10 = vpop.f32.mrb[11].mxu1 }
 0xa51   :  { %12287 = vmatprep.mubr.msk.f32.mxu0 %vm159_vm3, %v1343_v10  ;;  %v11176_v10 = vld [vmem:[%s17116_s7 + $0x198] ss:$0 sm:$0xff] }
 0xa52   :  { %12288 = vmatmul.mubr.msk.f32.vlgmr.msra.gmra.mrb[6].mxu0 %vm159_vm3, %v12284_v9 }
 0xa53   :  { %13615 = vmatpush3.bf16.msra.mxu0 %v13612_v6  ;;  %12309 = vmatprep.mubr.msk.f32.mxu0 %vm343_vm6, %v14916_v11  ;;  %v2043_v6 = vld [vmem:[%s17116_s7 + $0x170] sm:$0xff] }
 0xa54   :  { %13617 = vmatprep.subr.bf16.mxu0 %v13616_v13  ;;  %v13650_v9 = vpack.c.bf16 %v2043_v6, %v2042_v5  ;;  %v2516_v5 = vld [vmem:[%s17118_s10] sm:$0xff]  ;;  %v2517_v6 = vld [vmem:[%s17118_s10 + $0x8] sm:$0xff] }
 0xa57   :  { %v12300_v15 = vpop.f32.mrb[12].mxu1  ;;  %13619 = vmatpush3.bf16.msra.mxu0 %v13616_v13 }
 0xa58   :  { %v1517_v16 = vadd.f32 %v12300_v15, %v11161_v14  ;;  %v1511_v18 = vpop.f32.mrb[13].mxu1 }
 0xa59   :  { %v1512_v19 = vadd.f32 %v11161_v14, %v1511_v18 }
 0xa5a   :  { %12310 = vmatmul.mubr.msk.f32.vlgmr.msra.gmra.mrb[12].mxu0 %vm343_vm6, %v14928_v17 }
 0xa5b   :  { %12327 = vmatprep.mubr.msk.f32.mxu0 %vm159_vm3, %v1512_v19 }
 0xa5f   :  { %v12322_v20 = vpop.f32.mrb[14].mxu1 }
 0xa60   :  { %v1669_v21 = vpop.f32.mrb[15].mxu1 }
 0xa61   :  { %v13634_v22 = vpack.c.bf16 %v12322_v20, %v1669_v21 }
 0xa63   :  { %13635 = vmatprep.subr.bf16.mxu1 %v13634_v22 }
 0xa64   :  { %13637 = vmatpush3.bf16.msra.mxu1 %v13634_v22 }
 0xa65   :  { %13639 = vmatprep.subr.bf16.mxu1 %v13638_v49 }
 0xb2d   :  { %v12311_v23 = vpop.f32.mrb[12].mxu0 }
 0xb2e   :  { %v1590_v24 = vpop.f32.mrb[13].mxu0 }
 0xb2f   :  { %v13628_v25 = vpack.c.bf16 %v12311_v23, %v1590_v24 }
 0xb31   :  { %13630 = vmatprep.subr.msk.bf16.mxu0 %vm14950_vm7, %v13628_v25 }
 0xb32   :  { %13633 = vmatpush3.bf16.xpose.msk.msra.mxu0 %vm14950_vm7, %v13628_v25 }
 0xb33   :  { %12337 = vmatprep.subr.mxu0 %v1872_v50 }
 0xb39   :  { %12328 = vmatmul.mubr.msk.f32.vlgmr.msra.gmra.mrb[14].mxu0 %vm159_vm3, %v1517_v16 }
 0xb3a   :  { %12338 = vmatpush3.msra.mxu0 %v1872_v50 }
 0xb3b   :  { %13647 = vmatprep.subr.bf16.mxu0 %v13646_v4 }
 0xc0c   :  { %v12329_v26 = vpop.f32.mrb[14].mxu0 }
 0xc0d   :  { %v1766_v27 = vmul.f32 0.35355338, %v12329_v26  ;;  %v1756_v28 = vpop.f32.mrb[15].mxu0 }
 0xc0e   :  { %v1765_v29 = vmul.f32 0.35355338, %v1756_v28 }
 0xc0f   :  { %v1768_v31 = vadd.f32 %v1766_v27, %v14988_v44 }
 0xc10   :  { %v1767_v32 = vadd.f32 %v1765_v29, %v14993_v47 }
 0xc11   :  { %v1772_v33 = vsel %vm77_vm0, %v1768_v31, -inf }
 0xc12   :  { %1773 = vmax.xlane.f32.xlu0 %v1772_v33  ;;  %v1769_v34 = vsel %vm77_vm0, %v1767_v32, -inf }
 0xc13   :  { %1770 = vmax.xlane.f32.xlu1 %v1769_v34 }
 0xc9f   :  { %v1774_v35 = vpop.xlane.xlu0 %1773 }
 0xca0   :  { %v1776_v36 = vsub.f32 %v1768_v31, %v1774_v35  ;;  %v1771_v37 = vpop.xlane.xlu1 %1770 }
 0xca1   :  { %v1775_v38 = vsub.f32 %v1767_v32, %v1771_v37 }
 0xca2   :  { %v1779_v39 = vmul.f32 1.442695, %v1776_v36 }
 0xca3   :  { %v1777_v40 = vmul.f32 1.442695, %v1775_v38 }
 0xca4   :  { %14583 = vpow2.f32 %v1779_v39 }
 0xca5   :  { %14585 = vpow2.f32 %v1777_v40 }
 0xcae   :  { %v14584_v41 = vpop.eup %14583 }
 0xcaf   :  { %v14586_v42 = vpop.eup %14585  ;;  %v1784_v43 = vsel %vm77_vm0, %v14584_v41, 0.0 }
 0xcb0   :  { %1785 = vadd.xlane.f32.xlu0 %v1784_v43  ;;  %v1781_v45 = vsel %vm77_vm0, %v14586_v42, 0.0 }
 0xcb1   :  { %1782 = vadd.xlane.f32.xlu1 %v1781_v45 }
 0xd3d   :  { %v1786_v51 = vpop.xlane.xlu0 %1785 }
 0xd3e   :  { %14587 = vrcp.f32 %v1786_v51  ;;  %v1783_v52 = vpop.xlane.xlu1 %1782 }
 0xd3f   :  { %14589 = vrcp.f32 %v1783_v52  ;;  %v11130_v52 = vld [vmem:[%s17114_s9 + $0x70] ss:$0 sm:$0xff] }
 0xd40   :  { %v388_v55 = vadd.f32 %v11130_v52, %v14916_v11 }
 0xd48   :  { %v14588_v53 = vpop.eup %14587 }
 0xd49   :  { %v14590_v56 = vpop.eup %14589  ;;  %v1790_v58 = vmul.f32 %v14588_v53, %v14584_v41  ;;  %v2392_v41 = vld [vmem:[%s17114_s9 + $0x68] sm:$0xff]  ;;  %v389_v53 = vadd.f32 %v11130_v52, %v14928_v17 }
 0xd4a   :  { %v1789_v57 = vmul.f32 %v14590_v56, %v14586_v42 }
 0xd4c   :  { %12334 = vmatprep.mubr.msk.f32.mxu1 %vm77_vm0, %v1789_v57 }
 0xd4d   :  { %12335 = vmatmul.mubr.msk.f32.vlgmr.msra.gmra.mrb[16].mxu1 %vm77_vm0, %v1790_v58 }
 0xd4e   :  { %13641 = vmatpush3.bf16.msra.mxu1 %v13638_v49  ;;  %12350 = vmatprep.mubr.msk.f32.mxu1 %vm343_vm6, %v14916_v11 }
 0xd4f   :  { %13643 = vmatprep.subr.bf16.mxu1 %v13642_v59 }
 0xd52   :  { %13645 = vmatpush3.bf16.msra.mxu1 %v13642_v59 }
 0xd53   :  { %13655 = vmatprep.subr.bf16.mxu1 %v13654_v62 }
 0xd55   :  { %12351 = vmatmul.mubr.msk.f32.vlgmr.msra.gmra.mrb[18].mxu1 %vm343_vm6, %v14928_v17 }
 0xd56   :  { %13657 = vmatpush3.bf16.msra.mxu1 %v13654_v62  ;;  %12372 = vmatprep.mubr.msk.f32.mxu1 %vm343_vm6, %v14916_v11 }
 0xd57   :  { %13659 = vmatprep.subr.bf16.mxu1 %v13658_v1 }
 0xd5a   :  { %13661 = vmatpush3.bf16.msra.mxu1 %v13658_v1 }
 0xd5d   :  { %12373 = vmatmul.mubr.msk.f32.vlgmr.msra.gmra.mrb[20].mxu1 %vm343_vm6, %v14928_v17 }
 0xe20   :  { %v12336_v7 = vpop.f32.mrb[16].mxu1 }
 0xe21   :  { %v1863_v8 = vpop.f32.mrb[17].mxu1 }
 0xe22   :  { %12339 = vmatprep.mubr.msk.f32.mxu0 %vm159_vm3, %v1863_v8  ;;  %v2518_v8 = vld [vmem:[%s17118_s10 + $0x10] sm:$0xff] }
 0xe23   :  { %12340 = vmatmul.mubr.msk.f32.vlgmr.msra.gmra.mrb[6].mxu0 %vm159_vm3, %v12336_v7  ;;  %v13672_v7 = vpack.c.bf16 %v2517_v6, %v2516_v5 }
 0xe24   :  { %13649 = vmatpush3.bf16.msra.mxu0 %v13646_v4  ;;  %12361 = vmatprep.mubr.msk.f32.mxu0 %vm343_vm6, %v14916_v11 }
 0xe25   :  { %13651 = vmatprep.subr.bf16.mxu0 %v13650_v9 }
 0xe28   :  { %v12352_v13 = vpop.f32.mrb[18].mxu1  ;;  %13653 = vmatpush3.bf16.msra.mxu0 %v13650_v9  ;;  %v2519_v9 = vld [vmem:[%s17118_s10 + $0x18] sm:$0xff] }
 0xe29   :  { %v2037_v14 = vadd.f32 %v12352_v13, %v11176_v10  ;;  %v2031_v15 = vpop.f32.mrb[19].mxu1 }
 0xe2a   :  { %v2032_v16 = vadd.f32 %v11176_v10, %v2031_v15  ;;  %v13676_v10 = vpack.c.bf16 %v2519_v9, %v2518_v8 }
 0xe2b   :  { %12362 = vmatmul.mubr.msk.f32.vlgmr.msra.gmra.mrb[16].mxu0 %vm343_vm6, %v14928_v17 }
 0xe2c   :  { %12379 = vmatprep.mubr.msk.f32.mxu0 %vm159_vm3, %v2032_v16 }
 0xe30   :  { %v12374_v18 = vpop.f32.mrb[20].mxu1 }
 0xe31   :  { %v2189_v19 = vpop.f32.mrb[21].mxu1 }
 0xe32   :  { %v13668_v20 = vpack.c.bf16 %v12374_v18, %v2189_v19 }
 0xe34   :  { %13669 = vmatprep.subr.bf16.mxu1 %v13668_v20 }
 0xe35   :  { %13671 = vmatpush3.bf16.msra.mxu1 %v13668_v20 }
 0xe36   :  { %13673 = vmatprep.subr.bf16.mxu1 %v13672_v7 }
 0xefe   :  { %v12363_v21 = vpop.f32.mrb[16].mxu0 }
 0xeff   :  { %v2110_v22 = vpop.f32.mrb[17].mxu0 }
 0xf00   :  { %v13662_v23 = vpack.c.bf16 %v12363_v21, %v2110_v22  ;;  %v11191_v21 = vld [vmem:[%s17114_s9 + $0x78] ss:$0 sm:$0xff] }
 0xf02   :  { %13664 = vmatprep.subr.msk.bf16.mxu0 %vm14950_vm7, %v13662_v23 }
 0xf03   :  { %13667 = vmatpush3.bf16.xpose.msk.msra.mxu0 %vm14950_vm7, %v13662_v23 }
 0xf04   :  { %12389 = vmatprep.subr.mxu0 %v2392_v41 }
 0xf0a   :  { %12380 = vmatmul.mubr.msk.f32.vlgmr.msra.gmra.mrb[18].mxu0 %vm159_vm3, %v2037_v14 }
 0xf0b   :  { %12390 = vmatpush3.msra.mxu0 %v2392_v41  ;;  %v11193_v41 = vld [vmem:[%s17118_s10 + $0x20] ss:$0 sm:$0xff] }
 0xfdd   :  { %v12381_v24 = vpop.f32.mrb[18].mxu0 }
 0xfde   :  { %v2286_v25 = vmul.f32 0.35355338, %v12381_v24  ;;  %v2276_v26 = vpop.f32.mrb[19].mxu0 }
 0xfdf   :  { %v2285_v27 = vmul.f32 0.35355338, %v2276_v26 }
 0xfe0   :  { %v2288_v28 = vadd.f32 %v2286_v25, %v14988_v44  ;;  %v11192_v25 = vld [vmem:[%s17114_s9 + $0x80] ss:$0 sm:$0xff] }
 0xfe1   :  { %v2287_v29 = vadd.f32 %v2285_v27, %v14993_v47 }
 0xfe2   :  { %v2292_v31 = vsel %vm77_vm0, %v2288_v28, -inf }
 0xfe3   :  { %2293 = vmax.xlane.f32.xlu0 %v2292_v31  ;;  %v2289_v32 = vsel %vm77_vm0, %v2287_v29, -inf  ;;  %v2624_v31 = vld [vmem:[%s17114_s9 + $0x88] sm:$0xff] }
 0xfe4   :  { %2290 = vmax.xlane.f32.xlu1 %v2289_v32  ;;  %v2625_v32 = vld [vmem:[%s17114_s9 + $0x90] sm:$0xff] }
0x1070   :  { %v2294_v33 = vpop.xlane.xlu0 %2293 }
0x1071   :  { %v2296_v34 = vsub.f32 %v2288_v28, %v2294_v33  ;;  %v2291_v35 = vpop.xlane.xlu1 %2290  ;;  %v13680_v33 = vpack.c.bf16 %v2625_v32, %v2624_v31  ;;  %v2939_v32 = vld [vmem:[%s17116_s7 + $0x1f0] sm:$0xff] }
0x1072   :  { %v2295_v36 = vsub.f32 %v2287_v29, %v2291_v35  ;;  %v2627_v35 = vld [vmem:[%s17114_s9 + $0xa0] sm:$0xff] }
0x1073   :  { %v2299_v37 = vmul.f32 1.442695, %v2296_v34  ;;  %v2626_v34 = vld [vmem:[%s17114_s9 + $0x98] sm:$0xff]  ;;  %13681 = vmatprep.subr.bf16.mxu0 %v13680_v33 }
0x1074   :  { %v2297_v38 = vmul.f32 1.442695, %v2295_v36  ;;  %v2628_v36 = vld [vmem:[%s17114_s9 + $0xa8] sm:$0xff] }
0x1075   :  { %14591 = vpow2.f32 %v2299_v37  ;;  %v13684_v37 = vpack.c.bf16 %v2627_v35, %v2626_v34  ;;  %v2858_v35 = vld [vmem:[%s17116_s7 + $0x1c0] sm:$0xff] }
0x1076   :  { %14593 = vpow2.f32 %v2297_v38  ;;  %v2629_v38 = vld [vmem:[%s17114_s9 + $0xb0] sm:$0xff] }
0x107f   :  { %v14592_v39 = vpop.eup %14591 }
0x1080   :  { %v14594_v40 = vpop.eup %14593  ;;  %v2304_v44 = vsel %vm77_vm0, %v14592_v39, 0.0 }
0x1081   :  { %2305 = vadd.xlane.f32.xlu0 %v2304_v44  ;;  %v2301_v47 = vsel %vm77_vm0, %v14594_v40, 0.0  ;;  %v2631_v44 = vld [vmem:[%s17114_s9 + $0xc0] sm:$0xff] }
0x1082   :  { %2302 = vadd.xlane.f32.xlu1 %v2301_v47 }
0x110e   :  { %v2306_v42 = vpop.xlane.xlu0 %2305 }
0x110f   :  { %14595 = vrcp.f32 %v2306_v42  ;;  %v2303_v43 = vpop.xlane.xlu1 %2302 }
0x1110   :  { %14597 = vrcp.f32 %v2303_v43 }
0x1119   :  { %v14596_v45 = vpop.eup %14595 }
0x111a   :  { %v14598_v46 = vpop.eup %14597  ;;  %v2310_v49 = vmul.f32 %v14596_v45, %v14592_v39  ;;  %v13688_v39 = vpack.c.bf16 %v2629_v38, %v2628_v36  ;;  %v2859_v36 = vld [vmem:[%s17116_s7 + $0x1c8] sm:$0xff] }
0x111b   :  { %v2309_v48 = vmul.f32 %v14598_v46, %v14594_v40  ;;  %v2630_v40 = vld [vmem:[%s17114_s9 + $0xb8] sm:$0xff] }
0x111c   :  { %v13692_v47 = vpack.c.bf16 %v2631_v44, %v2630_v40 }
0x111d   :  { %12386 = vmatprep.mubr.msk.f32.mxu1 %vm77_vm0, %v2309_v48 }
0x111e   :  { %12387 = vmatmul.mubr.msk.f32.vlgmr.msra.gmra.mrb[22].mxu1 %vm77_vm0, %v2310_v49 }
0x111f   :  { %13675 = vmatpush3.bf16.msra.mxu1 %v13672_v7 }
0x1120   :  { %13677 = vmatprep.subr.bf16.mxu1 %v13676_v10 }
0x1123   :  { %13679 = vmatpush3.bf16.msra.mxu1 %v13676_v10 }
0x11f1   :  { %v12388_v50 = vpop.f32.mrb[22].mxu1 }
0x11f2   :  { %v2383_v51 = vpop.f32.mrb[23].mxu1 }
0x11f3   :  { %12391 = vmatprep.mubr.msk.f32.mxu0 %vm159_vm3, %v2383_v51 }
0x11f4   :  { %12392 = vmatmul.mubr.msk.f32.vlgmr.msra.gmra.mrb[6].mxu0 %vm159_vm3, %v12388_v50 }
0x11f5   :  { %13683 = vmatpush3.bf16.msra.mxu0 %v13680_v33  ;;  %v2940_v33 = vld [vmem:[%s17116_s7 + $0x1f8] sm:$0xff] }
0x11f6   :  { %13685 = vmatprep.subr.bf16.mxu0 %v13684_v37  ;;  %v13716_v34 = vpack.c.bf16 %v2940_v33, %v2939_v32 }
0x11f9   :  { %13687 = vmatpush3.bf16.msra.mxu0 %v13684_v37  ;;  %v13704_v37 = vpack.c.bf16 %v2859_v36, %v2858_v35 }
0x11fa   :  { %13689 = vmatprep.subr.bf16.mxu0 %v13688_v39 }
0x11fd   :  { %13691 = vmatpush3.bf16.msra.mxu0 %v13688_v39 }
0x11fe   :  { %13693 = vmatprep.subr.bf16.mxu0 %v13692_v47 }
0x1201   :  { %13695 = vmatpush3.bf16.msra.mxu0 %v13692_v47 }
0x12c7   :  { %v12393_v54 = vpop.f32.mrb[6].mxu0 }
0x12c8   :  { %v14519_v56 = vadd.f32 %v12393_v54, %v389_v53  ;;  %v2465_v57 = vpop.f32.mrb[7].mxu0 }
0x12c9   :  { %v14520_v58 = vadd.f32 %v2465_v57, %v388_v55 }
0x12ca   :  { %v2481_v59 = vsel %vm343_vm6, %v14519_v56, 0.0 }
0x12cb   :  { %2482 = vadd.xlane.f32.xlu0 %v2481_v59  ;;  %v2478_v60 = vsel %vm343_vm6, %v14520_v58, 0.0 }
0x12cc   :  { %2479 = vadd.xlane.f32.xlu1 %v2478_v60 }
0x1358   :  { %v2483_v61 = vpop.xlane.xlu0 %2482 }
0x1359   :  { %v2485_v62 = vmul.f32 0.03125, %v2483_v61  ;;  %v2480_v63 = vpop.xlane.xlu1 %2479 }
0x135a   :  { %v2484_v0 = vmul.f32 0.03125, %v2480_v63 }
0x135b   :  { %v2487_v1 = vsub.f32 %v14519_v56, %v2485_v62 }
0x135c   :  { %v2486_v2 = vsub.f32 %v14520_v58, %v2484_v0 }
0x135d   :  { %v2489_v3 = vmul.f32 %v2487_v1, %v2487_v1 }
0x135e   :  { %v2488_v17 = vmul.f32 %v2486_v2, %v2486_v2 }
0x135f   :  { %v2493_v4 = vsel %vm343_vm6, %v2489_v3, 0.0 }
0x1360   :  { %2494 = vadd.xlane.f32.xlu0 %v2493_v4  ;;  %v2490_v11 = vsel %vm343_vm6, %v2488_v17, 0.0 }
0x1361   :  { %2491 = vadd.xlane.f32.xlu1 %v2490_v11 }
0x13ed   :  { %v2495_v13 = vpop.xlane.xlu0 %2494 }
0x13ee   :  { %v2497_v14 = vmul.f32 0.03125, %v2495_v13  ;;  %v2492_v15 = vpop.xlane.xlu1 %2491 }
0x13ef   :  { %v2496_v16 = vmul.f32 0.03125, %v2492_v15 }
0x13f0   :  { %v2499_v18 = vadd.f32 1e-12, %v2497_v14 }
0x13f1   :  { %v2498_v19 = vadd.f32 1e-12, %v2496_v16 }
0x13f2   :  { %14599 = vrsqrt.f32 %v2499_v18 }
0x13f3   :  { %14601 = vrsqrt.f32 %v2498_v19 }
0x13fc   :  { %v14600_v20 = vpop.eup %14599 }
0x13fd   :  { %v14602_v22 = vpop.eup %14601  ;;  %v2503_v23 = vmul.f32 %v14600_v20, %v2487_v1 }
0x13fe   :  { %v2502_v24 = vmul.f32 %v14602_v22, %v2486_v2  ;;  %v11196_v2 = vld [vmem:[%s17114_s9 + $0xc8] ss:$0 sm:$0xff]  ;;  %v2768_v22 = vld [vmem:[%s17116_s7 + $0x1a0] sm:$0xff] }
0x13ff   :  { %v2509_v26 = vmul.f32 %v11191_v21, %v2503_v23  ;;  %v2769_v23 = vld [vmem:[%s17116_s7 + $0x1a8] sm:$0xff] }
0x1400   :  { %v2508_v27 = vmul.f32 %v11191_v21, %v2502_v24  ;;  %v13696_v24 = vpack.c.bf16 %v2769_v23, %v2768_v22  ;;  %v15359_v23 = vld [vmem:[%s17117_s3] sm:$0xff] }
0x1401   :  { %v2515_v29 = vadd.f32 %v11192_v25, %v2509_v26  ;;  %v2938_v26 = vld [vmem:[%s17116_s7 + $0x1e8] sm:$0xff] }
0x1402   :  { %v2514_v28 = vadd.f32 %v11192_v25, %v2508_v27  ;;  %v2937_v25 = vld [vmem:[%s17116_s7 + $0x1e0] sm:$0xff]  ;;  %13697 = vmatprep.subr.bf16.mxu1 %v13696_v24 }
0x1403   :  { %v13712_v27 = vpack.c.bf16 %v2938_v26, %v2937_v25 }
0x1404   :  { %12402 = vmatprep.mubr.msk.f32.mxu1 %vm343_vm6, %v2514_v28 }
0x1405   :  { %12403 = vmatmul.mubr.msk.f32.vlgmr.msra.gmra.mrb[24].mxu1 %vm343_vm6, %v2515_v29  ;;  %13713 = vmatprep.subr.bf16.mxu0 %v13712_v27 }
0x1406   :  { %13699 = vmatpush3.bf16.msra.mxu1 %v13696_v24 }
0x14d8   :  { %v12404_v42 = vpop.f32.mrb[24].mxu1 }
0x14d9   :  { %v2603_v43 = vadd.f32 %v12404_v42, %v11193_v41  ;;  %v2597_v45 = vpop.f32.mrb[25].mxu1 }
0x14da   :  { %v2598_v46 = vadd.f32 %v11193_v41, %v2597_v45 }
0x14db   :  { %v2609_v48 = vmul.f32 0.044715, %v2603_v43  ;;  %v2607_v63 = vmul.f32 0.5, %v2603_v43 }
0x14dc   :  { %v2608_v49 = vmul.f32 0.044715, %v2598_v46  ;;  %v2606_v61 = vmul.f32 0.5, %v2598_v46 }
0x14dd   :  { %v2611_v50 = vmul.f32 %v2609_v48, %v2603_v43 }
0x14de   :  { %v2610_v51 = vmul.f32 %v2608_v49, %v2598_v46  ;;  %v11200_v49 = vld [vmem:[%s17114_s9 + $0xd8] ss:$0 sm:$0xff] }
0x14df   :  { %v2613_v52 = vmul.f32 %v2611_v50, %v2603_v43 }
0x14e0   :  { %v2612_v53 = vmul.f32 %v2610_v51, %v2598_v46 }
0x14e1   :  { %v2615_v54 = vadd.f32 %v2613_v52, %v2603_v43  ;;  %v11199_v43 = vld [vmem:[%s17114_s9 + $0xd0] ss:$0 sm:$0xff] }
0x14e2   :  { %v2614_v55 = vadd.f32 %v2612_v53, %v2598_v46  ;;  %v2860_v52 = vld [vmem:[%s17116_s7 + $0x1d0] sm:$0xff]  ;;  %v2861_v53 = vld [vmem:[%s17116_s7 + $0x1d8] sm:$0xff] }
0x14e3   :  { %v2617_v56 = vmul.f32 0.7978846, %v2615_v54 }
0x14e4   :  { %v2616_v57 = vmul.f32 0.7978846, %v2614_v55 }
0x14e5   :  { %14603 = vtanh.f32 %v2617_v56  ;;  %v13708_v56 = vpack.c.bf16 %v2861_v53, %v2860_v52  ;;  %v3378_v52 = vld [vmem:[%s17116_s7 + $0x228] sm:$0xff]  ;;  %v3379_v53 = vld [vmem:[%s17116_s7 + $0x230] sm:$0xff] }
0x14e6   :  { %14605 = vtanh.f32 %v2616_v57  ;;  %v11202_v57 = vld [vmem:[%s17116_s7 + $0x200] ss:$0 sm:$0xff] }
0x14ef   :  { %v14604_v58 = vpop.eup %14603 }
0x14f0   :  { %v14606_v59 = vpop.eup %14605  ;;  %v2621_v60 = vadd.f32 1.0, %v14604_v58 }
0x14f1   :  { %v2620_v62 = vadd.f32 1.0, %v14606_v59 }
0x14f2   :  { %v2623_v1 = vmul.f32 %v2621_v60, %v2607_v63 }
0x14f3   :  { %v2622_v0 = vmul.f32 %v2620_v62, %v2606_v61 }
0x14f5   :  { %12421 = vmatprep.mubr.msk.f32.mxu0 %vm2637_vm8, %v2622_v0  ;;  %v3294_v0 = vld [vmem:[%s17116_s7 + $0x208] sm:$0xff] }
0x14f6   :  { %12422 = vmatmul.mubr.msk.f32.vlgmr.msra.gmra.mrb[20].mxu0 %vm2637_vm8, %v2623_v1  ;;  %v3295_v1 = vld [vmem:[%s17116_s7 + $0x210] sm:$0xff] }
0x14f7   :  { %13715 = vmatpush3.bf16.msra.mxu0 %v13712_v27  ;;  %v11217_v27 = vld [vmem:[%s17116_s7 + $0x268] ss:$0 sm:$0xff] }
0x14f8   :  { %13717 = vmatprep.subr.bf16.mxu0 %v13716_v34 }
0x14fb   :  { %13719 = vmatpush3.bf16.msra.mxu0 %v13716_v34 }
0x15c9   :  { %v12423_v3 = vpop.f32.mrb[20].mxu0 }
0x15ca   :  { %v2716_v17 = vadd.f32 %v12423_v3, %v11196_v2  ;;  %v2710_v4 = vpop.f32.mrb[21].mxu0 }
0x15cb   :  { %v2711_v11 = vadd.f32 %v11196_v2, %v2710_v4  ;;  %v13730_v4 = vpack.c.bf16 %v3295_v1, %v3294_v0 }
0x15cc   :  { %v2720_v5 = vadd.f32 %v2716_v17, %v2515_v29  ;;  %v2771_v29 = vld [vmem:[%s17116_s7 + $0x1b8] sm:$0xff] }
0x15cd   :  { %v2719_v6 = vadd.f32 %v2711_v11, %v2514_v28  ;;  %v2770_v28 = vld [vmem:[%s17116_s7 + $0x1b0] sm:$0xff]  ;;  %v3296_v11 = vld [vmem:[%s17116_s7 + $0x218] sm:$0xff] }
0x15ce   :  { %v2726_v7 = vsel %vm343_vm6, %v2720_v5, 0.0  ;;  %v13700_v31 = vpack.c.bf16 %v2771_v29, %v2770_v28 }
0x15cf   :  { %2727 = vadd.xlane.f32.xlu0 %v2726_v7  ;;  %v2723_v8 = vsel %vm343_vm6, %v2719_v6, 0.0 }
0x15d0   :  { %2724 = vadd.xlane.f32.xlu1 %v2723_v8  ;;  %13701 = vmatprep.subr.bf16.mxu1 %v13700_v31  ;;  %v3457_v8 = vld [vmem:[%s17116_s7 + $0x248] sm:$0xff] }
0x15d1   :  { %13703 = vmatpush3.bf16.msra.mxu1 %v13700_v31 }
0x15d2   :  { %13705 = vmatprep.subr.bf16.mxu1 %v13704_v37 }
0x165c   :  { %v2728_v9 = vpop.xlane.xlu0 %2727 }
0x165d   :  { %v2730_v10 = vmul.f32 0.03125, %v2728_v9  ;;  %v2725_v13 = vpop.xlane.xlu1 %2724  ;;  %v3458_v9 = vld [vmem:[%s17116_s7 + $0x250] sm:$0xff] }
0x165e   :  { %v2729_v14 = vmul.f32 0.03125, %v2725_v13  ;;  %v3459_v13 = vld [vmem:[%s17116_s7 + $0x258] sm:$0xff] }
0x165f   :  { %v2732_v15 = vsub.f32 %v2720_v5, %v2730_v10  ;;  %v3297_v5 = vld [vmem:[%s17116_s7 + $0x220] sm:$0xff]  ;;  %v13746_v10 = vpack.c.bf16 %v3458_v9, %v3457_v8 }
0x1660   :  { %v2731_v16 = vsub.f32 %v2719_v6, %v2729_v14  ;;  %v13734_v7 = vpack.c.bf16 %v3297_v5, %v3296_v11  ;;  %v3460_v14 = vld [vmem:[%s17116_s7 + $0x260] sm:$0xff] }
0x1661   :  { %v2734_v18 = vmul.f32 %v2732_v15, %v2732_v15 }
0x1662   :  { %v2733_v19 = vmul.f32 %v2731_v16, %v2731_v16 }
0x1663   :  { %v2738_v20 = vsel %vm343_vm6, %v2734_v18, 0.0 }
0x1664   :  { %2739 = vadd.xlane.f32.xlu0 %v2738_v20  ;;  %v2735_v21 = vsel %vm343_vm6, %v2733_v19, 0.0 }
0x1665   :  { %2736 = vadd.xlane.f32.xlu1 %v2735_v21  ;;  %v15353_v21 = vld [vmem:[%s17117_s3 + $0x8] sm:$0xff] }
0x16f1   :  { %v2740_v38 = vpop.xlane.xlu0 %2739 }
0x16f2   :  { %v2742_v39 = vmul.f32 0.03125, %v2740_v38  ;;  %v2737_v40 = vpop.xlane.xlu1 %2736 }
0x16f3   :  { %v2741_v44 = vmul.f32 0.03125, %v2737_v40 }
0x16f4   :  { %v2744_v47 = vadd.f32 1e-12, %v2742_v39 }
0x16f5   :  { %v2743_v41 = vadd.f32 1e-12, %v2741_v44 }
0x16f6   :  { %14607 = vrsqrt.f32 %v2744_v47 }
0x16f7   :  { %14609 = vrsqrt.f32 %v2743_v41 }
0x1700   :  { %v14608_v42 = vpop.eup %14607 }
0x1701   :  { %v14610_v45 = vpop.eup %14609  ;;  %v2748_v46 = vmul.f32 %v14608_v42, %v2732_v15  ;;  %v13750_v15 = vpack.c.bf16 %v3460_v14, %v3459_v13 }
0x1702   :  { %v2747_v48 = vmul.f32 %v14610_v45, %v2731_v16 }
0x1703   :  { %v2754_v50 = vmul.f32 %v11199_v43, %v2748_v46 }
0x1704   :  { %v2753_v51 = vmul.f32 %v11199_v43, %v2747_v48  ;;  %v3210_v43 = vld [vmem:[%s17114_s9 + $0xe0] sm:$0xff] }
0x1705   :  { %v15295_v55 = vadd.f32 %v11200_v49, %v2754_v50 }
0x1706   :  { %v15293_v54 = vadd.f32 %v11200_v49, %v2753_v51 }
0x1708   :  { %12432 = vmatprep.mubr.msk.f32.mxu1 %vm343_vm6, %v15293_v54  ;;  %12454 = vmatprep.mubr.msk.f32.mxu0 %vm343_vm6, %v15293_v54 }
0x1709   :  { %12433 = vmatmul.mubr.msk.f32.vlgmr.msra.gmra.mrb[26].mxu1 %vm343_vm6, %v15295_v55  ;;  %12455 = vmatmul.mubr.msk.f32.vlgmr.msra.gmra.mrb[22].mxu0 %vm343_vm6, %v15295_v55 }
0x170a   :  { %13707 = vmatpush3.bf16.msra.mxu1 %v13704_v37  ;;  %12443 = vmatprep.mubr.msk.f32.mxu1 %vm343_vm6, %v15293_v54 }
0x170b   :  { %13709 = vmatprep.subr.bf16.mxu1 %v13708_v56 }
0x170e   :  { %13711 = vmatpush3.bf16.msra.mxu1 %v13708_v56  ;;  %v13738_v56 = vpack.c.bf16 %v3379_v53, %v3378_v52 }
0x1711   :  { %12444 = vmatmul.mubr.msk.f32.vlgmr.msra.gmra.mrb[28].mxu1 %vm343_vm6, %v15295_v55 }
0x17dc   :  { %v12434_v58 = vpop.f32.mrb[26].mxu1  ;;  %v12456_v59 = vpop.f32.mrb[22].mxu0 }
0x17dd   :  { %v2849_v60 = vpop.f32.mrb[27].mxu1  ;;  %v3007_v61 = vpop.f32.mrb[23].mxu0  ;;  %v2855_v6 = vadd.f32 %v12434_v58, %v11202_v57  ;;  %v3381_v58 = vld [vmem:[%s17116_s7 + $0x240] sm:$0xff] }
0x17de   :  { %v2850_v62 = vadd.f32 %v11202_v57, %v2849_v60  ;;  %v13726_v63 = vpack.c.bf16 %v12456_v59, %v3007_v61  ;;  %v3380_v57 = vld [vmem:[%s17116_s7 + $0x238] sm:$0xff] }
0x17df   :  { %v13742_v61 = vpack.c.bf16 %v3381_v58, %v3380_v57 }
0x17e0   :  { %12461 = vmatprep.mubr.msk.f32.mxu1 %vm159_vm3, %v2850_v62  ;;  %13727 = vmatprep.subr.bf16.mxu0 %v13726_v63 }
0x17e1   :  { %13729 = vmatpush3.bf16.msra.mxu0 %v13726_v63 }
0x17e2   :  { %12471 = vmatprep.subr.mxu0 %v3210_v43 }
0x17e4   :  { %v12445_v2 = vpop.f32.mrb[28].mxu1 }
0x17e5   :  { %v2928_v3 = vpop.f32.mrb[29].mxu1 }
0x17e6   :  { %v13720_v17 = vpack.c.bf16 %v12445_v2, %v2928_v3 }
0x17e8   :  { %13722 = vmatprep.subr.msk.bf16.mxu1 %vm14950_vm7, %v13720_v17 }
0x17e9   :  { %13725 = vmatpush3.bf16.xpose.msk.msra.mxu1 %vm14950_vm7, %v13720_v17 }
0x17ea   :  { %13731 = vmatprep.subr.bf16.mxu1 %v13730_v4 }
0x17f0   :  { %12462 = vmatmul.mubr.msk.f32.vlgmr.msra.gmra.mrb[30].mxu1 %vm159_vm3, %v2855_v6 }
0x17f1   :  { %13733 = vmatpush3.bf16.msra.mxu1 %v13730_v4  ;;  %12484 = vmatprep.mubr.msk.f32.mxu1 %vm343_vm6, %v15293_v54 }
0x17f2   :  { %13735 = vmatprep.subr.bf16.mxu1 %v13734_v7 }
0x17f5   :  { %13737 = vmatpush3.bf16.msra.mxu1 %v13734_v7 }
0x17f6   :  { %13747 = vmatprep.subr.bf16.mxu1 %v13746_v10 }
0x17f8   :  { %12485 = vmatmul.mubr.msk.f32.vlgmr.msra.gmra.mrb[32].mxu1 %vm343_vm6, %v15295_v55 }
0x17f9   :  { %13749 = vmatpush3.bf16.msra.mxu1 %v13746_v10  ;;  %12506 = vmatprep.mubr.msk.f32.mxu1 %vm343_vm6, %v15293_v54 }
0x17fa   :  { %13751 = vmatprep.subr.bf16.mxu1 %v13750_v15 }
0x17fd   :  { %13753 = vmatpush3.bf16.msra.mxu1 %v13750_v15 }
0x1800   :  { %12507 = vmatmul.mubr.msk.f32.vlgmr.msra.gmra.mrb[34].mxu1 %vm343_vm6, %v15295_v55 }
0x18c3   :  { %v12463_v16 = vpop.f32.mrb[30].mxu1 }
0x18c4   :  { %v3104_v18 = vmul.f32 0.35355338, %v12463_v16  ;;  %v3094_v19 = vpop.f32.mrb[31].mxu1 }
0x18c5   :  { %v3103_v20 = vmul.f32 0.35355338, %v3094_v19 }
0x18c6   :  { %v3106_v22 = vadd.f32 %v15353_v21, %v3104_v18 }
0x18c7   :  { %v3105_v24 = vadd.f32 %v15359_v23, %v3103_v20 }
0x18c8   :  { %v3110_v25 = vsel %vm77_vm0, %v3106_v22, -inf }
0x18c9   :  { %3111 = vmax.xlane.f32.xlu0 %v3110_v25  ;;  %v3107_v26 = vsel %vm77_vm0, %v3105_v24, -inf }
0x18ca   :  { %3108 = vmax.xlane.f32.xlu1 %v3107_v26  ;;  %v3730_v26 = vld [vmem:[%s17114_s9 + $0xe8] sm:$0xff] }
0x18cb   :  { %v12486_v28 = vpop.f32.mrb[32].mxu1 }
0x18cc   :  { %v3375_v29 = vadd.f32 %v12486_v28, %v11217_v27  ;;  %v3369_v31 = vpop.f32.mrb[33].mxu1 }
0x18cd   :  { %v3370_v62 = vadd.f32 %v11217_v27, %v3369_v31  ;;  %v3816_v31 = vld [vmem:[%s17116_s7 + $0x280] sm:$0xff] }
0x18d3   :  { %v12508_v32 = vpop.f32.mrb[34].mxu1 }
0x18d4   :  { %v3527_v33 = vpop.f32.mrb[35].mxu1 }
0x18d5   :  { %v13760_v34 = vpack.c.bf16 %v12508_v32, %v3527_v33  ;;  %v3817_v32 = vld [vmem:[%s17116_s7 + $0x288] sm:$0xff] }
0x18d7   :  { %13761 = vmatprep.subr.bf16.mxu1 %v13760_v34 }
0x18d8   :  { %13763 = vmatpush3.bf16.msra.mxu1 %v13760_v34 }
0x1956   :  { %v3112_v35 = vpop.xlane.xlu0 %3111 }
0x1957   :  { %v3114_v36 = vsub.f32 %v3106_v22, %v3112_v35  ;;  %v3109_v37 = vpop.xlane.xlu1 %3108  ;;  %v3814_v22 = vld [vmem:[%s17116_s7 + $0x270] sm:$0xff] }
0x1958   :  { %v3113_v38 = vsub.f32 %v3105_v24, %v3109_v37  ;;  %v3815_v24 = vld [vmem:[%s17116_s7 + $0x278] sm:$0xff]  ;;  %v3977_v37 = vld [vmem:[%s17116_s7 + $0x2b0] sm:$0xff] }
0x1959   :  { %v3117_v39 = vmul.f32 1.442695, %v3114_v36  ;;  %v13764_v25 = vpack.c.bf16 %v3815_v24, %v3814_v22  ;;  %v13768_v36 = vpack.c.bf16 %v3817_v32, %v3816_v31  ;;  %v4250_v24 = vld [vmem:[%s17114_s9 + $0xf0] sm:$0xff] }
0x195a   :  { %v3115_v40 = vmul.f32 1.442695, %v3113_v38  ;;  %v3978_v38 = vld [vmem:[%s17116_s7 + $0x2b8] sm:$0xff] }
0x195b   :  { %14611 = vpow2.f32 %v3117_v39  ;;  %13765 = vmatprep.subr.bf16.mxu1 %v13764_v25  ;;  %v13780_v39 = vpack.c.bf16 %v3978_v38, %v3977_v37  ;;  %v4499_v38 = vld [vmem:[%s17116_s7 + $0x328] sm:$0xff] }
0x195c   :  { %14613 = vpow2.f32 %v3115_v40  ;;  %v3979_v40 = vld [vmem:[%s17116_s7 + $0x2c0] sm:$0xff] }
0x1965   :  { %v14612_v44 = vpop.eup %14611 }
0x1966   :  { %v14614_v47 = vpop.eup %14613  ;;  %v3122_v41 = vsel %vm77_vm0, %v14612_v44, 0.0 }
0x1967   :  { %3123 = vadd.xlane.f32.xlu0 %v3122_v41  ;;  %v3119_v42 = vsel %vm77_vm0, %v14614_v47, 0.0  ;;  %v3898_v41 = vld [vmem:[%s17116_s7 + $0x290] sm:$0xff] }
0x1968   :  { %3120 = vadd.xlane.f32.xlu1 %v3119_v42  ;;  %v3899_v42 = vld [vmem:[%s17116_s7 + $0x298] sm:$0xff] }
0x19f4   :  { %v3124_v45 = vpop.xlane.xlu0 %3123 }
0x19f5   :  { %14615 = vrcp.f32 %v3124_v45  ;;  %v3121_v46 = vpop.xlane.xlu1 %3120  ;;  %v3900_v45 = vld [vmem:[%s17116_s7 + $0x2a0] sm:$0xff] }
0x19f6   :  { %14617 = vrcp.f32 %v3121_v46  ;;  %v3901_v46 = vld [vmem:[%s17116_s7 + $0x2a8] sm:$0xff] }
0x19ff   :  { %v14616_v48 = vpop.eup %14615 }
0x1a00   :  { %v14618_v49 = vpop.eup %14617  ;;  %v3128_v51 = vmul.f32 %v14616_v48, %v14612_v44  ;;  %v3980_v44 = vld [vmem:[%s17116_s7 + $0x2c8] sm:$0xff] }
0x1a01   :  { %v3127_v50 = vmul.f32 %v14618_v49, %v14614_v47  ;;  %v13784_v47 = vpack.c.bf16 %v3980_v44, %v3979_v40  ;;  %v4418_v44 = vld [vmem:[%s17116_s7 + $0x2f8] sm:$0xff] }
0x1a03   :  { %12468 = vmatprep.mubr.msk.f32.mxu0 %vm77_vm0, %v3127_v50  ;;  %v13776_v50 = vpack.c.bf16 %v3901_v46, %v3900_v45 }
0x1a04   :  { %12469 = vmatmul.mubr.msk.f32.vlgmr.msra.gmra.mrb[24].mxu0 %vm77_vm0, %v3128_v51  ;;  %v11232_v51 = vld [vmem:[%s17116_s7 + $0x2d0] ss:$0 sm:$0xff] }
0x1a05   :  { %12472 = vmatpush3.msra.mxu0 %v3210_v43  ;;  %v13772_v43 = vpack.c.bf16 %v3899_v42, %v3898_v41  ;;  %v4420_v42 = vld [vmem:[%s17116_s7 + $0x308] sm:$0xff] }
0x1a06   :  { %13739 = vmatprep.subr.bf16.mxu0 %v13738_v56 }
0x1ad7   :  { %v12470_v59 = vpop.f32.mrb[24].mxu0 }
0x1ad8   :  { %v3201_v60 = vpop.f32.mrb[25].mxu0 }
0x1ad9   :  { %12473 = vmatprep.mubr.msk.f32.mxu0 %vm159_vm3, %v3201_v60 }
0x1ada   :  { %12474 = vmatmul.mubr.msk.f32.vlgmr.msra.gmra.mrb[26].mxu0 %vm159_vm3, %v12470_v59 }
0x1adb   :  { %13741 = vmatpush3.bf16.msra.mxu0 %v13738_v56  ;;  %12495 = vmatprep.mubr.msk.f32.mxu0 %vm343_vm6, %v15293_v54 }
0x1adc   :  { %13743 = vmatprep.subr.bf16.mxu0 %v13742_v61 }
0x1adf   :  { %13745 = vmatpush3.bf16.msra.mxu0 %v13742_v61 }
0x1ae2   :  { %12496 = vmatmul.mubr.msk.f32.vlgmr.msra.gmra.mrb[28].mxu0 %vm343_vm6, %v15295_v55 }
0x1ae3   :  { %12513 = vmatprep.mubr.msk.f32.mxu0 %vm159_vm3, %v3370_v62 }
0x1bb5   :  { %v12497_v63 = vpop.f32.mrb[28].mxu0 }
0x1bb6   :  { %v3448_v0 = vpop.f32.mrb[29].mxu0 }
0x1bb7   :  { %v13754_v1 = vpack.c.bf16 %v12497_v63, %v3448_v0 }
0x1bb9   :  { %13756 = vmatprep.subr.msk.bf16.mxu0 %vm14950_vm7, %v13754_v1 }
0x1bba   :  { %13759 = vmatpush3.bf16.xpose.msk.msra.mxu0 %vm14950_vm7, %v13754_v1 }
0x1bbb   :  { %12523 = vmatprep.subr.mxu0 %v3730_v26 }
0x1bc1   :  { %12514 = vmatmul.mubr.msk.f32.vlgmr.msra.gmra.mrb[30].mxu0 %vm159_vm3, %v3375_v29 }
0x1bc2   :  { %12524 = vmatpush3.msra.mxu0 %v3730_v26 }
0x1bc3   :  { %13773 = vmatprep.subr.bf16.mxu0 %v13772_v43 }
0x1c94   :  { %v12515_v2 = vpop.f32.mrb[30].mxu0 }
0x1c95   :  { %v3624_v3 = vmul.f32 0.35355338, %v12515_v2  ;;  %v3614_v17 = vpop.f32.mrb[31].mxu0 }
0x1c96   :  { %v3623_v4 = vmul.f32 0.35355338, %v3614_v17 }
0x1c97   :  { %v3626_v11 = vadd.f32 %v15353_v21, %v3624_v3 }
0x1c98   :  { %v3625_v5 = vadd.f32 %v15359_v23, %v3623_v4 }
0x1c99   :  { %v3630_v6 = vsel %vm77_vm0, %v3626_v11, -inf }
0x1c9a   :  { %3631 = vmax.xlane.f32.xlu0 %v3630_v6  ;;  %v3627_v7 = vsel %vm77_vm0, %v3625_v5, -inf }
0x1c9b   :  { %3628 = vmax.xlane.f32.xlu1 %v3627_v7 }
0x1d27   :  { %v3632_v8 = vpop.xlane.xlu0 %3631 }
0x1d28   :  { %v3634_v9 = vsub.f32 %v3626_v11, %v3632_v8  ;;  %v3629_v10 = vpop.xlane.xlu1 %3628 }
0x1d29   :  { %v3633_v13 = vsub.f32 %v3625_v5, %v3629_v10 }
0x1d2a   :  { %v3637_v14 = vmul.f32 1.442695, %v3634_v9 }
0x1d2b   :  { %v3635_v15 = vmul.f32 1.442695, %v3633_v13 }
0x1d2c   :  { %14619 = vpow2.f32 %v3637_v14 }
0x1d2d   :  { %14621 = vpow2.f32 %v3635_v15 }
0x1d36   :  { %v14620_v16 = vpop.eup %14619 }
0x1d37   :  { %v14622_v18 = vpop.eup %14621  ;;  %v3642_v19 = vsel %vm77_vm0, %v14620_v16, 0.0 }
0x1d38   :  { %3643 = vadd.xlane.f32.xlu0 %v3642_v19  ;;  %v3639_v20 = vsel %vm77_vm0, %v14622_v18, 0.0  ;;  %v4334_v19 = vld [vmem:[%s17116_s7 + $0x2d8] sm:$0xff] }
0x1d39   :  { %3640 = vadd.xlane.f32.xlu1 %v3639_v20  ;;  %v4335_v20 = vld [vmem:[%s17116_s7 + $0x2e0] sm:$0xff] }
0x1d3a   :  { %v13798_v22 = vpack.c.bf16 %v4335_v20, %v4334_v19 }
0x1dc5   :  { %v3644_v27 = vpop.xlane.xlu0 %3643 }
0x1dc6   :  { %14623 = vrcp.f32 %v3644_v27  ;;  %v3641_v28 = vpop.xlane.xlu1 %3640 }
0x1dc7   :  { %14625 = vrcp.f32 %v3641_v28  ;;  %v4336_v28 = vld [vmem:[%s17116_s7 + $0x2e8] sm:$0xff] }
0x1dd0   :  { %v14624_v29 = vpop.eup %14623 }
0x1dd1   :  { %v14626_v33 = vpop.eup %14625  ;;  %v3648_v35 = vmul.f32 %v14624_v29, %v14620_v16  ;;  %v4337_v29 = vld [vmem:[%s17116_s7 + $0x2f0] sm:$0xff] }
0x1dd2   :  { %v3647_v34 = vmul.f32 %v14626_v33, %v14622_v18 }
0x1dd4   :  { %12520 = vmatprep.mubr.msk.f32.mxu1 %vm77_vm0, %v3647_v34  ;;  %v13802_v34 = vpack.c.bf16 %v4337_v29, %v4336_v28 }
0x1dd5   :  { %12521 = vmatmul.mubr.msk.f32.vlgmr.msra.gmra.mrb[36].mxu1 %vm77_vm0, %v3648_v35  ;;  %v4497_v35 = vld [vmem:[%s17116_s7 + $0x318] sm:$0xff] }
0x1dd6   :  { %13767 = vmatpush3.bf16.msra.mxu1 %v13764_v25  ;;  %12536 = vmatprep.mubr.msk.f32.mxu1 %vm343_vm6, %v15293_v54 }
0x1dd7   :  { %13769 = vmatprep.subr.bf16.mxu1 %v13768_v36 }
0x1dda   :  { %13771 = vmatpush3.bf16.msra.mxu1 %v13768_v36  ;;  %v4498_v36 = vld [vmem:[%s17116_s7 + $0x320] sm:$0xff] }
0x1ddb   :  { %13781 = vmatprep.subr.bf16.mxu1 %v13780_v39  ;;  %v13814_v37 = vpack.c.bf16 %v4498_v36, %v4497_v35 }
0x1ddd   :  { %12537 = vmatmul.mubr.msk.f32.vlgmr.msra.gmra.mrb[38].mxu1 %vm343_vm6, %v15295_v55 }
0x1dde   :  { %13783 = vmatpush3.bf16.msra.mxu1 %v13780_v39  ;;  %12558 = vmatprep.mubr.msk.f32.mxu1 %vm343_vm6, %v15293_v54  ;;  %v4500_v39 = vld [vmem:[%s17116_s7 + $0x330] sm:$0xff] }
0x1ddf   :  { %13785 = vmatprep.subr.bf16.mxu1 %v13784_v47  ;;  %v13818_v40 = vpack.c.bf16 %v4500_v39, %v4499_v38 }
0x1de2   :  { %13787 = vmatpush3.bf16.msra.mxu1 %v13784_v47  ;;  %v4419_v47 = vld [vmem:[%s17116_s7 + $0x300] sm:$0xff] }
0x1de3   :  { %v13806_v41 = vpack.c.bf16 %v4419_v47, %v4418_v44 }
0x1de5   :  { %12559 = vmatmul.mubr.msk.f32.vlgmr.msra.gmra.mrb[40].mxu1 %vm343_vm6, %v15295_v55 }
0x1ea8   :  { %v12522_v48 = vpop.f32.mrb[36].mxu1 }
0x1ea9   :  { %v3721_v49 = vpop.f32.mrb[37].mxu1 }
0x1eaa   :  { %12525 = vmatprep.mubr.msk.f32.mxu0 %vm159_vm3, %v3721_v49  ;;  %v11247_v49 = vld [vmem:[%s17116_s7 + $0x338] ss:$0 sm:$0xff] }
0x1eab   :  { %12526 = vmatmul.mubr.msk.f32.vlgmr.msra.gmra.mrb[26].mxu0 %vm159_vm3, %v12522_v48 }
0x1eac   :  { %13775 = vmatpush3.bf16.msra.mxu0 %v13772_v43  ;;  %12547 = vmatprep.mubr.msk.f32.mxu0 %vm343_vm6, %v15293_v54  ;;  %v4421_v43 = vld [vmem:[%s17116_s7 + $0x310] sm:$0xff] }
0x1ead   :  { %13777 = vmatprep.subr.bf16.mxu0 %v13776_v50  ;;  %v13810_v48 = vpack.c.bf16 %v4421_v43, %v4420_v42  ;;  %v4895_v42 = vld [vmem:[%s17118_s10 + $0x30] sm:$0xff] }
0x1eb0   :  { %v12538_v52 = vpop.f32.mrb[38].mxu1  ;;  %13779 = vmatpush3.bf16.msra.mxu0 %v13776_v50 }
0x1eb1   :  { %v3895_v53 = vadd.f32 %v12538_v52, %v11232_v51  ;;  %v3889_v56 = vpop.f32.mrb[39].mxu1 }
0x1eb2   :  { %v3890_v57 = vadd.f32 %v11232_v51, %v3889_v56 }
0x1eb3   :  { %12548 = vmatmul.mubr.msk.f32.vlgmr.msra.gmra.mrb[32].mxu0 %vm343_vm6, %v15295_v55 }
0x1eb4   :  { %12565 = vmatprep.mubr.msk.f32.mxu0 %vm159_vm3, %v3890_v57 }
0x1eb8   :  { %v12560_v58 = vpop.f32.mrb[40].mxu1 }
0x1eb9   :  { %v4047_v59 = vpop.f32.mrb[41].mxu1 }
0x1eba   :  { %v13794_v60 = vpack.c.bf16 %v12560_v58, %v4047_v59 }
0x1ebc   :  { %13795 = vmatprep.subr.bf16.mxu1 %v13794_v60 }
0x1ebd   :  { %13797 = vmatpush3.bf16.msra.mxu1 %v13794_v60 }
0x1ebe   :  { %13799 = vmatprep.subr.bf16.mxu1 %v13798_v22 }
0x1f86   :  { %v12549_v61 = vpop.f32.mrb[32].mxu0 }
0x1f87   :  { %v3968_v62 = vpop.f32.mrb[33].mxu0 }
0x1f88   :  { %v13788_v63 = vpack.c.bf16 %v12549_v61, %v3968_v62 }
0x1f8a   :  { %13790 = vmatprep.subr.msk.bf16.mxu0 %vm14950_vm7, %v13788_v63 }
0x1f8b   :  { %13793 = vmatpush3.bf16.xpose.msk.msra.mxu0 %vm14950_vm7, %v13788_v63 }
0x1f8c   :  { %12575 = vmatprep.subr.mxu0 %v4250_v24 }
0x1f92   :  { %12566 = vmatmul.mubr.msk.f32.vlgmr.msra.gmra.mrb[34].mxu0 %vm159_vm3, %v3895_v53 }
0x1f93   :  { %12576 = vmatpush3.msra.mxu0 %v4250_v24 }
0x1f94   :  { %13807 = vmatprep.subr.bf16.mxu0 %v13806_v41 }
0x2065   :  { %v12567_v0 = vpop.f32.mrb[34].mxu0 }
0x2066   :  { %v4144_v1 = vmul.f32 0.35355338, %v12567_v0  ;;  %v4134_v2 = vpop.f32.mrb[35].mxu0 }
0x2067   :  { %v4143_v3 = vmul.f32 0.35355338, %v4134_v2 }
0x2068   :  { %v4146_v17 = vadd.f32 %v15353_v21, %v4144_v1 }
0x2069   :  { %v4145_v4 = vadd.f32 %v15359_v23, %v4143_v3 }
0x206a   :  { %v4150_v11 = vsel %vm77_vm0, %v4146_v17, -inf }
0x206b   :  { %4151 = vmax.xlane.f32.xlu0 %v4150_v11  ;;  %v4147_v5 = vsel %vm77_vm0, %v4145_v4, -inf }
0x206c   :  { %4148 = vmax.xlane.f32.xlu1 %v4147_v5 }
0x20f8   :  { %v4152_v6 = vpop.xlane.xlu0 %4151 }
0x20f9   :  { %v4154_v7 = vsub.f32 %v4146_v17, %v4152_v6  ;;  %v4149_v8 = vpop.xlane.xlu1 %4148 }
0x20fa   :  { %v4153_v9 = vsub.f32 %v4145_v4, %v4149_v8 }
0x20fb   :  { %v4157_v10 = vmul.f32 1.442695, %v4154_v7 }
0x20fc   :  { %v4155_v13 = vmul.f32 1.442695, %v4153_v9 }
0x20fd   :  { %14627 = vpow2.f32 %v4157_v10 }
0x20fe   :  { %14629 = vpow2.f32 %v4155_v13  ;;  %v4770_v13 = vld [vmem:[%s17114_s9 + $0xf8] sm:$0xff] }
0x2107   :  { %v14628_v14 = vpop.eup %14627 }
0x2108   :  { %v14630_v15 = vpop.eup %14629  ;;  %v4162_v16 = vsel %vm77_vm0, %v14628_v14, 0.0 }
0x2109   :  { %4163 = vadd.xlane.f32.xlu0 %v4162_v16  ;;  %v4159_v18 = vsel %vm77_vm0, %v14630_v15, 0.0 }
0x210a   :  { %4160 = vadd.xlane.f32.xlu1 %v4159_v18 }
0x2196   :  { %v4164_v25 = vpop.xlane.xlu0 %4163 }
0x2197   :  { %14631 = vrcp.f32 %v4164_v25  ;;  %v4161_v26 = vpop.xlane.xlu1 %4160  ;;  %v11201_v25 = vld [vmem:[%s17114_s9 + $0x100] ss:$0 sm:$0xff] }
0x2198   :  { %14633 = vrcp.f32 %v4161_v26  ;;  %v2767_v26 = vadd.f32 %v11201_v25, %v15295_v55  ;;  %v2766_v28 = vadd.f32 %v11201_v25, %v15293_v54 }
0x21a1   :  { %v14632_v27 = vpop.eup %14631 }
0x21a2   :  { %v14634_v31 = vpop.eup %14633  ;;  %v4168_v33 = vmul.f32 %v14632_v27, %v14628_v14 }
0x21a3   :  { %v4167_v32 = vmul.f32 %v14634_v31, %v14630_v15 }
0x21a5   :  { %12572 = vmatprep.mubr.msk.f32.mxu1 %vm77_vm0, %v4167_v32 }
0x21a6   :  { %12573 = vmatmul.mubr.msk.f32.vlgmr.msra.gmra.mrb[42].mxu1 %vm77_vm0, %v4168_v33 }
0x21a7   :  { %13801 = vmatpush3.bf16.msra.mxu1 %v13798_v22  ;;  %12588 = vmatprep.mubr.msk.f32.mxu1 %vm343_vm6, %v15293_v54 }
0x21a8   :  { %13803 = vmatprep.subr.bf16.mxu1 %v13802_v34 }
0x21ab   :  { %13805 = vmatpush3.bf16.msra.mxu1 %v13802_v34 }
0x21ac   :  { %13815 = vmatprep.subr.bf16.mxu1 %v13814_v37 }
0x21ae   :  { %12589 = vmatmul.mubr.msk.f32.vlgmr.msra.gmra.mrb[44].mxu1 %vm343_vm6, %v15295_v55 }
0x21af   :  { %13817 = vmatpush3.bf16.msra.mxu1 %v13814_v37  ;;  %12610 = vmatprep.mubr.msk.f32.mxu1 %vm343_vm6, %v15293_v54 }
0x21b0   :  { %13819 = vmatprep.subr.bf16.mxu1 %v13818_v40 }
0x21b3   :  { %13821 = vmatpush3.bf16.msra.mxu1 %v13818_v40 }
0x21b6   :  { %12611 = vmatmul.mubr.msk.f32.vlgmr.msra.gmra.mrb[46].mxu1 %vm343_vm6, %v15295_v55 }
0x2279   :  { %v12574_v45 = vpop.f32.mrb[42].mxu1 }
0x227a   :  { %v4241_v46 = vpop.f32.mrb[43].mxu1 }
0x227b   :  { %12577 = vmatprep.mubr.msk.f32.mxu0 %vm159_vm3, %v4241_v46  ;;  %v4897_v46 = vld [vmem:[%s17118_s10 + $0x40] sm:$0xff] }
0x227c   :  { %12578 = vmatmul.mubr.msk.f32.vlgmr.msra.gmra.mrb[26].mxu0 %vm159_vm3, %v12574_v45  ;;  %v4896_v45 = vld [vmem:[%s17118_s10 + $0x38] sm:$0xff] }
0x227d   :  { %13809 = vmatpush3.bf16.msra.mxu0 %v13806_v41  ;;  %12599 = vmatprep.mubr.msk.f32.mxu0 %vm343_vm6, %v15293_v54  ;;  %v4894_v41 = vld [vmem:[%s17118_s10 + $0x28] sm:$0xff] }
0x227e   :  { %13811 = vmatprep.subr.bf16.mxu0 %v13810_v48  ;;  %v13832_v43 = vpack.c.bf16 %v4895_v42, %v4894_v41 }
0x2281   :  { %v12590_v50 = vpop.f32.mrb[44].mxu1  ;;  %13813 = vmatpush3.bf16.msra.mxu0 %v13810_v48  ;;  %v13836_v48 = vpack.c.bf16 %v4897_v46, %v4896_v45 }
0x2282   :  { %v4415_v51 = vadd.f32 %v12590_v50, %v11247_v49  ;;  %v4409_v52 = vpop.f32.mrb[45].mxu1 }
0x2283   :  { %v4410_v53 = vadd.f32 %v11247_v49, %v4409_v52 }
0x2284   :  { %12600 = vmatmul.mubr.msk.f32.vlgmr.msra.gmra.mrb[36].mxu0 %vm343_vm6, %v15295_v55 }
0x2285   :  { %12617 = vmatprep.mubr.msk.f32.mxu0 %vm159_vm3, %v4410_v53 }
0x2289   :  { %v12612_v56 = vpop.f32.mrb[46].mxu1 }
0x228a   :  { %v4567_v57 = vpop.f32.mrb[47].mxu1 }
0x228b   :  { %v13828_v58 = vpack.c.bf16 %v12612_v56, %v4567_v57 }
0x228d   :  { %13829 = vmatprep.subr.bf16.mxu1 %v13828_v58 }
0x228e   :  { %13831 = vmatpush3.bf16.msra.mxu1 %v13828_v58  ;;  %v11262_v58 = vld [vmem:[%s17114_s9 + $0x108] ss:$0 sm:$0xff] }
0x228f   :  { %13833 = vmatprep.subr.bf16.mxu1 %v13832_v43 }
0x2357   :  { %v12601_v59 = vpop.f32.mrb[36].mxu0 }
0x2358   :  { %v4488_v60 = vpop.f32.mrb[37].mxu0 }
0x2359   :  { %v13822_v61 = vpack.c.bf16 %v12601_v59, %v4488_v60 }
0x235b   :  { %13824 = vmatprep.subr.msk.bf16.mxu0 %vm14950_vm7, %v13822_v61 }
0x235c   :  { %13827 = vmatpush3.bf16.xpose.msk.msra.mxu0 %vm14950_vm7, %v13822_v61 }
0x235d   :  { %12627 = vmatprep.subr.mxu0 %v4770_v13 }
0x2363   :  { %12618 = vmatmul.mubr.msk.f32.vlgmr.msra.gmra.mrb[38].mxu0 %vm159_vm3, %v4415_v51 }
0x2364   :  { %12628 = vmatpush3.msra.mxu0 %v4770_v13 }
0x2436   :  { %v12619_v62 = vpop.f32.mrb[38].mxu0 }
0x2437   :  { %v4664_v63 = vmul.f32 0.35355338, %v12619_v62  ;;  %v4654_v0 = vpop.f32.mrb[39].mxu0  ;;  %v11263_v62 = vld [vmem:[%s17114_s9 + $0x110] ss:$0 sm:$0xff] }
0x2438   :  { %v4663_v1 = vmul.f32 0.35355338, %v4654_v0 }
0x2439   :  { %v4666_v2 = vadd.f32 %v15353_v21, %v4664_v63 }
0x243a   :  { %v4665_v3 = vadd.f32 %v15359_v23, %v4663_v1 }
0x243b   :  { %v4670_v17 = vsel %vm77_vm0, %v4666_v2, -inf }
0x243c   :  { %4671 = vmax.xlane.f32.xlu0 %v4670_v17  ;;  %v4667_v4 = vsel %vm77_vm0, %v4665_v3, -inf  ;;  %v5003_v17 = vld [vmem:[%s17114_s9 + $0x120] sm:$0xff] }
0x243d   :  { %4668 = vmax.xlane.f32.xlu1 %v4667_v4 }
0x24c9   :  { %v4672_v11 = vpop.xlane.xlu0 %4671 }
0x24ca   :  { %v4674_v5 = vsub.f32 %v4666_v2, %v4672_v11  ;;  %v4669_v30 = vpop.xlane.xlu1 %4668  ;;  %v5004_v11 = vld [vmem:[%s17114_s9 + $0x128] sm:$0xff] }
0x24cb   :  { %v4673_v6 = vsub.f32 %v4665_v3, %v4669_v30  ;;  %v5002_v3 = vld [vmem:[%s17114_s9 + $0x118] sm:$0xff] }
0x24cc   :  { %v4677_v7 = vmul.f32 1.442695, %v4674_v5  ;;  %v13840_v4 = vpack.c.bf16 %v5003_v17, %v5002_v3  ;;  %v5005_v5 = vld [vmem:[%s17114_s9 + $0x130] sm:$0xff]  ;;  %v5006_v30 = vld [vmem:[%s17114_s9 + $0x138] sm:$0xff] }
0x24cd   :  { %v4675_v8 = vmul.f32 1.442695, %v4673_v6  ;;  %v13844_v6 = vpack.c.bf16 %v5005_v5, %v5004_v11  ;;  %v11271_v11 = vld [vmem:[%s17114_s9 + $0x168] ss:$0 sm:$0xff] }
0x24ce   :  { %14635 = vpow2.f32 %v4677_v7  ;;  %13841 = vmatprep.subr.bf16.mxu0 %v13840_v4  ;;  %v5007_v7 = vld [vmem:[%s17114_s9 + $0x140] sm:$0xff] }
0x24cf   :  { %14637 = vpow2.f32 %v4675_v8  ;;  %v13848_v8 = vpack.c.bf16 %v5007_v7, %v5006_v30  ;;  %v5246_v7 = vld [vmem:[%s17118_s10 + $0x60] sm:$0xff] }
0x24d8   :  { %v14636_v9 = vpop.eup %14635 }
0x24d9   :  { %v14638_v10 = vpop.eup %14637  ;;  %v4682_v21 = vsel %vm77_vm0, %v14636_v9, 0.0 }
0x24da   :  { %4683 = vadd.xlane.f32.xlu0 %v4682_v21  ;;  %v4679_v23 = vsel %vm77_vm0, %v14638_v10, 0.0 }
0x24db   :  { %4680 = vadd.xlane.f32.xlu1 %v4679_v23  ;;  %v11264_v23 = vld [vmem:[%s17118_s10 + $0x48] ss:$0 sm:$0xff] }
0x2567   :  { %v4684_v14 = vpop.xlane.xlu0 %4683 }
0x2568   :  { %14639 = vrcp.f32 %v4684_v14  ;;  %v4681_v15 = vpop.xlane.xlu1 %4680 }
0x2569   :  { %14641 = vrcp.f32 %v4681_v15 }
0x2572   :  { %v14640_v16 = vpop.eup %14639 }
0x2573   :  { %v14642_v18 = vpop.eup %14641  ;;  %v4688_v20 = vmul.f32 %v14640_v16, %v14636_v9  ;;  %v5008_v9 = vld [vmem:[%s17114_s9 + $0x148] sm:$0xff] }
0x2574   :  { %v4687_v19 = vmul.f32 %v14642_v18, %v14638_v10  ;;  %v5009_v10 = vld [vmem:[%s17114_s9 + $0x150] sm:$0xff] }
0x2575   :  { %v13852_v21 = vpack.c.bf16 %v5009_v10, %v5008_v9 }
0x2576   :  { %12624 = vmatprep.mubr.msk.f32.mxu1 %vm77_vm0, %v4687_v19 }
0x2577   :  { %12625 = vmatmul.mubr.msk.f32.vlgmr.msra.gmra.mrb[48].mxu1 %vm77_vm0, %v4688_v20 }
0x2578   :  { %13835 = vmatpush3.bf16.msra.mxu1 %v13832_v43 }
0x2579   :  { %13837 = vmatprep.subr.bf16.mxu1 %v13836_v48 }
0x257c   :  { %13839 = vmatpush3.bf16.msra.mxu1 %v13836_v48 }
0x264a   :  { %v12626_v22 = vpop.f32.mrb[48].mxu1 }
0x264b   :  { %v4761_v24 = vpop.f32.mrb[49].mxu1 }
0x264c   :  { %12629 = vmatprep.mubr.msk.f32.mxu0 %vm159_vm3, %v4761_v24 }
0x264d   :  { %12630 = vmatmul.mubr.msk.f32.vlgmr.msra.gmra.mrb[26].mxu0 %vm159_vm3, %v12626_v22 }
0x264e   :  { %13843 = vmatpush3.bf16.msra.mxu0 %v13840_v4 }
0x264f   :  { %13845 = vmatprep.subr.bf16.mxu0 %v13844_v6 }
0x2652   :  { %13847 = vmatpush3.bf16.msra.mxu0 %v13844_v6  ;;  %v5245_v6 = vld [vmem:[%s17118_s10 + $0x58] sm:$0xff] }
0x2653   :  { %13849 = vmatprep.subr.bf16.mxu0 %v13848_v8  ;;  %v13859_v10 = vpack.c.bf16 %v5246_v7, %v5245_v6  ;;  %v5652_v6 = vld [vmem:[%s17121_s8 + $0x80] sm:$0xff]  ;;  %v5653_v7 = vld [vmem:[%s17121_s8 + $0x88] sm:$0xff] }
0x2656   :  { %13851 = vmatpush3.bf16.msra.mxu0 %v13848_v8 }
0x2657   :  { %13853 = vmatprep.subr.bf16.mxu0 %v13852_v21 }
0x265a   :  { %13855 = vmatpush3.bf16.msra.mxu0 %v13852_v21 }
0x2720   :  { %v12631_v27 = vpop.f32.mrb[26].mxu0 }
0x2721   :  { %v14521_v29 = vadd.f32 %v12631_v27, %v2767_v26  ;;  %v4843_v31 = vpop.f32.mrb[27].mxu0 }
0x2722   :  { %v14522_v32 = vadd.f32 %v4843_v31, %v2766_v28 }
0x2723   :  { %v4859_v33 = vsel %vm343_vm6, %v14521_v29, 0.0 }
0x2724   :  { %4860 = vadd.xlane.f32.xlu0 %v4859_v33  ;;  %v4856_v34 = vsel %vm343_vm6, %v14522_v32, 0.0 }
0x2725   :  { %4857 = vadd.xlane.f32.xlu1 %v4856_v34 }
0x27b1   :  { %v4861_v35 = vpop.xlane.xlu0 %4860 }
0x27b2   :  { %v4863_v36 = vmul.f32 0.03125, %v4861_v35  ;;  %v4858_v37 = vpop.xlane.xlu1 %4857 }
0x27b3   :  { %v4862_v38 = vmul.f32 0.03125, %v4858_v37 }
0x27b4   :  { %v4865_v39 = vsub.f32 %v14521_v29, %v4863_v36 }
0x27b5   :  { %v4864_v40 = vsub.f32 %v14522_v32, %v4862_v38 }
0x27b6   :  { %v4867_v44 = vmul.f32 %v4865_v39, %v4865_v39 }
0x27b7   :  { %v4866_v55 = vmul.f32 %v4864_v40, %v4864_v40 }
0x27b8   :  { %v4871_v47 = vsel %vm343_vm6, %v4867_v44, 0.0 }
0x27b9   :  { %4872 = vadd.xlane.f32.xlu0 %v4871_v47  ;;  %v4868_v54 = vsel %vm343_vm6, %v4866_v55, 0.0 }
0x27ba   :  { %4869 = vadd.xlane.f32.xlu1 %v4868_v54 }
0x2846   :  { %v4873_v49 = vpop.xlane.xlu0 %4872 }
0x2847   :  { %v4875_v50 = vmul.f32 0.03125, %v4873_v49  ;;  %v4870_v51 = vpop.xlane.xlu1 %4869 }
0x2848   :  { %v4874_v52 = vmul.f32 0.03125, %v4870_v51 }
0x2849   :  { %v4877_v53 = vadd.f32 1e-12, %v4875_v50 }
0x284a   :  { %v4876_v56 = vadd.f32 1e-12, %v4874_v52 }
0x284b   :  { %14643 = vrsqrt.f32 %v4877_v53 }
0x284c   :  { %14645 = vrsqrt.f32 %v4876_v56 }
0x2855   :  { %v14644_v57 = vpop.eup %14643 }
0x2856   :  { %v14646_v59 = vpop.eup %14645  ;;  %v4881_v60 = vmul.f32 %v14644_v57, %v4865_v39  ;;  %v11267_v39 = vld [vmem:[%s17114_s9 + $0x158] ss:$0 sm:$0xff] }
0x2857   :  { %v4880_v61 = vmul.f32 %v14646_v59, %v4864_v40 }
0x2858   :  { %v4887_v63 = vmul.f32 %v11262_v58, %v4881_v60 }
0x2859   :  { %v4886_v0 = vmul.f32 %v11262_v58, %v4880_v61  ;;  %v14757_v58 = vmov 0.0|0.0  }
0x285a   :  { %v4893_v2 = vadd.f32 %v11263_v62, %v4887_v63  ;;  %13856 = vmatprep.subr.bf16.mxu1 %v14757_v58 }
0x285b   :  { %v4892_v1 = vadd.f32 %v11263_v62, %v4886_v0 }
0x285d   :  { %12640 = vmatprep.mubr.msk.f32.mxu1 %vm343_vm6, %v4892_v1 }
0x285e   :  { %12641 = vmatmul.mubr.msk.f32.vlgmr.msra.gmra.mrb[50].mxu1 %vm343_vm6, %v4893_v2 }
0x285f   :  { %12666 = vmatprep.mubr.msk.f32.mxu1 %vm14758_vm9, %v14756_v12 }
0x2931   :  { %v12642_v13 = vpop.f32.mrb[50].mxu1 }
0x2932   :  { %v4981_v14 = vadd.f32 %v12642_v13, %v11264_v23  ;;  %v4975_v15 = vpop.f32.mrb[51].mxu1  ;;  %v5248_v13 = vld [vmem:[%s17118_s10 + $0x70] sm:$0xff] }
0x2933   :  { %v4976_v16 = vadd.f32 %v11264_v23, %v4975_v15  ;;  %v5247_v23 = vld [vmem:[%s17118_s10 + $0x68] sm:$0xff] }
0x2934   :  { %v4987_v18 = vmul.f32 0.044715, %v4981_v14  ;;  %v4985_v36 = vmul.f32 0.5, %v4981_v14  ;;  %v13863_v15 = vpack.c.bf16 %v5248_v13, %v5247_v23 }
0x2935   :  { %v4986_v19 = vmul.f32 0.044715, %v4976_v16  ;;  %v4984_v34 = vmul.f32 0.5, %v4976_v16 }
0x2936   :  { %v4989_v20 = vmul.f32 %v4987_v18, %v4981_v14  ;;  %v5242_v18 = vld [vmem:[%s17120_s1] sm:$0xff] }
0x2937   :  { %v4988_v22 = vmul.f32 %v4986_v19, %v4976_v16  ;;  %v5243_v19 = vld [vmem:[%s17120_s1 + $0x8] sm:$0xff] }
0x2938   :  { %v4991_v24 = vmul.f32 %v4989_v20, %v4981_v14 }
0x2939   :  { %v4990_v25 = vmul.f32 %v4988_v22, %v4976_v16 }
0x293a   :  { %v4993_v26 = vadd.f32 %v4991_v24, %v4981_v14  ;;  %v5138_v14 = vld [vmem:[%s17119_s5] sm:$0x3]  ;;  %v11277_v24 = vld [vmem:[%s17118_s10 + $0x78] ss:$0 sm:$0xff] }
0x293b   :  { %v4992_v27 = vadd.f32 %v4990_v25, %v4976_v16  ;;  %v5244_v16 = vld [vmem:[%s17118_s10 + $0x50] sm:$0xff] }
0x293c   :  { %v4995_v28 = vmul.f32 0.7978846, %v4993_v26 }
0x293d   :  { %v4994_v29 = vmul.f32 0.7978846, %v4992_v27 }
0x293e   :  { %14647 = vtanh.f32 %v4995_v28 }
0x293f   :  { %14649 = vtanh.f32 %v4994_v29  ;;  %v5424_v29 = vld [vmem:[%s17118_s10 + $0x88] sm:$0xff] }
0x2948   :  { %v14648_v31 = vpop.eup %14647 }
0x2949   :  { %v14650_v32 = vpop.eup %14649  ;;  %v4999_v33 = vadd.f32 1.0, %v14648_v31 }
0x294a   :  { %v4998_v35 = vadd.f32 1.0, %v14650_v32  ;;  %v5423_v32 = vld [vmem:[%s17118_s10 + $0x80] sm:$0xff] }
0x294b   :  { %v5001_v38 = vmul.f32 %v4999_v33, %v4985_v36 }
0x294c   :  { %v5000_v37 = vmul.f32 %v4998_v35, %v4984_v34 }
0x294e   :  { %12659 = vmatprep.mubr.msk.f32.mxu0 %vm2637_vm8, %v5000_v37 }
0x294f   :  { %12660 = vmatmul.mubr.msk.f32.vlgmr.msra.gmra.mrb[40].mxu0 %vm2637_vm8, %v5001_v38 }
0x2a22   :  { %v12661_v40 = vpop.f32.mrb[40].mxu0 }
0x2a23   :  { %v5093_v44 = vadd.f32 %v12661_v40, %v11267_v39  ;;  %v5087_v55 = vpop.f32.mrb[41].mxu0 }
0x2a24   :  { %v5088_v47 = vadd.f32 %v11267_v39, %v5087_v55 }
0x2a25   :  { %v5097_v54 = vadd.f32 %v5093_v44, %v4893_v2  ;;  %v11270_v2 = vld [vmem:[%s17114_s9 + $0x160] ss:$0 sm:$0xff] }
0x2a26   :  { %v5096_v41 = vadd.f32 %v5088_v47, %v4892_v1 }
0x2a27   :  { %v5103_v42 = vsel %vm343_vm6, %v5097_v54, 0.0 }
0x2a28   :  { %5104 = vadd.xlane.f32.xlu0 %v5103_v42  ;;  %v5100_v43 = vsel %vm343_vm6, %v5096_v41, 0.0 }
0x2a29   :  { %5101 = vadd.xlane.f32.xlu1 %v5100_v43 }
0x2ab5   :  { %v5105_v45 = vpop.xlane.xlu0 %5104 }
0x2ab6   :  { %v5107_v46 = vmul.f32 0.03125, %v5105_v45  ;;  %v5102_v48 = vpop.xlane.xlu1 %5101  ;;  %v5475_v45 = vld [vmem:[%s17121_s8] sm:$0xff] }
0x2ab7   :  { %v5106_v49 = vmul.f32 0.03125, %v5102_v48 }
0x2ab8   :  { %v5109_v50 = vsub.f32 %v5097_v54, %v5107_v46  ;;  %v5476_v46 = vld [vmem:[%s17121_s8 + $0x8] sm:$0xff] }
0x2ab9   :  { %v5108_v51 = vsub.f32 %v5096_v41, %v5106_v49  ;;  %v13867_v48 = vpack.c.bf16 %v5476_v46, %v5475_v45  ;;  %v5569_v49 = vld [vmem:[%s17121_s8 + $0x40] sm:$0xff] }
0x2aba   :  { %v5111_v52 = vmul.f32 %v5109_v50, %v5109_v50 }
0x2abb   :  { %v5110_v53 = vmul.f32 %v5108_v51, %v5108_v51  ;;  %13868 = vmatprep.subr.bf16.mxu0 %v13867_v48 }
0x2abc   :  { %v5115_v56 = vsel %vm343_vm6, %v5111_v52, 0.0  ;;  %13870 = vmatpush3.bf16.msra.mxu0 %v13867_v48  ;;  %v5477_v52 = vld [vmem:[%s17121_s8 + $0x10] sm:$0xff] }
0x2abd   :  { %5116 = vadd.xlane.f32.xlu0 %v5115_v56  ;;  %v5112_v57 = vsel %vm343_vm6, %v5110_v53, 0.0  ;;  %v5478_v53 = vld [vmem:[%s17121_s8 + $0x18] sm:$0xff] }
0x2abe   :  { %5113 = vadd.xlane.f32.xlu1 %v5112_v57  ;;  %v13871_v56 = vpack.c.bf16 %v5478_v53, %v5477_v52  ;;  %v5571_v57 = vld [vmem:[%s17121_s8 + $0x50] sm:$0xff]  ;;  %v15799_v52 = vld [vmem:[%s17117_s3 + $0x18] sm:$0xff] }
0x2ac0   :  { %13872 = vmatprep.subr.bf16.mxu0 %v13871_v56 }
0x2ac1   :  { %13874 = vmatpush3.bf16.msra.mxu0 %v13871_v56 }
0x2b4a   :  { %v5117_v59 = vpop.xlane.xlu0 %5116 }
0x2b4b   :  { %v5119_v60 = vmul.f32 0.03125, %v5117_v59  ;;  %v5114_v61 = vpop.xlane.xlu1 %5113  ;;  %v5572_v59 = vld [vmem:[%s17121_s8 + $0x58] sm:$0xff] }
0x2b4c   :  { %v5118_v62 = vmul.f32 0.03125, %v5114_v61  ;;  %v5479_v61 = vld [vmem:[%s17121_s8 + $0x20] sm:$0xff] }
0x2b4d   :  { %v5121_v63 = vadd.f32 1e-12, %v5119_v60  ;;  %v13887_v60 = vpack.c.bf16 %v5572_v59, %v5571_v57  ;;  %v15804_v57 = vld [vmem:[%s17117_s3 + $0x10] sm:$0xff] }
0x2b4e   :  { %v5120_v0 = vadd.f32 1e-12, %v5118_v62  ;;  %v5480_v62 = vld [vmem:[%s17121_s8 + $0x28] sm:$0xff] }
0x2b4f   :  { %14651 = vrsqrt.f32 %v5121_v63  ;;  %v13875_v63 = vpack.c.bf16 %v5480_v62, %v5479_v61 }
0x2b50   :  { %14653 = vrsqrt.f32 %v5120_v0  ;;  %v5573_v0 = vld [vmem:[%s17121_s8 + $0x60] sm:$0xff] }
0x2b51   :  { %13876 = vmatprep.subr.bf16.mxu0 %v13875_v63 }
0x2b52   :  { %13878 = vmatpush3.bf16.msra.mxu0 %v13875_v63 }
0x2b59   :  { %v14652_v1 = vpop.eup %14651 }
0x2b5a   :  { %v14654_v3 = vpop.eup %14653  ;;  %v5125_v17 = vmul.f32 %v14652_v1, %v5109_v50  ;;  %v5570_v50 = vld [vmem:[%s17121_s8 + $0x48] sm:$0xff] }
0x2b5b   :  { %v5124_v4 = vmul.f32 %v14654_v3, %v5108_v51  ;;  %v13883_v51 = vpack.c.bf16 %v5570_v50, %v5569_v49  ;;  %v5574_v1 = vld [vmem:[%s17121_s8 + $0x68] sm:$0xff]  ;;  %v5481_v3 = vld [vmem:[%s17121_s8 + $0x30] sm:$0xff] }
0x2b5c   :  { %v5131_v5 = vmul.f32 %v11270_v2, %v5125_v17  ;;  %v5482_v17 = vld [vmem:[%s17121_s8 + $0x38] sm:$0xff] }
0x2b5d   :  { %v5130_v30 = vmul.f32 %v11270_v2, %v5124_v4  ;;  %v13891_v2 = vpack.c.bf16 %v5574_v1, %v5573_v0  ;;  %v13879_v4 = vpack.c.bf16 %v5482_v17, %v5481_v3 }
0x2b5e   :  { %v15631_v8 = vadd.f32 %v11271_v11, %v5131_v5  ;;  %v5576_v5 = vld [vmem:[%s17121_s8 + $0x78] sm:$0xff] }
0x2b5f   :  { %v15633_v9 = vadd.f32 %v11271_v11, %v5130_v30  ;;  %v5575_v11 = vld [vmem:[%s17121_s8 + $0x70] sm:$0xff]  ;;  %13880 = vmatprep.subr.bf16.mxu0 %v13879_v4 }
0x2b60   :  { %v13895_v30 = vpack.c.bf16 %v5576_v5, %v5575_v11  ;;  %13882 = vmatpush3.bf16.msra.mxu0 %v13879_v4 }
0x2b61   :  { %v13857_v21 = vpack.c.bf16 %v15631_v8, %v15633_v9 }
0x2b63   :  { %13858 = vmatpush3.bf16.msra.mxu1 %v13857_v21 }
0x2b64   :  { %13860 = vmatprep.subr.bf16.mxu1 %v13859_v10 }
0x2b66   :  { %12667 = vmatmul.mubr.msk.f32.vlgmr.msra.gmra.mrb[52].mxu1 %vm77_vm0, %v5138_v14 }
0x2b67   :  { %13862 = vmatpush3.bf16.msra.mxu1 %v13859_v10  ;;  %12677 = vmatprep.mubr.msk.f32.mxu1 %vm343_vm6, %v15633_v9  ;;  %v13899_v10 = vpack.c.bf16 %v5653_v7, %v5652_v6  ;;  %v6014_v7 = vld [vmem:[%s17121_s8 + $0xc8] sm:$0xff] }
0x2b68   :  { %13864 = vmatprep.subr.bf16.mxu1 %v13863_v15 }
0x2b69   :  { %13900 = vmatprep.subr.bf16.mxu0 %v13899_v10 }
0x2b6b   :  { %13866 = vmatpush3.bf16.msra.mxu1 %v13863_v15 }
0x2b6c   :  { %12680 = vmatprep.subr.mxu1 %v5244_v16 }
0x2b6e   :  { %12678 = vmatmul.mubr.msk.f32.vlgmr.msra.gmra.mrb[54].mxu1 %vm343_vm6, %v15631_v8 }
0x2b6f   :  { %12681 = vmatpush3.msra.mxu1 %v5244_v16  ;;  %12682 = vmatprep.mubr.msk.f32.mxu1 %vm159_vm3, %v5242_v18 }
0x2b70   :  { %13884 = vmatprep.subr.bf16.mxu1 %v13883_v51 }
0x2b76   :  { %12683 = vmatmul.mubr.msk.f32.vlgmr.msra.gmra.mrb[54].mxu1 %vm159_vm3, %v5243_v19  ;;  %v11280_v19 = vld [vmem:[%s17118_s10 + $0x90] ss:$0 sm:$0xff] }
0x2b77   :  { %13886 = vmatpush3.bf16.msra.mxu1 %v13883_v51 }
0x2b78   :  { %13888 = vmatprep.subr.bf16.mxu1 %v13887_v60 }
0x2b7b   :  { %13890 = vmatpush3.bf16.msra.mxu1 %v13887_v60 }
0x2b7c   :  { %13892 = vmatprep.subr.bf16.mxu1 %v13891_v2 }
0x2b7f   :  { %13894 = vmatpush3.bf16.msra.mxu1 %v13891_v2 }
0x2b80   :  { %13896 = vmatprep.subr.bf16.mxu1 %v13895_v30 }
0x2b83   :  { %13898 = vmatpush3.bf16.msra.mxu1 %v13895_v30 }
0x2c39   :  { %v15662_v20 = vpop.f32.mrb[52].mxu1 }
0x2c3a   :  { %v12668_v22 = vpop.f32.mrb[53].mxu1 }
0x2c49   :  { %v12684_v25 = vpop.f32.mrb[54].mxu1 }
0x2c4a   :  { %v5417_v26 = vadd.f32 %v12684_v25, %v11277_v24  ;;  %v5402_v27 = vpop.f32.mrb[55].mxu1 }
0x2c4b   :  { %v5416_v28 = vadd.f32 %v11277_v24, %v5402_v27 }
0x2c4c   :  { %v5419_v31 = vmax.f32 %v5417_v26, 0.0  ;;  %v11281_v26 = vld [vmem:[%s17118_s10 + $0x98] ss:$0 sm:$0xff] }
0x2c4d   :  { %v5418_v33 = vmax.f32 %v5416_v28, 0.0 }
0x2c4e   :  { %v5426_v34 = vadd.f32 %v5424_v29, %v5419_v31  ;;  %v5654_v29 = vld [vmem:[%s17121_s8 + $0x90] sm:$0xff]  ;;  %v5655_v31 = vld [vmem:[%s17121_s8 + $0x98] sm:$0xff] }
0x2c4f   :  { %v5425_v35 = vadd.f32 %v5423_v32, %v5418_v33 }
0x2c50   :  { %v5432_v36 = vsel %vm2637_vm8, %v5426_v34, 0.0 }
0x2c51   :  { %5433 = vadd.xlane.f32.xlu0 %v5432_v36  ;;  %v5429_v37 = vsel %vm2637_vm8, %v5425_v35, 0.0  ;;  %v5657_v36 = vld [vmem:[%s17121_s8 + $0xa8] sm:$0xff] }
0x2c52   :  { %5430 = vadd.xlane.f32.xlu1 %v5429_v37 }
0x2cde   :  { %v5434_v38 = vpop.xlane.xlu0 %5433 }
0x2cdf   :  { %v5437_v39 = vmul.f32 0.015625, %v5434_v38  ;;  %v5431_v40 = vpop.xlane.xlu1 %5430  ;;  %v5658_v38 = vld [vmem:[%s17121_s8 + $0xb0] sm:$0xff] }
0x2ce0   :  { %v5436_v44 = vmul.f32 0.015625, %v5431_v40 }
0x2ce1   :  { %v15675_v55 = vsub.f32 %v5426_v34, %v5437_v39  ;;  %v13903_v34 = vpack.c.bf16 %v5655_v31, %v5654_v29  ;;  %v5659_v39 = vld [vmem:[%s17121_s8 + $0xb8] sm:$0xff]  ;;  %v6019_v29 = vld [vmem:[%s17121_s8 + $0xf0] sm:$0xff] }
0x2ce2   :  { %v15677_v47 = vsub.f32 %v5425_v35, %v5436_v44  ;;  %v5656_v35 = vld [vmem:[%s17121_s8 + $0xa0] sm:$0xff]  ;;  %v13911_v40 = vpack.c.bf16 %v5659_v39, %v5658_v38  ;;  %v6186_v38 = vld [vmem:[%s17121_s8 + $0x150] sm:$0xff] }
0x2ce3   :  { %v5441_v54 = vmul.f32 %v15675_v55, %v15675_v55  ;;  %v13907_v37 = vpack.c.bf16 %v5657_v36, %v5656_v35  ;;  %v11283_v44 = vld [vmem:[%s17121_s8 + $0xc0] ss:$0 sm:$0xff] }
0x2ce4   :  { %v5440_v41 = vmul.f32 %v15677_v47, %v15677_v47  ;;  %v6021_v35 = vld [vmem:[%s17121_s8 + $0x100] sm:$0xff] }
0x2ce5   :  { %v5445_v42 = vsel %vm2637_vm8, %v5441_v54, 0.0 }
0x2ce6   :  { %5446 = vadd.xlane.f32.xlu0 %v5445_v42  ;;  %v5442_v43 = vsel %vm2637_vm8, %v5440_v41, 0.0 }
0x2ce7   :  { %5443 = vadd.xlane.f32.xlu1 %v5442_v43 }
0x2d73   :  { %v5447_v21 = vpop.xlane.xlu0 %5446 }
0x2d74   :  { %v5449_v23 = vmul.f32 0.015625, %v5447_v21  ;;  %v5444_v13 = vpop.xlane.xlu1 %5443 }
0x2d75   :  { %v5448_v14 = vmul.f32 0.015625, %v5444_v13  ;;  %v5930_v13 = vld [vmem:[%s17118_s10 + $0xa8] sm:$0xff] }
0x2d76   :  { %v5451_v15 = vadd.f32 1e-12, %v5449_v23  ;;  %v5929_v23 = vld [vmem:[%s17118_s10 + $0xa0] sm:$0xff] }
0x2d77   :  { %v5450_v16 = vadd.f32 1e-12, %v5448_v14  ;;  %v13925_v14 = vpack.c.bf16 %v5930_v13, %v5929_v23  ;;  %v7080_v23 = vld [vmem:[%s17121_s8 + $0x258] sm:$0xff]  ;;  %v7081_v13 = vld [vmem:[%s17121_s8 + $0x260] sm:$0xff] }
0x2d78   :  { %14655 = vrsqrt.f32 %v5451_v15 }
0x2d79   :  { %14657 = vrsqrt.f32 %v5450_v16 }
0x2d82   :  { %v14656_v18 = vpop.eup %14655 }
0x2d83   :  { %v14658_v22 = vpop.eup %14657  ;;  %v5455_v24 = vmul.f32 %v14656_v18, %v15675_v55 }
0x2d84   :  { %v5454_v25 = vmul.f32 %v14658_v22, %v15677_v47  ;;  %v6017_v22 = vld [vmem:[%s17121_s8 + $0xe0] sm:$0xff] }
0x2d85   :  { %v5461_v27 = vmul.f32 %v11280_v19, %v5455_v24 }
0x2d86   :  { %v5460_v28 = vmul.f32 %v11280_v19, %v5454_v25  ;;  %v6016_v19 = vld [vmem:[%s17121_s8 + $0xd8] sm:$0xff] }
0x2d87   :  { %v15755_v33 = vadd.f32 %v11281_v26, %v5461_v27  ;;  %v13933_v27 = vpack.c.bf16 %v6017_v22, %v6016_v19  ;;  %v7084_v19 = vld [vmem:[%s17121_s8 + $0x278] sm:$0xff]  ;;  %v7085_v22 = vld [vmem:[%s17121_s8 + $0x280] sm:$0xff] }
0x2d88   :  { %v15753_v32 = vadd.f32 %v11281_v26, %v5460_v28  ;;  %v6018_v28 = vld [vmem:[%s17121_s8 + $0xe8] sm:$0xff] }
0x2d89   :  { %v13937_v31 = vpack.c.bf16 %v6019_v29, %v6018_v28  ;;  %v7251_v28 = vld [vmem:[%s17121_s8 + $0x2d8] sm:$0xff]  ;;  %v7252_v29 = vld [vmem:[%s17121_s8 + $0x2e0] sm:$0xff] }
0x2d8a   :  { %12701 = vmatprep.mubr.msk.f32.mxu0 %vm2637_vm8, %v15753_v32  ;;  %12720 = vmatprep.mubr.msk.f32.mxu1 %vm2637_vm8, %v15753_v32 }
0x2d8b   :  { %12702 = vmatmul.mubr.msk.f32.vlgmr.msra.gmra.mrb[42].mxu0 %vm2637_vm8, %v15755_v33  ;;  %12721 = vmatmul.mubr.msk.f32.vlgmr.msra.gmra.mrb[56].mxu1 %vm2637_vm8, %v15755_v33 }
0x2d8c   :  { %13902 = vmatpush3.bf16.msra.mxu0 %v13899_v10  ;;  %12739 = vmatprep.mubr.msk.f32.mxu0 %vm2637_vm8, %v15753_v32  ;;  %v6015_v10 = vld [vmem:[%s17121_s8 + $0xd0] sm:$0xff] }
0x2d8d   :  { %13904 = vmatprep.subr.bf16.mxu0 %v13903_v34  ;;  %v13929_v21 = vpack.c.bf16 %v6015_v10, %v6014_v7  ;;  %v6724_v7 = vld [vmem:[%s17121_s8 + $0x240] sm:$0xff]  ;;  %v6725_v10 = vld [vmem:[%s17121_s8 + $0x248] sm:$0xff] }
0x2d90   :  { %13906 = vmatpush3.bf16.msra.mxu0 %v13903_v34  ;;  %v6020_v34 = vld [vmem:[%s17121_s8 + $0xf8] sm:$0xff] }
0x2d91   :  { %13908 = vmatprep.subr.bf16.mxu0 %v13907_v37  ;;  %v13941_v36 = vpack.c.bf16 %v6021_v35, %v6020_v34  ;;  %v7253_v34 = vld [vmem:[%s17121_s8 + $0x2e8] sm:$0xff]  ;;  %v7254_v35 = vld [vmem:[%s17121_s8 + $0x2f0] sm:$0xff] }
0x2d94   :  { %13910 = vmatpush3.bf16.msra.mxu0 %v13907_v37  ;;  %v6185_v37 = vld [vmem:[%s17121_s8 + $0x148] sm:$0xff] }
0x2d95   :  { %13912 = vmatprep.subr.bf16.mxu0 %v13911_v40  ;;  %v13961_v39 = vpack.c.bf16 %v6186_v38, %v6185_v37  ;;  %v7255_v37 = vld [vmem:[%s17121_s8 + $0x2f8] sm:$0xff]  ;;  %v7256_v38 = vld [vmem:[%s17121_s8 + $0x300] sm:$0xff] }
0x2d98   :  { %13914 = vmatpush3.bf16.msra.mxu0 %v13911_v40  ;;  %v6187_v40 = vld [vmem:[%s17121_s8 + $0x158] sm:$0xff] }
0x2d99   :  { %13926 = vmatprep.subr.bf16.mxu0 %v13925_v14 }
0x2d9b   :  { %12740 = vmatmul.mubr.msk.f32.vlgmr.msra.gmra.mrb[44].mxu0 %vm2637_vm8, %v15755_v33 }
0x2d9c   :  { %13928 = vmatpush3.bf16.msra.mxu0 %v13925_v14  ;;  %v14053_v14 = vpack.c.bf16 %v7081_v13, %v7080_v23 }
0x2e5e   :  { %v12703_v55 = vpop.f32.mrb[42].mxu0  ;;  %v12722_v47 = vpop.f32.mrb[56].mxu1 }
0x2e5f   :  { %v5560_v54 = vpop.f32.mrb[43].mxu0  ;;  %v5643_v41 = vpop.f32.mrb[57].mxu1  ;;  %v5566_v46 = vadd.f32 %v12703_v55, %v11283_v44 }
0x2e60   :  { %v5561_v43 = vadd.f32 %v11283_v44, %v5560_v54  ;;  %v13915_v45 = vpack.c.bf16 %v12722_v47, %v5643_v41  ;;  %v6188_v44 = vld [vmem:[%s17121_s8 + $0x160] sm:$0xff]  ;;  %v6189_v47 = vld [vmem:[%s17121_s8 + $0x168] sm:$0xff]  ;;  %v6190_v54 = vld [vmem:[%s17121_s8 + $0x170] sm:$0xff] }
0x2e61   :  { %v13965_v55 = vpack.c.bf16 %v6188_v44, %v6187_v40  ;;  %v13969_v41 = vpack.c.bf16 %v6190_v54, %v6189_v47  ;;  %v7257_v40 = vld [vmem:[%s17121_s8 + $0x308] sm:$0xff]  ;;  %v7258_v44 = vld [vmem:[%s17121_s8 + $0x310] sm:$0xff] }
0x2e62   :  { %13917 = vmatprep.subr.msk.bf16.mxu1 %vm15786_vm10, %v13915_v45  ;;  %12746 = vmatprep.mubr.msk.f32.mxu1 %vm77_vm0, %v5561_v43  ;;  %v6191_v43 = vld [vmem:[%s17121_s8 + $0x178] sm:$0xff]  ;;  %v6103_v47 = vld [vmem:[%s17121_s8 + $0x110] sm:$0xff] }
0x2e63   :  { %13920 = vmatpush3.bf16.xpose.msk.msra.mxu1 %vm15786_vm10, %v13915_v45  ;;  %v6192_v45 = vld [vmem:[%s17121_s8 + $0x180] sm:$0xff] }
0x2e6a   :  { %12747 = vmatmul.mubr.msk.f32.vlgmr.msra.gmra.mrb[58].mxu1 %vm77_vm0, %v5566_v46  ;;  %v13973_v46 = vpack.c.bf16 %v6192_v45, %v6191_v43  ;;  %v6104_v43 = vld [vmem:[%s17121_s8 + $0x118] sm:$0xff]  ;;  %v6105_v45 = vld [vmem:[%s17121_s8 + $0x120] sm:$0xff] }
0x2e6e   :  { %v12741_v48 = vpop.f32.mrb[44].mxu0 }
0x2e6f   :  { %v5726_v49 = vpop.f32.mrb[45].mxu0 }
0x2e70   :  { %v13921_v50 = vpack.c.bf16 %v12741_v48, %v5726_v49  ;;  %v6547_v48 = vld [vmem:[%s17121_s8 + $0x190] sm:$0xff]  ;;  %v6548_v49 = vld [vmem:[%s17121_s8 + $0x198] sm:$0xff] }
0x2e72   :  { %13922 = vmatprep.subr.bf16.mxu1 %v13921_v50 }
0x2e73   :  { %13924 = vmatpush3.bf16.msra.mxu1 %v13921_v50  ;;  %v13991_v50 = vpack.c.bf16 %v6548_v49, %v6547_v48  ;;  %v13949_v49 = vpack.c.bf16 %v6105_v45, %v6104_v43  ;;  %v6462_v43 = vld [vmem:[%s17118_s10 + $0xb0] sm:$0xff]  ;;  %v6463_v45 = vld [vmem:[%s17118_s10 + $0xb8] sm:$0xff] }
0x2e74   :  { %13930 = vmatprep.subr.bf16.mxu1 %v13929_v21 }
0x2f3d   :  { %v12748_v51 = vpop.f32.mrb[58].mxu1 }
0x2f3e   :  { %v5823_v53 = vmul.f32 0.25, %v12748_v51  ;;  %v5813_v56 = vpop.f32.mrb[59].mxu1  ;;  %v6549_v51 = vld [vmem:[%s17121_s8 + $0x1a0] sm:$0xff] }
0x2f3f   :  { %v5822_v59 = vmul.f32 0.25, %v5813_v56 }
0x2f40   :  { %v5825_v60 = vadd.f32 %v15799_v52, %v5823_v53  ;;  %v6550_v53 = vld [vmem:[%s17121_s8 + $0x1a8] sm:$0xff] }
0x2f41   :  { %v5824_v61 = vadd.f32 %v15804_v57, %v5822_v59  ;;  %v13995_v56 = vpack.c.bf16 %v6550_v53, %v6549_v51  ;;  %v6551_v59 = vld [vmem:[%s17121_s8 + $0x1b0] sm:$0xff] }
0x2f42   :  { %v5829_v62 = vsel %vm77_vm0, %v5825_v60, -inf  ;;  %v6107_v51 = vld [vmem:[%s17121_s8 + $0x130] sm:$0xff] }
0x2f43   :  { %5830 = vmax.xlane.f32.xlu0 %v5829_v62  ;;  %v5826_v63 = vsel %vm77_vm0, %v5824_v61, -inf  ;;  %v6553_v62 = vld [vmem:[%s17121_s8 + $0x1c0] sm:$0xff] }
0x2f44   :  { %5827 = vmax.xlane.f32.xlu1 %v5826_v63  ;;  %v6554_v63 = vld [vmem:[%s17121_s8 + $0x1c8] sm:$0xff] }
0x2fd0   :  { %v5831_v0 = vpop.xlane.xlu0 %5830 }
0x2fd1   :  { %v5833_v1 = vsub.f32 %v5825_v60, %v5831_v0  ;;  %v5828_v2 = vpop.xlane.xlu1 %5827  ;;  %v6552_v60 = vld [vmem:[%s17121_s8 + $0x1b8] sm:$0xff]  ;;  %v14003_v0 = vpack.c.bf16 %v6554_v63, %v6553_v62 }
0x2fd2   :  { %v5832_v3 = vsub.f32 %v5824_v61, %v5828_v2  ;;  %v13999_v61 = vpack.c.bf16 %v6552_v60, %v6551_v59  ;;  %v6719_v2 = vld [vmem:[%s17121_s8 + $0x218] sm:$0xff]  ;;  %v6109_v59 = vld [vmem:[%s17121_s8 + $0x140] sm:$0xff] }
0x2fd3   :  { %v5836_v17 = vmul.f32 1.442695, %v5833_v1  ;;  %v6718_v1 = vld [vmem:[%s17121_s8 + $0x210] sm:$0xff] }
0x2fd4   :  { %v5834_v4 = vmul.f32 1.442695, %v5832_v3  ;;  %v14023_v3 = vpack.c.bf16 %v6719_v2, %v6718_v1 }
0x2fd5   :  { %14659 = vpow2.f32 %v5836_v17  ;;  %v6720_v17 = vld [vmem:[%s17121_s8 + $0x220] sm:$0xff] }
0x2fd6   :  { %14661 = vpow2.f32 %v5834_v4  ;;  %v6721_v4 = vld [vmem:[%s17121_s8 + $0x228] sm:$0xff] }
0x2fdf   :  { %v14660_v11 = vpop.eup %14659 }
0x2fe0   :  { %v14662_v5 = vpop.eup %14661  ;;  %v5841_v30 = vsel %vm77_vm0, %v14660_v11, 0.0 }
0x2fe1   :  { %5842 = vadd.xlane.f32.xlu0 %v5841_v30  ;;  %v5838_v6 = vsel %vm77_vm0, %v14662_v5, 0.0  ;;  %v6723_v30 = vld [vmem:[%s17121_s8 + $0x238] sm:$0xff] }
0x2fe2   :  { %5839 = vadd.xlane.f32.xlu1 %v5838_v6 }
0x306e   :  { %v5843_v15 = vpop.xlane.xlu0 %5842 }
0x306f   :  { %14663 = vrcp.f32 %v5843_v15  ;;  %v5840_v16 = vpop.xlane.xlu1 %5839  ;;  %v7082_v15 = vld [vmem:[%s17121_s8 + $0x268] sm:$0xff] }
0x3070   :  { %14665 = vrcp.f32 %v5840_v16  ;;  %v7083_v16 = vld [vmem:[%s17121_s8 + $0x270] sm:$0xff] }
0x3079   :  { %v14664_v18 = vpop.eup %14663 }
0x307a   :  { %v14666_v24 = vpop.eup %14665  ;;  %v5847_v26 = vmul.f32 %v14664_v18, %v14660_v11  ;;  %v14027_v11 = vpack.c.bf16 %v6721_v4, %v6720_v17  ;;  %v14057_v18 = vpack.c.bf16 %v7083_v16, %v7082_v15  ;;  %v16025_v4 = vld [vmem:[%s17121_s8 + $0x250] ss:$0 sm:$0xff] }
0x307b   :  { %v5846_v25 = vmul.f32 %v14666_v24, %v14662_v5  ;;  %v6722_v5 = vld [vmem:[%s17121_s8 + $0x230] sm:$0xff]  ;;  %v14061_v24 = vpack.c.bf16 %v7085_v22, %v7084_v19 }
0x307c   :  { %v14031_v6 = vpack.c.bf16 %v6723_v30, %v6722_v5 }
0x307d   :  { %12753 = vmatprep.mubr.msk.f32.mxu1 %vm77_vm0, %v5846_v25  ;;  %v7086_v25 = vld [vmem:[%s17121_s8 + $0x288] sm:$0xff] }
0x307e   :  { %12754 = vmatmul.mubr.msk.f32.vlgmr.msra.gmra.mrb[60].mxu1 %vm77_vm0, %v5847_v26  ;;  %v7087_v26 = vld [vmem:[%s17121_s8 + $0x290] sm:$0xff] }
0x307f   :  { %13932 = vmatpush3.bf16.msra.mxu1 %v13929_v21  ;;  %12779 = vmatprep.mubr.msk.f32.mxu1 %vm2637_vm8, %v15753_v32  ;;  %v14035_v21 = vpack.c.bf16 %v6725_v10, %v6724_v7 }
0x3080   :  { %13934 = vmatprep.subr.bf16.mxu1 %v13933_v27 }
0x3083   :  { %13936 = vmatpush3.bf16.msra.mxu1 %v13933_v27  ;;  %v14065_v27 = vpack.c.bf16 %v7087_v26, %v7086_v25 }
0x3084   :  { %13938 = vmatprep.subr.bf16.mxu1 %v13937_v31 }
0x3087   :  { %13940 = vmatpush3.bf16.msra.mxu1 %v13937_v31  ;;  %v14085_v31 = vpack.c.bf16 %v7252_v29, %v7251_v28 }
0x3088   :  { %13942 = vmatprep.subr.bf16.mxu1 %v13941_v36 }
0x308b   :  { %13944 = vmatpush3.bf16.msra.mxu1 %v13941_v36  ;;  %v14089_v36 = vpack.c.bf16 %v7254_v35, %v7253_v34 }
0x308c   :  { %13962 = vmatprep.subr.bf16.mxu1 %v13961_v39 }
0x308e   :  { %12780 = vmatmul.mubr.msk.f32.vlgmr.msra.gmra.mrb[62].mxu1 %vm2637_vm8, %v15755_v33 }
0x308f   :  { %13964 = vmatpush3.bf16.msra.mxu1 %v13961_v39  ;;  %12817 = vmatprep.mubr.msk.f32.mxu1 %vm2637_vm8, %v15753_v32  ;;  %v14093_v39 = vpack.c.bf16 %v7256_v38, %v7255_v37 }
0x3090   :  { %13966 = vmatprep.subr.bf16.mxu1 %v13965_v55 }
0x3093   :  { %13968 = vmatpush3.bf16.msra.mxu1 %v13965_v55  ;;  %v6102_v55 = vld [vmem:[%s17121_s8 + $0x108] sm:$0xff] }
0x3094   :  { %13970 = vmatprep.subr.bf16.mxu1 %v13969_v41  ;;  %v13945_v54 = vpack.c.bf16 %v6103_v47, %v6102_v55 }
0x3096   :  { %13946 = vmatprep.subr.bf16.mxu0 %v13945_v54 }
0x3097   :  { %13972 = vmatpush3.bf16.msra.mxu1 %v13969_v41  ;;  %v14097_v41 = vpack.c.bf16 %v7258_v44, %v7257_v40 }
0x3098   :  { %13974 = vmatprep.subr.bf16.mxu1 %v13973_v46 }
0x309b   :  { %13976 = vmatpush3.bf16.msra.mxu1 %v13973_v46 }
0x309c   :  { %13992 = vmatprep.subr.bf16.mxu1 %v13991_v50 }
0x309e   :  { %12818 = vmatmul.mubr.msk.f32.vlgmr.msra.gmra.mrb[64].mxu1 %vm2637_vm8, %v15755_v33 }
0x309f   :  { %13994 = vmatpush3.bf16.msra.mxu1 %v13991_v50  ;;  %12857 = vmatprep.mubr.msk.f32.mxu1 %vm2637_vm8, %v15753_v32  ;;  %v6106_v50 = vld [vmem:[%s17121_s8 + $0x128] sm:$0xff] }
0x30a0   :  { %13996 = vmatprep.subr.bf16.mxu1 %v13995_v56  ;;  %v13953_v53 = vpack.c.bf16 %v6107_v51, %v6106_v50 }
0x30a3   :  { %13998 = vmatpush3.bf16.msra.mxu1 %v13995_v56  ;;  %v6108_v56 = vld [vmem:[%s17121_s8 + $0x138] sm:$0xff] }
0x30a4   :  { %14000 = vmatprep.subr.bf16.mxu1 %v13999_v61  ;;  %v13957_v60 = vpack.c.bf16 %v6109_v59, %v6108_v56  ;;  %v6635_v59 = vld [vmem:[%s17121_s8 + $0x1d0] sm:$0xff] }
0x30a7   :  { %14002 = vmatpush3.bf16.msra.mxu1 %v13999_v61  ;;  %v11298_v61 = vld [vmem:[%s17121_s8 + $0x188] ss:$0 sm:$0xff] }
0x30a8   :  { %14004 = vmatprep.subr.bf16.mxu1 %v14003_v0 }
0x30ab   :  { %14006 = vmatpush3.bf16.msra.mxu1 %v14003_v0 }
0x30ac   :  { %14024 = vmatprep.subr.bf16.mxu1 %v14023_v3 }
0x30ae   :  { %12858 = vmatmul.mubr.msk.f32.vlgmr.msra.gmra.mrb[66].mxu1 %vm2637_vm8, %v15755_v33 }
0x30af   :  { %14026 = vmatpush3.bf16.msra.mxu1 %v14023_v3  ;;  %12895 = vmatprep.mubr.msk.f32.mxu1 %vm2637_vm8, %v15753_v32 }
0x30b0   :  { %14028 = vmatprep.subr.bf16.mxu1 %v14027_v11 }
0x30b3   :  { %14030 = vmatpush3.bf16.msra.mxu1 %v14027_v11 }
0x30b4   :  { %14032 = vmatprep.subr.bf16.mxu1 %v14031_v6 }
0x30b7   :  { %14034 = vmatpush3.bf16.msra.mxu1 %v14031_v6 }
0x30b8   :  { %14036 = vmatprep.subr.bf16.mxu1 %v14035_v21 }
0x30bb   :  { %14038 = vmatpush3.bf16.msra.mxu1 %v14035_v21  ;;  %v16037_v21 = vld [vmem:[%s17121_s8 + $0x318] ss:$0 sm:$0xff] }
0x30bc   :  { %14054 = vmatprep.subr.bf16.mxu1 %v14053_v14 }
0x30be   :  { %12896 = vmatmul.mubr.msk.f32.vlgmr.msra.gmra.mrb[68].mxu1 %vm2637_vm8, %v15755_v33 }
0x30bf   :  { %14056 = vmatpush3.bf16.msra.mxu1 %v14053_v14  ;;  %12935 = vmatprep.mubr.msk.f32.mxu1 %vm2637_vm8, %v15753_v32 }
0x30c0   :  { %14058 = vmatprep.subr.bf16.mxu1 %v14057_v18 }
0x30c3   :  { %14060 = vmatpush3.bf16.msra.mxu1 %v14057_v18 }
0x30c4   :  { %14062 = vmatprep.subr.bf16.mxu1 %v14061_v24 }
0x30c7   :  { %14064 = vmatpush3.bf16.msra.mxu1 %v14061_v24 }
0x30c8   :  { %14066 = vmatprep.subr.bf16.mxu1 %v14065_v27 }
0x30cb   :  { %14068 = vmatpush3.bf16.msra.mxu1 %v14065_v27 }
0x30cc   :  { %14086 = vmatprep.subr.bf16.mxu1 %v14085_v31 }
0x30ce   :  { %12936 = vmatmul.mubr.msk.f32.vlgmr.msra.gmra.mrb[70].mxu1 %vm2637_vm8, %v15755_v33 }
0x30cf   :  { %14088 = vmatpush3.bf16.msra.mxu1 %v14085_v31  ;;  %12973 = vmatprep.mubr.msk.f32.mxu1 %vm2637_vm8, %v15753_v32 }
0x30d0   :  { %14090 = vmatprep.subr.bf16.mxu1 %v14089_v36 }
0x30d3   :  { %14092 = vmatpush3.bf16.msra.mxu1 %v14089_v36 }
0x30d4   :  { %14094 = vmatprep.subr.bf16.mxu1 %v14093_v39 }
0x30d7   :  { %14096 = vmatpush3.bf16.msra.mxu1 %v14093_v39 }
0x30d8   :  { %14098 = vmatprep.subr.bf16.mxu1 %v14097_v41 }
0x30db   :  { %14100 = vmatpush3.bf16.msra.mxu1 %v14097_v41 }
0x30de   :  { %12974 = vmatmul.mubr.msk.f32.vlgmr.msra.gmra.mrb[72].mxu1 %vm2637_vm8, %v15755_v33 }
0x3151   :  { %v12755_v46 = vpop.f32.mrb[60].mxu1 }
0x3152   :  { %v5920_v48 = vpop.f32.mrb[61].mxu1 }
0x3153   :  { %12760 = vmatprep.mubr.msk.f32.mxu0 %vm77_vm0, %v5920_v48 }
0x3154   :  { %12761 = vmatmul.mubr.msk.f32.vlgmr.msra.gmra.mrb[46].mxu0 %vm77_vm0, %v12755_v46  ;;  %v13987_v46 = vpack.c.bf16 %v6463_v45, %v6462_v43 }
0x3155   :  { %13948 = vmatpush3.bf16.msra.mxu0 %v13945_v54  ;;  %12798 = vmatprep.mubr.msk.f32.mxu0 %vm2637_vm8, %v15753_v32 }
0x3156   :  { %13950 = vmatprep.subr.bf16.mxu0 %v13949_v49 }
0x3159   :  { %13952 = vmatpush3.bf16.msra.mxu0 %v13949_v49 }
0x315a   :  { %13954 = vmatprep.subr.bf16.mxu0 %v13953_v53 }
0x315d   :  { %13956 = vmatpush3.bf16.msra.mxu0 %v13953_v53 }
0x315e   :  { %13958 = vmatprep.subr.bf16.mxu0 %v13957_v60 }
0x3161   :  { %v12781_v62 = vpop.f32.mrb[62].mxu1  ;;  %13960 = vmatpush3.bf16.msra.mxu0 %v13957_v60  ;;  %v6636_v60 = vld [vmem:[%s17121_s8 + $0x1d8] sm:$0xff] }
0x3162   :  { %v6099_v63 = vadd.f32 %v12781_v62, %v11298_v61  ;;  %v6093_v0 = vpop.f32.mrb[63].mxu1  ;;  %v6637_v62 = vld [vmem:[%s17121_s8 + $0x1e0] sm:$0xff] }
0x3163   :  { %v6094_v1 = vadd.f32 %v11298_v61, %v6093_v0  ;;  %v14007_v61 = vpack.c.bf16 %v6636_v60, %v6635_v59 }
0x3164   :  { %12799 = vmatmul.mubr.msk.f32.vlgmr.msra.gmra.mrb[48].mxu0 %vm2637_vm8, %v15755_v33 }
0x3165   :  { %12824 = vmatprep.mubr.msk.f32.mxu0 %vm77_vm0, %v6094_v1 }
0x3171   :  { %v12819_v2 = vpop.f32.mrb[64].mxu1 }
0x3172   :  { %v6259_v3 = vpop.f32.mrb[65].mxu1 }
0x3173   :  { %v13983_v17 = vpack.c.bf16 %v12819_v2, %v6259_v3  ;;  %v6639_v3 = vld [vmem:[%s17121_s8 + $0x1f0] sm:$0xff] }
0x3181   :  { %v12859_v11 = vpop.f32.mrb[66].mxu1 }
0x3182   :  { %v16028_v5 = vadd.f32 %v12859_v11, %v16025_v4  ;;  %v16030_v30 = vpop.f32.mrb[67].mxu1 }
0x3191   :  { %v12897_v6 = vpop.f32.mrb[68].mxu1 }
0x3192   :  { %v6792_v7 = vpop.f32.mrb[69].mxu1 }
0x3193   :  { %v16032_v10 = vpack.c.bf16 %v12897_v6, %v6792_v7  ;;  %v6641_v6 = vld [vmem:[%s17121_s8 + $0x200] sm:$0xff]  ;;  %v6642_v7 = vld [vmem:[%s17121_s8 + $0x208] sm:$0xff] }
0x31a1   :  { %v12937_v23 = vpop.f32.mrb[70].mxu1 }
0x31a2   :  { %v16040_v13 = vadd.f32 %v12937_v23, %v16037_v21  ;;  %v16042_v14 = vpop.f32.mrb[71].mxu1  ;;  %v14019_v23 = vpack.c.bf16 %v6642_v7, %v6641_v6 }
0x31b1   :  { %v12975_v15 = vpop.f32.mrb[72].mxu1 }
0x31b2   :  { %v7325_v16 = vpop.f32.mrb[73].mxu1 }
0x31b3   :  { %v16044_v18 = vpack.c.bf16 %v12975_v15, %v7325_v16  ;;  %v6627_v15 = vadd.f32 %v16025_v4, %v16030_v30 }
0x3237   :  { %v12800_v19 = vpop.f32.mrb[48].mxu0 }
0x3238   :  { %v6176_v22 = vpop.f32.mrb[49].mxu0 }
0x3239   :  { %v13977_v24 = vpack.c.bf16 %v12800_v19, %v6176_v22 }
0x323b   :  { %13979 = vmatprep.subr.msk.bf16.mxu0 %vm15786_vm10, %v13977_v24 }
0x323c   :  { %13982 = vmatpush3.bf16.xpose.msk.msra.mxu0 %vm15786_vm10, %v13977_v24 }
0x323d   :  { %13984 = vmatprep.subr.bf16.mxu0 %v13983_v17 }
0x3243   :  { %12825 = vmatmul.mubr.msk.f32.vlgmr.msra.gmra.mrb[50].mxu0 %vm77_vm0, %v6099_v63  ;;  %v6638_v63 = vld [vmem:[%s17121_s8 + $0x1e8] sm:$0xff] }
0x3244   :  { %13986 = vmatpush3.bf16.msra.mxu0 %v13983_v17  ;;  %v14011_v2 = vpack.c.bf16 %v6638_v63, %v6637_v62  ;;  %v6640_v17 = vld [vmem:[%s17121_s8 + $0x1f8] sm:$0xff]  ;;  %v7173_v63 = vld [vmem:[%s17121_s8 + $0x2c0] sm:$0xff] }
0x3245   :  { %13988 = vmatprep.subr.bf16.mxu0 %v13987_v46  ;;  %v14015_v11 = vpack.c.bf16 %v6640_v17, %v6639_v3  ;;  %v7172_v62 = vld [vmem:[%s17121_s8 + $0x2b8] sm:$0xff]  ;;  %v7160_v17 = vadd.f32 %v16037_v21, %v16042_v14 }
0x3316   :  { %v12826_v25 = vpop.f32.mrb[50].mxu0 }
0x3317   :  { %v6356_v26 = vmul.f32 0.25, %v12826_v25  ;;  %v6346_v27 = vpop.f32.mrb[51].mxu0 }
0x3318   :  { %v6355_v28 = vmul.f32 0.25, %v6346_v27 }
0x3319   :  { %v6358_v29 = vadd.f32 %v15799_v52, %v6356_v26 }
0x331a   :  { %v6357_v31 = vadd.f32 %v15804_v57, %v6355_v28 }
0x331b   :  { %v6362_v34 = vsel %vm77_vm0, %v6358_v29, -inf }
0x331c   :  { %6363 = vmax.xlane.f32.xlu0 %v6362_v34  ;;  %v6359_v35 = vsel %vm77_vm0, %v6357_v31, -inf }
0x331d   :  { %6360 = vmax.xlane.f32.xlu1 %v6359_v35 }
0x33a9   :  { %v6364_v36 = vpop.xlane.xlu0 %6363 }
0x33aa   :  { %v6366_v37 = vsub.f32 %v6358_v29, %v6364_v36  ;;  %v6361_v38 = vpop.xlane.xlu1 %6360 }
0x33ab   :  { %v6365_v39 = vsub.f32 %v6357_v31, %v6361_v38 }
0x33ac   :  { %v6369_v40 = vmul.f32 1.442695, %v6366_v37 }
0x33ad   :  { %v6367_v44 = vmul.f32 1.442695, %v6365_v39 }
0x33ae   :  { %14667 = vpow2.f32 %v6369_v40 }
0x33af   :  { %14669 = vpow2.f32 %v6367_v44  ;;  %v6995_v44 = vld [vmem:[%s17118_s10 + $0xc0] sm:$0xff] }
0x33b8   :  { %v14668_v55 = vpop.eup %14667 }
0x33b9   :  { %v14670_v47 = vpop.eup %14669  ;;  %v6374_v54 = vsel %vm77_vm0, %v14668_v55, 0.0 }
0x33ba   :  { %6375 = vadd.xlane.f32.xlu0 %v6374_v54  ;;  %v6371_v41 = vsel %vm77_vm0, %v14670_v47, 0.0 }
0x33bb   :  { %6372 = vadd.xlane.f32.xlu1 %v6371_v41 }
0x3447   :  { %v6376_v48 = vpop.xlane.xlu0 %6375 }
0x3448   :  { %14671 = vrcp.f32 %v6376_v48  ;;  %v6373_v49 = vpop.xlane.xlu1 %6372 }
0x3449   :  { %14673 = vrcp.f32 %v6373_v49  ;;  %v7168_v49 = vld [vmem:[%s17121_s8 + $0x298] sm:$0xff] }
0x3452   :  { %v14672_v50 = vpop.eup %14671 }
0x3453   :  { %v14674_v51 = vpop.eup %14673  ;;  %v6380_v56 = vmul.f32 %v14672_v50, %v14668_v55  ;;  %v6996_v55 = vld [vmem:[%s17118_s10 + $0xc8] sm:$0xff]  ;;  %v7169_v50 = vld [vmem:[%s17121_s8 + $0x2a0] sm:$0xff] }
0x3454   :  { %v6379_v53 = vmul.f32 %v14674_v51, %v14670_v47  ;;  %v14049_v47 = vpack.c.bf16 %v6996_v55, %v6995_v44  ;;  %v14069_v51 = vpack.c.bf16 %v7169_v50, %v7168_v49  ;;  %v11282_v44 = vld [vmem:[%s17118_s10 + $0xe0] ss:$0 sm:$0xff] }
0x3455   :  { %v5474_v55 = vadd.f32 %v11282_v44, %v15755_v33 }
0x3456   :  { %12831 = vmatprep.mubr.msk.f32.mxu0 %vm77_vm0, %v6379_v53  ;;  %v7170_v53 = vld [vmem:[%s17121_s8 + $0x2a8] sm:$0xff] }
0x3457   :  { %12832 = vmatmul.mubr.msk.f32.vlgmr.msra.gmra.mrb[52].mxu0 %vm77_vm0, %v6380_v56  ;;  %v7171_v56 = vld [vmem:[%s17121_s8 + $0x2b0] sm:$0xff] }
0x3458   :  { %13990 = vmatpush3.bf16.msra.mxu0 %v13987_v46 }
0x3459   :  { %14008 = vmatprep.subr.bf16.mxu0 %v14007_v61 }
0x352a   :  { %v12833_v0 = vpop.f32.mrb[52].mxu0 }
0x352b   :  { %v6453_v1 = vpop.f32.mrb[53].mxu0 }
0x352c   :  { %12838 = vmatprep.mubr.msk.f32.mxu0 %vm77_vm0, %v6453_v1  ;;  %v7174_v1 = vld [vmem:[%s17121_s8 + $0x2c8] sm:$0xff] }
0x352d   :  { %12839 = vmatmul.mubr.msk.f32.vlgmr.msra.gmra.mrb[46].mxu0 %vm77_vm0, %v12833_v0  ;;  %v14077_v0 = vpack.c.bf16 %v7173_v63, %v7172_v62  ;;  %v7653_v62 = vld [vmem:[%s17122_s11] sm:$0xff]  ;;  %v7654_v63 = vld [vmem:[%s17122_s11 + $0x8] sm:$0xff] }
0x352e   :  { %14010 = vmatpush3.bf16.msra.mxu0 %v14007_v61  ;;  %12876 = vmatprep.mubr.msk.f32.mxu0 %vm2637_vm8, %v15753_v32  ;;  %v14073_v61 = vpack.c.bf16 %v7171_v56, %v7170_v53 }
0x352f   :  { %14012 = vmatprep.subr.bf16.mxu0 %v14011_v2 }
0x3532   :  { %14014 = vmatpush3.bf16.msra.mxu0 %v14011_v2  ;;  %v7175_v2 = vld [vmem:[%s17121_s8 + $0x2d0] sm:$0xff] }
0x3533   :  { %14016 = vmatprep.subr.bf16.mxu0 %v14015_v11  ;;  %v14081_v3 = vpack.c.bf16 %v7175_v2, %v7174_v1  ;;  %v7655_v1 = vld [vmem:[%s17122_s11 + $0x10] sm:$0xff]  ;;  %v7656_v2 = vld [vmem:[%s17122_s11 + $0x18] sm:$0xff] }
0x3536   :  { %14018 = vmatpush3.bf16.msra.mxu0 %v14015_v11 }
0x3537   :  { %14020 = vmatprep.subr.bf16.mxu0 %v14019_v23 }
0x353a   :  { %14022 = vmatpush3.bf16.msra.mxu0 %v14019_v23 }
0x353d   :  { %12877 = vmatmul.mubr.msk.f32.vlgmr.msra.gmra.mrb[54].mxu0 %vm2637_vm8, %v15755_v33 }
0x353e   :  { %12902 = vmatprep.mubr.msk.f32.mxu0 %vm77_vm0, %v6627_v15 }
0x3610   :  { %v12878_v16 = vpop.f32.mrb[54].mxu0 }
0x3611   :  { %v6709_v19 = vpop.f32.mrb[55].mxu0 }
0x3612   :  { %v14039_v22 = vpack.c.bf16 %v12878_v16, %v6709_v19 }
0x3614   :  { %14041 = vmatprep.subr.msk.bf16.mxu0 %vm15786_vm10, %v14039_v22 }
0x3615   :  { %14044 = vmatpush3.bf16.xpose.msk.msra.mxu0 %vm15786_vm10, %v14039_v22 }
0x3616   :  { %14046 = vmatprep.subr.bf16.mxu0 %v16032_v10 }
0x361c   :  { %12903 = vmatmul.mubr.msk.f32.vlgmr.msra.gmra.mrb[56].mxu0 %vm77_vm0, %v16028_v5 }
0x361d   :  { %14048 = vmatpush3.bf16.msra.mxu0 %v16032_v10 }
0x361e   :  { %14050 = vmatprep.subr.bf16.mxu0 %v14049_v47 }
0x36ef   :  { %v12904_v4 = vpop.f32.mrb[56].mxu0 }
0x36f0   :  { %v6889_v30 = vmul.f32 0.25, %v12904_v4  ;;  %v6879_v24 = vpop.f32.mrb[57].mxu0 }
0x36f1   :  { %v6888_v25 = vmul.f32 0.25, %v6879_v24 }
0x36f2   :  { %v6891_v26 = vadd.f32 %v15799_v52, %v6889_v30 }
0x36f3   :  { %v6890_v27 = vadd.f32 %v15804_v57, %v6888_v25 }
0x36f4   :  { %v6895_v28 = vsel %vm77_vm0, %v6891_v26, -inf }
0x36f5   :  { %6896 = vmax.xlane.f32.xlu0 %v6895_v28  ;;  %v6892_v29 = vsel %vm77_vm0, %v6890_v27, -inf }
0x36f6   :  { %6893 = vmax.xlane.f32.xlu1 %v6892_v29  ;;  %v7528_v29 = vld [vmem:[%s17118_s10 + $0xd0] sm:$0xff] }
0x3782   :  { %v6897_v31 = vpop.xlane.xlu0 %6896 }
0x3783   :  { %v6899_v34 = vsub.f32 %v6891_v26, %v6897_v31  ;;  %v6894_v35 = vpop.xlane.xlu1 %6893  ;;  %v7529_v31 = vld [vmem:[%s17118_s10 + $0xd8] sm:$0xff] }
0x3784   :  { %v6898_v5 = vsub.f32 %v6890_v27, %v6894_v35 }
0x3785   :  { %v6902_v36 = vmul.f32 1.442695, %v6899_v34  ;;  %v14111_v34 = vpack.c.bf16 %v7529_v31, %v7528_v29 }
0x3786   :  { %v6900_v10 = vmul.f32 1.442695, %v6898_v5 }
0x3787   :  { %14675 = vpow2.f32 %v6902_v36 }
0x3788   :  { %14677 = vpow2.f32 %v6900_v10 }
0x3791   :  { %v14676_v37 = vpop.eup %14675 }
0x3792   :  { %v14678_v38 = vpop.eup %14677  ;;  %v6907_v39 = vsel %vm77_vm0, %v14676_v37, 0.0 }
0x3793   :  { %6908 = vadd.xlane.f32.xlu0 %v6907_v39  ;;  %v6904_v40 = vsel %vm77_vm0, %v14678_v38, 0.0 }
0x3794   :  { %6905 = vadd.xlane.f32.xlu1 %v6904_v40 }
0x3820   :  { %v6909_v54 = vpop.xlane.xlu0 %6908 }
0x3821   :  { %14679 = vrcp.f32 %v6909_v54  ;;  %v6906_v41 = vpop.xlane.xlu1 %6905  ;;  %v5473_v54 = vadd.f32 %v11282_v44, %v15753_v32 }
0x3822   :  { %14681 = vrcp.f32 %v6906_v41 }
0x382b   :  { %v14680_v43 = vpop.eup %14679 }
0x382c   :  { %v14682_v45 = vpop.eup %14681  ;;  %v6913_v48 = vmul.f32 %v14680_v43, %v14676_v37 }
0x382d   :  { %v6912_v46 = vmul.f32 %v14682_v45, %v14678_v38 }
0x382f   :  { %12909 = vmatprep.mubr.msk.f32.mxu0 %vm77_vm0, %v6912_v46 }
0x3830   :  { %12910 = vmatmul.mubr.msk.f32.vlgmr.msra.gmra.mrb[58].mxu0 %vm77_vm0, %v6913_v48 }
0x3831   :  { %14052 = vmatpush3.bf16.msra.mxu0 %v14049_v47 }
0x3832   :  { %14070 = vmatprep.subr.bf16.mxu0 %v14069_v51 }
0x3903   :  { %v12911_v59 = vpop.f32.mrb[58].mxu0 }
0x3904   :  { %v6986_v60 = vpop.f32.mrb[59].mxu0 }
0x3905   :  { %12916 = vmatprep.mubr.msk.f32.mxu0 %vm77_vm0, %v6986_v60 }
0x3906   :  { %12917 = vmatmul.mubr.msk.f32.vlgmr.msra.gmra.mrb[46].mxu0 %vm77_vm0, %v12911_v59 }
0x3907   :  { %14072 = vmatpush3.bf16.msra.mxu0 %v14069_v51  ;;  %12954 = vmatprep.mubr.msk.f32.mxu0 %vm2637_vm8, %v15753_v32 }
0x3908   :  { %14074 = vmatprep.subr.bf16.mxu0 %v14073_v61 }
0x390b   :  { %14076 = vmatpush3.bf16.msra.mxu0 %v14073_v61 }
0x390c   :  { %14078 = vmatprep.subr.bf16.mxu0 %v14077_v0 }
0x390f   :  { %14080 = vmatpush3.bf16.msra.mxu0 %v14077_v0  ;;  %v14115_v0 = vpack.c.bf16 %v7654_v63, %v7653_v62 }
0x3910   :  { %14082 = vmatprep.subr.bf16.mxu0 %v14081_v3 }
0x3911   :  { %14116 = vmatprep.subr.bf16.mxu1 %v14115_v0 }
0x3912   :  { %14118 = vmatpush3.bf16.msra.mxu1 %v14115_v0 }
0x3913   :  { %14084 = vmatpush3.bf16.msra.mxu0 %v14081_v3  ;;  %v14119_v3 = vpack.c.bf16 %v7656_v2, %v7655_v1 }
0x3915   :  { %14120 = vmatprep.subr.bf16.mxu1 %v14119_v3 }
0x3916   :  { %12955 = vmatmul.mubr.msk.f32.vlgmr.msra.gmra.mrb[60].mxu0 %vm2637_vm8, %v15755_v33  ;;  %14122 = vmatpush3.bf16.msra.mxu1 %v14119_v3 }
0x3917   :  { %12980 = vmatprep.mubr.msk.f32.mxu0 %vm77_vm0, %v7160_v17  ;;  %v7657_v17 = vld [vmem:[%s17122_s11 + $0x20] sm:$0xff] }
0x39e9   :  { %v12956_v11 = vpop.f32.mrb[60].mxu0 }
0x39ea   :  { %v7242_v6 = vpop.f32.mrb[61].mxu0 }
0x39eb   :  { %v14101_v7 = vpack.c.bf16 %v12956_v11, %v7242_v6  ;;  %v7658_v11 = vld [vmem:[%s17122_s11 + $0x28] sm:$0xff] }
0x39ec   :  { %v14123_v6 = vpack.c.bf16 %v7658_v11, %v7657_v17 }
0x39ed   :  { %14103 = vmatprep.subr.msk.bf16.mxu0 %vm15786_vm10, %v14101_v7 }
0x39ee   :  { %14106 = vmatpush3.bf16.xpose.msk.msra.mxu0 %vm15786_vm10, %v14101_v7  ;;  %14124 = vmatprep.subr.bf16.mxu1 %v14123_v6  ;;  %v7659_v7 = vld [vmem:[%s17122_s11 + $0x30] sm:$0xff] }
0x39ef   :  { %14108 = vmatprep.subr.bf16.mxu0 %v16044_v18  ;;  %14126 = vmatpush3.bf16.msra.mxu1 %v14123_v6 }
0x39f5   :  { %12981 = vmatmul.mubr.msk.f32.vlgmr.msra.gmra.mrb[62].mxu0 %vm77_vm0, %v16040_v13 }
0x39f6   :  { %14110 = vmatpush3.bf16.msra.mxu0 %v16044_v18 }
0x39f7   :  { %14112 = vmatprep.subr.bf16.mxu0 %v14111_v34 }
0x3ac8   :  { %v12982_v21 = vpop.f32.mrb[62].mxu0 }
0x3ac9   :  { %v7422_v14 = vmul.f32 0.25, %v12982_v21  ;;  %v7412_v23 = vpop.f32.mrb[63].mxu0  ;;  %v7660_v21 = vld [vmem:[%s17122_s11 + $0x38] sm:$0xff] }
0x3aca   :  { %v7421_v15 = vmul.f32 0.25, %v7412_v23  ;;  %v7765_v23 = vld [vmem:[%s17118_s10 + $0xf8] sm:$0xff] }
0x3acb   :  { %v7424_v16 = vadd.f32 %v15799_v52, %v7422_v14  ;;  %v14127_v14 = vpack.c.bf16 %v7660_v21, %v7659_v7 }
0x3acc   :  { %v7423_v19 = vadd.f32 %v15804_v57, %v7421_v15  ;;  %v7766_v15 = vld [vmem:[%s17118_s10 + $0x100] sm:$0xff] }
0x3acd   :  { %v7428_v22 = vsel %vm77_vm0, %v7424_v16, -inf  ;;  %14128 = vmatprep.subr.bf16.mxu1 %v14127_v14 }
0x3ace   :  { %7429 = vmax.xlane.f32.xlu0 %v7428_v22  ;;  %v7425_v4 = vsel %vm77_vm0, %v7423_v19, -inf  ;;  %14130 = vmatpush3.bf16.msra.mxu1 %v14127_v14 }
0x3acf   :  { %7426 = vmax.xlane.f32.xlu1 %v7425_v4 }
0x3b5b   :  { %v7430_v30 = vpop.xlane.xlu0 %7429 }
0x3b5c   :  { %v7432_v24 = vsub.f32 %v7424_v16, %v7430_v30  ;;  %v7427_v25 = vpop.xlane.xlu1 %7426  ;;  %v14131_v16 = vpack.c.bf16 %v7766_v15, %v7765_v23 }
0x3b5d   :  { %v7431_v13 = vsub.f32 %v7423_v19, %v7427_v25 }
0x3b5e   :  { %v7435_v26 = vmul.f32 1.442695, %v7432_v24 }
0x3b5f   :  { %v7433_v18 = vmul.f32 1.442695, %v7431_v13 }
0x3b60   :  { %14683 = vpow2.f32 %v7435_v26  ;;  %v11343_v26 = vld [vmem:[%s17118_s10 + $0xe8] ss:$0 sm:$0xff] }
0x3b61   :  { %14685 = vpow2.f32 %v7433_v18 }
0x3b6a   :  { %v14684_v27 = vpop.eup %14683 }
0x3b6b   :  { %v14686_v28 = vpop.eup %14685  ;;  %v7440_v52 = vsel %vm77_vm0, %v14684_v27, 0.0 }
0x3b6c   :  { %7441 = vadd.xlane.f32.xlu0 %v7440_v52  ;;  %v7437_v57 = vsel %vm77_vm0, %v14686_v28, 0.0  ;;  %v11344_v52 = vld [vmem:[%s17118_s10 + $0xf0] ss:$0 sm:$0xff] }
0x3b6d   :  { %7438 = vadd.xlane.f32.xlu1 %v7437_v57 }
0x3bf9   :  { %v7442_v35 = vpop.xlane.xlu0 %7441 }
0x3bfa   :  { %14687 = vrcp.f32 %v7442_v35  ;;  %v7439_v5 = vpop.xlane.xlu1 %7438  ;;  %v7767_v35 = vld [vmem:[%s17118_s10 + $0x108] sm:$0xff] }
0x3bfb   :  { %14689 = vrcp.f32 %v7439_v5  ;;  %v7768_v5 = vld [vmem:[%s17118_s10 + $0x110] sm:$0xff] }
0x3c04   :  { %v14688_v36 = vpop.eup %14687 }
0x3c05   :  { %v14690_v10 = vpop.eup %14689  ;;  %v7446_v38 = vmul.f32 %v14688_v36, %v14684_v27  ;;  %v14135_v36 = vpack.c.bf16 %v7768_v5, %v7767_v35 }
0x3c06   :  { %v7445_v37 = vmul.f32 %v14690_v10, %v14686_v28  ;;  %v7769_v10 = vld [vmem:[%s17118_s10 + $0x118] sm:$0xff] }
0x3c08   :  { %12987 = vmatprep.mubr.msk.f32.mxu0 %vm77_vm0, %v7445_v37  ;;  %v7770_v37 = vld [vmem:[%s17118_s10 + $0x120] sm:$0xff] }
0x3c09   :  { %12988 = vmatmul.mubr.msk.f32.vlgmr.msra.gmra.mrb[64].mxu0 %vm77_vm0, %v7446_v38  ;;  %v14139_v38 = vpack.c.bf16 %v7770_v37, %v7769_v10 }
0x3c0a   :  { %14114 = vmatpush3.bf16.msra.mxu0 %v14111_v34 }
0x3c0b   :  { %14132 = vmatprep.subr.bf16.mxu0 %v14131_v16 }
0x3cdc   :  { %v12989_v39 = vpop.f32.mrb[64].mxu0 }
0x3cdd   :  { %v7519_v40 = vpop.f32.mrb[65].mxu0 }
0x3cde   :  { %12994 = vmatprep.mubr.msk.f32.mxu0 %vm77_vm0, %v7519_v40  ;;  %v7772_v40 = vld [vmem:[%s17118_s10 + $0x130] sm:$0xff] }
0x3cdf   :  { %12995 = vmatmul.mubr.msk.f32.vlgmr.msra.gmra.mrb[46].mxu0 %vm77_vm0, %v12989_v39  ;;  %v7771_v39 = vld [vmem:[%s17118_s10 + $0x128] sm:$0xff] }
0x3ce0   :  { %14134 = vmatpush3.bf16.msra.mxu0 %v14131_v16  ;;  %v14143_v44 = vpack.c.bf16 %v7772_v40, %v7771_v39  ;;  %v7911_v39 = vld [vmem:[%s17121_s8 + $0x328] sm:$0xff] }
0x3ce1   :  { %14136 = vmatprep.subr.bf16.mxu0 %v14135_v36 }
0x3ce4   :  { %14138 = vmatpush3.bf16.msra.mxu0 %v14135_v36 }
0x3ce5   :  { %14140 = vmatprep.subr.bf16.mxu0 %v14139_v38 }
0x3ce8   :  { %14142 = vmatpush3.bf16.msra.mxu0 %v14139_v38  ;;  %v7910_v38 = vld [vmem:[%s17121_s8 + $0x320] sm:$0xff] }
0x3ce9   :  { %14144 = vmatprep.subr.bf16.mxu0 %v14143_v44  ;;  %v14163_v40 = vpack.c.bf16 %v7911_v39, %v7910_v38  ;;  %v8449_v39 = vld [vmem:[%s17121_s8 + $0x3e8] sm:$0xff] }
0x3ceb   :  { %14164 = vmatprep.subr.bf16.mxu1 %v14163_v40 }
0x3cec   :  { %14146 = vmatpush3.bf16.msra.mxu0 %v14143_v44  ;;  %v8087_v44 = vld [vmem:[%s17121_s8 + $0x3a0] sm:$0xff] }
0x3db2   :  { %v12996_v47 = vpop.f32.mrb[46].mxu0 }
0x3db3   :  { %v14523_v41 = vadd.f32 %v12996_v47, %v5474_v55  ;;  %v7602_v43 = vpop.f32.mrb[47].mxu0  ;;  %v7773_v55 = vld [vmem:[%s17118_s10 + $0x138] sm:$0xff]  ;;  %v7774_v47 = vld [vmem:[%s17118_s10 + $0x140] sm:$0xff] }
0x3db4   :  { %v14524_v45 = vadd.f32 %v7602_v43, %v5473_v54  ;;  %v7775_v54 = vld [vmem:[%s17118_s10 + $0x148] sm:$0xff]  ;;  %v7776_v43 = vld [vmem:[%s17118_s10 + $0x150] sm:$0xff] }
0x3db5   :  { %v7618_v46 = vsel %vm2637_vm8, %v14523_v41, 0.0 }
0x3db6   :  { %7619 = vadd.xlane.f32.xlu0 %v7618_v46  ;;  %v7615_v48 = vsel %vm2637_vm8, %v14524_v45, 0.0  ;;  %v7777_v46 = vld [vmem:[%s17118_s10 + $0x158] sm:$0xff] }
0x3db7   :  { %7616 = vadd.xlane.f32.xlu1 %v7615_v48  ;;  %v7778_v48 = vld [vmem:[%s17118_s10 + $0x160] sm:$0xff] }
0x3e43   :  { %v7620_v49 = vpop.xlane.xlu0 %7619 }
0x3e44   :  { %v7622_v50 = vmul.f32 0.015625, %v7620_v49  ;;  %v7617_v51 = vpop.xlane.xlu1 %7616  ;;  %v14155_v49 = vpack.c.bf16 %v7778_v48, %v7777_v46  ;;  %v8090_v46 = vld [vmem:[%s17121_s8 + $0x3b8] sm:$0xff] }
0x3e45   :  { %v7621_v53 = vmul.f32 0.015625, %v7617_v51  ;;  %v7780_v51 = vld [vmem:[%s17118_s10 + $0x170] sm:$0xff] }
0x3e46   :  { %v7624_v56 = vsub.f32 %v14523_v41, %v7622_v50  ;;  %v14147_v41 = vpack.c.bf16 %v7774_v47, %v7773_v55  ;;  %v7779_v50 = vld [vmem:[%s17118_s10 + $0x168] sm:$0xff] }
0x3e47   :  { %v7623_v59 = vsub.f32 %v14524_v45, %v7621_v53  ;;  %v14151_v45 = vpack.c.bf16 %v7776_v43, %v7775_v54  ;;  %v14159_v53 = vpack.c.bf16 %v7780_v51, %v7779_v50  ;;  %v8088_v55 = vld [vmem:[%s17121_s8 + $0x3a8] sm:$0xff]  ;;  %v7912_v54 = vld [vmem:[%s17121_s8 + $0x330] sm:$0xff] }
0x3e48   :  { %v7626_v60 = vmul.f32 %v7624_v56, %v7624_v56  ;;  %14148 = vmatprep.subr.bf16.mxu0 %v14147_v41  ;;  %v14195_v47 = vpack.c.bf16 %v8088_v55, %v8087_v44  ;;  %v7915_v50 = vld [vmem:[%s17121_s8 + $0x348] sm:$0xff] }
0x3e49   :  { %v7625_v33 = vmul.f32 %v7623_v59, %v7623_v59  ;;  %14150 = vmatpush3.bf16.msra.mxu0 %v14147_v41  ;;  %v7913_v41 = vld [vmem:[%s17121_s8 + $0x338] sm:$0xff] }
0x3e4a   :  { %v7630_v61 = vsel %vm2637_vm8, %v7626_v60, 0.0  ;;  %14152 = vmatprep.subr.bf16.mxu0 %v14151_v45  ;;  %v14167_v43 = vpack.c.bf16 %v7913_v41, %v7912_v54  ;;  %v8451_v41 = vld [vmem:[%s17121_s8 + $0x3f8] sm:$0xff] }
0x3e4b   :  { %7631 = vadd.xlane.f32.xlu0 %v7630_v61  ;;  %v7627_v32 = vsel %vm2637_vm8, %v7625_v33, 0.0 }
0x3e4c   :  { %7628 = vadd.xlane.f32.xlu1 %v7627_v32 }
0x3e4d   :  { %14154 = vmatpush3.bf16.msra.mxu0 %v14151_v45  ;;  %v8089_v45 = vld [vmem:[%s17121_s8 + $0x3b0] sm:$0xff] }
0x3e4e   :  { %14156 = vmatprep.subr.bf16.mxu0 %v14155_v49  ;;  %v14199_v48 = vpack.c.bf16 %v8090_v46, %v8089_v45 }
0x3e51   :  { %14158 = vmatpush3.bf16.msra.mxu0 %v14155_v49  ;;  %v7914_v49 = vld [vmem:[%s17121_s8 + $0x340] sm:$0xff] }
0x3e52   :  { %14160 = vmatprep.subr.bf16.mxu0 %v14159_v53  ;;  %v14171_v51 = vpack.c.bf16 %v7915_v50, %v7914_v49  ;;  %v8454_v49 = vld [vmem:[%s17121_s8 + $0x410] sm:$0xff] }
0x3e55   :  { %14162 = vmatpush3.bf16.msra.mxu0 %v14159_v53  ;;  %v8091_v53 = vld [vmem:[%s17121_s8 + $0x3c0] sm:$0xff] }
0x3e56   :  { %14196 = vmatprep.subr.bf16.mxu0 %v14195_v47 }
0x3ed8   :  { %v7632_v19 = vpop.xlane.xlu0 %7631 }
0x3ed9   :  { %v7634_v22 = vmul.f32 0.015625, %v7632_v19  ;;  %v7629_v4 = vpop.xlane.xlu1 %7628 }
0x3eda   :  { %v7633_v30 = vmul.f32 0.015625, %v7629_v4  ;;  %v11348_v4 = vld [vmem:[%s17118_s10 + $0x178] ss:$0 sm:$0xff] }
0x3edb   :  { %v7636_v24 = vadd.f32 1e-12, %v7634_v22 }
0x3edc   :  { %v7635_v25 = vadd.f32 1e-12, %v7633_v30 }
0x3edd   :  { %14691 = vrsqrt.f32 %v7636_v24 }
0x3ede   :  { %14693 = vrsqrt.f32 %v7635_v25 }
0x3ee7   :  { %v14692_v13 = vpop.eup %14691 }
0x3ee8   :  { %v14694_v18 = vpop.eup %14693  ;;  %v7640_v27 = vmul.f32 %v14692_v13, %v7624_v56  ;;  %v11345_v56 = vld [vmem:[%s17122_s11 + $0x40] ss:$0 sm:$0xff] }
0x3ee9   :  { %v7639_v28 = vmul.f32 %v14694_v18, %v7623_v59 }
0x3eea   :  { %v7646_v57 = vmul.f32 %v11343_v26, %v7640_v27 }
0x3eeb   :  { %v7645_v29 = vmul.f32 %v11343_v26, %v7639_v28 }
0x3eec   :  { %v16224_v34 = vadd.f32 %v11344_v52, %v7646_v57 }
0x3eed   :  { %v16222_v31 = vadd.f32 %v11344_v52, %v7645_v29 }
0x3eef   :  { %13013 = vmatprep.mubr.msk.f32.mxu1 %vm2637_vm8, %v16222_v31 }
0x3ef0   :  { %13014 = vmatmul.mubr.msk.f32.vlgmr.msra.gmra.mrb[74].mxu1 %vm2637_vm8, %v16224_v34 }
0x3ef1   :  { %14166 = vmatpush3.bf16.msra.mxu1 %v14163_v40  ;;  %v8450_v40 = vld [vmem:[%s17121_s8 + $0x3f0] sm:$0xff] }
0x3ef2   :  { %14168 = vmatprep.subr.bf16.mxu1 %v14167_v43  ;;  %v14225_v54 = vpack.c.bf16 %v8450_v40, %v8449_v39  ;;  %v9518_v39 = vld [vmem:[%s17121_s8 + $0x590] sm:$0xff] }
0x3ef5   :  { %14170 = vmatpush3.bf16.msra.mxu1 %v14167_v43  ;;  %v8452_v43 = vld [vmem:[%s17121_s8 + $0x400] sm:$0xff] }
0x3ef6   :  { %14172 = vmatprep.subr.bf16.mxu1 %v14171_v51  ;;  %v14229_v46 = vpack.c.bf16 %v8452_v43, %v8451_v41  ;;  %v9522_v41 = vld [vmem:[%s17121_s8 + $0x5b0] sm:$0xff] }
0x3ef9   :  { %14174 = vmatpush3.bf16.msra.mxu1 %v14171_v51  ;;  %v8455_v51 = vld [vmem:[%s17121_s8 + $0x418] sm:$0xff] }
0x3fc3   :  { %v13015_v59 = vpop.f32.mrb[74].mxu1 }
0x3fc4   :  { %v7744_v60 = vadd.f32 %v13015_v59, %v11345_v56  ;;  %v7738_v33 = vpop.f32.mrb[75].mxu1 }
0x3fc5   :  { %v7739_v61 = vadd.f32 %v11345_v56, %v7738_v33  ;;  %v8092_v56 = vld [vmem:[%s17121_s8 + $0x3c8] sm:$0xff]  ;;  %v7917_v33 = vld [vmem:[%s17121_s8 + $0x358] sm:$0xff] }
0x3fc6   :  { %v7750_v32 = vmul.f32 0.044715, %v7744_v60  ;;  %v7748_v16 = vmul.f32 0.5, %v7744_v60  ;;  %v14203_v59 = vpack.c.bf16 %v8092_v56, %v8091_v53  ;;  %v8456_v53 = vld [vmem:[%s17121_s8 + $0x420] sm:$0xff] }
0x3fc7   :  { %v7749_v62 = vmul.f32 0.044715, %v7739_v61  ;;  %v7747_v23 = vmul.f32 0.5, %v7739_v61  ;;  %v14237_v56 = vpack.c.bf16 %v8456_v53, %v8455_v51  ;;  %v9690_v53 = vld [vmem:[%s17121_s8 + $0x618] sm:$0xff] }
0x3fc8   :  { %v7752_v63 = vmul.f32 %v7750_v32, %v7744_v60  ;;  %v8093_v32 = vld [vmem:[%s17121_s8 + $0x3d0] sm:$0xff] }
0x3fc9   :  { %v7751_v0 = vmul.f32 %v7749_v62, %v7739_v61  ;;  %v8094_v62 = vld [vmem:[%s17121_s8 + $0x3d8] sm:$0xff] }
0x3fca   :  { %v7754_v1 = vmul.f32 %v7752_v63, %v7744_v60  ;;  %v14207_v63 = vpack.c.bf16 %v8094_v62, %v8093_v32  ;;  %v8623_v32 = vld [vmem:[%s17121_s8 + $0x480] sm:$0xff] }
0x3fcb   :  { %v7753_v2 = vmul.f32 %v7751_v0, %v7739_v61  ;;  %v8004_v0 = vld [vmem:[%s17121_s8 + $0x360] sm:$0xff] }
0x3fcc   :  { %v7756_v3 = vadd.f32 %v7754_v1, %v7744_v60  ;;  %v7916_v60 = vld [vmem:[%s17121_s8 + $0x350] sm:$0xff]  ;;  %v8005_v1 = vld [vmem:[%s17121_s8 + $0x368] sm:$0xff] }
0x3fcd   :  { %v7755_v17 = vadd.f32 %v7753_v2, %v7739_v61  ;;  %v14175_v61 = vpack.c.bf16 %v7917_v33, %v7916_v60  ;;  %v14179_v2 = vpack.c.bf16 %v8005_v1, %v8004_v0  ;;  %v8621_v60 = vld [vmem:[%s17121_s8 + $0x470] sm:$0xff] }
0x3fce   :  { %v7758_v11 = vmul.f32 0.7978846, %v7756_v3  ;;  %v8625_v0 = vld [vmem:[%s17121_s8 + $0x490] sm:$0xff] }
0x3fcf   :  { %v7757_v6 = vmul.f32 0.7978846, %v7755_v17  ;;  %14176 = vmatprep.subr.bf16.mxu1 %v14175_v61 }
0x3fd0   :  { %14695 = vtanh.f32 %v7758_v11  ;;  %14178 = vmatpush3.bf16.msra.mxu1 %v14175_v61  ;;  %v8622_v61 = vld [vmem:[%s17121_s8 + $0x478] sm:$0xff] }
0x3fd1   :  { %14697 = vtanh.f32 %v7757_v6  ;;  %14180 = vmatprep.subr.bf16.mxu1 %v14179_v2  ;;  %v14261_v62 = vpack.c.bf16 %v8623_v32, %v8622_v61 }
0x3fda   :  { %v14696_v7 = vpop.eup %14695 }
0x3fdb   :  { %v14698_v21 = vpop.eup %14697  ;;  %v7762_v14 = vadd.f32 1.0, %v14696_v7 }
0x3fdc   :  { %v7761_v15 = vadd.f32 1.0, %v14698_v21 }
0x3fdd   :  { %v7764_v22 = vmul.f32 %v7762_v14, %v7748_v16 }
0x3fde   :  { %v7763_v19 = vmul.f32 %v7761_v15, %v7747_v23  ;;  %v11349_v23 = vld [vmem:[%s17118_s10 + $0x180] ss:$0 sm:$0xff] }
0x3fe0   :  { %13048 = vmatprep.mubr.f32.mxu0 %v7763_v19 }
0x3fe1   :  { %13049 = vmatmul.mubr.f32.vlgmr.msra.gmra.mrb[66].mxu0 %v7764_v22  ;;  %v11350_v22 = vld [vmem:[%s17118_s10 + $0x188] ss:$0 sm:$0xff] }
0x3fe2   :  { %14198 = vmatpush3.bf16.msra.mxu0 %v14195_v47 }
0x3fe3   :  { %14200 = vmatprep.subr.bf16.mxu0 %v14199_v48 }
0x3fe6   :  { %14202 = vmatpush3.bf16.msra.mxu0 %v14199_v48  ;;  %v8453_v48 = vld [vmem:[%s17121_s8 + $0x408] sm:$0xff] }
0x3fe7   :  { %14204 = vmatprep.subr.bf16.mxu0 %v14203_v59  ;;  %v14233_v50 = vpack.c.bf16 %v8454_v49, %v8453_v48  ;;  %v9688_v49 = vld [vmem:[%s17121_s8 + $0x608] sm:$0xff] }
0x3fea   :  { %14206 = vmatpush3.bf16.msra.mxu0 %v14203_v59  ;;  %v8620_v59 = vld [vmem:[%s17121_s8 + $0x468] sm:$0xff] }
0x3feb   :  { %14208 = vmatprep.subr.bf16.mxu0 %v14207_v63  ;;  %v14257_v33 = vpack.c.bf16 %v8621_v60, %v8620_v59  ;;  %v9692_v60 = vld [vmem:[%s17121_s8 + $0x628] sm:$0xff] }
0x3fee   :  { %14210 = vmatpush3.bf16.msra.mxu0 %v14207_v63  ;;  %v8624_v63 = vld [vmem:[%s17121_s8 + $0x488] sm:$0xff] }
0x3fef   :  { %v14265_v1 = vpack.c.bf16 %v8625_v0, %v8624_v63 }
0x40b4   :  { %v13050_v30 = vpop.f32.mrb[66].mxu0 }
0x40b5   :  { %v7858_v24 = vadd.f32 %v13050_v30, %v11348_v4  ;;  %v7852_v25 = vpop.f32.mrb[67].mxu0 }
0x40b6   :  { %v7853_v13 = vadd.f32 %v11348_v4, %v7852_v25  ;;  %v8007_v25 = vld [vmem:[%s17121_s8 + $0x378] sm:$0xff] }
0x40b7   :  { %v7862_v26 = vadd.f32 %v7858_v24, %v16224_v34  ;;  %v8006_v24 = vld [vmem:[%s17121_s8 + $0x370] sm:$0xff] }
0x40b8   :  { %v7861_v18 = vadd.f32 %v7853_v13, %v16222_v31 }
0x40b9   :  { %v7868_v27 = vsel %vm2637_vm8, %v7862_v26, 0.0 }
0x40ba   :  { %7869 = vadd.xlane.f32.xlu0 %v7868_v27  ;;  %v7865_v28 = vsel %vm2637_vm8, %v7861_v18, 0.0  ;;  %v8008_v27 = vld [vmem:[%s17121_s8 + $0x380] sm:$0xff] }
0x40bb   :  { %7866 = vadd.xlane.f32.xlu1 %v7865_v28  ;;  %v8009_v28 = vld [vmem:[%s17121_s8 + $0x388] sm:$0xff] }
0x4147   :  { %v7870_v52 = vpop.xlane.xlu0 %7869 }
0x4148   :  { %v7872_v57 = vmul.f32 0.015625, %v7870_v52  ;;  %v7867_v29 = vpop.xlane.xlu1 %7866  ;;  %v14187_v52 = vpack.c.bf16 %v8009_v28, %v8008_v27  ;;  %v9155_v27 = vld [vmem:[%s17121_s8 + $0x540] sm:$0xff]  ;;  %v9156_v28 = vld [vmem:[%s17121_s8 + $0x548] sm:$0xff] }
0x4149   :  { %v7871_v35 = vmul.f32 0.015625, %v7867_v29  ;;  %v8011_v29 = vld [vmem:[%s17121_s8 + $0x398] sm:$0xff] }
0x414a   :  { %v16282_v5 = vsub.f32 %v7862_v26, %v7872_v57  ;;  %v8010_v57 = vld [vmem:[%s17121_s8 + $0x390] sm:$0xff] }
0x414b   :  { %v16284_v36 = vsub.f32 %v7861_v18, %v7871_v35  ;;  %v14183_v18 = vpack.c.bf16 %v8007_v25, %v8006_v24  ;;  %v14191_v35 = vpack.c.bf16 %v8011_v29, %v8010_v57  ;;  %v9153_v24 = vld [vmem:[%s17121_s8 + $0x530] sm:$0xff]  ;;  %v9154_v25 = vld [vmem:[%s17121_s8 + $0x538] sm:$0xff] }
0x414c   :  { %v7876_v10 = vmul.f32 %v16282_v5, %v16282_v5  ;;  %v9157_v57 = vld [vmem:[%s17121_s8 + $0x550] sm:$0xff]  ;;  %v9158_v29 = vld [vmem:[%s17121_s8 + $0x558] sm:$0xff] }
0x414d   :  { %v7875_v31 = vmul.f32 %v16284_v36, %v16284_v36 }
0x414e   :  { %v7880_v34 = vsel %vm2637_vm8, %v7876_v10, 0.0 }
0x414f   :  { %7881 = vadd.xlane.f32.xlu0 %v7880_v34  ;;  %v7877_v37 = vsel %vm2637_vm8, %v7875_v31, 0.0 }
0x4150   :  { %7878 = vadd.xlane.f32.xlu1 %v7877_v37 }
0x41dc   :  { %v7882_v3 = vpop.xlane.xlu0 %7881 }
0x41dd   :  { %v7884_v17 = vmul.f32 0.015625, %v7882_v3  ;;  %v7879_v11 = vpop.xlane.xlu1 %7878  ;;  %v8627_v3 = vld [vmem:[%s17121_s8 + $0x4a0] sm:$0xff] }
0x41de   :  { %v7883_v6 = vmul.f32 0.015625, %v7879_v11  ;;  %v8982_v11 = vld [vmem:[%s17121_s8 + $0x4b0] sm:$0xff] }
0x41df   :  { %v7886_v7 = vadd.f32 1e-12, %v7884_v17 }
0x41e0   :  { %v7885_v21 = vadd.f32 1e-12, %v7883_v6  ;;  %v8983_v6 = vld [vmem:[%s17121_s8 + $0x4b8] sm:$0xff] }
0x41e1   :  { %14699 = vrsqrt.f32 %v7886_v7  ;;  %v14287_v7 = vpack.c.bf16 %v8983_v6, %v8982_v11 }
0x41e2   :  { %14701 = vrsqrt.f32 %v7885_v21  ;;  %v8984_v21 = vld [vmem:[%s17121_s8 + $0x4c0] sm:$0xff] }
0x41eb   :  { %v14700_v14 = vpop.eup %14699 }
0x41ec   :  { %v14702_v15 = vpop.eup %14701  ;;  %v7890_v16 = vmul.f32 %v14700_v14, %v16282_v5  ;;  %v11352_v5 = vld [vmem:[%s17121_s8 + $0x3e0] ss:$0 sm:$0xff]  ;;  %v8985_v14 = vld [vmem:[%s17121_s8 + $0x4c8] sm:$0xff] }
0x41ed   :  { %v7889_v19 = vmul.f32 %v14702_v15, %v16284_v36  ;;  %v8986_v15 = vld [vmem:[%s17121_s8 + $0x4d0] sm:$0xff] }
0x41ee   :  { %v7896_v4 = vmul.f32 %v11349_v23, %v7890_v16  ;;  %v8987_v16 = vld [vmem:[%s17121_s8 + $0x4d8] sm:$0xff] }
0x41ef   :  { %v7895_v30 = vmul.f32 %v11349_v23, %v7889_v19  ;;  %v14291_v23 = vpack.c.bf16 %v8985_v14, %v8984_v21  ;;  %v14295_v19 = vpack.c.bf16 %v8987_v16, %v8986_v15 }
0x41f0   :  { %v16362_v26 = vadd.f32 %v11350_v22, %v7896_v4  ;;  %v8989_v4 = vld [vmem:[%s17121_s8 + $0x4e8] sm:$0xff] }
0x41f1   :  { %v16360_v13 = vadd.f32 %v11350_v22, %v7895_v30  ;;  %v8988_v22 = vld [vmem:[%s17121_s8 + $0x4e0] sm:$0xff] }
0x41f2   :  { %v14299_v30 = vpack.c.bf16 %v8989_v4, %v8988_v22  ;;  %v16594_v22 = vld [vmem:[%s17121_s8 + $0x570] ss:$0 sm:$0xff] }
0x41f3   :  { %13067 = vmatprep.mubr.msk.f32.mxu1 %vm2637_vm8, %v16360_v13  ;;  %13105 = vmatprep.mubr.msk.f32.mxu0 %vm2637_vm8, %v16360_v13 }
0x41f4   :  { %13068 = vmatmul.mubr.msk.f32.vlgmr.msra.gmra.mrb[76].mxu1 %vm2637_vm8, %v16362_v26  ;;  %13106 = vmatmul.mubr.msk.f32.vlgmr.msra.gmra.mrb[68].mxu0 %vm2637_vm8, %v16362_v26 }
0x41f5   :  { %14182 = vmatpush3.bf16.msra.mxu1 %v14179_v2  ;;  %13086 = vmatprep.mubr.msk.f32.mxu1 %vm2637_vm8, %v16360_v13  ;;  %v8626_v2 = vld [vmem:[%s17121_s8 + $0x498] sm:$0xff] }
0x41f6   :  { %14184 = vmatprep.subr.bf16.mxu1 %v14183_v18  ;;  %v14269_v17 = vpack.c.bf16 %v8627_v3, %v8626_v2  ;;  %v16574_v3 = vld [vmem:[%s17117_s3 + $0x10] sm:$0xff] }
0x41f9   :  { %14186 = vmatpush3.bf16.msra.mxu1 %v14183_v18  ;;  %v14319_v18 = vpack.c.bf16 %v9154_v25, %v9153_v24 }
0x41fa   :  { %14188 = vmatprep.subr.bf16.mxu1 %v14187_v52 }
0x41fd   :  { %14190 = vmatpush3.bf16.msra.mxu1 %v14187_v52  ;;  %v14323_v52 = vpack.c.bf16 %v9156_v28, %v9155_v27  ;;  %v16606_v28 = vld [vmem:[%s17121_s8 + $0x638] ss:$0 sm:$0xff] }
0x41fe   :  { %14192 = vmatprep.subr.bf16.mxu1 %v14191_v35 }
0x4201   :  { %14194 = vmatpush3.bf16.msra.mxu1 %v14191_v35  ;;  %v14327_v35 = vpack.c.bf16 %v9158_v29, %v9157_v57 }
0x4204   :  { %13087 = vmatmul.mubr.msk.f32.vlgmr.msra.gmra.mrb[78].mxu1 %vm2637_vm8, %v16362_v26 }
0x42c7   :  { %v13069_v36 = vpop.f32.mrb[76].mxu1  ;;  %v13107_v10 = vpop.f32.mrb[68].mxu0 }
0x42c8   :  { %v7995_v31 = vpop.f32.mrb[77].mxu1  ;;  %v8161_v34 = vpop.f32.mrb[69].mxu0  ;;  %v8001_v45 = vadd.f32 %v13069_v36, %v11352_v5  ;;  %v9160_v36 = vld [vmem:[%s17121_s8 + $0x568] sm:$0xff] }
0x42c9   :  { %v7996_v37 = vadd.f32 %v11352_v5, %v7995_v31  ;;  %v14217_v38 = vpack.c.bf16 %v13107_v10, %v8161_v34  ;;  %v9159_v5 = vld [vmem:[%s17121_s8 + $0x560] sm:$0xff]  ;;  %v9515_v31 = vld [vmem:[%s17121_s8 + $0x578] sm:$0xff] }
0x42ca   :  { %v14331_v10 = vpack.c.bf16 %v9160_v36, %v9159_v5  ;;  %v9516_v34 = vld [vmem:[%s17121_s8 + $0x580] sm:$0xff] }
0x42cb   :  { %13112 = vmatprep.mubr.msk.f32.mxu1 %vm77_vm0, %v7996_v37  ;;  %14218 = vmatprep.subr.bf16.mxu0 %v14217_v38  ;;  %v14349_v37 = vpack.c.bf16 %v9516_v34, %v9515_v31 }
0x42cc   :  { %14220 = vmatpush3.bf16.msra.mxu0 %v14217_v38  ;;  %v9517_v38 = vld [vmem:[%s17121_s8 + $0x588] sm:$0xff] }
0x42cd   :  { %v14353_v40 = vpack.c.bf16 %v9518_v39, %v9517_v38 }
0x42d7   :  { %v13088_v44 = vpop.f32.mrb[78].mxu1 }
0x42d8   :  { %v8078_v55 = vpop.f32.mrb[79].mxu1 }
0x42d9   :  { %v14211_v47 = vpack.c.bf16 %v13088_v44, %v8078_v55  ;;  %v9519_v44 = vld [vmem:[%s17121_s8 + $0x598] sm:$0xff]  ;;  %v9520_v55 = vld [vmem:[%s17121_s8 + $0x5a0] sm:$0xff] }
0x42db   :  { %14213 = vmatprep.subr.msk.bf16.mxu1 %vm15786_vm10, %v14211_v47 }
0x42dc   :  { %14216 = vmatpush3.bf16.xpose.msk.msra.mxu1 %vm15786_vm10, %v14211_v47  ;;  %v14357_v47 = vpack.c.bf16 %v9520_v55, %v9519_v44 }
0x42dd   :  { %14226 = vmatprep.subr.bf16.mxu1 %v14225_v54 }
0x42e3   :  { %13113 = vmatmul.mubr.msk.f32.vlgmr.msra.gmra.mrb[80].mxu1 %vm77_vm0, %v8001_v45  ;;  %v9686_v45 = vld [vmem:[%s17121_s8 + $0x5f8] sm:$0xff] }
0x42e4   :  { %14228 = vmatpush3.bf16.msra.mxu1 %v14225_v54  ;;  %13145 = vmatprep.mubr.msk.f32.mxu1 %vm2637_vm8, %v16360_v13  ;;  %v9521_v54 = vld [vmem:[%s17121_s8 + $0x5a8] sm:$0xff] }
0x42e5   :  { %14230 = vmatprep.subr.bf16.mxu1 %v14229_v46  ;;  %v14361_v43 = vpack.c.bf16 %v9522_v41, %v9521_v54  ;;  %v8364_v54 = vld [vmem:[%s17118_s10 + $0x190] sm:$0xff]  ;;  %v8365_v41 = vld [vmem:[%s17118_s10 + $0x198] sm:$0xff] }
0x42e8   :  { %14232 = vmatpush3.bf16.msra.mxu1 %v14229_v46  ;;  %v9687_v46 = vld [vmem:[%s17121_s8 + $0x600] sm:$0xff] }
0x42e9   :  { %14234 = vmatprep.subr.bf16.mxu1 %v14233_v50  ;;  %v14381_v48 = vpack.c.bf16 %v9687_v46, %v9686_v45 }
0x42ec   :  { %14236 = vmatpush3.bf16.msra.mxu1 %v14233_v50  ;;  %v9689_v50 = vld [vmem:[%s17121_s8 + $0x610] sm:$0xff] }
0x42ed   :  { %14238 = vmatprep.subr.bf16.mxu1 %v14237_v56  ;;  %v14385_v51 = vpack.c.bf16 %v9689_v50, %v9688_v49 }
0x42f0   :  { %14240 = vmatpush3.bf16.msra.mxu1 %v14237_v56  ;;  %v9691_v56 = vld [vmem:[%s17121_s8 + $0x620] sm:$0xff] }
0x42f1   :  { %14258 = vmatprep.subr.bf16.mxu1 %v14257_v33  ;;  %v14389_v59 = vpack.c.bf16 %v9691_v56, %v9690_v53  ;;  %v8537_v53 = vld [vmem:[%s17121_s8 + $0x428] sm:$0xff]  ;;  %v8538_v56 = vld [vmem:[%s17121_s8 + $0x430] sm:$0xff] }
0x42f3   :  { %13146 = vmatmul.mubr.msk.f32.vlgmr.msra.gmra.mrb[82].mxu1 %vm2637_vm8, %v16362_v26 }
0x42f4   :  { %14260 = vmatpush3.bf16.msra.mxu1 %v14257_v33  ;;  %13183 = vmatprep.mubr.msk.f32.mxu1 %vm2637_vm8, %v16360_v13  ;;  %v9693_v33 = vld [vmem:[%s17121_s8 + $0x630] sm:$0xff] }
0x42f5   :  { %14262 = vmatprep.subr.bf16.mxu1 %v14261_v62  ;;  %v14393_v61 = vpack.c.bf16 %v9693_v33, %v9692_v60  ;;  %v8539_v60 = vld [vmem:[%s17121_s8 + $0x438] sm:$0xff]  ;;  %v8540_v33 = vld [vmem:[%s17121_s8 + $0x440] sm:$0xff] }
0x42f8   :  { %14264 = vmatpush3.bf16.msra.mxu1 %v14261_v62 }
0x42f9   :  { %14266 = vmatprep.subr.bf16.mxu1 %v14265_v1 }
0x42fc   :  { %14268 = vmatpush3.bf16.msra.mxu1 %v14265_v1  ;;  %v16568_v1 = vld [vmem:[%s17117_s3 + $0x18] sm:$0xff] }
0x42fd   :  { %14270 = vmatprep.subr.bf16.mxu1 %v14269_v17 }
0x4300   :  { %14272 = vmatpush3.bf16.msra.mxu1 %v14269_v17 }
0x4301   :  { %14288 = vmatprep.subr.bf16.mxu1 %v14287_v7 }
0x4303   :  { %13184 = vmatmul.mubr.msk.f32.vlgmr.msra.gmra.mrb[84].mxu1 %vm2637_vm8, %v16362_v26 }
0x4304   :  { %14290 = vmatpush3.bf16.msra.mxu1 %v14287_v7  ;;  %13223 = vmatprep.mubr.msk.f32.mxu1 %vm2637_vm8, %v16360_v13  ;;  %v16582_v7 = vld [vmem:[%s17121_s8 + $0x4a8] ss:$0 sm:$0xff] }
0x4305   :  { %14292 = vmatprep.subr.bf16.mxu1 %v14291_v23 }
0x4308   :  { %14294 = vmatpush3.bf16.msra.mxu1 %v14291_v23 }
0x4309   :  { %14296 = vmatprep.subr.bf16.mxu1 %v14295_v19 }
0x430c   :  { %14298 = vmatpush3.bf16.msra.mxu1 %v14295_v19 }
0x430d   :  { %14300 = vmatprep.subr.bf16.mxu1 %v14299_v30 }
0x4310   :  { %14302 = vmatpush3.bf16.msra.mxu1 %v14299_v30 }
0x4311   :  { %14320 = vmatprep.subr.bf16.mxu1 %v14319_v18 }
0x4313   :  { %13224 = vmatmul.mubr.msk.f32.vlgmr.msra.gmra.mrb[86].mxu1 %vm2637_vm8, %v16362_v26 }
0x4314   :  { %14322 = vmatpush3.bf16.msra.mxu1 %v14319_v18  ;;  %13261 = vmatprep.mubr.msk.f32.mxu1 %vm2637_vm8, %v16360_v13 }
0x4315   :  { %14324 = vmatprep.subr.bf16.mxu1 %v14323_v52 }
0x4318   :  { %14326 = vmatpush3.bf16.msra.mxu1 %v14323_v52 }
0x4319   :  { %14328 = vmatprep.subr.bf16.mxu1 %v14327_v35 }
0x431c   :  { %14330 = vmatpush3.bf16.msra.mxu1 %v14327_v35 }
0x431d   :  { %14332 = vmatprep.subr.bf16.mxu1 %v14331_v10 }
0x4320   :  { %14334 = vmatpush3.bf16.msra.mxu1 %v14331_v10 }
0x4321   :  { %14350 = vmatprep.subr.bf16.mxu1 %v14349_v37 }
0x4323   :  { %13262 = vmatmul.mubr.msk.f32.vlgmr.msra.gmra.mrb[88].mxu1 %vm2637_vm8, %v16362_v26 }
0x4324   :  { %14352 = vmatpush3.bf16.msra.mxu1 %v14349_v37  ;;  %13301 = vmatprep.mubr.msk.f32.mxu1 %vm2637_vm8, %v16360_v13 }
0x4325   :  { %14354 = vmatprep.subr.bf16.mxu1 %v14353_v40 }
0x4328   :  { %14356 = vmatpush3.bf16.msra.mxu1 %v14353_v40 }
0x4329   :  { %14358 = vmatprep.subr.bf16.mxu1 %v14357_v47 }
0x432c   :  { %14360 = vmatpush3.bf16.msra.mxu1 %v14357_v47 }
0x432d   :  { %14362 = vmatprep.subr.bf16.mxu1 %v14361_v43 }
0x4330   :  { %14364 = vmatpush3.bf16.msra.mxu1 %v14361_v43  ;;  %v14221_v43 = vpack.c.bf16 %v8365_v41, %v8364_v54  ;;  %v8898_v54 = vld [vmem:[%s17118_s10 + $0x1a8] sm:$0xff] }
0x4331   :  { %14382 = vmatprep.subr.bf16.mxu1 %v14381_v48 }
0x4332   :  { %14222 = vmatprep.subr.bf16.mxu0 %v14221_v43 }
0x4333   :  { %13302 = vmatmul.mubr.msk.f32.vlgmr.msra.gmra.mrb[90].mxu1 %vm2637_vm8, %v16362_v26 }
0x4334   :  { %14384 = vmatpush3.bf16.msra.mxu1 %v14381_v48  ;;  %13339 = vmatprep.mubr.msk.f32.mxu1 %vm2637_vm8, %v16360_v13 }
0x4335   :  { %14386 = vmatprep.subr.bf16.mxu1 %v14385_v51 }
0x4338   :  { %14388 = vmatpush3.bf16.msra.mxu1 %v14385_v51 }
0x4339   :  { %14390 = vmatprep.subr.bf16.mxu1 %v14389_v59 }
0x433c   :  { %14392 = vmatpush3.bf16.msra.mxu1 %v14389_v59  ;;  %v14241_v59 = vpack.c.bf16 %v8538_v56, %v8537_v53  ;;  %v9071_v53 = vld [vmem:[%s17121_s8 + $0x4f8] sm:$0xff] }
0x433d   :  { %14394 = vmatprep.subr.bf16.mxu1 %v14393_v61 }
0x4340   :  { %14396 = vmatpush3.bf16.msra.mxu1 %v14393_v61 }
0x4343   :  { %13340 = vmatmul.mubr.msk.f32.vlgmr.msra.gmra.mrb[92].mxu1 %vm2637_vm8, %v16362_v26 }
0x43b6   :  { %v13114_v32 = vpop.f32.mrb[80].mxu1 }
0x43b7   :  { %v8258_v62 = vmul.f32 0.25, %v13114_v32  ;;  %v8248_v63 = vpop.f32.mrb[81].mxu1 }
0x43b8   :  { %v8257_v0 = vmul.f32 0.25, %v8248_v63  ;;  %v8541_v63 = vld [vmem:[%s17121_s8 + $0x448] sm:$0xff] }
0x43b9   :  { %v8260_v2 = vadd.f32 %v16568_v1, %v8258_v62  ;;  %v14245_v62 = vpack.c.bf16 %v8540_v33, %v8539_v60  ;;  %v9073_v60 = vld [vmem:[%s17121_s8 + $0x508] sm:$0xff] }
0x43ba   :  { %v8259_v17 = vadd.f32 %v16574_v3, %v8257_v0  ;;  %v8542_v0 = vld [vmem:[%s17121_s8 + $0x450] sm:$0xff] }
0x43bb   :  { %v8264_v11 = vsel %vm77_vm0, %v8260_v2, -inf }
0x43bc   :  { %8265 = vmax.xlane.f32.xlu0 %v8264_v11  ;;  %v8261_v6 = vsel %vm77_vm0, %v8259_v17, -inf  ;;  %v8544_v11 = vld [vmem:[%s17121_s8 + $0x460] sm:$0xff] }
0x43bd   :  { %8262 = vmax.xlane.f32.xlu1 %v8261_v6 }
0x43c6   :  { %v13147_v21 = vpop.f32.mrb[82].mxu1 }
0x43c7   :  { %v16585_v14 = vadd.f32 %v13147_v21, %v16582_v7  ;;  %v16587_v23 = vpop.f32.mrb[83].mxu1 }
0x43c8   :  { %v8529_v21 = vadd.f32 %v16582_v7, %v16587_v23 }
0x43d6   :  { %v13185_v15 = vpop.f32.mrb[84].mxu1 }
0x43d7   :  { %v8694_v16 = vpop.f32.mrb[85].mxu1 }
0x43d8   :  { %v16589_v19 = vpack.c.bf16 %v13185_v15, %v8694_v16 }
0x43e6   :  { %v13225_v4 = vpop.f32.mrb[86].mxu1 }
0x43e7   :  { %v16597_v30 = vadd.f32 %v13225_v4, %v16594_v22  ;;  %v16599_v24 = vpop.f32.mrb[87].mxu1 }
0x43f6   :  { %v13263_v25 = vpop.f32.mrb[88].mxu1 }
0x43f7   :  { %v9227_v18 = vpop.f32.mrb[89].mxu1 }
0x43f8   :  { %v16601_v27 = vpack.c.bf16 %v13263_v25, %v9227_v18 }
0x4406   :  { %v13303_v52 = vpop.f32.mrb[90].mxu1 }
0x4407   :  { %v16609_v57 = vadd.f32 %v13303_v52, %v16606_v28  ;;  %v16611_v29 = vpop.f32.mrb[91].mxu1 }
0x4416   :  { %v13341_v35 = vpop.f32.mrb[92].mxu1 }
0x4417   :  { %v9760_v5 = vpop.f32.mrb[93].mxu1 }
0x4418   :  { %v16613_v36 = vpack.c.bf16 %v13341_v35, %v9760_v5 }
0x4449   :  { %v8266_v10 = vpop.xlane.xlu0 %8265 }
0x444a   :  { %v8268_v31 = vsub.f32 %v8260_v2, %v8266_v10  ;;  %v8263_v34 = vpop.xlane.xlu1 %8262  ;;  %v14249_v2 = vpack.c.bf16 %v8542_v0, %v8541_v63  ;;  %v9075_v63 = vld [vmem:[%s17121_s8 + $0x518] sm:$0xff] }
0x444b   :  { %v8267_v37 = vsub.f32 %v8259_v17, %v8263_v34  ;;  %v8543_v17 = vld [vmem:[%s17121_s8 + $0x458] sm:$0xff] }
0x444c   :  { %v8271_v38 = vmul.f32 1.442695, %v8268_v31  ;;  %v14253_v6 = vpack.c.bf16 %v8544_v11, %v8543_v17  ;;  %v9077_v17 = vld [vmem:[%s17121_s8 + $0x528] sm:$0xff] }
0x444d   :  { %v8269_v39 = vmul.f32 1.442695, %v8267_v37 }
0x444e   :  { %14703 = vpow2.f32 %v8271_v38 }
0x444f   :  { %14705 = vpow2.f32 %v8269_v39 }
0x4458   :  { %v14704_v40 = vpop.eup %14703 }
0x4459   :  { %v14706_v44 = vpop.eup %14705  ;;  %v8276_v55 = vsel %vm77_vm0, %v14704_v40, 0.0 }
0x445a   :  { %8277 = vadd.xlane.f32.xlu0 %v8276_v55  ;;  %v8273_v47 = vsel %vm77_vm0, %v14706_v44, 0.0 }
0x445b   :  { %8274 = vadd.xlane.f32.xlu1 %v8273_v47  ;;  %v8897_v47 = vld [vmem:[%s17118_s10 + $0x1a0] sm:$0xff] }
0x445c   :  { %v14283_v41 = vpack.c.bf16 %v8898_v54, %v8897_v47 }
0x44e7   :  { %v8278_v45 = vpop.xlane.xlu0 %8277 }
0x44e8   :  { %14707 = vrcp.f32 %v8278_v45  ;;  %v8275_v46 = vpop.xlane.xlu1 %8274 }
0x44e9   :  { %14709 = vrcp.f32 %v8275_v46 }
0x44f2   :  { %v14708_v48 = vpop.eup %14707 }
0x44f3   :  { %v14710_v49 = vpop.eup %14709  ;;  %v8282_v51 = vmul.f32 %v14708_v48, %v14704_v40 }
0x44f4   :  { %v8281_v50 = vmul.f32 %v14710_v49, %v14706_v44 }
0x44f6   :  { %13119 = vmatprep.mubr.msk.f32.mxu0 %vm77_vm0, %v8281_v50 }
0x44f7   :  { %13120 = vmatmul.mubr.msk.f32.vlgmr.msra.gmra.mrb[70].mxu0 %vm77_vm0, %v8282_v51  ;;  %v9070_v51 = vld [vmem:[%s17121_s8 + $0x4f0] sm:$0xff] }
0x44f8   :  { %14224 = vmatpush3.bf16.msra.mxu0 %v14221_v43  ;;  %v14303_v56 = vpack.c.bf16 %v9071_v53, %v9070_v51 }
0x44f9   :  { %14242 = vmatprep.subr.bf16.mxu0 %v14241_v59 }
0x45ca   :  { %v13121_v61 = vpop.f32.mrb[70].mxu0 }
0x45cb   :  { %v8355_v32 = vpop.f32.mrb[71].mxu0 }
0x45cc   :  { %13126 = vmatprep.mubr.msk.f32.mxu0 %vm77_vm0, %v8355_v32 }
0x45cd   :  { %13127 = vmatmul.mubr.msk.f32.vlgmr.msra.gmra.mrb[72].mxu0 %vm77_vm0, %v13121_v61 }
0x45ce   :  { %14244 = vmatpush3.bf16.msra.mxu0 %v14241_v59  ;;  %13164 = vmatprep.mubr.msk.f32.mxu0 %vm2637_vm8, %v16360_v13  ;;  %v9072_v59 = vld [vmem:[%s17121_s8 + $0x500] sm:$0xff] }
0x45cf   :  { %14246 = vmatprep.subr.bf16.mxu0 %v14245_v62  ;;  %v14307_v32 = vpack.c.bf16 %v9073_v60, %v9072_v59  ;;  %v9607_v59 = vld [vmem:[%s17121_s8 + $0x5d8] sm:$0xff]  ;;  %v9608_v60 = vld [vmem:[%s17121_s8 + $0x5e0] sm:$0xff] }
0x45d2   :  { %14248 = vmatpush3.bf16.msra.mxu0 %v14245_v62  ;;  %v9074_v62 = vld [vmem:[%s17121_s8 + $0x510] sm:$0xff] }
0x45d3   :  { %14250 = vmatprep.subr.bf16.mxu0 %v14249_v2  ;;  %v14311_v0 = vpack.c.bf16 %v9075_v63, %v9074_v62  ;;  %v9595_v63 = vadd.f32 %v16606_v28, %v16611_v29 }
0x45d6   :  { %14252 = vmatpush3.bf16.msra.mxu0 %v14249_v2  ;;  %v9076_v2 = vld [vmem:[%s17121_s8 + $0x520] sm:$0xff] }
0x45d7   :  { %14254 = vmatprep.subr.bf16.mxu0 %v14253_v6  ;;  %v14315_v11 = vpack.c.bf16 %v9077_v17, %v9076_v2 }
0x45da   :  { %14256 = vmatpush3.bf16.msra.mxu0 %v14253_v6  ;;  %v9062_v6 = vadd.f32 %v16594_v22, %v16599_v24 }
0x45dd   :  { %13165 = vmatmul.mubr.msk.f32.vlgmr.msra.gmra.mrb[74].mxu0 %vm2637_vm8, %v16362_v26 }
0x45de   :  { %13190 = vmatprep.mubr.msk.f32.mxu0 %vm77_vm0, %v8529_v21 }
0x46b0   :  { %v13166_v15 = vpop.f32.mrb[74].mxu0 }
0x46b1   :  { %v8611_v16 = vpop.f32.mrb[75].mxu0 }
0x46b2   :  { %v14273_v4 = vpack.c.bf16 %v13166_v15, %v8611_v16 }
0x46b4   :  { %14275 = vmatprep.subr.msk.bf16.mxu0 %vm15786_vm10, %v14273_v4 }
0x46b5   :  { %14278 = vmatpush3.bf16.xpose.msk.msra.mxu0 %vm15786_vm10, %v14273_v4 }
0x46b6   :  { %14280 = vmatprep.subr.bf16.mxu0 %v16589_v19 }
0x46bc   :  { %13191 = vmatmul.mubr.msk.f32.vlgmr.msra.gmra.mrb[76].mxu0 %vm77_vm0, %v16585_v14 }
0x46bd   :  { %14282 = vmatpush3.bf16.msra.mxu0 %v16589_v19 }
0x46be   :  { %14284 = vmatprep.subr.bf16.mxu0 %v14283_v41 }
0x478f   :  { %v13192_v7 = vpop.f32.mrb[76].mxu0 }
0x4790   :  { %v8791_v23 = vmul.f32 0.25, %v13192_v7  ;;  %v8781_v25 = vpop.f32.mrb[77].mxu0 }
0x4791   :  { %v8790_v18 = vmul.f32 0.25, %v8781_v25 }
0x4792   :  { %v8793_v52 = vadd.f32 %v16568_v1, %v8791_v23 }
0x4793   :  { %v8792_v35 = vadd.f32 %v16574_v3, %v8790_v18 }
0x4794   :  { %v8797_v5 = vsel %vm77_vm0, %v8793_v52, -inf }
0x4795   :  { %8798 = vmax.xlane.f32.xlu0 %v8797_v5  ;;  %v8794_v10 = vsel %vm77_vm0, %v8792_v35, -inf }
0x4796   :  { %8795 = vmax.xlane.f32.xlu1 %v8794_v10 }
0x4822   :  { %v8799_v31 = vpop.xlane.xlu0 %8798 }
0x4823   :  { %v8801_v34 = vsub.f32 %v8793_v52, %v8799_v31  ;;  %v8796_v37 = vpop.xlane.xlu1 %8795 }
0x4824   :  { %v8800_v14 = vsub.f32 %v8792_v35, %v8796_v37 }
0x4825   :  { %v8804_v38 = vmul.f32 1.442695, %v8801_v34 }
0x4826   :  { %v8802_v19 = vmul.f32 1.442695, %v8800_v14 }
0x4827   :  { %14711 = vpow2.f32 %v8804_v38 }
0x4828   :  { %14713 = vpow2.f32 %v8802_v19  ;;  %v9430_v19 = vld [vmem:[%s17118_s10 + $0x1b0] sm:$0xff] }
0x4831   :  { %v14712_v39 = vpop.eup %14711 }
0x4832   :  { %v14714_v40 = vpop.eup %14713  ;;  %v8809_v44 = vsel %vm77_vm0, %v14712_v39, 0.0 }
0x4833   :  { %8810 = vadd.xlane.f32.xlu0 %v8809_v44  ;;  %v8806_v55 = vsel %vm77_vm0, %v14714_v40, 0.0 }
0x4834   :  { %8807 = vadd.xlane.f32.xlu1 %v8806_v55 }
0x48c0   :  { %v8811_v43 = vpop.xlane.xlu0 %8810 }
0x48c1   :  { %14715 = vrcp.f32 %v8811_v43  ;;  %v8808_v45 = vpop.xlane.xlu1 %8807 }
0x48c2   :  { %14717 = vrcp.f32 %v8808_v45  ;;  %v9603_v45 = vld [vmem:[%s17121_s8 + $0x5b8] sm:$0xff] }
0x48cb   :  { %v14716_v46 = vpop.eup %14715 }
0x48cc   :  { %v14718_v48 = vpop.eup %14717  ;;  %v8815_v50 = vmul.f32 %v14716_v46, %v14712_v39  ;;  %v9431_v39 = vld [vmem:[%s17118_s10 + $0x1b8] sm:$0xff]  ;;  %v9604_v46 = vld [vmem:[%s17121_s8 + $0x5c0] sm:$0xff] }
0x48cd   :  { %v8814_v49 = vmul.f32 %v14718_v48, %v14714_v40  ;;  %v14345_v40 = vpack.c.bf16 %v9431_v39, %v9430_v19  ;;  %v14365_v48 = vpack.c.bf16 %v9604_v46, %v9603_v45 }
0x48cf   :  { %13197 = vmatprep.mubr.msk.f32.mxu0 %vm77_vm0, %v8814_v49  ;;  %v9605_v49 = vld [vmem:[%s17121_s8 + $0x5c8] sm:$0xff] }
0x48d0   :  { %13198 = vmatmul.mubr.msk.f32.vlgmr.msra.gmra.mrb[78].mxu0 %vm77_vm0, %v8815_v50  ;;  %v9606_v50 = vld [vmem:[%s17121_s8 + $0x5d0] sm:$0xff] }
0x48d1   :  { %14286 = vmatpush3.bf16.msra.mxu0 %v14283_v41 }
0x48d2   :  { %14304 = vmatprep.subr.bf16.mxu0 %v14303_v56 }
0x49a3   :  { %v13199_v33 = vpop.f32.mrb[78].mxu0 }
0x49a4   :  { %v8888_v61 = vpop.f32.mrb[79].mxu0 }
0x49a5   :  { %13204 = vmatprep.mubr.msk.f32.mxu0 %vm77_vm0, %v8888_v61  ;;  %v9609_v61 = vld [vmem:[%s17121_s8 + $0x5e8] sm:$0xff] }
0x49a6   :  { %13205 = vmatmul.mubr.msk.f32.vlgmr.msra.gmra.mrb[72].mxu0 %vm77_vm0, %v13199_v33  ;;  %v14373_v33 = vpack.c.bf16 %v9608_v60, %v9607_v59  ;;  %v10089_v59 = vld [vmem:[%s17122_s11 + $0x50] sm:$0xff] }
0x49a7   :  { %14306 = vmatpush3.bf16.msra.mxu0 %v14303_v56  ;;  %13242 = vmatprep.mubr.msk.f32.mxu0 %vm2637_vm8, %v16360_v13  ;;  %v14369_v56 = vpack.c.bf16 %v9606_v50, %v9605_v49 }
0x49a8   :  { %14308 = vmatprep.subr.bf16.mxu0 %v14307_v32 }
0x49ab   :  { %14310 = vmatpush3.bf16.msra.mxu0 %v14307_v32  ;;  %v9610_v32 = vld [vmem:[%s17121_s8 + $0x5f0] sm:$0xff] }
0x49ac   :  { %14312 = vmatprep.subr.bf16.mxu0 %v14311_v0  ;;  %v14377_v62 = vpack.c.bf16 %v9610_v32, %v9609_v61  ;;  %v10091_v61 = vld [vmem:[%s17122_s11 + $0x60] sm:$0xff] }
0x49af   :  { %14314 = vmatpush3.bf16.msra.mxu0 %v14311_v0 }
0x49b0   :  { %14316 = vmatprep.subr.bf16.mxu0 %v14315_v11 }
0x49b3   :  { %14318 = vmatpush3.bf16.msra.mxu0 %v14315_v11 }
0x49b6   :  { %13243 = vmatmul.mubr.msk.f32.vlgmr.msra.gmra.mrb[80].mxu0 %vm2637_vm8, %v16362_v26 }
0x49b7   :  { %13268 = vmatprep.mubr.msk.f32.mxu0 %vm77_vm0, %v9062_v6 }
0x4a89   :  { %v13244_v21 = vpop.f32.mrb[80].mxu0 }
0x4a8a   :  { %v9144_v15 = vpop.f32.mrb[81].mxu0 }
0x4a8b   :  { %v14335_v16 = vpack.c.bf16 %v13244_v21, %v9144_v15 }
0x4a8d   :  { %14337 = vmatprep.subr.msk.bf16.mxu0 %vm15786_vm10, %v14335_v16 }
0x4a8e   :  { %14340 = vmatpush3.bf16.xpose.msk.msra.mxu0 %vm15786_vm10, %v14335_v16 }
0x4a8f   :  { %14342 = vmatprep.subr.bf16.mxu0 %v16601_v27 }
0x4a95   :  { %13269 = vmatmul.mubr.msk.f32.vlgmr.msra.gmra.mrb[82].mxu0 %vm77_vm0, %v16597_v30 }
0x4a96   :  { %14344 = vmatpush3.bf16.msra.mxu0 %v16601_v27 }
0x4a97   :  { %14346 = vmatprep.subr.bf16.mxu0 %v14345_v40 }
0x4b68   :  { %v13270_v22 = vpop.f32.mrb[82].mxu0 }
0x4b69   :  { %v9324_v24 = vmul.f32 0.25, %v13270_v22  ;;  %v9314_v4 = vpop.f32.mrb[83].mxu0 }
0x4b6a   :  { %v9323_v7 = vmul.f32 0.25, %v9314_v4 }
0x4b6b   :  { %v9326_v23 = vadd.f32 %v16568_v1, %v9324_v24 }
0x4b6c   :  { %v9325_v25 = vadd.f32 %v16574_v3, %v9323_v7 }
0x4b6d   :  { %v9330_v18 = vsel %vm77_vm0, %v9326_v23, -inf }
0x4b6e   :  { %9331 = vmax.xlane.f32.xlu0 %v9330_v18  ;;  %v9327_v52 = vsel %vm77_vm0, %v9325_v25, -inf  ;;  %v9963_v18 = vld [vmem:[%s17118_s10 + $0x1c0] sm:$0xff] }
0x4b6f   :  { %9328 = vmax.xlane.f32.xlu1 %v9327_v52  ;;  %v9964_v52 = vld [vmem:[%s17118_s10 + $0x1c8] sm:$0xff] }
0x4bfb   :  { %v9332_v35 = vpop.xlane.xlu0 %9331 }
0x4bfc   :  { %v9334_v5 = vsub.f32 %v9326_v23, %v9332_v35  ;;  %v9329_v10 = vpop.xlane.xlu1 %9328  ;;  %v14407_v35 = vpack.c.bf16 %v9964_v52, %v9963_v18 }
0x4bfd   :  { %v9333_v30 = vsub.f32 %v9325_v25, %v9329_v10 }
0x4bfe   :  { %v9337_v31 = vmul.f32 1.442695, %v9334_v5 }
0x4bff   :  { %v9335_v27 = vmul.f32 1.442695, %v9333_v30 }
0x4c00   :  { %14719 = vpow2.f32 %v9337_v31 }
0x4c01   :  { %14721 = vpow2.f32 %v9335_v27 }
0x4c0a   :  { %v14720_v34 = vpop.eup %14719 }
0x4c0b   :  { %v14722_v37 = vpop.eup %14721  ;;  %v9342_v14 = vsel %vm77_vm0, %v14720_v34, 0.0 }
0x4c0c   :  { %9343 = vadd.xlane.f32.xlu0 %v9342_v14  ;;  %v9339_v38 = vsel %vm77_vm0, %v14722_v37, 0.0 }
0x4c0d   :  { %9340 = vadd.xlane.f32.xlu1 %v9339_v38  ;;  %v11351_v38 = vld [vmem:[%s17118_s10 + $0x1d0] ss:$0 sm:$0xff] }
0x4c0e   :  { %v7909_v19 = vadd.f32 %v11351_v38, %v16362_v26 }
0x4c99   :  { %v9344_v44 = vpop.xlane.xlu0 %9343 }
0x4c9a   :  { %14723 = vrcp.f32 %v9344_v44  ;;  %v9341_v55 = vpop.xlane.xlu1 %9340 }
0x4c9b   :  { %14725 = vrcp.f32 %v9341_v55 }
0x4ca4   :  { %v14724_v47 = vpop.eup %14723 }
0x4ca5   :  { %v14726_v54 = vpop.eup %14725  ;;  %v9348_v43 = vmul.f32 %v14724_v47, %v14720_v34 }
0x4ca6   :  { %v9347_v41 = vmul.f32 %v14726_v54, %v14722_v37 }
0x4ca8   :  { %13275 = vmatprep.mubr.msk.f32.mxu0 %vm77_vm0, %v9347_v41 }
0x4ca9   :  { %13276 = vmatmul.mubr.msk.f32.vlgmr.msra.gmra.mrb[84].mxu0 %vm77_vm0, %v9348_v43 }
0x4caa   :  { %14348 = vmatpush3.bf16.msra.mxu0 %v14345_v40  ;;  %v7908_v40 = vadd.f32 %v11351_v38, %v16360_v13  ;;  %v10208_v38 = vld [vmem:[%s17118_s10 + $0x228] sm:$0xff] }
0x4cab   :  { %14366 = vmatprep.subr.bf16.mxu0 %v14365_v48 }
0x4d7c   :  { %v13277_v51 = vpop.f32.mrb[84].mxu0 }
0x4d7d   :  { %v9421_v53 = vpop.f32.mrb[85].mxu0 }
0x4d7e   :  { %13282 = vmatprep.mubr.msk.f32.mxu0 %vm77_vm0, %v9421_v53 }
0x4d7f   :  { %13283 = vmatmul.mubr.msk.f32.vlgmr.msra.gmra.mrb[72].mxu0 %vm77_vm0, %v13277_v51 }
0x4d80   :  { %14368 = vmatpush3.bf16.msra.mxu0 %v14365_v48  ;;  %13320 = vmatprep.mubr.msk.f32.mxu0 %vm2637_vm8, %v16360_v13 }
0x4d81   :  { %14370 = vmatprep.subr.bf16.mxu0 %v14369_v56 }
0x4d84   :  { %14372 = vmatpush3.bf16.msra.mxu0 %v14369_v56  ;;  %v10088_v56 = vld [vmem:[%s17122_s11 + $0x48] sm:$0xff] }
0x4d85   :  { %14374 = vmatprep.subr.bf16.mxu0 %v14373_v33  ;;  %v14411_v60 = vpack.c.bf16 %v10089_v59, %v10088_v56 }
0x4d87   :  { %14412 = vmatprep.subr.bf16.mxu1 %v14411_v60 }
0x4d88   :  { %14376 = vmatpush3.bf16.msra.mxu0 %v14373_v33  ;;  %14414 = vmatpush3.bf16.msra.mxu1 %v14411_v60  ;;  %v10090_v33 = vld [vmem:[%s17122_s11 + $0x58] sm:$0xff] }
0x4d89   :  { %14378 = vmatprep.subr.bf16.mxu0 %v14377_v62  ;;  %v14415_v32 = vpack.c.bf16 %v10091_v61, %v10090_v33 }
0x4d8b   :  { %14416 = vmatprep.subr.bf16.mxu1 %v14415_v32 }
0x4d8c   :  { %14380 = vmatpush3.bf16.msra.mxu0 %v14377_v62  ;;  %14418 = vmatpush3.bf16.msra.mxu1 %v14415_v32  ;;  %v10092_v62 = vld [vmem:[%s17122_s11 + $0x68] sm:$0xff] }
0x4d8f   :  { %13321 = vmatmul.mubr.msk.f32.vlgmr.msra.gmra.mrb[86].mxu0 %vm2637_vm8, %v16362_v26 }
0x4d90   :  { %13346 = vmatprep.mubr.msk.f32.mxu0 %vm77_vm0, %v9595_v63  ;;  %v10093_v63 = vld [vmem:[%s17122_s11 + $0x70] sm:$0xff] }
0x4e62   :  { %v13322_v0 = vpop.f32.mrb[86].mxu0 }
0x4e63   :  { %v9677_v2 = vpop.f32.mrb[87].mxu0 }
0x4e64   :  { %v14397_v17 = vpack.c.bf16 %v13322_v0, %v9677_v2  ;;  %v14419_v0 = vpack.c.bf16 %v10093_v63, %v10092_v62  ;;  %v10094_v2 = vld [vmem:[%s17122_s11 + $0x78] sm:$0xff] }
0x4e66   :  { %14399 = vmatprep.subr.msk.bf16.mxu0 %vm15786_vm10, %v14397_v17  ;;  %14420 = vmatprep.subr.bf16.mxu1 %v14419_v0 }
0x4e67   :  { %14402 = vmatpush3.bf16.xpose.msk.msra.mxu0 %vm15786_vm10, %v14397_v17  ;;  %v10095_v17 = vld [vmem:[%s17122_s11 + $0x80] sm:$0xff]  ;;  %14422 = vmatpush3.bf16.msra.mxu1 %v14419_v0 }
0x4e68   :  { %14404 = vmatprep.subr.bf16.mxu0 %v16613_v36 }
0x4e6e   :  { %13347 = vmatmul.mubr.msk.f32.vlgmr.msra.gmra.mrb[88].mxu0 %vm77_vm0, %v16609_v57 }
0x4e6f   :  { %14406 = vmatpush3.bf16.msra.mxu0 %v16613_v36 }
0x4e70   :  { %14408 = vmatprep.subr.bf16.mxu0 %v14407_v35 }
0x4f41   :  { %v13348_v28 = vpop.f32.mrb[88].mxu0 }
0x4f42   :  { %v9857_v29 = vmul.f32 0.25, %v13348_v28  ;;  %v9847_v11 = vpop.f32.mrb[89].mxu0  ;;  %v14423_v28 = vpack.c.bf16 %v10095_v17, %v10094_v2 }
0x4f43   :  { %v9856_v6 = vmul.f32 0.25, %v9847_v11  ;;  %v10201_v11 = vld [vmem:[%s17118_s10 + $0x1f0] sm:$0xff] }
0x4f44   :  { %v9859_v21 = vadd.f32 %v16568_v1, %v9857_v29  ;;  %14424 = vmatprep.subr.bf16.mxu1 %v14423_v28  ;;  %v10200_v29 = vld [vmem:[%s17118_s10 + $0x1e8] sm:$0xff] }
0x4f45   :  { %v9858_v15 = vadd.f32 %v16574_v3, %v9856_v6  ;;  %14426 = vmatpush3.bf16.msra.mxu1 %v14423_v28  ;;  %v14427_v6 = vpack.c.bf16 %v10201_v11, %v10200_v29 }
0x4f46   :  { %v9863_v16 = vsel %vm77_vm0, %v9859_v21, -inf  ;;  %14459 = vmatprep.subr.bf16.mxu1 %v14757_v58 }
0x4f47   :  { %9864 = vmax.xlane.f32.xlu0 %v9863_v16  ;;  %v9860_v42 = vsel %vm77_vm0, %v9858_v15, -inf }
0x4f48   :  { %9861 = vmax.xlane.f32.xlu1 %v9860_v42 }
0x4fd4   :  { %v9865_v22 = vpop.xlane.xlu0 %9864 }
0x4fd5   :  { %v9867_v24 = vsub.f32 %v9859_v21, %v9865_v22  ;;  %v9862_v4 = vpop.xlane.xlu1 %9861 }
0x4fd6   :  { %v9866_v57 = vsub.f32 %v9858_v15, %v9862_v4 }
0x4fd7   :  { %v9870_v7 = vmul.f32 1.442695, %v9867_v24 }
0x4fd8   :  { %v9868_v36 = vmul.f32 1.442695, %v9866_v57  ;;  %v11412_v57 = vld [vmem:[%s17118_s10 + $0x1d8] ss:$0 sm:$0xff] }
0x4fd9   :  { %14727 = vpow2.f32 %v9870_v7 }
0x4fda   :  { %14729 = vpow2.f32 %v9868_v36 }
0x4fe3   :  { %v14728_v23 = vpop.eup %14727 }
0x4fe4   :  { %v14730_v25 = vpop.eup %14729  ;;  %v9875_v1 = vsel %vm77_vm0, %v14728_v23, 0.0 }
0x4fe5   :  { %9876 = vadd.xlane.f32.xlu0 %v9875_v1  ;;  %v9872_v3 = vsel %vm77_vm0, %v14730_v25, 0.0 }
0x4fe6   :  { %9873 = vadd.xlane.f32.xlu1 %v9872_v3 }
0x5072   :  { %v9877_v5 = vpop.xlane.xlu0 %9876 }
0x5073   :  { %14731 = vrcp.f32 %v9877_v5  ;;  %v9874_v10 = vpop.xlane.xlu1 %9873  ;;  %v10203_v5 = vld [vmem:[%s17118_s10 + $0x200] sm:$0xff] }
0x5074   :  { %14733 = vrcp.f32 %v9874_v10 }
0x507d   :  { %v14732_v30 = vpop.eup %14731 }
0x507e   :  { %v14734_v31 = vpop.eup %14733  ;;  %v9881_v34 = vmul.f32 %v14732_v30, %v14728_v23  ;;  %v10204_v30 = vld [vmem:[%s17118_s10 + $0x208] sm:$0xff] }
0x507f   :  { %v9880_v27 = vmul.f32 %v14734_v31, %v14730_v25  ;;  %v11413_v25 = vld [vmem:[%s17118_s10 + $0x1e0] ss:$0 sm:$0xff]  ;;  %v10205_v31 = vld [vmem:[%s17118_s10 + $0x210] sm:$0xff] }
0x5081   :  { %13353 = vmatprep.mubr.msk.f32.mxu0 %vm77_vm0, %v9880_v27  ;;  %v14435_v27 = vpack.c.bf16 %v10205_v31, %v10204_v30 }
0x5082   :  { %13354 = vmatmul.mubr.msk.f32.vlgmr.msra.gmra.mrb[90].mxu0 %vm77_vm0, %v9881_v34  ;;  %v10206_v34 = vld [vmem:[%s17118_s10 + $0x218] sm:$0xff] }
0x5083   :  { %14410 = vmatpush3.bf16.msra.mxu0 %v14407_v35  ;;  %v10202_v35 = vld [vmem:[%s17118_s10 + $0x1f8] sm:$0xff] }
0x5084   :  { %14428 = vmatprep.subr.bf16.mxu0 %v14427_v6  ;;  %v14431_v10 = vpack.c.bf16 %v10203_v5, %v10202_v35 }
0x5155   :  { %v13355_v37 = vpop.f32.mrb[90].mxu0 }
0x5156   :  { %v9954_v14 = vpop.f32.mrb[91].mxu0 }
0x5157   :  { %13360 = vmatprep.mubr.msk.f32.mxu0 %vm77_vm0, %v9954_v14 }
0x5158   :  { %13361 = vmatmul.mubr.msk.f32.vlgmr.msra.gmra.mrb[72].mxu0 %vm77_vm0, %v13355_v37  ;;  %v10207_v37 = vld [vmem:[%s17118_s10 + $0x220] sm:$0xff] }
0x5159   :  { %14430 = vmatpush3.bf16.msra.mxu0 %v14427_v6  ;;  %v14439_v14 = vpack.c.bf16 %v10207_v37, %v10206_v34  ;;  %v11422_v34 = vld [vmem:[%s17123_s4 + $0x10] sm:$0xff]  ;;  %v11423_v37 = vld [vmem:[%s17123_s4 + $0x18] sm:$0xff] }
0x515a   :  { %14432 = vmatprep.subr.bf16.mxu0 %v14431_v10 }
0x515d   :  { %14434 = vmatpush3.bf16.msra.mxu0 %v14431_v10 }
0x515e   :  { %14436 = vmatprep.subr.bf16.mxu0 %v14435_v27 }
0x5161   :  { %14438 = vmatpush3.bf16.msra.mxu0 %v14435_v27  ;;  %v5213_v27 = vld [vmem:[%s17123_s4 + $0x8] sm:$0xff] }
0x5162   :  { %14440 = vmatprep.subr.bf16.mxu0 %v14439_v14 }
0x5165   :  { %14442 = vmatpush3.bf16.msra.mxu0 %v14439_v14  ;;  %v10678_v14 = vld [vmem:[%s17118_s10 + $0x2c8] sm:$0xff] }
0x522b   :  { %v13362_v39 = vpop.f32.mrb[72].mxu0 }
0x522c   :  { %v14525_v44 = vadd.f32 %v13362_v39, %v7909_v19  ;;  %v10037_v55 = vpop.f32.mrb[73].mxu0  ;;  %v10209_v19 = vld [vmem:[%s17118_s10 + $0x230] sm:$0xff]  ;;  %v10210_v39 = vld [vmem:[%s17118_s10 + $0x238] sm:$0xff] }
0x522d   :  { %v14526_v47 = vadd.f32 %v10037_v55, %v7908_v40  ;;  %v14443_v40 = vpack.c.bf16 %v10209_v19, %v10208_v38  ;;  %v10679_v38 = vld [vmem:[%s17118_s10 + $0x2d0] sm:$0xff]  ;;  %v10680_v19 = vld [vmem:[%s17118_s10 + $0x2d8] sm:$0xff] }
0x522e   :  { %v10053_v54 = vsel %vm2637_vm8, %v14525_v44, 0.0 }
0x522f   :  { %10054 = vadd.xlane.f32.xlu0 %v10053_v54  ;;  %v10050_v41 = vsel %vm2637_vm8, %v14526_v47, 0.0  ;;  %14444 = vmatprep.subr.bf16.mxu0 %v14443_v40  ;;  %v10213_v54 = vld [vmem:[%s17118_s10 + $0x250] sm:$0xff] }
0x5230   :  { %10051 = vadd.xlane.f32.xlu1 %v10050_v41  ;;  %14446 = vmatpush3.bf16.msra.mxu0 %v14443_v40  ;;  %v10681_v40 = vld [vmem:[%s17118_s10 + $0x2e0] sm:$0xff] }
0x52bc   :  { %v10055_v43 = vpop.xlane.xlu0 %10054 }
0x52bd   :  { %v10057_v45 = vmul.f32 0.015625, %v10055_v43  ;;  %v10052_v46 = vpop.xlane.xlu1 %10051  ;;  %v10214_v43 = vld [vmem:[%s17118_s10 + $0x258] sm:$0xff] }
0x52be   :  { %v10056_v48 = vmul.f32 0.015625, %v10052_v46 }
0x52bf   :  { %v10059_v49 = vsub.f32 %v14525_v44, %v10057_v45  ;;  %v10211_v44 = vld [vmem:[%s17118_s10 + $0x240] sm:$0xff] }
0x52c0   :  { %v10058_v50 = vsub.f32 %v14526_v47, %v10056_v48  ;;  %v14447_v55 = vpack.c.bf16 %v10211_v44, %v10210_v39  ;;  %v10212_v47 = vld [vmem:[%s17118_s10 + $0x248] sm:$0xff]  ;;  %v10215_v45 = vld [vmem:[%s17118_s10 + $0x260] sm:$0xff]  ;;  %v14475_v39 = vpack.c.bf16 %v10679_v38, %v10678_v14  ;;  %v14478_v44 = vpack.c.bf16 %v10681_v40, %v10680_v19  ;;  %v10602_v14 = vld [vmem:[%s17118_s10 + $0x2b8] sm:$0xff] }
0x52c1   :  { %v10061_v51 = vmul.f32 %v10059_v49, %v10059_v49  ;;  %v14451_v41 = vpack.c.bf16 %v10213_v54, %v10212_v47  ;;  %v14455_v46 = vpack.c.bf16 %v10215_v45, %v10214_v43  ;;  %v11414_v48 = vld [vmem:[%s17122_s11 + $0x88] ss:$0 sm:$0xff]  ;;  %v10683_v47 = vld [vmem:[%s17118_s10 + $0x2f0] sm:$0xff]  ;;  %v10685_v43 = vld [vmem:[%s17118_s10 + $0x300] sm:$0xff] }
0x52c2   :  { %v10060_v26 = vmul.f32 %v10058_v50, %v10058_v50  ;;  %14448 = vmatprep.subr.bf16.mxu0 %v14447_v55 }
0x52c3   :  { %v10065_v53 = vsel %vm2637_vm8, %v10061_v51, 0.0  ;;  %14450 = vmatpush3.bf16.msra.mxu0 %v14447_v55  ;;  %v10682_v55 = vld [vmem:[%s17118_s10 + $0x2e8] sm:$0xff] }
0x52c4   :  { %10066 = vadd.xlane.f32.xlu0 %v10065_v53  ;;  %v10062_v13 = vsel %vm2637_vm8, %v10060_v26, 0.0  ;;  %14452 = vmatprep.subr.bf16.mxu0 %v14451_v41  ;;  %v14481_v54 = vpack.c.bf16 %v10683_v47, %v10682_v55  ;;  %v10760_v55 = vld [vmem:[%s17118_s10 + $0x308] sm:$0xff]  ;;  %v10761_v47 = vld [vmem:[%s17118_s10 + $0x310] sm:$0xff] }
0x52c5   :  { %10063 = vadd.xlane.f32.xlu1 %v10062_v13 }
0x52c7   :  { %14454 = vmatpush3.bf16.msra.mxu0 %v14451_v41  ;;  %v10684_v41 = vld [vmem:[%s17118_s10 + $0x2f8] sm:$0xff] }
0x52c8   :  { %14456 = vmatprep.subr.bf16.mxu0 %v14455_v46  ;;  %v14484_v45 = vpack.c.bf16 %v10685_v43, %v10684_v41 }
0x52cb   :  { %14458 = vmatpush3.bf16.msra.mxu0 %v14455_v46 }
0x52cc   :  { %14474 = vmatprep.subr.bf16.mxu0 %v14757_v58 }
0x5351   :  { %v10067_v21 = vpop.xlane.xlu0 %10066 }
0x5352   :  { %v10069_v15 = vmul.f32 0.015625, %v10067_v21  ;;  %v10064_v16 = vpop.xlane.xlu1 %10063 }
0x5353   :  { %v10068_v42 = vmul.f32 0.015625, %v10064_v16 }
0x5354   :  { %v10071_v22 = vadd.f32 1e-12, %v10069_v15  ;;  %v11417_v15 = vld [vmem:[%s17118_s10 + $0x268] ss:$0 sm:$0xff] }
0x5355   :  { %v10070_v24 = vadd.f32 1e-12, %v10068_v42 }
0x5356   :  { %14735 = vrsqrt.f32 %v10071_v22 }
0x5357   :  { %14737 = vrsqrt.f32 %v10070_v24 }
0x5360   :  { %v14736_v4 = vpop.eup %14735 }
0x5361   :  { %v14738_v7 = vpop.eup %14737  ;;  %v10075_v36 = vmul.f32 %v14736_v4, %v10059_v49 }
0x5362   :  { %v10074_v23 = vmul.f32 %v14738_v7, %v10058_v50 }
0x5363   :  { %v10081_v1 = vmul.f32 %v11412_v57, %v10075_v36 }
0x5364   :  { %v10080_v3 = vmul.f32 %v11412_v57, %v10074_v23 }
0x5365   :  { %v16840_v52 = vadd.f32 %v11413_v25, %v10081_v1 }
0x5366   :  { %v16838_v18 = vadd.f32 %v11413_v25, %v10080_v3 }
0x5368   :  { %13379 = vmatprep.mubr.msk.f32.mxu1 %vm2637_vm8, %v16838_v18 }
0x5369   :  { %13380 = vmatmul.mubr.msk.f32.vlgmr.msra.gmra.mrb[94].mxu1 %vm2637_vm8, %v16840_v52 }
0x536a   :  { %13421 = vmatprep.mubr.msk.f32.mxu1 %vm14758_vm9, %v14756_v12 }
0x543c   :  { %v13381_v49 = vpop.f32.mrb[94].mxu1 }
0x543d   :  { %v10179_v50 = vadd.f32 %v13381_v49, %v11414_v48  ;;  %v10173_v51 = vpop.f32.mrb[95].mxu1 }
0x543e   :  { %v10174_v26 = vadd.f32 %v11414_v48, %v10173_v51 }
0x543f   :  { %v10185_v53 = vmul.f32 0.044715, %v10179_v50  ;;  %v10183_v11 = vmul.f32 0.5, %v10179_v50 }
0x5440   :  { %v10184_v13 = vmul.f32 0.044715, %v10174_v26  ;;  %v10182_v28 = vmul.f32 0.5, %v10174_v26 }
0x5441   :  { %v10187_v56 = vmul.f32 %v10185_v53, %v10179_v50 }
0x5442   :  { %v10186_v59 = vmul.f32 %v10184_v13, %v10174_v26 }
0x5443   :  { %v10189_v60 = vmul.f32 %v10187_v56, %v10179_v50 }
0x5444   :  { %v10188_v33 = vmul.f32 %v10186_v59, %v10174_v26  ;;  %v11418_v59 = vld [vmem:[%s17118_s10 + $0x270] ss:$0 sm:$0xff] }
0x5445   :  { %v10191_v61 = vadd.f32 %v10189_v60, %v10179_v50 }
0x5446   :  { %v10190_v32 = vadd.f32 %v10188_v33, %v10174_v26 }
0x5447   :  { %v10193_v62 = vmul.f32 0.7978846, %v10191_v61 }
0x5448   :  { %v10192_v63 = vmul.f32 0.7978846, %v10190_v32  ;;  %v11419_v32 = vld [vmem:[%s17118_s10 + $0x278] ss:$0 sm:$0xff] }
0x5449   :  { %14739 = vtanh.f32 %v10193_v62 }
0x544a   :  { %14741 = vtanh.f32 %v10192_v63 }
0x5453   :  { %v14740_v0 = vpop.eup %14739 }
0x5454   :  { %v14742_v2 = vpop.eup %14741  ;;  %v10197_v17 = vadd.f32 1.0, %v14740_v0 }
0x5455   :  { %v10196_v29 = vadd.f32 1.0, %v14742_v2 }
0x5456   :  { %v10199_v21 = vmul.f32 %v10197_v17, %v10183_v11 }
0x5457   :  { %v10198_v6 = vmul.f32 %v10196_v29, %v10182_v28 }
0x5459   :  { %13414 = vmatprep.mubr.f32.mxu0 %v10198_v6  ;;  %v10446_v6 = vld [vmem:[%s17118_s10 + $0x290] sm:$0xff] }
0x545a   :  { %13415 = vmatmul.mubr.f32.vlgmr.msra.gmra.mrb[92].mxu0 %v10199_v21 }
0x545b   :  { %13467 = vmatprep.mubr.msk.f32.mxu0 %vm14758_vm9, %v14756_v12  ;;  %14476 = vmatpush3.bf16.msra.mxu0 %v14475_v39 }
0x545c   :  { %14477 = vmatprep.subr.bf16.mxu0 %v14757_v58 }
0x545f   :  { %14479 = vmatpush3.bf16.msra.mxu0 %v14478_v44 }
0x5460   :  { %14480 = vmatprep.subr.bf16.mxu0 %v14757_v58 }
0x5463   :  { %14482 = vmatpush3.bf16.msra.mxu0 %v14481_v54 }
0x5464   :  { %14483 = vmatprep.subr.bf16.mxu0 %v14757_v58 }
0x5467   :  { %14485 = vmatpush3.bf16.msra.mxu0 %v14484_v45 }
0x5468   :  { %14498 = vmatprep.subr.bf16.mxu0 %v14757_v58 }
0x552d   :  { %v13416_v16 = vpop.f32.mrb[92].mxu0 }
0x552e   :  { %v10293_v42 = vadd.f32 %v13416_v16, %v11417_v15  ;;  %v10287_v22 = vpop.f32.mrb[93].mxu0 }
0x552f   :  { %v10288_v24 = vadd.f32 %v11417_v15, %v10287_v22 }
0x5530   :  { %v10297_v4 = vadd.f32 %v10293_v42, %v16840_v52  ;;  %v11420_v42 = vld [vmem:[%s17119_s5 + $0x2] sm:$0x3] }
0x5531   :  { %v10296_v57 = vadd.f32 %v10288_v24, %v16838_v18  ;;  %v5212_v18 = vld [vmem:[%s17123_s4] sm:$0xff]  ;;  %v10447_v24 = vld [vmem:[%s17118_s10 + $0x298] sm:$0xff] }
0x5532   :  { %v10303_v7 = vsel %vm2637_vm8, %v10297_v4, 0.0 }
0x5533   :  { %10304 = vadd.xlane.f32.xlu0 %v10303_v7  ;;  %v10300_v36 = vsel %vm2637_vm8, %v10296_v57, 0.0 }
0x5534   :  { %10301 = vadd.xlane.f32.xlu1 %v10300_v36 }
0x55c0   :  { %v10305_v23 = vpop.xlane.xlu0 %10304 }
0x55c1   :  { %v10307_v25 = vmul.f32 0.015625, %v10305_v23  ;;  %v10302_v1 = vpop.xlane.xlu1 %10301 }
0x55c2   :  { %v10306_v3 = vmul.f32 0.015625, %v10302_v1 }
0x55c3   :  { %v10309_v35 = vsub.f32 %v10297_v4, %v10307_v25  ;;  %v10448_v4 = vld [vmem:[%s17118_s10 + $0x2a0] sm:$0xff] }
0x55c4   :  { %v10308_v5 = vsub.f32 %v10296_v57, %v10306_v3  ;;  %v14466_v36 = vpack.c.bf16 %v10448_v4, %v10447_v24 }
0x55c5   :  { %v10311_v10 = vmul.f32 %v10309_v35, %v10309_v35 }
0x55c6   :  { %v10310_v30 = vmul.f32 %v10308_v5, %v10308_v5 }
0x55c7   :  { %v10315_v31 = vsel %vm2637_vm8, %v10311_v10, 0.0  ;;  %v10600_v10 = vld [vmem:[%s17118_s10 + $0x2a8] sm:$0xff] }
0x55c8   :  { %10316 = vadd.xlane.f32.xlu0 %v10315_v31  ;;  %v10312_v52 = vsel %vm2637_vm8, %v10310_v30, 0.0  ;;  %v10601_v30 = vld [vmem:[%s17118_s10 + $0x2b0] sm:$0xff] }
0x55c9   :  { %10313 = vadd.xlane.f32.xlu1 %v10312_v52 }
0x55da   :  { %5216 = vperm.xlu1 %14562, %v5212_v18  }
0x55de   :  { %5221 = vperm.xlu0 %14561, %v5213_v27   ;;  %10418 = vperm.xlu1 %14562, %v11422_v34   ;;  %v10443_v34 = vld [vmem:[%s17124_s6] sm:$0x3] }
0x55e2   :  { %10423 = vperm.xlu1 %14562, %v11423_v37   ;;  %v14469_v37 = vpack.c.bf16 %v10601_v30, %v10600_v10  ;;  %v10855_v10 = vld [vmem:[%s17114_s9 + $0x1a0] sm:$0xff]  ;;  %v10856_v30 = vld [vmem:[%s17114_s9 + $0x1a8] sm:$0xff] }
0x5655   :  { %v10317_v46 = vpop.xlane.xlu0 %10316 }
0x5656   :  { %v10319_v48 = vmul.f32 0.015625, %v10317_v46  ;;  %v10314_v49 = vpop.xlane.xlu1 %10313  ;;  %v14487_v46 = vpack.c.bf16 %v10761_v47, %v10760_v55  ;;  %v11431_v47 = vld [vmem:[%s17114_s9 + $0x1b0] ss:$0 sm:$0xff] }
0x5657   :  { %v10318_v50 = vmul.f32 0.015625, %v10314_v49  ;;  %v10763_v49 = vld [vmem:[%s17118_s10 + $0x320] sm:$0xff] }
0x5658   :  { %v10321_v51 = vadd.f32 1e-12, %v10319_v48  ;;  %v10762_v48 = vld [vmem:[%s17118_s10 + $0x318] sm:$0xff] }
0x5659   :  { %v10320_v26 = vadd.f32 1e-12, %v10318_v50 }
0x565a   :  { %14743 = vrsqrt.f32 %v10321_v51  ;;  %v5217_v56 = vpop.permute.xlu1 %5216 }
0x565b   :  { %14745 = vrsqrt.f32 %v10320_v26  ;;  %v5224_v63 = vadd.f32 %v5217_v56, %v15633_v9  ;;  %v10765_v56 = vld [vmem:[%s17118_s10 + $0x330] sm:$0xff] }
0x565d   :  { %v5222_v53 = vpop.permute.xlu0 %5221  ;;  %v5226_v11 = vsel %vm343_vm6, %v5224_v63, -inf }
0x565e   :  { %v5225_v33 = vadd.f32 %v5222_v53, %v15631_v8  ;;  %v10445_v8 = vld [vmem:[%s17118_s10 + $0x288] sm:$0xff]  ;;  %v5227_v16 = vrot.slane %v5226_v11, 4  ;;  %v10419_v9 = vpop.permute.xlu1 %10418  ;;  %v14490_v53 = vpack.c.bf16 %v10763_v49, %v10762_v48 }
0x565f   :  { %v14463_v22 = vpack.c.bf16 %v10446_v6, %v10445_v8  ;;  %v10851_v6 = vld [vmem:[%s17114_s9 + $0x180] sm:$0xff] }
0x5660   :  { %v5233_v17 = vsel %vm343_vm6, %v5225_v33, -inf  ;;  %v5228_v7 = vmax.f32 %v5226_v11, %v5227_v16  ;;  %v10850_v11 = vld [vmem:[%s17114_s9 + $0x178] sm:$0xff] }
0x5661   :  { %v5234_v21 = vrot.slane %v5233_v17, 4 }
0x5662   :  { %v10424_v25 = vpop.permute.xlu1 %10423 }
0x5663   :  { %v5235_v57 = vmax.f32 %v5233_v17, %v5234_v21  ;;  %v10852_v21 = vld [vmem:[%s17114_s9 + $0x188] sm:$0xff] }
0x5664   :  { %v14744_v13 = vpop.eup %14743 }
0x5665   :  { %v14746_v60 = vpop.eup %14745  ;;  %v10325_v61 = vmul.f32 %v14744_v13, %v10309_v35  ;;  %v5236_v23 = vrot.slane %v5235_v57, 2  ;;  %v5229_v35 = vrot.slane %v5228_v7, 2  ;;  %v10764_v13 = vld [vmem:[%s17118_s10 + $0x328] sm:$0xff] }
0x5666   :  { %v10324_v62 = vmul.f32 %v14746_v60, %v10308_v5  ;;  %v10444_v5 = vld [vmem:[%s17118_s10 + $0x280] sm:$0xf]  ;;  %v14493_v33 = vpack.c.bf16 %v10765_v56, %v10764_v13 }
0x5667   :  { %v10331_v0 = vmul.f32 %v11418_v59, %v10325_v61  ;;  %v5237_v31 = vmax.f32 %v5235_v57, %v5236_v23  ;;  %v5230_v27 = vmax.f32 %v5228_v7, %v5229_v35  ;;  %v10766_v61 = vld [vmem:[%s17118_s10 + $0x338] sm:$0xff] }
0x5668   :  { %v10330_v2 = vmul.f32 %v11418_v59, %v10324_v62  ;;  %v10854_v35 = vld [vmem:[%s17114_s9 + $0x198] sm:$0xff] }
0x5669   :  { %v10337_v28 = vadd.f32 %v11419_v32, %v10331_v0  ;;  %v5238_v38 = vrot.slane %v5237_v31, 1  ;;  %v5231_v40 = vrot.slane %v5230_v27, 1 }
0x566a   :  { %v10336_v29 = vadd.f32 %v11419_v32, %v10330_v2  ;;  %v10767_v32 = vld [vmem:[%s17118_s10 + $0x340] sm:$0xff] }
0x566b   :  { %v10427_v3 = vadd.f32 %v10424_v25, %v10337_v28  ;;  %v5239_v54 = vmax.f32 %v5237_v31, %v5238_v38  ;;  %v5232_v45 = vmax.f32 %v5230_v27, %v5231_v40  ;;  %v14496_v0 = vpack.c.bf16 %v10767_v32, %v10766_v61  ;;  %v10938_v40 = vld [vmem:[%s17114_s9 + $0x1c8] sm:$0xff]  ;;  %v11032_v61 = vld [vmem:[%s17122_s11 + $0xa0] sm:$0xf] }
0x566c   :  { %v14460_v15 = vpack.c.bf16 %v10337_v28, %v10336_v29  ;;  %v10426_v1 = vadd.f32 %v10419_v9, %v10336_v29  ;;  %v10849_v29 = vld [vmem:[%s17114_s9 + $0x170] sm:$0xff]  ;;  %v14502_v9 = vpack.c.bf16 %v10852_v21, %v10851_v6  ;;  %v14508_v31 = vpack.c.bf16 %v10856_v30, %v10855_v10 }
0x566d   :  { %v10435_v18 = vsel %vm2637_vm8, %v10427_v3, -inf  ;;  %v5241_v26 = vsel %vm5240_vm13, %v5232_v45, %v5239_v54  ;;  %v14499_v8 = vpack.c.bf16 %v10850_v11, %v10849_v29  ;;  %v10853_v3 = vld [vmem:[%s17114_s9 + $0x190] sm:$0xff] }
0x566e   :  { %14461 = vmatpush3.bf16.msra.mxu1 %v14460_v15  ;;  %v10428_v52 = vsel %vm2637_vm8, %v10426_v1, -inf  ;;  %v10436_v39 = vrot.slane %v10435_v18, 4 }
0x566f   :  { %14462 = vmatprep.subr.bf16.mxu1 %v14757_v58  ;;  %v10429_v19 = vrot.slane %v10428_v52, 4 }
0x5670   :  { %v10437_v43 = vmax.f32 %v10435_v18, %v10436_v39  ;;  %v10937_v18 = vld [vmem:[%s17114_s9 + $0x1c0] sm:$0xff] }
0x5671   :  { %13422 = vmatmul.mubr.msk.f32.vlgmr.msra.gmra.mrb[96].mxu1 %vm77_vm0, %v11420_v42  ;;  %v10430_v41 = vmax.f32 %v10428_v52, %v10429_v19  ;;  %v10936_v52 = vld [vmem:[%s17114_s9 + $0x1b8] sm:$0xff] }
0x5672   :  { %14464 = vmatpush3.bf16.msra.mxu1 %v14463_v22  ;;  %13432 = vmatprep.mubr.msk.f32.mxu1 %vm14758_vm9, %v14756_v12  ;;  %v10438_v51 = vrot.slane %v10437_v43, 2  ;;  %v14511_v27 = vpack.c.bf16 %v10937_v18, %v10936_v52 }
0x5673   :  { %14465 = vmatprep.subr.bf16.mxu1 %v14757_v58  ;;  %v10431_v50 = vrot.slane %v10430_v41, 2 }
0x5674   :  { %v10439_v60 = vmax.f32 %v10437_v43, %v10438_v51 }
0x5675   :  { %v10432_v59 = vmax.f32 %v10430_v41, %v10431_v50 }
0x5676   :  { %14467 = vmatpush3.bf16.msra.mxu1 %v14466_v36  ;;  %v10440_v63 = vrot.slane %v10439_v60, 1 }
0x5677   :  { %13435 = vmatprep.subr.mxu1 %v14756_v12  ;;  %v10433_v62 = vrot.slane %v10432_v59, 1 }
0x5678   :  { %v10441_v17 = vmax.f32 %v10439_v60, %v10440_v63  ;;  %v11031_v60 = vld [vmem:[%s17122_s11 + $0x98] sm:$0xff] }
0x5679   :  { %13433 = vmatmul.mubr.msk.f32.vlgmr.msra.gmra.mrb[98].mxu1 %vm343_vm6, %v15662_v20  ;;  %v10603_v20 = vld [vmem:[%s17118_s10 + $0x2c0] sm:$0xff]  ;;  %v10434_v2 = vmax.f32 %v10432_v59, %v10433_v62  ;;  %v11030_v59 = vld [vmem:[%s17122_s11 + $0x90] sm:$0xff] }
0x567a   :  { %13436 = vmatpush3.msk.msra.mxu1 %vm10526_vm11, %v10444_v5  ;;  %13437 = vmatprep.mubr.msk.f32.mxu1 %vm14758_vm9, %v14756_v12  ;;  %v14472_v44 = vpack.c.bf16 %v10603_v20, %v10602_v14  ;;  %v14505_v5 = vpack.c.bf16 %v10854_v35, %v10853_v3  ;;  %v11430_v20 = vld [vmem:[%s17118_s10 + $0x348] ss:$0 sm:$0xff] }
0x567b   :  { %14468 = vmatprep.subr.bf16.mxu1 %v14757_v58  ;;  %v10442_v28 = vsel %vm5240_vm13, %v10434_v2, %v10441_v17 }
0x567d   :  { %13438 = vmatmul.mubr.msk.f32.vlgmr.msra.gmra.mrb[100].mxu1 %vm10522_vm12, %v10443_v34 }
0x567e   :  { %14470 = vmatpush3.bf16.msra.mxu1 %v14469_v37  ;;  %13448 = vmatprep.mubr.msk.f32.mxu1 %vm14758_vm9, %v14756_v12 }
0x567f   :  { %14471 = vmatprep.subr.bf16.mxu1 %v14757_v58 }
0x5682   :  { %14473 = vmatpush3.bf16.msra.mxu1 %v14472_v44  ;;  %v10939_v44 = vld [vmem:[%s17114_s9 + $0x1d0] sm:$0xff] }
0x5683   :  { %14486 = vmatprep.subr.bf16.mxu1 %v14757_v58  ;;  %v14514_v55 = vpack.c.bf16 %v10939_v44, %v10938_v40 }
0x5685   :  { %13449 = vmatmul.mubr.msk.f32.vlgmr.msra.gmra.mrb[102].mxu1 %vm343_vm6, %v5241_v26 }
0x5686   :  { %14488 = vmatpush3.bf16.msra.mxu1 %v14487_v46  ;;  %13486 = vmatprep.mubr.msk.f32.mxu1 %vm14758_vm9, %v14756_v12  ;;  %v11433_v46 = vld [vmem:[%s17114_s9 + $0x1d8] ss:$0 sm:$0xff] }
0x5687   :  { %14489 = vmatprep.subr.bf16.mxu1 %v14757_v58 }
0x568a   :  { %14491 = vmatpush3.bf16.msra.mxu1 %v14490_v53 }
0x568b   :  { %14492 = vmatprep.subr.bf16.mxu1 %v14757_v58 }
0x568e   :  { %14494 = vmatpush3.bf16.msra.mxu1 %v14493_v33  ;;  %v14517_v33 = vpack.c.bf16 %v11031_v60, %v11030_v59 }
0x568f   :  { %14495 = vmatprep.subr.bf16.mxu1 %v14757_v58 }
0x5692   :  { %14497 = vmatpush3.bf16.msra.mxu1 %v14496_v0 }
0x5693   :  { %14510 = vmatprep.subr.bf16.mxu1 %v14757_v58 }
0x5695   :  { %13487 = vmatmul.mubr.msk.f32.vlgmr.msra.gmra.mrb[104].mxu1 %vm2637_vm8, %v10442_v28 }
0x5696   :  { %13516 = vmatprep.mubr.msk.f32.mxu1 %vm14758_vm9, %v14756_v12  ;;  %14512 = vmatpush3.bf16.msra.mxu1 %v14511_v27 }
0x5697   :  { %14513 = vmatprep.subr.bf16.mxu1 %v14757_v58 }
0x569a   :  { %14515 = vmatpush3.bf16.msra.mxu1 %v14514_v55 }
0x569b   :  { %14516 = vmatprep.subr.bf16.mxu1 %v14757_v58 }
0x5744   :  { %v10409_v15 = vpop.f32.mrb[96].mxu1 }
0x5745   :  { %v13423_v16 = vpop.f32.mrb[97].mxu1  ;;  %13468 = vmatmul.mubr.msk.f32.vlgmr.msra.gmra.mrb[94].mxu0 %vm2637_vm8, %v10409_v15 }
0x5746   :  { %14500 = vmatpush3.bf16.msra.mxu0 %v14499_v8  ;;  %13505 = vmatprep.mubr.msk.f32.mxu0 %vm14758_vm9, %v14756_v12 }
0x5747   :  { %14501 = vmatprep.subr.bf16.mxu0 %v14757_v58 }
0x574a   :  { %14503 = vmatpush3.bf16.msra.mxu0 %v14502_v9 }
0x574b   :  { %14504 = vmatprep.subr.bf16.mxu0 %v14757_v58 }
0x574c   :  { %v10518_v42 = vpop.f32.mrb[98].mxu1 }
0x574d   :  { %v13434_v22 = vpop.f32.mrb[99].mxu1 }
0x574e   :  { %14506 = vmatpush3.bf16.msra.mxu0 %v14505_v5 }
0x574f   :  { %14507 = vmatprep.subr.bf16.mxu0 %v14757_v58 }
0x5750   :  { %v10596_v24 = vpop.f32.mrb[100].mxu1 }
0x5751   :  { %v10597_v4 = vadd.f32 %v10596_v24, %v10518_v42  ;;  %v13439_v57 = vpop.f32.mrb[101].mxu1 }
0x5752   :  { %14509 = vmatpush3.bf16.msra.mxu0 %v14508_v31 }
0x5758   :  { %v10673_v7 = vpop.f32.mrb[102].mxu1 }
0x5759   :  { %v10677_v36 = vadd.f32 %v10673_v7, %v10597_v4  ;;  %v13450_v23 = vpop.f32.mrb[103].mxu1 }
0x5768   :  { %v10837_v25 = vpop.f32.mrb[104].mxu1 }
0x5769   :  { %v13488_v1 = vpop.f32.mrb[105].mxu1 }
0x5818   :  { %v10755_v34 = vpop.f32.mrb[94].mxu0 }
0x5819   :  { %v10759_v37 = vadd.f32 %v10755_v34, %v10677_v36  ;;  %v13469_v14 = vpop.f32.mrb[95].mxu0 }
0x581b   :  { %v10841_v38 = vadd.f32 %v10837_v25, %v10759_v37 }
0x581d   :  { %v10847_v19 = vadd.f32 %v11430_v20, %v10841_v38 }
0x581f   :  { %v10848_v39 = vmax.f32 %v10847_v19, 0.0 }
0x5821   :  { %13506 = vmatmul.mubr.msk.f32.vlgmr.msra.gmra.mrb[96].mxu0 %vm2637_vm8, %v10848_v39 }
0x58f4   :  { %v10931_v54 = vpop.f32.mrb[96].mxu0 }
0x58f5   :  { %v10932_v41 = vadd.f32 %v11431_v47, %v10931_v54  ;;  %v13507_v43 = vpop.f32.mrb[97].mxu0 }
0x58f7   :  { %v10935_v45 = vmax.f32 %v10932_v41, 0.0 }
0x58f9   :  { %13517 = vmatmul.mubr.msk.f32.vlgmr.msra.gmra.mrb[106].mxu1 %vm343_vm6, %v10935_v45 }
0x58fa   :  { %13525 = vmatprep.mubr.msk.f32.mxu1 %vm14758_vm9, %v14756_v12  ;;  %14518 = vmatpush3.bf16.msra.mxu1 %v14517_v33 }
0x58fb   :  { %13523 = vmatprep.subr.mxu1 %v14756_v12 }
0x58fe   :  { %13524 = vmatpush3.msk.msra.mxu1 %vm10526_vm11, %v11032_v61 }
0x59cc   :  { %v11014_v48 = vpop.f32.mrb[106].mxu1 }
0x59cd   :  { %v11015_v58 = vadd.f32 %v11433_v46, %v11014_v48  ;;  %v13518_v49 = vpop.f32.mrb[107].mxu1 }
0x59cf   :  { %v11019_v50 = vsel %vm11018_vm14, %v11015_v58, -inf }
0x59d0   :  { %11020 = vmax.xlane.f32.xlu0 %v11019_v50 }
0x5a5d   :  { %v11021_v51 = vpop.xlane.xlu0 %11020 }
0x5a5e   :  { %v11022_v26 = vsub.f32 %v11015_v58, %v11021_v51 }
0x5a60   :  { %v11023_v53 = vmul.f32 1.442695, %v11022_v26 }
0x5a62   :  { %14747 = vpow2.f32 %v11023_v53 }
0x5a6c   :  { %v14748_v13 = vpop.eup %14747 }
0x5a6d   :  { %v11025_v56 = vsel %vm11018_vm14, %v14748_v13, 0.0 }
0x5a6e   :  { %11026 = vadd.xlane.f32.xlu1 %v11025_v56 }
0x5afb   :  { %v11027_v32 = vpop.xlane.xlu1 %11026 }
0x5afc   :  { %14749 = vrcp.f32 %v11027_v32 }
0x5b06   :  { %v14750_v62 = vpop.eup %14749 }
0x5b07   :  { %v11029_v63 = vmul.f32 %v14750_v62, %v14748_v13 }
0x5b09   :  { %13526 = vmatmul.mubr.msk.f32.vlgmr.msra.gmra.mrb[108].mxu1 %vm11033_vm15, %v11029_v63 }
0x5bdc   :  { %v11106_v0 = vpop.f32.mrb[108].mxu1 }
0x5bdd   :  { %11110 = vst [vmem:[%s17125_s12] sm:$0x3] %v11106_v0  ;;  %v13527_v2 = vpop.f32.mrb[109].mxu1 }

</bundles_post_ra>
